<compile_context>
chip_gen: v7x
topology: tpu7x:2x2x1
jax: 0.10.0
libtpu: 0.0.40
codegen_flags: <defaults>
</compile_context>

<pallas_src>
import math
from functools import partial

import jax
import jax.numpy as jnp
from jax.experimental import pallas as pl
from jax.experimental.pallas import tpu as pltpu


LN_EPS = 1e-5  # matches nn.LayerNorm default


# ----------------------------------------------------------------------------
# small in-kernel helpers
# ----------------------------------------------------------------------------

def _layernorm_f32(x, g, b):
    """LayerNorm with f32 statistics. x: (M, D) f32, g/b: (1, D) f32."""
    mu = jnp.mean(x, axis=-1, keepdims=True)
    var = jnp.mean(jnp.square(x - mu), axis=-1, keepdims=True)
    return (x - mu) * jax.lax.rsqrt(var + LN_EPS) * g + b


def _gelu_tanh(x):
    # TODO(synk): nn.GELU() default is exact erf; Mosaic has no erf lowering,
    # so the tanh approximation (|err| ~ 1e-3) is used.  jnp.tanh lowers to
    # the EUP slot, keeping the binding 4-wide VALU slot free.
    c = math.sqrt(2.0 / math.pi)
    return 0.5 * x * (1.0 + jnp.tanh(c * (x + 0.044715 * (x * x * x))))


# ----------------------------------------------------------------------------
# fused per-layer kernel
# ----------------------------------------------------------------------------

def _layer_kernel(x_ref,
                  ag_ref, ab_ref, wq_ref, wkv_ref, wo_ref, bo_ref,
                  fg_ref, fb_ref, w1_ref, b1_ref, w2_ref, b2_ref,
                  ng_ref, nb_ref,
                  o_ref, *, heads, dim_head, apply_final_ln):
    """One full encoder layer (attn block + FFN block [+ final LN]) for a
    (Bt, N, D) batch tile."""
    bt, n, d = x_ref.shape
    m = bt * n
    inner = heads * dim_head
    scale = dim_head ** -0.5
    cdt = wq_ref.dtype                        # MXU operand dtype (bf16)

    x = x_ref[...].astype(jnp.float32).reshape(m, d)   # f32 residual stream

    # ---- attention sub-block: x = x + to_out(attn(LN(x))) -----------------
    xn = _layernorm_f32(x, ag_ref[...], ab_ref[...]).astype(cdt)
    # bias-free projections; scale folded into q ONCE (not per-head scores)
    q = jnp.dot(xn, wq_ref[...], preferred_element_type=jnp.float32) * scale
    kv = jnp.dot(xn, wkv_ref[...], preferred_element_type=jnp.float32)

    q3 = q.reshape(bt, n, inner).astype(cdt)
    k3 = kv[:, :inner].reshape(bt, n, inner).astype(cdt)
    v3 = kv[:, inner:].reshape(bt, n, inner).astype(cdt)

    ohs = []
    for h in range(heads):                    # static unroll, lane slices in VMEM
        lo, hi = h * dim_head, (h + 1) * dim_head
        s = jnp.einsum("bqd,bkd->bqk", q3[:, :, lo:hi], k3[:, :, lo:hi],
                       preferred_element_type=jnp.float32)      # (Bt, N, N)
        s = s - jnp.max(s, axis=-1, keepdims=True)
        p = jnp.exp(s)
        p = p * pl.reciprocal(jnp.sum(p, axis=-1, keepdims=True), approx=True)
        ohs.append(jnp.einsum("bqk,bkd->bqd", p.astype(cdt), v3[:, :, lo:hi],
                              preferred_element_type=jnp.float32))
    # single K=inner output projection instead of per-head K=dim_head matmuls
    o_heads = jnp.concatenate(ohs, axis=-1).reshape(m, inner)
    x = x + jnp.dot(o_heads.astype(cdt), wo_ref[...],
                    preferred_element_type=jnp.float32) + bo_ref[...]

    # ---- feed-forward sub-block: x = x + W2 @ GELU(W1 @ LN(x) + b1) + b2 --
    xn = _layernorm_f32(x, fg_ref[...], fb_ref[...]).astype(cdt)
    hdn = jnp.dot(xn, w1_ref[...], preferred_element_type=jnp.float32) + b1_ref[...]
    hdn = _gelu_tanh(hdn)
    x = x + jnp.dot(hdn.astype(cdt), w2_ref[...],
                    preferred_element_type=jnp.float32) + b2_ref[...]

    # ---- fused final nn.LayerNorm on the last layer ------------------------
    if apply_final_ln:
        x = _layernorm_f32(x, ng_ref[...], nb_ref[...])

    o_ref[...] = x.reshape(bt, n, d).astype(o_ref.dtype)


def _ln_only_kernel(x_ref, g_ref, b_ref, o_ref):
    """Standalone final LayerNorm (only used for the depth==0 edge case)."""
    x = x_ref[0].astype(jnp.float32)
    o_ref[0] = _layernorm_f32(x, g_ref[...], b_ref[...]).astype(o_ref.dtype)


# ----------------------------------------------------------------------------
# pallas_call wrappers
# ----------------------------------------------------------------------------

def _bcast_spec(shape):
    zeros = (0,) * len(shape)
    return pl.BlockSpec(shape, lambda *_: zeros)


def _layer_call(x, layer, norm_g, norm_b, *, apply_final_ln, out_dtype, bt):
    B, N, D = x.shape
    attn = layer["attn"]
    heads, dim_head = attn["heads"], attn["dim_head"]
    inner = heads * dim_head
    H = layer["ff"]["w1"].shape[1]
    kern = partial(_layer_kernel, heads=heads, dim_head=dim_head,
                   apply_final_ln=apply_final_ln)
    return pl.pallas_call(
        kern,
        grid=(B // bt,),
        in_specs=[
            pl.BlockSpec((bt, N, D), lambda i: (i, 0, 0)),       # x tile
            _bcast_spec((1, D)), _bcast_spec((1, D)),            # attn LN g/b
            _bcast_spec((D, inner)),                              # Wq
            _bcast_spec((D, 2 * inner)),                          # Wkv
            _bcast_spec((inner, D)), _bcast_spec((1, D)),         # Wo, bo
            _bcast_spec((1, D)), _bcast_spec((1, D)),             # ff LN g/b
            _bcast_spec((D, H)), _bcast_spec((1, H)),             # W1, b1
            _bcast_spec((H, D)), _bcast_spec((1, D)),             # W2, b2
            _bcast_spec((1, D)), _bcast_spec((1, D)),             # final LN g/b
        ],
        out_specs=pl.BlockSpec((bt, N, D), lambda i: (i, 0, 0)),
        out_shape=jax.ShapeDtypeStruct((B, N, D), out_dtype),
        compiler_params=pltpu.CompilerParams(
            dimension_semantics=("parallel",)),
    )(x, layer["attn_ln_g"], layer["attn_ln_b"],
      attn["to_q_w"], attn["to_kv_w"], attn["to_out_w"], attn["to_out_b"],
      layer["ff_ln_g"], layer["ff_ln_b"],
      layer["ff"]["w1"], layer["ff"]["b1"], layer["ff"]["w2"], layer["ff"]["b2"],
      norm_g, norm_b)


def _final_layernorm(x, g, b):
    B, N, D = x.shape
    return pl.pallas_call(
        _ln_only_kernel,
        grid=(B,),
        in_specs=[pl.BlockSpec((1, N, D), lambda i: (i, 0, 0)),
                  _bcast_spec((1, D)), _bcast_spec((1, D))],
        out_specs=pl.BlockSpec((1, N, D), lambda i: (i, 0, 0)),
        out_shape=jax.ShapeDtypeStruct((B, N, D), jnp.float32),
        compiler_params=pltpu.CompilerParams(
            dimension_semantics=("parallel",)),
    )(x, g, b)


def transformer_fwd(params, x, *, act_dtype=jnp.bfloat16, min_tile_rows=128):
    """Transformer.forward: per layer PreNorm(Attn)+x, PreNorm(FF)+x; final LN.

    Dropout(p=0.0) is the identity and is omitted.  Inter-layer activations
    are stored in `act_dtype` (bf16); the final output is f32.
    """
    B, N, D = x.shape
    layers = params["layers"]
    if not layers:
        return _final_layernorm(x, params["norm_g"], params["norm_b"])

    # Batch tile: smallest divisor of B giving >= min_tile_rows rows per step
    # (target >=128 on v5e, >=256 on v6e/v7x); falls back to the whole batch.
    bt = B
    for cand in range(1, B + 1):
        if B % cand == 0 and cand * N >= min_tile_rows:
            bt = cand
            break
    # TODO(synk): for long sequences (N beyond ~1-2K, esp. on v7x's smaller
    # VMEM) add a q-row grid axis with flash-style streaming over kv tiles.

    depth = len(layers)
    for li, layer in enumerate(layers):
        last = li == depth - 1
        x = _layer_call(x, layer, params["norm_g"], params["norm_b"],
                        apply_final_ln=last,
                        out_dtype=jnp.float32 if last else act_dtype,
                        bt=bt)
    return x


# ----------------------------------------------------------------------------
# Parameter init (mirrors nn.Linear / nn.LayerNorm defaults; matmul weights
# are stored in the bf16 compute dtype, biases / LN params stay f32)
# ----------------------------------------------------------------------------

def _init_linear(key, d_in, d_out, *, bias=True, dtype=jnp.bfloat16):
    kw, kb = jax.random.split(key)
    bound = 1.0 / math.sqrt(d_in)
    w = jax.random.uniform(kw, (d_in, d_out), jnp.float32, -bound, bound)
    b = (jax.random.uniform(kb, (1, d_out), jnp.float32, -bound, bound)
         if bias else None)
    return w.astype(dtype), b


def init_transformer(key, *, dim, depth, heads, dim_head, mlp_dim,
                     compute_dtype=jnp.bfloat16):
    inner = heads * dim_head
    layers = []
    for _ in range(depth):
        key, kq, kkv, ko, k1, k2 = jax.random.split(key, 6)
        qw, _ = _init_linear(kq, dim, inner, bias=False, dtype=compute_dtype)
        kvw, _ = _init_linear(kkv, dim, 2 * inner, bias=False, dtype=compute_dtype)
        ow, ob = _init_linear(ko, inner, dim, dtype=compute_dtype)
        w1, b1 = _init_linear(k1, dim, mlp_dim, dtype=compute_dtype)
        w2, b2 = _init_linear(k2, mlp_dim, dim, dtype=compute_dtype)
        layers.append(dict(
            attn_ln_g=jnp.ones((1, dim), jnp.float32),
            attn_ln_b=jnp.zeros((1, dim), jnp.float32),
            attn=dict(heads=heads, dim_head=dim_head,
                      to_q_w=qw, to_kv_w=kvw, to_out_w=ow, to_out_b=ob),
            ff_ln_g=jnp.ones((1, dim), jnp.float32),
            ff_ln_b=jnp.zeros((1, dim), jnp.float32),
            ff=dict(w1=w1, b1=b1, w2=w2, b2=b2)))
    return dict(layers=layers,
                norm_g=jnp.ones((1, dim), jnp.float32),
                norm_b=jnp.zeros((1, dim), jnp.float32))


# ----------------------------------------------------------------------------
# Pure-JAX reference (same mixed-precision policy: bf16 operands, f32 acc,
# bf16 inter-layer activations, tanh-GELU)
# ----------------------------------------------------------------------------

def _ref_transformer(params, x, compute_dtype=jnp.bfloat16,
                     act_dtype=jnp.bfloat16):
    def ln(t, g, b):
        mu = jnp.mean(t, -1, keepdims=True)
        var = jnp.mean(jnp.square(t - mu), -1, keepdims=True)
        return (t - mu) * jax.lax.rsqrt(var + LN_EPS) * g + b

    def mm(a, w):
        return jnp.dot(a.astype(compute_dtype), w.astype(compute_dtype),
                       preferred_element_type=jnp.float32)

    B, N, _ = x.shape
    x = x.astype(jnp.float32)
    n_layers = len(params["layers"])
    for li, layer in enumerate(params["layers"]):
        attn = layer["attn"]
        h, dh = attn["heads"], attn["dim_head"]
        inner = h * dh
        xn = ln(x, layer["attn_ln_g"], layer["attn_ln_b"])
        q, kv = mm(xn, attn["to_q_w"]), mm(xn, attn["to_kv_w"])
        k, v = kv[..., :inner], kv[..., inner:]
        split = lambda t: t.reshape(B, N, h, dh).transpose(0, 2, 1, 3)
        qh, kh, vh = split(q), split(k), split(v)
        s = jnp.einsum("bhid,bhjd->bhij", qh.astype(compute_dtype),
                       kh.astype(compute_dtype),
                       preferred_element_type=jnp.float32) * dh ** -0.5
        p = jax.nn.softmax(s, axis=-1)
        o = jnp.einsum("bhij,bhjd->bhid", p.astype(compute_dtype),
                       vh.astype(compute_dtype),
                       preferred_element_type=jnp.float32)
        o = o.transpose(0, 2, 1, 3).reshape(B, N, inner)
        x = x + mm(o, attn["to_out_w"]) + attn["to_out_b"]
        xn = ln(x, layer["ff_ln_g"], layer["ff_ln_b"])
        hid = _gelu_tanh(mm(xn, layer["ff"]["w1"]) + layer["ff"]["b1"])
        x = x + mm(hid, layer["ff"]["w2"]) + layer["ff"]["b2"]
        if li < n_layers - 1:                    # inter-layer HBM round trip
            x = x.astype(act_dtype).astype(jnp.float32)
    return ln(x, params["norm_g"], params["norm_b"])


# ----------------------------------------------------------------------------
# Demo
# ----------------------------------------------------------------------------

if __name__ == "__main__":
    key = jax.random.PRNGKey(0)
    kp, kx = jax.random.split(key)

    # Small but lane-dense shapes; B*N gives >= 128 rows per batch tile and a
    # grid deep enough for pipelining / megacore sharding.
    B, N, dim = 8, 64, 128
    depth, heads, dim_head, mlp_dim = 2, 4, 32, 256

    params = init_transformer(kp, dim=dim, depth=depth, heads=heads,
                              dim_head=dim_head, mlp_dim=mlp_dim,
                              compute_dtype=jnp.bfloat16)
    x = jax.random.normal(kx, (B, N, dim), jnp.float32)

    fwd = jax.jit(partial(transformer_fwd, params))
    out = fwd(x)
    jax.block_until_ready(out)

    assert out.shape == x.shape, out.shape
    assert out.dtype == jnp.float32, out.dtype
    assert bool(jnp.all(jnp.isfinite(out)))

    ref = _ref_transformer(params, x)
    max_err = float(jnp.max(jnp.abs(out - ref)))
    assert max_err < 5e-2, f"max abs diff vs reference: {max_err}"

    print("KERNEL_OK")
</pallas_src>

<mosaic_0001>
module attributes {stable_mosaic.version = 11 : i64} {
  func.func @_layer_kernel(%arg0: i32, %arg1: memref<2x64x128xf32, #tpu.memory_space<vmem>>, %arg2: memref<1x128xf32, #tpu.memory_space<vmem>>, %arg3: memref<1x128xf32, #tpu.memory_space<vmem>>, %arg4: memref<128x128xbf16, #tpu.memory_space<vmem>>, %arg5: memref<128x256xbf16, #tpu.memory_space<vmem>>, %arg6: memref<128x128xbf16, #tpu.memory_space<vmem>>, %arg7: memref<1x128xf32, #tpu.memory_space<vmem>>, %arg8: memref<1x128xf32, #tpu.memory_space<vmem>>, %arg9: memref<1x128xf32, #tpu.memory_space<vmem>>, %arg10: memref<128x256xbf16, #tpu.memory_space<vmem>>, %arg11: memref<1x256xf32, #tpu.memory_space<vmem>>, %arg12: memref<256x128xbf16, #tpu.memory_space<vmem>>, %arg13: memref<1x128xf32, #tpu.memory_space<vmem>>, %arg14: memref<1x128xf32, #tpu.memory_space<vmem>>, %arg15: memref<1x128xf32, #tpu.memory_space<vmem>>, %arg16: memref<2x64x128xbf16, #tpu.memory_space<vmem>>) attributes {dimension_semantics = [#tpu.dimension_semantics<parallel>], iteration_bounds = array<i64: 4>, scalar_prefetch = 0 : i64, scratch_operands = 0 : i64, tpu.core_type = #tpu.core_type<tc>, window_params = [{transform_indices = @transform_0, window_bounds = array<i64: 2, 64, 128>}, {pipeline_mode = #tpu.pipeline_mode<synchronous>, transform_indices = @transform_1, window_bounds = array<i64: 1, 128>}, {pipeline_mode = #tpu.pipeline_mode<synchronous>, transform_indices = @transform_2, window_bounds = array<i64: 1, 128>}, {pipeline_mode = #tpu.pipeline_mode<synchronous>, transform_indices = @transform_3, window_bounds = array<i64: 128, 128>}, {pipeline_mode = #tpu.pipeline_mode<synchronous>, transform_indices = @transform_4, window_bounds = array<i64: 128, 256>}, {pipeline_mode = #tpu.pipeline_mode<synchronous>, transform_indices = @transform_5, window_bounds = array<i64: 128, 128>}, {pipeline_mode = #tpu.pipeline_mode<synchronous>, transform_indices = @transform_6, window_bounds = array<i64: 1, 128>}, {pipeline_mode = #tpu.pipeline_mode<synchronous>, transform_indices = @transform_7, window_bounds = array<i64: 1, 128>}, {pipeline_mode = #tpu.pipeline_mode<synchronous>, transform_indices = @transform_8, window_bounds = array<i64: 1, 128>}, {pipeline_mode = #tpu.pipeline_mode<synchronous>, transform_indices = @transform_9, window_bounds = array<i64: 128, 256>}, {pipeline_mode = #tpu.pipeline_mode<synchronous>, transform_indices = @transform_10, window_bounds = array<i64: 1, 256>}, {pipeline_mode = #tpu.pipeline_mode<synchronous>, transform_indices = @transform_11, window_bounds = array<i64: 256, 128>}, {pipeline_mode = #tpu.pipeline_mode<synchronous>, transform_indices = @transform_12, window_bounds = array<i64: 1, 128>}, {pipeline_mode = #tpu.pipeline_mode<synchronous>, transform_indices = @transform_13, window_bounds = array<i64: 1, 128>}, {pipeline_mode = #tpu.pipeline_mode<synchronous>, transform_indices = @transform_14, window_bounds = array<i64: 1, 128>}, {transform_indices = @transform_15, window_bounds = array<i64: 2, 64, 128>}]} {
    %c0 = arith.constant 0 : index
    %c0_0 = arith.constant 0 : index
    %c0_1 = arith.constant 0 : index
    %0 = vector.load %arg1[%c0, %c0_0, %c0_1] : memref<2x64x128xf32, #tpu.memory_space<vmem>>, vector<2x64x128xf32>
    %1 = vector.shape_cast %0 : vector<2x64x128xf32> to vector<128x128xf32>
    %c0_2 = arith.constant 0 : index
    %c0_3 = arith.constant 0 : index
    %2 = vector.load %arg2[%c0_2, %c0_3] : memref<1x128xf32, #tpu.memory_space<vmem>>, vector<1x128xf32>
    %c0_4 = arith.constant 0 : index
    %c0_5 = arith.constant 0 : index
    %3 = vector.load %arg3[%c0_4, %c0_5] : memref<1x128xf32, #tpu.memory_space<vmem>>, vector<1x128xf32>
    %cst = arith.constant dense<0.000000e+00> : vector<128xf32>
    %4 = vector.multi_reduction <add>, %1, %cst [1] : vector<128x128xf32> to vector<128xf32>
    %5 = vector.shape_cast %4 : vector<128xf32> to vector<128x1xf32>
    %cst_6 = arith.constant 1.280000e+02 : f32
    %6 = vector.broadcast %cst_6 : f32 to vector<128x1xf32>
    %7 = arith.divf %5, %6 : vector<128x1xf32>
    %8 = vector.broadcast %7 : vector<128x1xf32> to vector<128x128xf32>
    %9 = arith.subf %1, %8 : vector<128x128xf32>
    %10 = arith.mulf %9, %9 : vector<128x128xf32>
    %cst_7 = arith.constant dense<0.000000e+00> : vector<128xf32>
    %11 = vector.multi_reduction <add>, %10, %cst_7 [1] : vector<128x128xf32> to vector<128xf32>
    %12 = vector.shape_cast %11 : vector<128xf32> to vector<128x1xf32>
    %cst_8 = arith.constant 1.280000e+02 : f32
    %13 = vector.broadcast %cst_8 : f32 to vector<128x1xf32>
    %14 = arith.divf %12, %13 : vector<128x1xf32>
    %15 = vector.broadcast %7 : vector<128x1xf32> to vector<128x128xf32>
    %16 = arith.subf %1, %15 : vector<128x128xf32>
    %cst_9 = arith.constant 9.99999974E-6 : f32
    %17 = vector.broadcast %cst_9 : f32 to vector<128x1xf32>
    %18 = arith.addf %14, %17 : vector<128x1xf32>
    %19 = math.rsqrt %18 : vector<128x1xf32>
    %20 = vector.broadcast %19 : vector<128x1xf32> to vector<128x128xf32>
    %21 = arith.mulf %16, %20 : vector<128x128xf32>
    %22 = vector.broadcast %2 : vector<1x128xf32> to vector<128x128xf32>
    %23 = arith.mulf %21, %22 : vector<128x128xf32>
    %24 = vector.broadcast %3 : vector<1x128xf32> to vector<128x128xf32>
    %25 = arith.addf %23, %24 : vector<128x128xf32>
    %26 = arith.truncf %25 : vector<128x128xf32> to vector<128x128xbf16>
    %c0_10 = arith.constant 0 : index
    %c0_11 = arith.constant 0 : index
    %27 = vector.load %arg4[%c0_10, %c0_11] : memref<128x128xbf16, #tpu.memory_space<vmem>>, vector<128x128xbf16>
    %cst_12 = arith.constant dense<0.000000e+00> : vector<128x128xf32>
    %28 = tpu.matmul %26, %27, %cst_12 {dimension_numbers = #tpu.dot_dimension_numbers<[1], [0], [0], [1], [0, 0, 1, 1], [], []>} : vector<128x128xbf16>, vector<128x128xbf16>, vector<128x128xf32> -> vector<128x128xf32>
    %cst_13 = arith.constant 0.176776692 : f32
    %29 = vector.broadcast %cst_13 : f32 to vector<128x128xf32>
    %30 = arith.mulf %28, %29 : vector<128x128xf32>
    %c0_14 = arith.constant 0 : index
    %c0_15 = arith.constant 0 : index
    %31 = vector.load %arg5[%c0_14, %c0_15] : memref<128x256xbf16, #tpu.memory_space<vmem>>, vector<128x256xbf16>
    %cst_16 = arith.constant dense<0.000000e+00> : vector<128x256xf32>
    %32 = tpu.matmul %26, %31, %cst_16 {dimension_numbers = #tpu.dot_dimension_numbers<[1], [0], [0], [1], [0, 0, 1, 1], [], []>} : vector<128x128xbf16>, vector<128x256xbf16>, vector<128x256xf32> -> vector<128x256xf32>
    %33 = vector.shape_cast %30 : vector<128x128xf32> to vector<2x64x128xf32>
    %34 = arith.truncf %33 : vector<2x64x128xf32> to vector<2x64x128xbf16>
    %35 = vector.extract_strided_slice %32 {offsets = [0, 0], sizes = [128, 128], strides = [1, 1]} : vector<128x256xf32> to vector<128x128xf32>
    %36 = vector.shape_cast %35 : vector<128x128xf32> to vector<2x64x128xf32>
    %37 = arith.truncf %36 : vector<2x64x128xf32> to vector<2x64x128xbf16>
    %38 = vector.extract_strided_slice %32 {offsets = [0, 128], sizes = [128, 128], strides = [1, 1]} : vector<128x256xf32> to vector<128x128xf32>
    %39 = vector.shape_cast %38 : vector<128x128xf32> to vector<2x64x128xf32>
    %40 = arith.truncf %39 : vector<2x64x128xf32> to vector<2x64x128xbf16>
    %41 = vector.extract_strided_slice %34 {offsets = [0, 0, 0], sizes = [2, 64, 32], strides = [1, 1, 1]} : vector<2x64x128xbf16> to vector<2x64x32xbf16>
    %42 = vector.extract_strided_slice %37 {offsets = [0, 0, 0], sizes = [2, 64, 32], strides = [1, 1, 1]} : vector<2x64x128xbf16> to vector<2x64x32xbf16>
    "tpu.trace_start"() <{level = 10 : i32, message = "bqd,bkd->bqk"}> : () -> ()
    %cst_17 = arith.constant dense<0.000000e+00> : vector<2x64x64xf32>
    %43 = tpu.matmul %41, %42, %cst_17 {dimension_numbers = #tpu.dot_dimension_numbers<[2], [2], [1], [1], [0, 0, 0, 1, 1, 1], [0], [0]>} : vector<2x64x32xbf16>, vector<2x64x32xbf16>, vector<2x64x64xf32> -> vector<2x64x64xf32>
    "tpu.trace_stop"() : () -> ()
    %cst_18 = arith.constant dense<0xFF800000> : vector<2x64xf32>
    %44 = vector.multi_reduction <maximumf>, %43, %cst_18 [2] : vector<2x64x64xf32> to vector<2x64xf32>
    %45 = vector.shape_cast %44 : vector<2x64xf32> to vector<2x64x1xf32>
    %46 = vector.broadcast %45 : vector<2x64x1xf32> to vector<2x64x64xf32>
    %47 = arith.subf %43, %46 : vector<2x64x64xf32>
    %48 = math.exp %47 : vector<2x64x64xf32>
    %cst_19 = arith.constant dense<0.000000e+00> : vector<2x64xf32>
    %49 = vector.multi_reduction <add>, %48, %cst_19 [2] : vector<2x64x64xf32> to vector<2x64xf32>
    %50 = vector.shape_cast %49 : vector<2x64xf32> to vector<2x64x1xf32>
    %51 = tpu.reciprocal %50 {approx = true} : vector<2x64x1xf32> -> vector<2x64x1xf32>
    %52 = vector.broadcast %51 : vector<2x64x1xf32> to vector<2x64x64xf32>
    %53 = arith.mulf %48, %52 : vector<2x64x64xf32>
    %54 = arith.truncf %53 : vector<2x64x64xf32> to vector<2x64x64xbf16>
    %55 = vector.extract_strided_slice %40 {offsets = [0, 0, 0], sizes = [2, 64, 32], strides = [1, 1, 1]} : vector<2x64x128xbf16> to vector<2x64x32xbf16>
    "tpu.trace_start"() <{level = 10 : i32, message = "bqk,bkd->bqd"}> : () -> ()
    %cst_20 = arith.constant dense<0.000000e+00> : vector<2x64x32xf32>
    %56 = tpu.matmul %54, %55, %cst_20 {dimension_numbers = #tpu.dot_dimension_numbers<[2], [1], [1], [2], [0, 0, 0, 1, 1, 2], [0], [0]>} : vector<2x64x64xbf16>, vector<2x64x32xbf16>, vector<2x64x32xf32> -> vector<2x64x32xf32>
    "tpu.trace_stop"() : () -> ()
    %57 = vector.extract_strided_slice %34 {offsets = [0, 0, 32], sizes = [2, 64, 32], strides = [1, 1, 1]} : vector<2x64x128xbf16> to vector<2x64x32xbf16>
    %58 = vector.extract_strided_slice %37 {offsets = [0, 0, 32], sizes = [2, 64, 32], strides = [1, 1, 1]} : vector<2x64x128xbf16> to vector<2x64x32xbf16>
    "tpu.trace_start"() <{level = 10 : i32, message = "bqd,bkd->bqk"}> : () -> ()
    %cst_21 = arith.constant dense<0.000000e+00> : vector<2x64x64xf32>
    %59 = tpu.matmul %57, %58, %cst_21 {dimension_numbers = #tpu.dot_dimension_numbers<[2], [2], [1], [1], [0, 0, 0, 1, 1, 1], [0], [0]>} : vector<2x64x32xbf16>, vector<2x64x32xbf16>, vector<2x64x64xf32> -> vector<2x64x64xf32>
    "tpu.trace_stop"() : () -> ()
    %cst_22 = arith.constant dense<0xFF800000> : vector<2x64xf32>
    %60 = vector.multi_reduction <maximumf>, %59, %cst_22 [2] : vector<2x64x64xf32> to vector<2x64xf32>
    %61 = vector.shape_cast %60 : vector<2x64xf32> to vector<2x64x1xf32>
    %62 = vector.broadcast %61 : vector<2x64x1xf32> to vector<2x64x64xf32>
    %63 = arith.subf %59, %62 : vector<2x64x64xf32>
    %64 = math.exp %63 : vector<2x64x64xf32>
    %cst_23 = arith.constant dense<0.000000e+00> : vector<2x64xf32>
    %65 = vector.multi_reduction <add>, %64, %cst_23 [2] : vector<2x64x64xf32> to vector<2x64xf32>
    %66 = vector.shape_cast %65 : vector<2x64xf32> to vector<2x64x1xf32>
    %67 = tpu.reciprocal %66 {approx = true} : vector<2x64x1xf32> -> vector<2x64x1xf32>
    %68 = vector.broadcast %67 : vector<2x64x1xf32> to vector<2x64x64xf32>
    %69 = arith.mulf %64, %68 : vector<2x64x64xf32>
    %70 = arith.truncf %69 : vector<2x64x64xf32> to vector<2x64x64xbf16>
    %71 = vector.extract_strided_slice %40 {offsets = [0, 0, 32], sizes = [2, 64, 32], strides = [1, 1, 1]} : vector<2x64x128xbf16> to vector<2x64x32xbf16>
    "tpu.trace_start"() <{level = 10 : i32, message = "bqk,bkd->bqd"}> : () -> ()
    %cst_24 = arith.constant dense<0.000000e+00> : vector<2x64x32xf32>
    %72 = tpu.matmul %70, %71, %cst_24 {dimension_numbers = #tpu.dot_dimension_numbers<[2], [1], [1], [2], [0, 0, 0, 1, 1, 2], [0], [0]>} : vector<2x64x64xbf16>, vector<2x64x32xbf16>, vector<2x64x32xf32> -> vector<2x64x32xf32>
    "tpu.trace_stop"() : () -> ()
    %73 = vector.extract_strided_slice %34 {offsets = [0, 0, 64], sizes = [2, 64, 32], strides = [1, 1, 1]} : vector<2x64x128xbf16> to vector<2x64x32xbf16>
    %74 = vector.extract_strided_slice %37 {offsets = [0, 0, 64], sizes = [2, 64, 32], strides = [1, 1, 1]} : vector<2x64x128xbf16> to vector<2x64x32xbf16>
    "tpu.trace_start"() <{level = 10 : i32, message = "bqd,bkd->bqk"}> : () -> ()
    %cst_25 = arith.constant dense<0.000000e+00> : vector<2x64x64xf32>
    %75 = tpu.matmul %73, %74, %cst_25 {dimension_numbers = #tpu.dot_dimension_numbers<[2], [2], [1], [1], [0, 0, 0, 1, 1, 1], [0], [0]>} : vector<2x64x32xbf16>, vector<2x64x32xbf16>, vector<2x64x64xf32> -> vector<2x64x64xf32>
    "tpu.trace_stop"() : () -> ()
    %cst_26 = arith.constant dense<0xFF800000> : vector<2x64xf32>
    %76 = vector.multi_reduction <maximumf>, %75, %cst_26 [2] : vector<2x64x64xf32> to vector<2x64xf32>
    %77 = vector.shape_cast %76 : vector<2x64xf32> to vector<2x64x1xf32>
    %78 = vector.broadcast %77 : vector<2x64x1xf32> to vector<2x64x64xf32>
    %79 = arith.subf %75, %78 : vector<2x64x64xf32>
    %80 = math.exp %79 : vector<2x64x64xf32>
    %cst_27 = arith.constant dense<0.000000e+00> : vector<2x64xf32>
    %81 = vector.multi_reduction <add>, %80, %cst_27 [2] : vector<2x64x64xf32> to vector<2x64xf32>
    %82 = vector.shape_cast %81 : vector<2x64xf32> to vector<2x64x1xf32>
    %83 = tpu.reciprocal %82 {approx = true} : vector<2x64x1xf32> -> vector<2x64x1xf32>
    %84 = vector.broadcast %83 : vector<2x64x1xf32> to vector<2x64x64xf32>
    %85 = arith.mulf %80, %84 : vector<2x64x64xf32>
    %86 = arith.truncf %85 : vector<2x64x64xf32> to vector<2x64x64xbf16>
    %87 = vector.extract_strided_slice %40 {offsets = [0, 0, 64], sizes = [2, 64, 32], strides = [1, 1, 1]} : vector<2x64x128xbf16> to vector<2x64x32xbf16>
    "tpu.trace_start"() <{level = 10 : i32, message = "bqk,bkd->bqd"}> : () -> ()
    %cst_28 = arith.constant dense<0.000000e+00> : vector<2x64x32xf32>
    %88 = tpu.matmul %86, %87, %cst_28 {dimension_numbers = #tpu.dot_dimension_numbers<[2], [1], [1], [2], [0, 0, 0, 1, 1, 2], [0], [0]>} : vector<2x64x64xbf16>, vector<2x64x32xbf16>, vector<2x64x32xf32> -> vector<2x64x32xf32>
    "tpu.trace_stop"() : () -> ()
    %89 = vector.extract_strided_slice %34 {offsets = [0, 0, 96], sizes = [2, 64, 32], strides = [1, 1, 1]} : vector<2x64x128xbf16> to vector<2x64x32xbf16>
    %90 = vector.extract_strided_slice %37 {offsets = [0, 0, 96], sizes = [2, 64, 32], strides = [1, 1, 1]} : vector<2x64x128xbf16> to vector<2x64x32xbf16>
    "tpu.trace_start"() <{level = 10 : i32, message = "bqd,bkd->bqk"}> : () -> ()
    %cst_29 = arith.constant dense<0.000000e+00> : vector<2x64x64xf32>
    %91 = tpu.matmul %89, %90, %cst_29 {dimension_numbers = #tpu.dot_dimension_numbers<[2], [2], [1], [1], [0, 0, 0, 1, 1, 1], [0], [0]>} : vector<2x64x32xbf16>, vector<2x64x32xbf16>, vector<2x64x64xf32> -> vector<2x64x64xf32>
    "tpu.trace_stop"() : () -> ()
    %cst_30 = arith.constant dense<0xFF800000> : vector<2x64xf32>
    %92 = vector.multi_reduction <maximumf>, %91, %cst_30 [2] : vector<2x64x64xf32> to vector<2x64xf32>
    %93 = vector.shape_cast %92 : vector<2x64xf32> to vector<2x64x1xf32>
    %94 = vector.broadcast %93 : vector<2x64x1xf32> to vector<2x64x64xf32>
    %95 = arith.subf %91, %94 : vector<2x64x64xf32>
    %96 = math.exp %95 : vector<2x64x64xf32>
    %cst_31 = arith.constant dense<0.000000e+00> : vector<2x64xf32>
    %97 = vector.multi_reduction <add>, %96, %cst_31 [2] : vector<2x64x64xf32> to vector<2x64xf32>
    %98 = vector.shape_cast %97 : vector<2x64xf32> to vector<2x64x1xf32>
    %99 = tpu.reciprocal %98 {approx = true} : vector<2x64x1xf32> -> vector<2x64x1xf32>
    %100 = vector.broadcast %99 : vector<2x64x1xf32> to vector<2x64x64xf32>
    %101 = arith.mulf %96, %100 : vector<2x64x64xf32>
    %102 = arith.truncf %101 : vector<2x64x64xf32> to vector<2x64x64xbf16>
    %103 = vector.extract_strided_slice %40 {offsets = [0, 0, 96], sizes = [2, 64, 32], strides = [1, 1, 1]} : vector<2x64x128xbf16> to vector<2x64x32xbf16>
    "tpu.trace_start"() <{level = 10 : i32, message = "bqk,bkd->bqd"}> : () -> ()
    %cst_32 = arith.constant dense<0.000000e+00> : vector<2x64x32xf32>
    %104 = tpu.matmul %102, %103, %cst_32 {dimension_numbers = #tpu.dot_dimension_numbers<[2], [1], [1], [2], [0, 0, 0, 1, 1, 2], [0], [0]>} : vector<2x64x64xbf16>, vector<2x64x32xbf16>, vector<2x64x32xf32> -> vector<2x64x32xf32>
    "tpu.trace_stop"() : () -> ()
    %105 = tpu.concatenate %56, %72, %88, %104 in 2 : vector<2x64x32xf32>, vector<2x64x32xf32>, vector<2x64x32xf32>, vector<2x64x32xf32> -> vector<2x64x128xf32>
    %106 = vector.shape_cast %105 : vector<2x64x128xf32> to vector<128x128xf32>
    %107 = arith.truncf %106 : vector<128x128xf32> to vector<128x128xbf16>
    %c0_33 = arith.constant 0 : index
    %c0_34 = arith.constant 0 : index
    %108 = vector.load %arg6[%c0_33, %c0_34] : memref<128x128xbf16, #tpu.memory_space<vmem>>, vector<128x128xbf16>
    %cst_35 = arith.constant dense<0.000000e+00> : vector<128x128xf32>
    %109 = tpu.matmul %107, %108, %cst_35 {dimension_numbers = #tpu.dot_dimension_numbers<[1], [0], [0], [1], [0, 0, 1, 1], [], []>} : vector<128x128xbf16>, vector<128x128xbf16>, vector<128x128xf32> -> vector<128x128xf32>
    %110 = arith.addf %1, %109 : vector<128x128xf32>
    %c0_36 = arith.constant 0 : index
    %c0_37 = arith.constant 0 : index
    %111 = vector.load %arg7[%c0_36, %c0_37] : memref<1x128xf32, #tpu.memory_space<vmem>>, vector<1x128xf32>
    %112 = vector.broadcast %111 : vector<1x128xf32> to vector<128x128xf32>
    %113 = arith.addf %110, %112 : vector<128x128xf32>
    %c0_38 = arith.constant 0 : index
    %c0_39 = arith.constant 0 : index
    %114 = vector.load %arg8[%c0_38, %c0_39] : memref<1x128xf32, #tpu.memory_space<vmem>>, vector<1x128xf32>
    %c0_40 = arith.constant 0 : index
    %c0_41 = arith.constant 0 : index
    %115 = vector.load %arg9[%c0_40, %c0_41] : memref<1x128xf32, #tpu.memory_space<vmem>>, vector<1x128xf32>
    %cst_42 = arith.constant dense<0.000000e+00> : vector<128xf32>
    %116 = vector.multi_reduction <add>, %113, %cst_42 [1] : vector<128x128xf32> to vector<128xf32>
    %117 = vector.shape_cast %116 : vector<128xf32> to vector<128x1xf32>
    %cst_43 = arith.constant 1.280000e+02 : f32
    %118 = vector.broadcast %cst_43 : f32 to vector<128x1xf32>
    %119 = arith.divf %117, %118 : vector<128x1xf32>
    %120 = vector.broadcast %119 : vector<128x1xf32> to vector<128x128xf32>
    %121 = arith.subf %113, %120 : vector<128x128xf32>
    %122 = arith.mulf %121, %121 : vector<128x128xf32>
    %cst_44 = arith.constant dense<0.000000e+00> : vector<128xf32>
    %123 = vector.multi_reduction <add>, %122, %cst_44 [1] : vector<128x128xf32> to vector<128xf32>
    %124 = vector.shape_cast %123 : vector<128xf32> to vector<128x1xf32>
    %cst_45 = arith.constant 1.280000e+02 : f32
    %125 = vector.broadcast %cst_45 : f32 to vector<128x1xf32>
    %126 = arith.divf %124, %125 : vector<128x1xf32>
    %127 = vector.broadcast %119 : vector<128x1xf32> to vector<128x128xf32>
    %128 = arith.subf %113, %127 : vector<128x128xf32>
    %cst_46 = arith.constant 9.99999974E-6 : f32
    %129 = vector.broadcast %cst_46 : f32 to vector<128x1xf32>
    %130 = arith.addf %126, %129 : vector<128x1xf32>
    %131 = math.rsqrt %130 : vector<128x1xf32>
    %132 = vector.broadcast %131 : vector<128x1xf32> to vector<128x128xf32>
    %133 = arith.mulf %128, %132 : vector<128x128xf32>
    %134 = vector.broadcast %114 : vector<1x128xf32> to vector<128x128xf32>
    %135 = arith.mulf %133, %134 : vector<128x128xf32>
    %136 = vector.broadcast %115 : vector<1x128xf32> to vector<128x128xf32>
    %137 = arith.addf %135, %136 : vector<128x128xf32>
    %138 = arith.truncf %137 : vector<128x128xf32> to vector<128x128xbf16>
    %c0_47 = arith.constant 0 : index
    %c0_48 = arith.constant 0 : index
    %139 = vector.load %arg10[%c0_47, %c0_48] : memref<128x256xbf16, #tpu.memory_space<vmem>>, vector<128x256xbf16>
    %cst_49 = arith.constant dense<0.000000e+00> : vector<128x256xf32>
    %140 = tpu.matmul %138, %139, %cst_49 {dimension_numbers = #tpu.dot_dimension_numbers<[1], [0], [0], [1], [0, 0, 1, 1], [], []>} : vector<128x128xbf16>, vector<128x256xbf16>, vector<128x256xf32> -> vector<128x256xf32>
    %c0_50 = arith.constant 0 : index
    %c0_51 = arith.constant 0 : index
    %141 = vector.load %arg11[%c0_50, %c0_51] : memref<1x256xf32, #tpu.memory_space<vmem>>, vector<1x256xf32>
    %142 = vector.broadcast %141 : vector<1x256xf32> to vector<128x256xf32>
    %143 = arith.addf %140, %142 : vector<128x256xf32>
    %cst_52 = arith.constant 5.000000e-01 : f32
    %144 = vector.broadcast %cst_52 : f32 to vector<128x256xf32>
    %145 = arith.mulf %144, %143 : vector<128x256xf32>
    %146 = arith.mulf %143, %143 : vector<128x256xf32>
    %147 = arith.mulf %146, %143 : vector<128x256xf32>
    %cst_53 = arith.constant 4.471500e-02 : f32
    %148 = vector.broadcast %cst_53 : f32 to vector<128x256xf32>
    %149 = arith.mulf %148, %147 : vector<128x256xf32>
    %150 = arith.addf %143, %149 : vector<128x256xf32>
    %cst_54 = arith.constant 0.797884583 : f32
    %151 = vector.broadcast %cst_54 : f32 to vector<128x256xf32>
    %152 = arith.mulf %151, %150 : vector<128x256xf32>
    %153 = math.tanh %152 : vector<128x256xf32>
    %cst_55 = arith.constant 1.000000e+00 : f32
    %154 = vector.broadcast %cst_55 : f32 to vector<128x256xf32>
    %155 = arith.addf %154, %153 : vector<128x256xf32>
    %156 = arith.mulf %145, %155 : vector<128x256xf32>
    %157 = arith.truncf %156 : vector<128x256xf32> to vector<128x256xbf16>
    %c0_56 = arith.constant 0 : index
    %c0_57 = arith.constant 0 : index
    %158 = vector.load %arg12[%c0_56, %c0_57] : memref<256x128xbf16, #tpu.memory_space<vmem>>, vector<256x128xbf16>
    %cst_58 = arith.constant dense<0.000000e+00> : vector<128x128xf32>
    %159 = tpu.matmul %157, %158, %cst_58 {dimension_numbers = #tpu.dot_dimension_numbers<[1], [0], [0], [1], [0, 0, 1, 1], [], []>} : vector<128x256xbf16>, vector<256x128xbf16>, vector<128x128xf32> -> vector<128x128xf32>
    %160 = arith.addf %113, %159 : vector<128x128xf32>
    %c0_59 = arith.constant 0 : index
    %c0_60 = arith.constant 0 : index
    %161 = vector.load %arg13[%c0_59, %c0_60] : memref<1x128xf32, #tpu.memory_space<vmem>>, vector<1x128xf32>
    %162 = vector.broadcast %161 : vector<1x128xf32> to vector<128x128xf32>
    %163 = arith.addf %160, %162 : vector<128x128xf32>
    %164 = vector.shape_cast %163 : vector<128x128xf32> to vector<2x64x128xf32>
    %165 = arith.truncf %164 : vector<2x64x128xf32> to vector<2x64x128xbf16>
    %c0_61 = arith.constant 0 : index
    %c0_62 = arith.constant 0 : index
    %c0_63 = arith.constant 0 : index
    %166 = vector.load %arg16[%c0_61, %c0_62, %c0_63] : memref<2x64x128xbf16, #tpu.memory_space<vmem>>, vector<2x64x128xbf16>
    tpu.vector_store %arg16[%c0_61, %c0_62, %c0_63], %165 {strides = array<i32>} : memref<2x64x128xbf16, #tpu.memory_space<vmem>>, vector<2x64x128xbf16>,
    return
  }
  func.func @transform_0(%arg0: i32) -> (i32, i32, i32) {
    %c0_i32 = arith.constant 0 : i32
    %c0_i32_0 = arith.constant 0 : i32
    %c0_i32_1 = arith.constant 0 : i32
    return %arg0, %c0_i32, %c0_i32_0 : i32, i32, i32
  }
  func.func @transform_1(%arg0: i32) -> (i32, i32) {
    %c0_i32 = arith.constant 0 : i32
    %c0_i32_0 = arith.constant 0 : i32
    %c0_i32_1 = arith.constant 0 : i32
    return %c0_i32, %c0_i32_0 : i32, i32
  }
  func.func @transform_2(%arg0: i32) -> (i32, i32) {
    %c0_i32 = arith.constant 0 : i32
    %c0_i32_0 = arith.constant 0 : i32
    %c0_i32_1 = arith.constant 0 : i32
    return %c0_i32, %c0_i32_0 : i32, i32
  }
  func.func @transform_3(%arg0: i32) -> (i32, i32) {
    %c0_i32 = arith.constant 0 : i32
    %c0_i32_0 = arith.constant 0 : i32
    %c0_i32_1 = arith.constant 0 : i32
    return %c0_i32, %c0_i32_0 : i32, i32
  }
  func.func @transform_4(%arg0: i32) -> (i32, i32) {
    %c0_i32 = arith.constant 0 : i32
    %c0_i32_0 = arith.constant 0 : i32
    %c0_i32_1 = arith.constant 0 : i32
    return %c0_i32, %c0_i32_0 : i32, i32
  }
  func.func @transform_5(%arg0: i32) -> (i32, i32) {
    %c0_i32 = arith.constant 0 : i32
    %c0_i32_0 = arith.constant 0 : i32
    %c0_i32_1 = arith.constant 0 : i32
    return %c0_i32, %c0_i32_0 : i32, i32
  }
  func.func @transform_6(%arg0: i32) -> (i32, i32) {
    %c0_i32 = arith.constant 0 : i32
    %c0_i32_0 = arith.constant 0 : i32
    %c0_i32_1 = arith.constant 0 : i32
    return %c0_i32, %c0_i32_0 : i32, i32
  }
  func.func @transform_7(%arg0: i32) -> (i32, i32) {
    %c0_i32 = arith.constant 0 : i32
    %c0_i32_0 = arith.constant 0 : i32
    %c0_i32_1 = arith.constant 0 : i32
    return %c0_i32, %c0_i32_0 : i32, i32
  }
  func.func @transform_8(%arg0: i32) -> (i32, i32) {
    %c0_i32 = arith.constant 0 : i32
    %c0_i32_0 = arith.constant 0 : i32
    %c0_i32_1 = arith.constant 0 : i32
    return %c0_i32, %c0_i32_0 : i32, i32
  }
  func.func @transform_9(%arg0: i32) -> (i32, i32) {
    %c0_i32 = arith.constant 0 : i32
    %c0_i32_0 = arith.constant 0 : i32
    %c0_i32_1 = arith.constant 0 : i32
    return %c0_i32, %c0_i32_0 : i32, i32
  }
  func.func @transform_10(%arg0: i32) -> (i32, i32) {
    %c0_i32 = arith.constant 0 : i32
    %c0_i32_0 = arith.constant 0 : i32
    %c0_i32_1 = arith.constant 0 : i32
    return %c0_i32, %c0_i32_0 : i32, i32
  }
  func.func @transform_11(%arg0: i32) -> (i32, i32) {
    %c0_i32 = arith.constant 0 : i32
    %c0_i32_0 = arith.constant 0 : i32
    %c0_i32_1 = arith.constant 0 : i32
    return %c0_i32, %c0_i32_0 : i32, i32
  }
  func.func @transform_12(%arg0: i32) -> (i32, i32) {
    %c0_i32 = arith.constant 0 : i32
    %c0_i32_0 = arith.constant 0 : i32
    %c0_i32_1 = arith.constant 0 : i32
    return %c0_i32, %c0_i32_0 : i32, i32
  }
  func.func @transform_13(%arg0: i32) -> (i32, i32) {
    %c0_i32 = arith.constant 0 : i32
    %c0_i32_0 = arith.constant 0 : i32
    %c0_i32_1 = arith.constant 0 : i32
    return %c0_i32, %c0_i32_0 : i32, i32
  }
  func.func @transform_14(%arg0: i32) -> (i32, i32) {
    %c0_i32 = arith.constant 0 : i32
    %c0_i32_0 = arith.constant 0 : i32
    %c0_i32_1 = arith.constant 0 : i32
    return %c0_i32, %c0_i32_0 : i32, i32
  }
  func.func @transform_15(%arg0: i32) -> (i32, i32, i32) {
    %c0_i32 = arith.constant 0 : i32
    %c0_i32_0 = arith.constant 0 : i32
    %c0_i32_1 = arith.constant 0 : i32
    return %arg0, %c0_i32, %c0_i32_0 : i32, i32, i32
  }
}

module attributes {stable_mosaic.version = 11 : i64} {
  func.func @_layer_kernel(%arg0: i32, %arg1: memref<2x64x128xbf16, #tpu.memory_space<vmem>>, %arg2: memref<1x128xf32, #tpu.memory_space<vmem>>, %arg3: memref<1x128xf32, #tpu.memory_space<vmem>>, %arg4: memref<128x128xbf16, #tpu.memory_space<vmem>>, %arg5: memref<128x256xbf16, #tpu.memory_space<vmem>>, %arg6: memref<128x128xbf16, #tpu.memory_space<vmem>>, %arg7: memref<1x128xf32, #tpu.memory_space<vmem>>, %arg8: memref<1x128xf32, #tpu.memory_space<vmem>>, %arg9: memref<1x128xf32, #tpu.memory_space<vmem>>, %arg10: memref<128x256xbf16, #tpu.memory_space<vmem>>, %arg11: memref<1x256xf32, #tpu.memory_space<vmem>>, %arg12: memref<256x128xbf16, #tpu.memory_space<vmem>>, %arg13: memref<1x128xf32, #tpu.memory_space<vmem>>, %arg14: memref<1x128xf32, #tpu.memory_space<vmem>>, %arg15: memref<1x128xf32, #tpu.memory_space<vmem>>, %arg16: memref<2x64x128xf32, #tpu.memory_space<vmem>>) attributes {dimension_semantics = [#tpu.dimension_semantics<parallel>], iteration_bounds = array<i64: 4>, scalar_prefetch = 0 : i64, scratch_operands = 0 : i64, tpu.core_type = #tpu.core_type<tc>, window_params = [{transform_indices = @transform_0, window_bounds = array<i64: 2, 64, 128>}, {pipeline_mode = #tpu.pipeline_mode<synchronous>, transform_indices = @transform_1, window_bounds = array<i64: 1, 128>}, {pipeline_mode = #tpu.pipeline_mode<synchronous>, transform_indices = @transform_2, window_bounds = array<i64: 1, 128>}, {pipeline_mode = #tpu.pipeline_mode<synchronous>, transform_indices = @transform_3, window_bounds = array<i64: 128, 128>}, {pipeline_mode = #tpu.pipeline_mode<synchronous>, transform_indices = @transform_4, window_bounds = array<i64: 128, 256>}, {pipeline_mode = #tpu.pipeline_mode<synchronous>, transform_indices = @transform_5, window_bounds = array<i64: 128, 128>}, {pipeline_mode = #tpu.pipeline_mode<synchronous>, transform_indices = @transform_6, window_bounds = array<i64: 1, 128>}, {pipeline_mode = #tpu.pipeline_mode<synchronous>, transform_indices = @transform_7, window_bounds = array<i64: 1, 128>}, {pipeline_mode = #tpu.pipeline_mode<synchronous>, transform_indices = @transform_8, window_bounds = array<i64: 1, 128>}, {pipeline_mode = #tpu.pipeline_mode<synchronous>, transform_indices = @transform_9, window_bounds = array<i64: 128, 256>}, {pipeline_mode = #tpu.pipeline_mode<synchronous>, transform_indices = @transform_10, window_bounds = array<i64: 1, 256>}, {pipeline_mode = #tpu.pipeline_mode<synchronous>, transform_indices = @transform_11, window_bounds = array<i64: 256, 128>}, {pipeline_mode = #tpu.pipeline_mode<synchronous>, transform_indices = @transform_12, window_bounds = array<i64: 1, 128>}, {pipeline_mode = #tpu.pipeline_mode<synchronous>, transform_indices = @transform_13, window_bounds = array<i64: 1, 128>}, {pipeline_mode = #tpu.pipeline_mode<synchronous>, transform_indices = @transform_14, window_bounds = array<i64: 1, 128>}, {transform_indices = @transform_15, window_bounds = array<i64: 2, 64, 128>}]} {
    %c0 = arith.constant 0 : index
    %c0_0 = arith.constant 0 : index
    %c0_1 = arith.constant 0 : index
    %0 = vector.load %arg1[%c0, %c0_0, %c0_1] : memref<2x64x128xbf16, #tpu.memory_space<vmem>>, vector<2x64x128xbf16>
    %1 = arith.extf %0 : vector<2x64x128xbf16> to vector<2x64x128xf32>
    %2 = vector.shape_cast %1 : vector<2x64x128xf32> to vector<128x128xf32>
    %c0_2 = arith.constant 0 : index
    %c0_3 = arith.constant 0 : index
    %3 = vector.load %arg2[%c0_2, %c0_3] : memref<1x128xf32, #tpu.memory_space<vmem>>, vector<1x128xf32>
    %c0_4 = arith.constant 0 : index
    %c0_5 = arith.constant 0 : index
    %4 = vector.load %arg3[%c0_4, %c0_5] : memref<1x128xf32, #tpu.memory_space<vmem>>, vector<1x128xf32>
    %cst = arith.constant dense<0.000000e+00> : vector<128xf32>
    %5 = vector.multi_reduction <add>, %2, %cst [1] : vector<128x128xf32> to vector<128xf32>
    %6 = vector.shape_cast %5 : vector<128xf32> to vector<128x1xf32>
    %cst_6 = arith.constant 1.280000e+02 : f32
    %7 = vector.broadcast %cst_6 : f32 to vector<128x1xf32>
    %8 = arith.divf %6, %7 : vector<128x1xf32>
    %9 = vector.broadcast %8 : vector<128x1xf32> to vector<128x128xf32>
    %10 = arith.subf %2, %9 : vector<128x128xf32>
    %11 = arith.mulf %10, %10 : vector<128x128xf32>
    %cst_7 = arith.constant dense<0.000000e+00> : vector<128xf32>
    %12 = vector.multi_reduction <add>, %11, %cst_7 [1] : vector<128x128xf32> to vector<128xf32>
    %13 = vector.shape_cast %12 : vector<128xf32> to vector<128x1xf32>
    %cst_8 = arith.constant 1.280000e+02 : f32
    %14 = vector.broadcast %cst_8 : f32 to vector<128x1xf32>
    %15 = arith.divf %13, %14 : vector<128x1xf32>
    %16 = vector.broadcast %8 : vector<128x1xf32> to vector<128x128xf32>
    %17 = arith.subf %2, %16 : vector<128x128xf32>
    %cst_9 = arith.constant 9.99999974E-6 : f32
    %18 = vector.broadcast %cst_9 : f32 to vector<128x1xf32>
    %19 = arith.addf %15, %18 : vector<128x1xf32>
    %20 = math.rsqrt %19 : vector<128x1xf32>
    %21 = vector.broadcast %20 : vector<128x1xf32> to vector<128x128xf32>
    %22 = arith.mulf %17, %21 : vector<128x128xf32>
    %23 = vector.broadcast %3 : vector<1x128xf32> to vector<128x128xf32>
    %24 = arith.mulf %22, %23 : vector<128x128xf32>
    %25 = vector.broadcast %4 : vector<1x128xf32> to vector<128x128xf32>
    %26 = arith.addf %24, %25 : vector<128x128xf32>
    %27 = arith.truncf %26 : vector<128x128xf32> to vector<128x128xbf16>
    %c0_10 = arith.constant 0 : index
    %c0_11 = arith.constant 0 : index
    %28 = vector.load %arg4[%c0_10, %c0_11] : memref<128x128xbf16, #tpu.memory_space<vmem>>, vector<128x128xbf16>
    %cst_12 = arith.constant dense<0.000000e+00> : vector<128x128xf32>
    %29 = tpu.matmul %27, %28, %cst_12 {dimension_numbers = #tpu.dot_dimension_numbers<[1], [0], [0], [1], [0, 0, 1, 1], [], []>} : vector<128x128xbf16>, vector<128x128xbf16>, vector<128x128xf32> -> vector<128x128xf32>
    %cst_13 = arith.constant 0.176776692 : f32
    %30 = vector.broadcast %cst_13 : f32 to vector<128x128xf32>
    %31 = arith.mulf %29, %30 : vector<128x128xf32>
    %c0_14 = arith.constant 0 : index
    %c0_15 = arith.constant 0 : index
    %32 = vector.load %arg5[%c0_14, %c0_15] : memref<128x256xbf16, #tpu.memory_space<vmem>>, vector<128x256xbf16>
    %cst_16 = arith.constant dense<0.000000e+00> : vector<128x256xf32>
    %33 = tpu.matmul %27, %32, %cst_16 {dimension_numbers = #tpu.dot_dimension_numbers<[1], [0], [0], [1], [0, 0, 1, 1], [], []>} : vector<128x128xbf16>, vector<128x256xbf16>, vector<128x256xf32> -> vector<128x256xf32>
    %34 = vector.shape_cast %31 : vector<128x128xf32> to vector<2x64x128xf32>
    %35 = arith.truncf %34 : vector<2x64x128xf32> to vector<2x64x128xbf16>
    %36 = vector.extract_strided_slice %33 {offsets = [0, 0], sizes = [128, 128], strides = [1, 1]} : vector<128x256xf32> to vector<128x128xf32>
    %37 = vector.shape_cast %36 : vector<128x128xf32> to vector<2x64x128xf32>
    %38 = arith.truncf %37 : vector<2x64x128xf32> to vector<2x64x128xbf16>
    %39 = vector.extract_strided_slice %33 {offsets = [0, 128], sizes = [128, 128], strides = [1, 1]} : vector<128x256xf32> to vector<128x128xf32>
    %40 = vector.shape_cast %39 : vector<128x128xf32> to vector<2x64x128xf32>
    %41 = arith.truncf %40 : vector<2x64x128xf32> to vector<2x64x128xbf16>
    %42 = vector.extract_strided_slice %35 {offsets = [0, 0, 0], sizes = [2, 64, 32], strides = [1, 1, 1]} : vector<2x64x128xbf16> to vector<2x64x32xbf16>
    %43 = vector.extract_strided_slice %38 {offsets = [0, 0, 0], sizes = [2, 64, 32], strides = [1, 1, 1]} : vector<2x64x128xbf16> to vector<2x64x32xbf16>
    "tpu.trace_start"() <{level = 10 : i32, message = "bqd,bkd->bqk"}> : () -> ()
    %cst_17 = arith.constant dense<0.000000e+00> : vector<2x64x64xf32>
    %44 = tpu.matmul %42, %43, %cst_17 {dimension_numbers = #tpu.dot_dimension_numbers<[2], [2], [1], [1], [0, 0, 0, 1, 1, 1], [0], [0]>} : vector<2x64x32xbf16>, vector<2x64x32xbf16>, vector<2x64x64xf32> -> vector<2x64x64xf32>
    "tpu.trace_stop"() : () -> ()
    %cst_18 = arith.constant dense<0xFF800000> : vector<2x64xf32>
    %45 = vector.multi_reduction <maximumf>, %44, %cst_18 [2] : vector<2x64x64xf32> to vector<2x64xf32>
    %46 = vector.shape_cast %45 : vector<2x64xf32> to vector<2x64x1xf32>
    %47 = vector.broadcast %46 : vector<2x64x1xf32> to vector<2x64x64xf32>
    %48 = arith.subf %44, %47 : vector<2x64x64xf32>
    %49 = math.exp %48 : vector<2x64x64xf32>
    %cst_19 = arith.constant dense<0.000000e+00> : vector<2x64xf32>
    %50 = vector.multi_reduction <add>, %49, %cst_19 [2] : vector<2x64x64xf32> to vector<2x64xf32>
    %51 = vector.shape_cast %50 : vector<2x64xf32> to vector<2x64x1xf32>
    %52 = tpu.reciprocal %51 {approx = true} : vector<2x64x1xf32> -> vector<2x64x1xf32>
    %53 = vector.broadcast %52 : vector<2x64x1xf32> to vector<2x64x64xf32>
    %54 = arith.mulf %49, %53 : vector<2x64x64xf32>
    %55 = arith.truncf %54 : vector<2x64x64xf32> to vector<2x64x64xbf16>
    %56 = vector.extract_strided_slice %41 {offsets = [0, 0, 0], sizes = [2, 64, 32], strides = [1, 1, 1]} : vector<2x64x128xbf16> to vector<2x64x32xbf16>
    "tpu.trace_start"() <{level = 10 : i32, message = "bqk,bkd->bqd"}> : () -> ()
    %cst_20 = arith.constant dense<0.000000e+00> : vector<2x64x32xf32>
    %57 = tpu.matmul %55, %56, %cst_20 {dimension_numbers = #tpu.dot_dimension_numbers<[2], [1], [1], [2], [0, 0, 0, 1, 1, 2], [0], [0]>} : vector<2x64x64xbf16>, vector<2x64x32xbf16>, vector<2x64x32xf32> -> vector<2x64x32xf32>
    "tpu.trace_stop"() : () -> ()
    %58 = vector.extract_strided_slice %35 {offsets = [0, 0, 32], sizes = [2, 64, 32], strides = [1, 1, 1]} : vector<2x64x128xbf16> to vector<2x64x32xbf16>
    %59 = vector.extract_strided_slice %38 {offsets = [0, 0, 32], sizes = [2, 64, 32], strides = [1, 1, 1]} : vector<2x64x128xbf16> to vector<2x64x32xbf16>
    "tpu.trace_start"() <{level = 10 : i32, message = "bqd,bkd->bqk"}> : () -> ()
    %cst_21 = arith.constant dense<0.000000e+00> : vector<2x64x64xf32>
    %60 = tpu.matmul %58, %59, %cst_21 {dimension_numbers = #tpu.dot_dimension_numbers<[2], [2], [1], [1], [0, 0, 0, 1, 1, 1], [0], [0]>} : vector<2x64x32xbf16>, vector<2x64x32xbf16>, vector<2x64x64xf32> -> vector<2x64x64xf32>
    "tpu.trace_stop"() : () -> ()
    %cst_22 = arith.constant dense<0xFF800000> : vector<2x64xf32>
    %61 = vector.multi_reduction <maximumf>, %60, %cst_22 [2] : vector<2x64x64xf32> to vector<2x64xf32>
    %62 = vector.shape_cast %61 : vector<2x64xf32> to vector<2x64x1xf32>
    %63 = vector.broadcast %62 : vector<2x64x1xf32> to vector<2x64x64xf32>
    %64 = arith.subf %60, %63 : vector<2x64x64xf32>
    %65 = math.exp %64 : vector<2x64x64xf32>
    %cst_23 = arith.constant dense<0.000000e+00> : vector<2x64xf32>
    %66 = vector.multi_reduction <add>, %65, %cst_23 [2] : vector<2x64x64xf32> to vector<2x64xf32>
    %67 = vector.shape_cast %66 : vector<2x64xf32> to vector<2x64x1xf32>
    %68 = tpu.reciprocal %67 {approx = true} : vector<2x64x1xf32> -> vector<2x64x1xf32>
    %69 = vector.broadcast %68 : vector<2x64x1xf32> to vector<2x64x64xf32>
    %70 = arith.mulf %65, %69 : vector<2x64x64xf32>
    %71 = arith.truncf %70 : vector<2x64x64xf32> to vector<2x64x64xbf16>
    %72 = vector.extract_strided_slice %41 {offsets = [0, 0, 32], sizes = [2, 64, 32], strides = [1, 1, 1]} : vector<2x64x128xbf16> to vector<2x64x32xbf16>
    "tpu.trace_start"() <{level = 10 : i32, message = "bqk,bkd->bqd"}> : () -> ()
    %cst_24 = arith.constant dense<0.000000e+00> : vector<2x64x32xf32>
    %73 = tpu.matmul %71, %72, %cst_24 {dimension_numbers = #tpu.dot_dimension_numbers<[2], [1], [1], [2], [0, 0, 0, 1, 1, 2], [0], [0]>} : vector<2x64x64xbf16>, vector<2x64x32xbf16>, vector<2x64x32xf32> -> vector<2x64x32xf32>
    "tpu.trace_stop"() : () -> ()
    %74 = vector.extract_strided_slice %35 {offsets = [0, 0, 64], sizes = [2, 64, 32], strides = [1, 1, 1]} : vector<2x64x128xbf16> to vector<2x64x32xbf16>
    %75 = vector.extract_strided_slice %38 {offsets = [0, 0, 64], sizes = [2, 64, 32], strides = [1, 1, 1]} : vector<2x64x128xbf16> to vector<2x64x32xbf16>
    "tpu.trace_start"() <{level = 10 : i32, message = "bqd,bkd->bqk"}> : () -> ()
    %cst_25 = arith.constant dense<0.000000e+00> : vector<2x64x64xf32>
    %76 = tpu.matmul %74, %75, %cst_25 {dimension_numbers = #tpu.dot_dimension_numbers<[2], [2], [1], [1], [0, 0, 0, 1, 1, 1], [0], [0]>} : vector<2x64x32xbf16>, vector<2x64x32xbf16>, vector<2x64x64xf32> -> vector<2x64x64xf32>
    "tpu.trace_stop"() : () -> ()
    %cst_26 = arith.constant dense<0xFF800000> : vector<2x64xf32>
    %77 = vector.multi_reduction <maximumf>, %76, %cst_26 [2] : vector<2x64x64xf32> to vector<2x64xf32>
    %78 = vector.shape_cast %77 : vector<2x64xf32> to vector<2x64x1xf32>
    %79 = vector.broadcast %78 : vector<2x64x1xf32> to vector<2x64x64xf32>
    %80 = arith.subf %76, %79 : vector<2x64x64xf32>
    %81 = math.exp %80 : vector<2x64x64xf32>
    %cst_27 = arith.constant dense<0.000000e+00> : vector<2x64xf32>
    %82 = vector.multi_reduction <add>, %81, %cst_27 [2] : vector<2x64x64xf32> to vector<2x64xf32>
    %83 = vector.shape_cast %82 : vector<2x64xf32> to vector<2x64x1xf32>
    %84 = tpu.reciprocal %83 {approx = true} : vector<2x64x1xf32> -> vector<2x64x1xf32>
    %85 = vector.broadcast %84 : vector<2x64x1xf32> to vector<2x64x64xf32>
    %86 = arith.mulf %81, %85 : vector<2x64x64xf32>
    %87 = arith.truncf %86 : vector<2x64x64xf32> to vector<2x64x64xbf16>
    %88 = vector.extract_strided_slice %41 {offsets = [0, 0, 64], sizes = [2, 64, 32], strides = [1, 1, 1]} : vector<2x64x128xbf16> to vector<2x64x32xbf16>
    "tpu.trace_start"() <{level = 10 : i32, message = "bqk,bkd->bqd"}> : () -> ()
    %cst_28 = arith.constant dense<0.000000e+00> : vector<2x64x32xf32>
    %89 = tpu.matmul %87, %88, %cst_28 {dimension_numbers = #tpu.dot_dimension_numbers<[2], [1], [1], [2], [0, 0, 0, 1, 1, 2], [0], [0]>} : vector<2x64x64xbf16>, vector<2x64x32xbf16>, vector<2x64x32xf32> -> vector<2x64x32xf32>
    "tpu.trace_stop"() : () -> ()
    %90 = vector.extract_strided_slice %35 {offsets = [0, 0, 96], sizes = [2, 64, 32], strides = [1, 1, 1]} : vector<2x64x128xbf16> to vector<2x64x32xbf16>
    %91 = vector.extract_strided_slice %38 {offsets = [0, 0, 96], sizes = [2, 64, 32], strides = [1, 1, 1]} : vector<2x64x128xbf16> to vector<2x64x32xbf16>
    "tpu.trace_start"() <{level = 10 : i32, message = "bqd,bkd->bqk"}> : () -> ()
    %cst_29 = arith.constant dense<0.000000e+00> : vector<2x64x64xf32>
    %92 = tpu.matmul %90, %91, %cst_29 {dimension_numbers = #tpu.dot_dimension_numbers<[2], [2], [1], [1], [0, 0, 0, 1, 1, 1], [0], [0]>} : vector<2x64x32xbf16>, vector<2x64x32xbf16>, vector<2x64x64xf32> -> vector<2x64x64xf32>
    "tpu.trace_stop"() : () -> ()
    %cst_30 = arith.constant dense<0xFF800000> : vector<2x64xf32>
    %93 = vector.multi_reduction <maximumf>, %92, %cst_30 [2] : vector<2x64x64xf32> to vector<2x64xf32>
    %94 = vector.shape_cast %93 : vector<2x64xf32> to vector<2x64x1xf32>
    %95 = vector.broadcast %94 : vector<2x64x1xf32> to vector<2x64x64xf32>
    %96 = arith.subf %92, %95 : vector<2x64x64xf32>
    %97 = math.exp %96 : vector<2x64x64xf32>
    %cst_31 = arith.constant dense<0.000000e+00> : vector<2x64xf32>
    %98 = vector.multi_reduction <add>, %97, %cst_31 [2] : vector<2x64x64xf32> to vector<2x64xf32>
    %99 = vector.shape_cast %98 : vector<2x64xf32> to vector<2x64x1xf32>
    %100 = tpu.reciprocal %99 {approx = true} : vector<2x64x1xf32> -> vector<2x64x1xf32>
    %101 = vector.broadcast %100 : vector<2x64x1xf32> to vector<2x64x64xf32>
    %102 = arith.mulf %97, %101 : vector<2x64x64xf32>
    %103 = arith.truncf %102 : vector<2x64x64xf32> to vector<2x64x64xbf16>
    %104 = vector.extract_strided_slice %41 {offsets = [0, 0, 96], sizes = [2, 64, 32], strides = [1, 1, 1]} : vector<2x64x128xbf16> to vector<2x64x32xbf16>
    "tpu.trace_start"() <{level = 10 : i32, message = "bqk,bkd->bqd"}> : () -> ()
    %cst_32 = arith.constant dense<0.000000e+00> : vector<2x64x32xf32>
    %105 = tpu.matmul %103, %104, %cst_32 {dimension_numbers = #tpu.dot_dimension_numbers<[2], [1], [1], [2], [0, 0, 0, 1, 1, 2], [0], [0]>} : vector<2x64x64xbf16>, vector<2x64x32xbf16>, vector<2x64x32xf32> -> vector<2x64x32xf32>
    "tpu.trace_stop"() : () -> ()
    %106 = tpu.concatenate %57, %73, %89, %105 in 2 : vector<2x64x32xf32>, vector<2x64x32xf32>, vector<2x64x32xf32>, vector<2x64x32xf32> -> vector<2x64x128xf32>
    %107 = vector.shape_cast %106 : vector<2x64x128xf32> to vector<128x128xf32>
    %108 = arith.truncf %107 : vector<128x128xf32> to vector<128x128xbf16>
    %c0_33 = arith.constant 0 : index
    %c0_34 = arith.constant 0 : index
    %109 = vector.load %arg6[%c0_33, %c0_34] : memref<128x128xbf16, #tpu.memory_space<vmem>>, vector<128x128xbf16>
    %cst_35 = arith.constant dense<0.000000e+00> : vector<128x128xf32>
    %110 = tpu.matmul %108, %109, %cst_35 {dimension_numbers = #tpu.dot_dimension_numbers<[1], [0], [0], [1], [0, 0, 1, 1], [], []>} : vector<128x128xbf16>, vector<128x128xbf16>, vector<128x128xf32> -> vector<128x128xf32>
    %111 = arith.addf %2, %110 : vector<128x128xf32>
    %c0_36 = arith.constant 0 : index
    %c0_37 = arith.constant 0 : index
    %112 = vector.load %arg7[%c0_36, %c0_37] : memref<1x128xf32, #tpu.memory_space<vmem>>, vector<1x128xf32>
    %113 = vector.broadcast %112 : vector<1x128xf32> to vector<128x128xf32>
    %114 = arith.addf %111, %113 : vector<128x128xf32>
    %c0_38 = arith.constant 0 : index
    %c0_39 = arith.constant 0 : index
    %115 = vector.load %arg8[%c0_38, %c0_39] : memref<1x128xf32, #tpu.memory_space<vmem>>, vector<1x128xf32>
    %c0_40 = arith.constant 0 : index
    %c0_41 = arith.constant 0 : index
    %116 = vector.load %arg9[%c0_40, %c0_41] : memref<1x128xf32, #tpu.memory_space<vmem>>, vector<1x128xf32>
    %cst_42 = arith.constant dense<0.000000e+00> : vector<128xf32>
    %117 = vector.multi_reduction <add>, %114, %cst_42 [1] : vector<128x128xf32> to vector<128xf32>
    %118 = vector.shape_cast %117 : vector<128xf32> to vector<128x1xf32>
    %cst_43 = arith.constant 1.280000e+02 : f32
    %119 = vector.broadcast %cst_43 : f32 to vector<128x1xf32>
    %120 = arith.divf %118, %119 : vector<128x1xf32>
    %121 = vector.broadcast %120 : vector<128x1xf32> to vector<128x128xf32>
    %122 = arith.subf %114, %121 : vector<128x128xf32>
    %123 = arith.mulf %122, %122 : vector<128x128xf32>
    %cst_44 = arith.constant dense<0.000000e+00> : vector<128xf32>
    %124 = vector.multi_reduction <add>, %123, %cst_44 [1] : vector<128x128xf32> to vector<128xf32>
    %125 = vector.shape_cast %124 : vector<128xf32> to vector<128x1xf32>
    %cst_45 = arith.constant 1.280000e+02 : f32
    %126 = vector.broadcast %cst_45 : f32 to vector<128x1xf32>
    %127 = arith.divf %125, %126 : vector<128x1xf32>
    %128 = vector.broadcast %120 : vector<128x1xf32> to vector<128x128xf32>
    %129 = arith.subf %114, %128 : vector<128x128xf32>
    %cst_46 = arith.constant 9.99999974E-6 : f32
    %130 = vector.broadcast %cst_46 : f32 to vector<128x1xf32>
    %131 = arith.addf %127, %130 : vector<128x1xf32>
    %132 = math.rsqrt %131 : vector<128x1xf32>
    %133 = vector.broadcast %132 : vector<128x1xf32> to vector<128x128xf32>
    %134 = arith.mulf %129, %133 : vector<128x128xf32>
    %135 = vector.broadcast %115 : vector<1x128xf32> to vector<128x128xf32>
    %136 = arith.mulf %134, %135 : vector<128x128xf32>
    %137 = vector.broadcast %116 : vector<1x128xf32> to vector<128x128xf32>
    %138 = arith.addf %136, %137 : vector<128x128xf32>
    %139 = arith.truncf %138 : vector<128x128xf32> to vector<128x128xbf16>
    %c0_47 = arith.constant 0 : index
    %c0_48 = arith.constant 0 : index
    %140 = vector.load %arg10[%c0_47, %c0_48] : memref<128x256xbf16, #tpu.memory_space<vmem>>, vector<128x256xbf16>
    %cst_49 = arith.constant dense<0.000000e+00> : vector<128x256xf32>
    %141 = tpu.matmul %139, %140, %cst_49 {dimension_numbers = #tpu.dot_dimension_numbers<[1], [0], [0], [1], [0, 0, 1, 1], [], []>} : vector<128x128xbf16>, vector<128x256xbf16>, vector<128x256xf32> -> vector<128x256xf32>
    %c0_50 = arith.constant 0 : index
    %c0_51 = arith.constant 0 : index
    %142 = vector.load %arg11[%c0_50, %c0_51] : memref<1x256xf32, #tpu.memory_space<vmem>>, vector<1x256xf32>
    %143 = vector.broadcast %142 : vector<1x256xf32> to vector<128x256xf32>
    %144 = arith.addf %141, %143 : vector<128x256xf32>
    %cst_52 = arith.constant 5.000000e-01 : f32
    %145 = vector.broadcast %cst_52 : f32 to vector<128x256xf32>
    %146 = arith.mulf %145, %144 : vector<128x256xf32>
    %147 = arith.mulf %144, %144 : vector<128x256xf32>
    %148 = arith.mulf %147, %144 : vector<128x256xf32>
    %cst_53 = arith.constant 4.471500e-02 : f32
    %149 = vector.broadcast %cst_53 : f32 to vector<128x256xf32>
    %150 = arith.mulf %149, %148 : vector<128x256xf32>
    %151 = arith.addf %144, %150 : vector<128x256xf32>
    %cst_54 = arith.constant 0.797884583 : f32
    %152 = vector.broadcast %cst_54 : f32 to vector<128x256xf32>
    %153 = arith.mulf %152, %151 : vector<128x256xf32>
    %154 = math.tanh %153 : vector<128x256xf32>
    %cst_55 = arith.constant 1.000000e+00 : f32
    %155 = vector.broadcast %cst_55 : f32 to vector<128x256xf32>
    %156 = arith.addf %155, %154 : vector<128x256xf32>
    %157 = arith.mulf %146, %156 : vector<128x256xf32>
    %158 = arith.truncf %157 : vector<128x256xf32> to vector<128x256xbf16>
    %c0_56 = arith.constant 0 : index
    %c0_57 = arith.constant 0 : index
    %159 = vector.load %arg12[%c0_56, %c0_57] : memref<256x128xbf16, #tpu.memory_space<vmem>>, vector<256x128xbf16>
    %cst_58 = arith.constant dense<0.000000e+00> : vector<128x128xf32>
    %160 = tpu.matmul %158, %159, %cst_58 {dimension_numbers = #tpu.dot_dimension_numbers<[1], [0], [0], [1], [0, 0, 1, 1], [], []>} : vector<128x256xbf16>, vector<256x128xbf16>, vector<128x128xf32> -> vector<128x128xf32>
    %161 = arith.addf %114, %160 : vector<128x128xf32>
    %c0_59 = arith.constant 0 : index
    %c0_60 = arith.constant 0 : index
    %162 = vector.load %arg13[%c0_59, %c0_60] : memref<1x128xf32, #tpu.memory_space<vmem>>, vector<1x128xf32>
    %163 = vector.broadcast %162 : vector<1x128xf32> to vector<128x128xf32>
    %164 = arith.addf %161, %163 : vector<128x128xf32>
    %c0_61 = arith.constant 0 : index
    %c0_62 = arith.constant 0 : index
    %165 = vector.load %arg14[%c0_61, %c0_62] : memref<1x128xf32, #tpu.memory_space<vmem>>, vector<1x128xf32>
    %c0_63 = arith.constant 0 : index
    %c0_64 = arith.constant 0 : index
    %166 = vector.load %arg15[%c0_63, %c0_64] : memref<1x128xf32, #tpu.memory_space<vmem>>, vector<1x128xf32>
    %cst_65 = arith.constant dense<0.000000e+00> : vector<128xf32>
    %167 = vector.multi_reduction <add>, %164, %cst_65 [1] : vector<128x128xf32> to vector<128xf32>
    %168 = vector.shape_cast %167 : vector<128xf32> to vector<128x1xf32>
    %cst_66 = arith.constant 1.280000e+02 : f32
    %169 = vector.broadcast %cst_66 : f32 to vector<128x1xf32>
    %170 = arith.divf %168, %169 : vector<128x1xf32>
    %171 = vector.broadcast %170 : vector<128x1xf32> to vector<128x128xf32>
    %172 = arith.subf %164, %171 : vector<128x128xf32>
    %173 = arith.mulf %172, %172 : vector<128x128xf32>
    %cst_67 = arith.constant dense<0.000000e+00> : vector<128xf32>
    %174 = vector.multi_reduction <add>, %173, %cst_67 [1] : vector<128x128xf32> to vector<128xf32>
    %175 = vector.shape_cast %174 : vector<128xf32> to vector<128x1xf32>
    %cst_68 = arith.constant 1.280000e+02 : f32
    %176 = vector.broadcast %cst_68 : f32 to vector<128x1xf32>
    %177 = arith.divf %175, %176 : vector<128x1xf32>
    %178 = vector.broadcast %170 : vector<128x1xf32> to vector<128x128xf32>
    %179 = arith.subf %164, %178 : vector<128x128xf32>
    %cst_69 = arith.constant 9.99999974E-6 : f32
    %180 = vector.broadcast %cst_69 : f32 to vector<128x1xf32>
    %181 = arith.addf %177, %180 : vector<128x1xf32>
    %182 = math.rsqrt %181 : vector<128x1xf32>
    %183 = vector.broadcast %182 : vector<128x1xf32> to vector<128x128xf32>
    %184 = arith.mulf %179, %183 : vector<128x128xf32>
    %185 = vector.broadcast %165 : vector<1x128xf32> to vector<128x128xf32>
    %186 = arith.mulf %184, %185 : vector<128x128xf32>
    %187 = vector.broadcast %166 : vector<1x128xf32> to vector<128x128xf32>
    %188 = arith.addf %186, %187 : vector<128x128xf32>
    %189 = vector.shape_cast %188 : vector<128x128xf32> to vector<2x64x128xf32>
    %c0_70 = arith.constant 0 : index
    %c0_71 = arith.constant 0 : index
    %c0_72 = arith.constant 0 : index
    %190 = vector.load %arg16[%c0_70, %c0_71, %c0_72] : memref<2x64x128xf32, #tpu.memory_space<vmem>>, vector<2x64x128xf32>
    tpu.vector_store %arg16[%c0_70, %c0_71, %c0_72], %189 {strides = array<i32>} : memref<2x64x128xf32, #tpu.memory_space<vmem>>, vector<2x64x128xf32>,
    return
  }
  func.func @transform_0(%arg0: i32) -> (i32, i32, i32) {
    %c0_i32 = arith.constant 0 : i32
    %c0_i32_0 = arith.constant 0 : i32
    %c0_i32_1 = arith.constant 0 : i32
    return %arg0, %c0_i32, %c0_i32_0 : i32, i32, i32
  }
  func.func @transform_1(%arg0: i32) -> (i32, i32) {
    %c0_i32 = arith.constant 0 : i32
    %c0_i32_0 = arith.constant 0 : i32
    %c0_i32_1 = arith.constant 0 : i32
    return %c0_i32, %c0_i32_0 : i32, i32
  }
  func.func @transform_2(%arg0: i32) -> (i32, i32) {
    %c0_i32 = arith.constant 0 : i32
    %c0_i32_0 = arith.constant 0 : i32
    %c0_i32_1 = arith.constant 0 : i32
    return %c0_i32, %c0_i32_0 : i32, i32
  }
  func.func @transform_3(%arg0: i32) -> (i32, i32) {
    %c0_i32 = arith.constant 0 : i32
    %c0_i32_0 = arith.constant 0 : i32
    %c0_i32_1 = arith.constant 0 : i32
    return %c0_i32, %c0_i32_0 : i32, i32
  }
  func.func @transform_4(%arg0: i32) -> (i32, i32) {
    %c0_i32 = arith.constant 0 : i32
    %c0_i32_0 = arith.constant 0 : i32
    %c0_i32_1 = arith.constant 0 : i32
    return %c0_i32, %c0_i32_0 : i32, i32
  }
  func.func @transform_5(%arg0: i32) -> (i32, i32) {
    %c0_i32 = arith.constant 0 : i32
    %c0_i32_0 = arith.constant 0 : i32
    %c0_i32_1 = arith.constant 0 : i32
    return %c0_i32, %c0_i32_0 : i32, i32
  }
  func.func @transform_6(%arg0: i32) -> (i32, i32) {
    %c0_i32 = arith.constant 0 : i32
    %c0_i32_0 = arith.constant 0 : i32
    %c0_i32_1 = arith.constant 0 : i32
    return %c0_i32, %c0_i32_0 : i32, i32
  }
  func.func @transform_7(%arg0: i32) -> (i32, i32) {
    %c0_i32 = arith.constant 0 : i32
    %c0_i32_0 = arith.constant 0 : i32
    %c0_i32_1 = arith.constant 0 : i32
    return %c0_i32, %c0_i32_0 : i32, i32
  }
  func.func @transform_8(%arg0: i32) -> (i32, i32) {
    %c0_i32 = arith.constant 0 : i32
    %c0_i32_0 = arith.constant 0 : i32
    %c0_i32_1 = arith.constant 0 : i32
    return %c0_i32, %c0_i32_0 : i32, i32
  }
  func.func @transform_9(%arg0: i32) -> (i32, i32) {
    %c0_i32 = arith.constant 0 : i32
    %c0_i32_0 = arith.constant 0 : i32
    %c0_i32_1 = arith.constant 0 : i32
    return %c0_i32, %c0_i32_0 : i32, i32
  }
  func.func @transform_10(%arg0: i32) -> (i32, i32) {
    %c0_i32 = arith.constant 0 : i32
    %c0_i32_0 = arith.constant 0 : i32
    %c0_i32_1 = arith.constant 0 : i32
    return %c0_i32, %c0_i32_0 : i32, i32
  }
  func.func @transform_11(%arg0: i32) -> (i32, i32) {
    %c0_i32 = arith.constant 0 : i32
    %c0_i32_0 = arith.constant 0 : i32
    %c0_i32_1 = arith.constant 0 : i32
    return %c0_i32, %c0_i32_0 : i32, i32
  }
  func.func @transform_12(%arg0: i32) -> (i32, i32) {
    %c0_i32 = arith.constant 0 : i32
    %c0_i32_0 = arith.constant 0 : i32
    %c0_i32_1 = arith.constant 0 : i32
    return %c0_i32, %c0_i32_0 : i32, i32
  }
  func.func @transform_13(%arg0: i32) -> (i32, i32) {
    %c0_i32 = arith.constant 0 : i32
    %c0_i32_0 = arith.constant 0 : i32
    %c0_i32_1 = arith.constant 0 : i32
    return %c0_i32, %c0_i32_0 : i32, i32
  }
  func.func @transform_14(%arg0: i32) -> (i32, i32) {
    %c0_i32 = arith.constant 0 : i32
    %c0_i32_0 = arith.constant 0 : i32
    %c0_i32_1 = arith.constant 0 : i32
    return %c0_i32, %c0_i32_0 : i32, i32
  }
  func.func @transform_15(%arg0: i32) -> (i32, i32, i32) {
    %c0_i32 = arith.constant 0 : i32
    %c0_i32_0 = arith.constant 0 : i32
    %c0_i32_1 = arith.constant 0 : i32
    return %arg0, %c0_i32, %c0_i32_0 : i32, i32, i32
  }
}

</mosaic_0001>

<bundles_post_ra>
// kernel: transformer_fwd.2
= control target key start
LH: loop header
LB: loop body
LE: loop exit
PB: predicated region body
PF: predicated region fallthrough
CT: control target
= control target key end

     0   :  { %20 = vsyncpa [#allocation3], 0  ;;  %s8934_s0 = inlined_call_operand.vmem [shape: f32[8,64,128], index: 0, kind: input, shape index: {}]   ;;  %s8935_s1 = inlined_call_operand.vmem [shape: f32[1,128], index: 1, kind: input, shape index: {}, may-alias: {1,7,13}]   ;;  %s8936_s2 = inlined_call_operand.vmem [shape: f32[1,128], index: 2, kind: input, shape index: {}, may-alias: {2,8,14}]   ;;  %s8937_s3 = inlined_call_operand.hbm [shape: bf16[128,128], index: 3, kind: input, shape index: {}]   ;;  %s8938_s4 = inlined_call_operand.vmem [shape: bf16[128,256], index: 4, kind: input, shape index: {}]   ;;  %s8939_s5 = inlined_call_operand.vmem [shape: bf16[128,128], index: 5, kind: input, shape index: {}]   ;;  %s8940_s6 = inlined_call_operand.vmem [shape: f32[1,128], index: 6, kind: input, shape index: {}]   ;;  %s8941_s7 = inlined_call_operand.vmem [shape: f32[1,128], index: 7, kind: input, shape index: {}, may-alias: {1,7,13}]   ;;  %s8942_s8 = inlined_call_operand.vmem [shape: f32[1,128], index: 8, kind: input, shape index: {}, may-alias: {2,8,14}]   ;;  %s8943_s9 = inlined_call_operand.vmem [shape: bf16[128,256], index: 9, kind: input, shape index: {}]   ;;  %s8944_s10 = inlined_call_operand.vmem [shape: f32[1,256], index: 10, kind: input, shape index: {}]   ;;  %s8945_s11 = inlined_call_operand.hbm [shape: bf16[256,128], index: 11, kind: input, shape index: {}]   ;;  %s8946_s12 = inlined_call_operand.vmem [shape: f32[1,128], index: 12, kind: input, shape index: {}]   ;;  %s8947_s13 = inlined_call_operand.vmem [shape: f32[1,128], index: 13, kind: input, shape index: {}, may-alias: {1,7,13}]   ;;  %s8948_s14 = inlined_call_operand.vmem [shape: f32[1,128], index: 14, kind: input, shape index: {}, may-alias: {2,8,14}]   ;;  %s8949_s15 = inlined_call_operand.vmem [shape: bf16[8,64,128], index: 15, kind: output, shape index: {}]  }
   0x1   :  { %21 = vsyncpa [#allocation5], 0  ;;  %s6696_s18 = smov 0  }
   0x2 LB: > { %s8953_s13 = sadd.s32 4294967295, %s6606_s18   ;;  %p5079_p0 = scmp.ge.s32.totalorder %s6606_s18, 1  ;;  %s6606_s18 = sphi %s6696_s18, %s27_s18  }
   0x3   : > { %p378_p1 = scmp.lt.s32.totalorder %s6606_s18, 5  ;;  %s6608_s14 = smov [#allocation2]  }
   0x4   : > { %s396_s19 = sshll.u32 %s6608_s14, 4  ;;  %p6710_p3 = scmp.eq.s32.totalorder %s8953_s13, 0  ;;  %s397_s19 = int_to_ptr.vmem [resolvable:$true] %s396_s19 }
   0x5   : > { %p6704_p2 = pnand %p5079_p0, %p378_p1  ;;  %s6609_s22 = smov [#allocation4]  }
   0x6   : > { %s8959_s21 = scalar_select %p6710_p3, 1, 0 }
   0x7   : > { %s8958_s20 = scalar_select %p6704_p2, 1, 0 }
   0x8   : > { %p5909_p4 = pneg %p6704_p2  ;;  %s430_s23 = sshll.u32 %s6609_s22, 4  ;;  %s6722_s23 = int_to_ptr.vmem [resolvable:$true] %s430_s23 }
   0x9   : > { %s6536_s27 = scalar_lea.hbm %s8937_s3, 1024 }
   0xa   : > { %p6718_p5 = pnand %p6710_p3, %p5909_p4  ;;  %p6537_p6 = scmp.ne.s32.totalorder %s8937_s3, %s6536_s27 }
   0xb   : > { %p6543_p10 = scmp.lt.u32.totalorder %s6536_s27, %s8937_s3 }
   0xc   : > { %p6538_p7 = pneg %p6718_p5 }
   0xe   : > { %p6539_p8 = pnand %p6538_p7, %p6537_p6 }
  0x10   : > { %p6540_p9 = pneg %p6539_p8 }
  0x12   : > { %p6545_p11 = pnand %p6543_p10, %p6540_p9 }
  0x14   : > { %6548 = shalt.err (!%p6545_p11)
}
  0x15   : > { %s6549_s17 = scalar_lea.vmem %s397_s19, 1024  ;;  %p6557_p1 = scmp.lt.s32.totalorder %s397_s19, %s397_s19 }
  0x16   : > { %p6550_p12 = scmp.ne.s32.totalorder %s397_s19, %s6549_s17  ;;  %p6558_p4 = scmp.lt.s32.totalorder %s6549_s17, %s6549_s17 }
  0x18   : > { %p6552_p13 = pnand %p6550_p12, %p6538_p7  ;;  %p6559_p3 = por %p6558_p4, %p6557_p1 }
  0x1a   : > { %p6553_p0 = pneg %p6552_p13 }
  0x1c   : > { %p6560_p2 = pnand %p6559_p3, %p6553_p0 }
  0x1e   : > { %6563 = shalt.err (!%p6560_p2)
}
  0x1f   : > { %s6610_s14 = smov 64   ;;  %s6611_s22 = smov 4  }
  0x20   : > { %5912 = dma.hbm_to_vmem [thread:$0]  (!%p6718_p5), %s8937_s3, 1024, %s397_s19, [#allocation3], %s6610_s14, %s6610_s14, %s6611_s22  }
  0x21   : > { %s6564_s29 = scalar_lea.hbm %s8945_s11, 2048 }
  0x22   : > { %p6565_p6 = scmp.ne.s32.totalorder %s8945_s11, %s6564_s29  ;;  %p6571_p8 = scmp.lt.u32.totalorder %s6564_s29, %s8945_s11 }
  0x24   : > { %p6567_p2 = pnand %p6565_p6, %p6538_p7 }
  0x26   : > { %p6568_p3 = pneg %p6567_p2 }
  0x28   : > { %p6573_p9 = pnand %p6571_p8, %p6568_p3 }
  0x2a   : > { %6576 = shalt.err (!%p6573_p9)
}
  0x2b   : > { %s6577_s19 = scalar_lea.vmem %s6722_s23, 2048  ;;  %p6585_p13 = scmp.lt.s32.totalorder %s6722_s23, %s6722_s23 }
  0x2c   : > { %p6578_p10 = scmp.ne.s32.totalorder %s6722_s23, %s6577_s19  ;;  %p6586_p0 = scmp.lt.s32.totalorder %s6577_s19, %s6577_s19 }
  0x2e   : > { %p6580_p11 = pnand %p6578_p10, %p6538_p7  ;;  %p6587_p1 = por %p6586_p0, %p6585_p13 }
  0x30   : > { %p6581_p12 = pneg %p6580_p11 }
  0x32   : > { %p6588_p4 = pnand %p6587_p1, %p6581_p12 }
  0x34   : > { %6591 = shalt.err (!%p6588_p4)
}
  0x35   : > { %5915 = dma.hbm_to_vmem [thread:$0]  (!%p6718_p5), %s8945_s11, 2048, %s6722_s23, [#allocation5], %s6610_s14, %s6610_s14, %s6611_s22  }
  0x36   : > { %p8961_p6 = scmp.ne.s32.totalorder %s8958_s20, 0 }
  0x38   : > { %465 = sbr.rel (%p8961_p6) target bundleno = 4436 (0x1154), region = 80 }
  0x3f   : > { %p8962_p2 = scmp.ne.s32.totalorder %s8959_s21, 0 }
  0x41   : > { %6597 = dma.done.wait (%p8962_p2), [#allocation3], 1024  }
  0x42   : > { %6599 = vsyncadd (%p8962_p2), [#allocation3], 4294966272 }
  0x43   : > { %6601 = dma.done.wait (%p8962_p2), [#allocation5], 2048  }
  0x44   : > { %6603 = vsyncadd (%p8962_p2), [#allocation5], 4294965248  ;;  %s8963_s24 = sadd.s32 4294967295, %s6606_s18   ;;  %v6056_v16 = vld [vmem:[%s8938_s4 + $0x4] ss:$8 sps:$4 sm:$0xff]   ;;  %vm1191_vm0 = vcmask 261120  }
  0x45   : > { %s5086_s26 = sshll.u32 %s8963_s24, 1  ;;  %v6058_v17 = vld [vmem:[%s8938_s4] ss:$8 sps:$4 sm:$0xff]   ;;  %v6060_v19 = vld [vmem:[%s8938_s4 + $0x14] ss:$8 sps:$4 sm:$0xff]   ;;  %1054 = vmatprep.subr.bf16.mxu1 %v6056_v16  ;;  %s6613_s13 = smov 96  }
  0x46   : > { %p520_p7 = scmp.lt.s32.totalorder %s5086_s26, 7  ;;  %v6059_v18 = vld [vmem:[#allocation2] sm:$0xff]   ;;  %1055 = vmatpush1.bf16.msra.mxu1 %v6058_v17  ;;  %v6062_v58 = vld [vmem:[%s8938_s4 + $0x10] ss:$8 sps:$4 sm:$0xff]   ;;  %vm1370_vm1 = vcmask 523264   ;;  %s6614_s25 = smov 64  }
  0x47   : > { %5533 = vmatprep.subr.bf16.mxu0 %v6059_v18  ;;  %1056 = vmatprep.subr.bf16.mxu1 %v6060_v19  ;;  %v6068_v19 = vld [vmem:[%s8938_s4 + $0x34] ss:$8 sps:$4 sm:$0xff]   ;;  %s6615_s24 = smov 32   ;;  %vm3673_vm2 = vcmask 785408  }
  0x48   : > { %s9018_s26 = smov (!%p520_p7, %s5086_s26), 7  ;;  %5534 = vmatpush3.bf16.msra.mxu0 %v6059_v18  ;;  %v6067_v18 = vld [vmem:[#allocation2 + $0x10] sm:$0xff]  }
  0x49   : > { %s5244_s20 = sshll.u32 %s9018_s26, 6  ;;  %s5245_s14 = sshll.u32 %s9018_s26, 5 }
  0x4a   : > { %s6789_s22 = scalar_lea.vmem %s8934_s0, %s5244_s20  ;;  %1057 = vmatpush1.bf16.msra.mxu1 %v6062_v58 }
  0x4b   : > { %v534_v0 = vld [vmem:[%s6789_s22] sm:$0xff]  ;;  %v536_v1 = vld [vmem:[%s6789_s22 + $0x10] sm:$0xff]  ;;  %v535_v2 = vld [vmem:[%s6789_s22 + $0x8] sm:$0xff] }
  0x4c   : > { %552 = vadd.xlane.f32.xlu0 %v534_v0  ;;  %556 = vadd.xlane.f32.xlu1 %v536_v1  ;;  %v537_v3 = vld [vmem:[%s6789_s22 + $0x18] sm:$0xff]  ;;  %v538_v4 = vld [vmem:[%s6789_s22 + $0x20] sm:$0xff]  ;;  %v539_v5 = vld [vmem:[%s6789_s22 + $0x28] sm:$0xff] }
  0x4d   : > { %v6798_v6 = vld [vmem:[%s6789_s22 + $0x30] sm:$0xff]  ;;  %v6801_v7 = vld [vmem:[%s6789_s22 + $0x38] sm:$0xff]  ;;  %v6804_v8 = vld [vmem:[%s6789_s22 + $0x40] sm:$0xff] }
  0x4e   : > { %v6807_v9 = vld [vmem:[%s6789_s22 + $0x48] sm:$0xff]  ;;  %v6812_v10 = vld [vmem:[%s6789_s22 + $0x50] sm:$0xff]  ;;  %v6815_v11 = vld [vmem:[%s6789_s22 + $0x58] sm:$0xff] }
  0x4f   : > { %v6820_v12 = vld [vmem:[%s6789_s22 + $0x60] sm:$0xff]  ;;  %v6823_v13 = vld [vmem:[%s6789_s22 + $0x68] sm:$0xff]  ;;  %v6828_v14 = vld [vmem:[%s6789_s22 + $0x70] sm:$0xff] }
  0x50   : > { %554 = vadd.xlane.f32.xlu0 %v535_v2  ;;  %558 = vadd.xlane.f32.xlu1 %v537_v3  ;;  %v6831_v15 = vld [vmem:[%s6789_s22 + $0x78] sm:$0xff] }
  0x54   : > { %560 = vadd.xlane.f32.xlu0 %v538_v4  ;;  %562 = vadd.xlane.f32.xlu1 %v539_v5 }
  0x58   : > { %564 = vadd.xlane.f32.xlu0 %v6798_v6  ;;  %566 = vadd.xlane.f32.xlu1 %v6801_v7 }
  0x5c   : > { %568 = vadd.xlane.f32.xlu0 %v6804_v8  ;;  %570 = vadd.xlane.f32.xlu1 %v6807_v9 }
  0x60   : > { %572 = vadd.xlane.f32.xlu0 %v6812_v10  ;;  %574 = vadd.xlane.f32.xlu1 %v6815_v11 }
  0x64   : > { %576 = vadd.xlane.f32.xlu0 %v6820_v12  ;;  %578 = vadd.xlane.f32.xlu1 %v6823_v13 }
  0x68   : > { %580 = vadd.xlane.f32.xlu0 %v6828_v14  ;;  %582 = vadd.xlane.f32.xlu1 %v6831_v15 }
  0xd9   : > { %v553_v20 = vpop.xlane.xlu0 %552  ;;  %v557_v21 = vpop.xlane.xlu1 %556 }
  0xda   : > { %v585_v22 = vmul.f32 0.0078125, %v553_v20  ;;  %v587_v23 = vmul.f32 0.0078125, %v557_v21 }
  0xdc   : > { %v6846_v24 = vsub.f32 %v534_v0, %v585_v22  ;;  %v6848_v25 = vsub.f32 %v536_v1, %v587_v23  ;;  %v6063_v0 = vld [vmem:[#allocation2 + $0x8] sm:$0xff]   ;;  %v6070_v22 = vld [vmem:[%s8938_s4 + $0x30] ss:$8 sps:$4 sm:$0xff]  }
  0xdd   : > { %v555_v26 = vpop.xlane.xlu0 %554  ;;  %v559_v27 = vpop.xlane.xlu1 %558  ;;  %v6064_v1 = vld [vmem:[%s8938_s4 + $0x24] ss:$8 sps:$4 sm:$0xff]   ;;  %5535 = vmatprep.subr.bf16.mxu0 %v6063_v0 }
  0xde   : > { %v586_v28 = vmul.f32 0.0078125, %v555_v26  ;;  %v617_v29 = vmul.f32 %v6846_v24, %v6846_v24  ;;  %v588_v30 = vmul.f32 0.0078125, %v559_v27  ;;  %v619_v31 = vmul.f32 %v6848_v25, %v6848_v25  ;;  %1058 = vmatprep.subr.bf16.mxu1 %v6064_v1  ;;  %5536 = vmatpush3.bf16.msra.mxu0 %v6063_v0 }
  0xdf   : > { %5537 = vmatprep.subr.bf16.mxu0 %v6067_v18 }
  0xe0   : > { %633 = vadd.xlane.f32.xlu0 %v617_v29  ;;  %v6854_v32 = vsub.f32 %v535_v2, %v586_v28  ;;  %v6856_v33 = vsub.f32 %v537_v3, %v588_v30  ;;  %v6071_v29 = vld [vmem:[#allocation2 + $0x18] sm:$0xff]   ;;  %v6072_v30 = vld [vmem:[%s8938_s4 + $0x44] ss:$8 sps:$4 sm:$0xff]  }
  0xe1   : > { %v561_v34 = vpop.xlane.xlu0 %560  ;;  %v563_v35 = vpop.xlane.xlu1 %562 }
  0xe2   : > { %v589_v36 = vmul.f32 0.0078125, %v561_v34  ;;  %v618_v37 = vmul.f32 %v6854_v32, %v6854_v32  ;;  %v590_v38 = vmul.f32 0.0078125, %v563_v35  ;;  %v620_v39 = vmul.f32 %v6856_v33, %v6856_v33  ;;  %5538 = vmatpush3.bf16.msra.mxu0 %v6067_v18  ;;  %v6076_v35 = vld [vmem:[%s8938_s4 + $0x54] ss:$8 sps:$4 sm:$0xff]  }
  0xe3   : > { %5539 = vmatprep.subr.bf16.mxu0 %v6071_v29 }
  0xe4   : > { %637 = vadd.xlane.f32.xlu0 %v619_v31  ;;  %635 = vadd.xlane.f32.xlu1 %v618_v37  ;;  %v6862_v40 = vsub.f32 %v538_v4, %v589_v36  ;;  %v6864_v41 = vsub.f32 %v539_v5, %v590_v38  ;;  %v6074_v31 = vld [vmem:[%s8938_s4 + $0x40] ss:$8 sps:$4 sm:$0xff]   ;;  %v6078_v36 = vld [vmem:[%s8938_s4 + $0x50] ss:$8 sps:$4 sm:$0xff]   ;;  %v6080_v38 = vld [vmem:[%s8938_s4 + $0x64] ss:$8 sps:$4 sm:$0xff]  }
  0xe5   : > { %v565_v42 = vpop.xlane.xlu0 %564  ;;  %v567_v43 = vpop.xlane.xlu1 %566  ;;  %v6079_v37 = vld [vmem:[#allocation2 + $0x28] sm:$0xff]  }
  0xe6   : > { %v591_v44 = vmul.f32 0.0078125, %v565_v42  ;;  %v621_v45 = vmul.f32 %v6862_v40, %v6862_v40  ;;  %v592_v46 = vmul.f32 0.0078125, %v567_v43  ;;  %v622_v47 = vmul.f32 %v6864_v41, %v6864_v41  ;;  %5540 = vmatpush3.bf16.msra.mxu0 %v6071_v29  ;;  %v6083_v42 = vld [vmem:[#allocation2 + $0x30] sm:$0xff]  }
  0xe7   : > { %v6084_v43 = vld [vmem:[%s8938_s4 + $0x74] ss:$8 sps:$4 sm:$0xff]  }
  0xe8   : > { %639 = vadd.xlane.f32.xlu1 %v620_v39  ;;  %641 = vadd.xlane.f32.xlu0 %v621_v45  ;;  %v6871_v48 = vsub.f32 %v6798_v6, %v591_v44  ;;  %v6874_v49 = vsub.f32 %v6801_v7, %v592_v46  ;;  %v6066_v7 = vld [vmem:[%s8938_s4 + $0x20] ss:$8 sps:$4 sm:$0xff]   ;;  %v6086_v44 = vld [vmem:[%s8938_s4 + $0x70] ss:$8 sps:$4 sm:$0xff]   ;;  %v8954_v46 = vmov 0  }
  0xe9   : > { %v569_v50 = vpop.xlane.xlu0 %568  ;;  %v571_v51 = vpop.xlane.xlu1 %570  ;;  %1059 = vmatpush1.bf16.msra.mxu1 %v6066_v7  ;;  %v6082_v39 = vld [vmem:[%s8938_s4 + $0x60] ss:$8 sps:$4 sm:$0xff]   ;;  %v6087_v45 = vld [vmem:[#allocation2 + $0x38] sm:$0xff]   ;;  %1086 = vmatprep.mubr.bf16.mxu1 %v8954_v46 }
  0xea   : > { %v593_v52 = vmul.f32 0.0078125, %v569_v50  ;;  %v623_v53 = vmul.f32 %v6871_v48, %v6871_v48  ;;  %v594_v54 = vmul.f32 0.0078125, %v571_v51  ;;  %v624_v55 = vmul.f32 %v6874_v49, %v6874_v49  ;;  %1060 = vmatprep.subr.bf16.mxu1 %v6068_v19 }
  0xec   : > { %643 = vadd.xlane.f32.xlu1 %v622_v47  ;;  %645 = vadd.xlane.f32.xlu0 %v623_v53  ;;  %v6881_v56 = vsub.f32 %v6804_v8, %v593_v52  ;;  %v6884_v57 = vsub.f32 %v6807_v9, %v594_v54 }
  0xed   : > { %v573_v59 = vpop.xlane.xlu0 %572  ;;  %v575_v60 = vpop.xlane.xlu1 %574  ;;  %1061 = vmatpush1.bf16.msra.mxu1 %v6070_v22  ;;  %v6964_v22 = vld [vmem:[%s8935_s1] ss:$0 sm:$0xff] }
  0xee   : > { %v595_v61 = vmul.f32 0.0078125, %v573_v59  ;;  %v625_v62 = vmul.f32 %v6881_v56, %v6881_v56  ;;  %v596_v63 = vmul.f32 0.0078125, %v575_v60  ;;  %v626_v2 = vmul.f32 %v6884_v57, %v6884_v57  ;;  %1062 = vmatprep.subr.bf16.mxu1 %v6072_v30 }
  0xf0   : > { %647 = vadd.xlane.f32.xlu1 %v624_v55  ;;  %649 = vadd.xlane.f32.xlu0 %v625_v62  ;;  %v6897_v3 = vsub.f32 %v6812_v10, %v595_v61  ;;  %v6900_v4 = vsub.f32 %v6815_v11, %v596_v63 }
  0xf1   : > { %v577_v5 = vpop.xlane.xlu0 %576  ;;  %v579_v6 = vpop.xlane.xlu1 %578  ;;  %1063 = vmatpush1.bf16.msra.mxu1 %v6074_v31 }
  0xf2   : > { %v597_v8 = vmul.f32 0.0078125, %v577_v5  ;;  %v627_v9 = vmul.f32 %v6897_v3, %v6897_v3  ;;  %v598_v16 = vmul.f32 0.0078125, %v579_v6  ;;  %v628_v10 = vmul.f32 %v6900_v4, %v6900_v4  ;;  %1064 = vmatprep.subr.bf16.mxu1 %v6076_v35 }
  0xf4   : > { %651 = vadd.xlane.f32.xlu1 %v626_v2  ;;  %653 = vadd.xlane.f32.xlu0 %v627_v9  ;;  %v6910_v11 = vsub.f32 %v6820_v12, %v597_v8  ;;  %v6913_v17 = vsub.f32 %v6823_v13, %v598_v16 }
  0xf5   : > { %v581_v20 = vpop.xlane.xlu0 %580  ;;  %v583_v21 = vpop.xlane.xlu1 %582  ;;  %1065 = vmatpush1.bf16.msra.mxu1 %v6078_v36 }
  0xf6   : > { %v599_v23 = vmul.f32 0.0078125, %v581_v20  ;;  %v629_v26 = vmul.f32 %v6910_v11, %v6910_v11  ;;  %v600_v12 = vmul.f32 0.0078125, %v583_v21  ;;  %v630_v13 = vmul.f32 %v6913_v17, %v6913_v17  ;;  %1066 = vmatprep.subr.bf16.mxu1 %v6080_v38 }
  0xf8   : > { %655 = vadd.xlane.f32.xlu1 %v628_v10  ;;  %657 = vadd.xlane.f32.xlu0 %v629_v26  ;;  %v6926_v27 = vsub.f32 %v6828_v14, %v599_v23  ;;  %v6929_v28 = vsub.f32 %v6831_v15, %v600_v12  ;;  %v6075_v15 = vld [vmem:[#allocation2 + $0x20] sm:$0xff]  }
  0xf9   : > { %5541 = vmatprep.subr.bf16.mxu0 %v6075_v15  ;;  %1067 = vmatpush1.bf16.msra.mxu1 %v6082_v39 }
  0xfa   : > { %v631_v34 = vmul.f32 %v6926_v27, %v6926_v27  ;;  %v632_v14 = vmul.f32 %v6929_v28, %v6929_v28  ;;  %5542 = vmatpush3.bf16.msra.mxu0 %v6075_v15  ;;  %1068 = vmatprep.subr.bf16.mxu1 %v6084_v43  ;;  %v6971_v15 = vld [vmem:[%s8936_s2] ss:$0 sm:$0xff] }
  0xfb   : > { %5543 = vmatprep.subr.bf16.mxu0 %v6079_v37 }
  0xfc   : > { %659 = vadd.xlane.f32.xlu1 %v630_v13  ;;  %661 = vadd.xlane.f32.xlu0 %v631_v34 }
  0xfd   : > { %1069 = vmatpush1.bf16.msra.mxu1 %v6086_v44 }
  0xfe   : > { %5544 = vmatpush3.bf16.msra.mxu0 %v6079_v37 }
  0xff   : > { %5545 = vmatprep.subr.bf16.mxu0 %v6083_v42 }
 0x100   : > { %663 = vadd.xlane.f32.xlu1 %v632_v14 }
 0x102   : > { %5546 = vmatpush3.bf16.msra.mxu0 %v6083_v42 }
 0x103   : > { %5547 = vmatprep.subr.bf16.mxu0 %v6087_v45 }
 0x106   : > { %5548 = vmatpush3.bf16.msra.mxu0 %v6087_v45 }
 0x16d   : > { %v634_v47 = vpop.xlane.xlu0 %633 }
 0x16e   : > { %v665_v50 = vmul.f32 0.0078125, %v634_v47 }
 0x170   : > { %v681_v51 = vadd.f32 1e-05, %v665_v50 }
 0x171   : > { %v636_v52 = vpop.xlane.xlu1 %635  ;;  %v638_v53 = vpop.xlane.xlu0 %637 }
 0x172   : > { %6136 = vrsqrt.f32 %v681_v51  ;;  %v666_v54 = vmul.f32 0.0078125, %v636_v52  ;;  %v667_v55 = vmul.f32 0.0078125, %v638_v53 }
 0x174   : > { %v682_v58 = vadd.f32 1e-05, %v666_v54  ;;  %v683_v59 = vadd.f32 1e-05, %v667_v55 }
 0x175   : > { %v640_v60 = vpop.xlane.xlu1 %639  ;;  %v642_v61 = vpop.xlane.xlu0 %641 }
 0x176   : > { %6138 = vrsqrt.f32 %v682_v58  ;;  %v668_v62 = vmul.f32 0.0078125, %v640_v60  ;;  %v669_v63 = vmul.f32 0.0078125, %v642_v61 }
 0x177   : > { %6140 = vrsqrt.f32 %v683_v59 }
 0x178   : > { %v684_v0 = vadd.f32 1e-05, %v668_v62  ;;  %v685_v1 = vadd.f32 1e-05, %v669_v63 }
 0x179   : > { %v644_v2 = vpop.xlane.xlu1 %643  ;;  %v646_v5 = vpop.xlane.xlu0 %645 }
 0x17a   : > { %6142 = vrsqrt.f32 %v684_v0  ;;  %v670_v6 = vmul.f32 0.0078125, %v644_v2  ;;  %v671_v7 = vmul.f32 0.0078125, %v646_v5 }
 0x17b   : > { %6144 = vrsqrt.f32 %v685_v1 }
 0x17c   : > { %v6137_v8 = vpop.eup %6136  ;;  %v686_v9 = vadd.f32 1e-05, %v670_v6  ;;  %v687_v16 = vadd.f32 1e-05, %v671_v7 }
 0x17d   : > { %v648_v10 = vpop.xlane.xlu1 %647  ;;  %v650_v18 = vpop.xlane.xlu0 %649  ;;  %v713_v19 = vmul.f32 %v6137_v8, %v6846_v24 }
 0x17e   : > { %6146 = vrsqrt.f32 %v686_v9  ;;  %v672_v20 = vmul.f32 0.0078125, %v648_v10  ;;  %v673_v21 = vmul.f32 0.0078125, %v650_v18 }
 0x17f   : > { %6148 = vrsqrt.f32 %v687_v16  ;;  %v735_v34 = vmul.f32 %v6964_v22, %v713_v19 }
 0x180   : > { %v6139_v23 = vpop.eup %6138  ;;  %v688_v26 = vadd.f32 1e-05, %v672_v20  ;;  %v689_v12 = vadd.f32 1e-05, %v673_v21 }
 0x181   : > { %v6141_v13 = vpop.eup %6140  ;;  %v652_v29 = vpop.xlane.xlu1 %651  ;;  %v714_v31 = vmul.f32 %v6139_v23, %v6854_v32  ;;  %v757_v45 = vadd.f32 %v6971_v15, %v735_v34 }
 0x182   : > { %v654_v30 = vpop.xlane.xlu0 %653  ;;  %6150 = vrsqrt.f32 %v688_v26  ;;  %v674_v24 = vmul.f32 0.0078125, %v652_v29  ;;  %v715_v35 = vmul.f32 %v6141_v13, %v6848_v25 }
 0x183   : > { %v675_v14 = vmul.f32 0.0078125, %v654_v30  ;;  %6152 = vrsqrt.f32 %v689_v12  ;;  %v736_v36 = vmul.f32 %v6964_v22, %v714_v31 }
 0x184   : > { %v6143_v37 = vpop.eup %6142  ;;  %v690_v38 = vadd.f32 1e-05, %v674_v24  ;;  %v737_v32 = vmul.f32 %v6964_v22, %v715_v35 }
 0x185   : > { %v691_v39 = vadd.f32 1e-05, %v675_v14  ;;  %v6145_v42 = vpop.eup %6144  ;;  %v656_v43 = vpop.xlane.xlu1 %655  ;;  %v758_v47 = vadd.f32 %v6971_v15, %v736_v36  ;;  %v716_v50 = vmul.f32 %v6143_v37, %v6856_v33 }
 0x186   : > { %v658_v44 = vpop.xlane.xlu0 %657  ;;  %6154 = vrsqrt.f32 %v690_v38  ;;  %v676_v51 = vmul.f32 0.0078125, %v656_v43  ;;  %v717_v54 = vmul.f32 %v6145_v42, %v6862_v40  ;;  %v759_v60 = vadd.f32 %v6971_v15, %v737_v32 }
 0x187   : > { %v677_v25 = vmul.f32 0.0078125, %v658_v44  ;;  %6156 = vrsqrt.f32 %v691_v39  ;;  %v773_v52 = vpack.c.bf16 %v758_v47, %v757_v45  ;;  %v738_v53 = vmul.f32 %v6964_v22, %v716_v50 }
 0x188   : > { %v6147_v55 = vpop.eup %6146  ;;  %v692_v58 = vadd.f32 1e-05, %v676_v51  ;;  %v739_v1 = vmul.f32 %v6964_v22, %v717_v54 }
 0x189   : > { %v693_v59 = vadd.f32 1e-05, %v677_v25  ;;  %v6149_v61 = vpop.eup %6148  ;;  %v660_v62 = vpop.xlane.xlu1 %659  ;;  %5549 = vmatprep.mubr.bf16.mxu0 %v773_v52  ;;  %1087 = vmatmul.mubr.bf16.vlgmr.msra.gmra.mrb[0].mxu1 %v773_v52  ;;  %v760_v33 = vadd.f32 %v6971_v15, %v738_v53  ;;  %v718_v0 = vmul.f32 %v6147_v55, %v6864_v41 }
 0x18a   : > { %v662_v63 = vpop.xlane.xlu0 %661  ;;  %6158 = vrsqrt.f32 %v692_v58  ;;  %v678_v2 = vmul.f32 0.0078125, %v660_v62  ;;  %1096 = vmatprep.mubr.bf16.mxu1 %v8954_v46  ;;  %v719_v40 = vmul.f32 %v6149_v61, %v6871_v48  ;;  %v761_v19 = vadd.f32 %v6971_v15, %v739_v1 }
 0x18b   : > { %v679_v5 = vmul.f32 0.0078125, %v662_v63  ;;  %6160 = vrsqrt.f32 %v693_v59  ;;  %v774_v6 = vpack.c.bf16 %v760_v33, %v759_v60  ;;  %v740_v7 = vmul.f32 %v6964_v22, %v718_v0 }
 0x18c   : > { %v6151_v8 = vpop.eup %6150  ;;  %v694_v9 = vadd.f32 1e-05, %v678_v2  ;;  %v741_v10 = vmul.f32 %v6964_v22, %v719_v40 }
 0x18d   : > { %v695_v16 = vadd.f32 1e-05, %v679_v5  ;;  %v6153_v18 = vpop.eup %6152  ;;  %v664_v41 = vpop.xlane.xlu1 %663  ;;  %5550 = vmatmul.mubr.bf16.vlgmr.msra.gmra.mrb[0].mxu0 %v774_v6  ;;  %v762_v20 = vadd.f32 %v6971_v15, %v740_v7  ;;  %v720_v21 = vmul.f32 %v6151_v8, %v6874_v49 }
 0x18e   : > { %6162 = vrsqrt.f32 %v694_v9  ;;  %v680_v48 = vmul.f32 0.0078125, %v664_v41  ;;  %v721_v23 = vmul.f32 %v6153_v18, %v6881_v56  ;;  %v763_v30 = vadd.f32 %v6971_v15, %v741_v10 }
 0x18f   : > { %6164 = vrsqrt.f32 %v695_v16  ;;  %v775_v26 = vpack.c.bf16 %v762_v20, %v761_v19  ;;  %v742_v12 = vmul.f32 %v6964_v22, %v720_v21 }
 0x190   : > { %v6155_v13 = vpop.eup %6154  ;;  %v696_v29 = vadd.f32 1e-05, %v680_v48  ;;  %v743_v49 = vmul.f32 %v6964_v22, %v721_v23 }
 0x191   : > { %v6157_v31 = vpop.eup %6156  ;;  %5553 = vmatprep.mubr.bf16.mxu0 %v775_v26  ;;  %1097 = vmatmul.mubr.bf16.gmra.mrb[4].mxu1 %v774_v6  ;;  %v764_v34 = vadd.f32 %v6971_v15, %v742_v12  ;;  %v722_v24 = vmul.f32 %v6155_v13, %v6884_v57 }
 0x192   : > { %6166 = vrsqrt.f32 %v696_v29  ;;  %1106 = vmatprep.mubr.bf16.mxu1 %v8954_v46  ;;  %v723_v56 = vmul.f32 %v6157_v31, %v6897_v3  ;;  %v765_v39 = vadd.f32 %v6971_v15, %v743_v49 }
 0x193   : > { %v776_v14 = vpack.c.bf16 %v764_v34, %v763_v30  ;;  %v744_v35 = vmul.f32 %v6964_v22, %v722_v24 }
 0x194   : > { %v6159_v36 = vpop.eup %6158  ;;  %v745_v37 = vmul.f32 %v6964_v22, %v723_v56 }
 0x195   : > { %v6161_v38 = vpop.eup %6160  ;;  %5554 = vmatmul.mubr.bf16.gmra.mrb[4].mxu0 %v776_v14  ;;  %v766_v32 = vadd.f32 %v6971_v15, %v744_v35  ;;  %v724_v57 = vmul.f32 %v6159_v36, %v6900_v4 }
 0x196   : > { %v725_v42 = vmul.f32 %v6161_v38, %v6910_v11  ;;  %v767_v45 = vadd.f32 %v6971_v15, %v745_v37 }
 0x197   : > { %v777_v43 = vpack.c.bf16 %v766_v32, %v765_v39  ;;  %v746_v44 = vmul.f32 %v6964_v22, %v724_v57 }
 0x198   : > { %v6163_v3 = vpop.eup %6162  ;;  %v747_v25 = vmul.f32 %v6964_v22, %v725_v42 }
 0x199   : > { %v6165_v47 = vpop.eup %6164  ;;  %5557 = vmatprep.mubr.bf16.mxu0 %v777_v43  ;;  %1107 = vmatmul.mubr.bf16.gmra.mrb[8].mxu1 %v775_v26  ;;  %v768_v50 = vadd.f32 %v6971_v15, %v746_v44  ;;  %v726_v51 = vmul.f32 %v6163_v3, %v6913_v17 }
 0x19a   : > { %1116 = vmatprep.mubr.bf16.mxu1 %v8954_v46  ;;  %v727_v4 = vmul.f32 %v6165_v47, %v6926_v27  ;;  %v769_v54 = vadd.f32 %v6971_v15, %v747_v25 }
 0x19b   : > { %v778_v11 = vpack.c.bf16 %v768_v50, %v767_v45  ;;  %v748_v52 = vmul.f32 %v6964_v22, %v726_v51 }
 0x19c   : > { %v6167_v53 = vpop.eup %6166  ;;  %v749_v59 = vmul.f32 %v6964_v22, %v727_v4 }
 0x19d   : > { %5558 = vmatmul.mubr.bf16.gmra.mrb[8].mxu0 %v778_v11  ;;  %v770_v55 = vadd.f32 %v6971_v15, %v748_v52  ;;  %v728_v58 = vmul.f32 %v6167_v53, %v6929_v28 }
 0x19e   : > { %v771_v27 = vadd.f32 %v6971_v15, %v749_v59 }
 0x19f   : > { %v779_v17 = vpack.c.bf16 %v770_v55, %v769_v54  ;;  %v750_v60 = vmul.f32 %v6964_v22, %v728_v58 }
 0x1a1   : > { %5561 = vmatprep.mubr.bf16.mxu0 %v779_v17  ;;  %1117 = vmatmul.mubr.bf16.gmra.mrb[12].mxu1 %v776_v14  ;;  %v772_v61 = vadd.f32 %v6971_v15, %v750_v60 }
 0x1a2   : > { %1126 = vmatprep.mubr.bf16.mxu1 %v8954_v46 }
 0x1a3   : > { %v780_v62 = vpack.c.bf16 %v772_v61, %v771_v27 }
 0x1a5   : > { %5562 = vmatmul.mubr.bf16.gmra.mrb[12].mxu0 %v780_v62 }
 0x1a9   : > { %1127 = vmatmul.mubr.bf16.gmra.mrb[16].mxu1 %v777_v43 }
 0x1aa   : > { %1136 = vmatprep.mubr.bf16.mxu1 %v8954_v46 }
 0x1b1   : > { %1137 = vmatmul.mubr.bf16.gmra.mrb[20].mxu1 %v778_v11 }
 0x1b2   : > { %1146 = vmatprep.mubr.bf16.mxu1 %v8954_v46 }
 0x1b9   : > { %1147 = vmatmul.mubr.bf16.gmra.mrb[24].mxu1 %v779_v17 }
 0x1ba   : > { %1156 = vmatprep.mubr.bf16.mxu1 %v8954_v46 }
 0x1c1   : > { %1157 = vmatmul.mubr.bf16.gmra.mrb[28].mxu1 %v780_v62 }
 0x25c   : > { %v1088_v28 = vpop.f32.mrb[0].mxu1 }
 0x25d   : > { %v1090_v22 = vpop.f32.mrb[1].mxu1 }
 0x25e   : > { %v1092_v63 = vpop.f32.mrb[2].mxu1 }
 0x25f   : > { %v7025_v33 = vpack.c.bf16 %v1092_v63, %v1088_v28  ;;  %v1094_v15 = vpop.f32.mrb[3].mxu1 }
 0x260   : > { %v7027_v0 = vpack.c.bf16 %v1094_v15, %v1090_v22  ;;  %v5551_v1 = vpop.f32.mrb[0].mxu0 }
 0x261   : > { %1725 = vrot.lane.b32.xlu0 %v7025_v33, %s6613_s13  ;;  %v879_v2 = vpop.f32.mrb[1].mxu0  ;;  %5869 = vmatprep.subr.msk.bf16.mxu0 %vm1191_vm0, %v7025_v33  ;;  %v1205_v5 = vsel %vm1191_vm0, %v7025_v33, 0  ;;  %v944_v6 = vmul.f32 0.17677669, %v5551_v1 }
 0x262   : > { %v5552_v40 = vpop.f32.mrb[2].mxu0  ;;  %5566 = vmatpush3.bf16.xpose.msra.mxu0 %v1205_v5  ;;  %5597 = vmatprep.subr.bf16.mxu1 %v7027_v0  ;;  %v942_v9 = vmul.f32 0.17677669, %v879_v2 }
 0x263   : > { %v945_v7 = vmul.f32 0.17677669, %v5552_v40  ;;  %v882_v8 = vpop.f32.mrb[3].mxu0  ;;  %5598 = vmatpush3.bf16.msra.mxu1 %v7027_v0 }
 0x264   : > { %v943_v16 = vmul.f32 0.17677669, %v882_v8  ;;  %v1098_v10 = vpop.f32.mrb[4].mxu1 }
 0x265   : > { %v7037_v18 = vpack.c.bf16 %v945_v7, %v944_v6  ;;  %v1100_v41 = vpop.f32.mrb[5].mxu1 }
 0x266   : > { %v7039_v19 = vpack.c.bf16 %v943_v16, %v942_v9  ;;  %v1102_v20 = vpop.f32.mrb[6].mxu1 }
 0x267   : > { %v7041_v21 = vpack.c.bf16 %v1102_v20, %v1098_v10  ;;  %v1104_v48 = vpop.f32.mrb[7].mxu1 }
 0x268   : > { %v7043_v23 = vpack.c.bf16 %v1104_v48, %v1100_v41  ;;  %v5555_v26 = vpop.f32.mrb[4].mxu0  ;;  %5573 = vmatprep.mubr.msk.bf16.mxu0 %vm1191_vm0, %v7039_v19 }
 0x269   : > { %1727 = vrot.lane.b32.xlu1 %v7041_v21, %s6613_s13  ;;  %v895_v12 = vpop.f32.mrb[5].mxu0  ;;  %5870 = vmatprep.subr.msk.bf16.mxu0 %vm1191_vm0, %v7041_v21  ;;  %v1208_v13 = vsel %vm1191_vm0, %v7041_v21, 0  ;;  %v948_v30 = vmul.f32 0.17677669, %v5555_v26 }
 0x26a   : > { %v5556_v29 = vpop.f32.mrb[6].mxu0  ;;  %5568 = vmatpush3.bf16.xpose.msra.mxu0 %v1208_v13  ;;  %5599 = vmatprep.subr.bf16.mxu1 %v7043_v23  ;;  %v946_v24 = vmul.f32 0.17677669, %v895_v12 }
 0x26b   : > { %v949_v31 = vmul.f32 0.17677669, %v5556_v29  ;;  %v898_v34 = vpop.f32.mrb[7].mxu0  ;;  %5600 = vmatpush3.bf16.msra.mxu1 %v7043_v23 }
 0x26c   : > { %v947_v49 = vmul.f32 0.17677669, %v898_v34  ;;  %v1108_v56 = vpop.f32.mrb[8].mxu1 }
 0x26d   : > { %v7055_v14 = vpack.c.bf16 %v949_v31, %v948_v30  ;;  %v1110_v35 = vpop.f32.mrb[9].mxu1 }
 0x26e   : > { %v7057_v36 = vpack.c.bf16 %v947_v49, %v946_v24  ;;  %v1112_v37 = vpop.f32.mrb[10].mxu1 }
 0x26f   : > { %v7059_v38 = vpack.c.bf16 %v1112_v37, %v1108_v56  ;;  %v1114_v39 = vpop.f32.mrb[11].mxu1 }
 0x270   : > { %v7061_v32 = vpack.c.bf16 %v1114_v39, %v1110_v35  ;;  %v5559_v57 = vpop.f32.mrb[8].mxu0 }
 0x271   : > { %1729 = vrot.lane.b32.xlu0 %v7059_v38, %s6613_s13  ;;  %v911_v42 = vpop.f32.mrb[9].mxu0  ;;  %5871 = vmatprep.subr.msk.bf16.mxu0 %vm1191_vm0, %v7059_v38  ;;  %v1211_v43 = vsel %vm1191_vm0, %v7059_v38, 0  ;;  %v952_v3 = vmul.f32 0.17677669, %v5559_v57 }
 0x272   : > { %v5560_v44 = vpop.f32.mrb[10].mxu0  ;;  %5570 = vmatpush3.bf16.xpose.msra.mxu0 %v1211_v43  ;;  %5601 = vmatprep.subr.bf16.mxu1 %v7061_v32  ;;  %v950_v50 = vmul.f32 0.17677669, %v911_v42 }
 0x273   : > { %v953_v45 = vmul.f32 0.17677669, %v5560_v44  ;;  %v914_v47 = vpop.f32.mrb[11].mxu0  ;;  %5602 = vmatpush3.bf16.msra.mxu1 %v7061_v32 }
 0x274   : > { %v951_v51 = vmul.f32 0.17677669, %v914_v47  ;;  %v1118_v25 = vpop.f32.mrb[12].mxu1 }
 0x275   : > { %v7071_v4 = vpack.c.bf16 %v953_v45, %v952_v3  ;;  %v1120_v11 = vpop.f32.mrb[13].mxu1 }
 0x276   : > { %v7073_v52 = vpack.c.bf16 %v951_v51, %v950_v50  ;;  %v1122_v53 = vpop.f32.mrb[14].mxu1 }
 0x277   : > { %v7075_v54 = vpack.c.bf16 %v1122_v53, %v1118_v25  ;;  %v1124_v55 = vpop.f32.mrb[15].mxu1 }
 0x278   : > { %v7077_v58 = vpack.c.bf16 %v1124_v55, %v1120_v11  ;;  %v5563_v59 = vpop.f32.mrb[12].mxu0 }
 0x279   : > { %1731 = vrot.lane.b32.xlu0 %v7075_v54, %s6613_s13  ;;  %v927_v17 = vpop.f32.mrb[13].mxu0  ;;  %5872 = vmatprep.subr.msk.bf16.mxu0 %vm1191_vm0, %v7075_v54  ;;  %v1214_v60 = vsel %vm1191_vm0, %v7075_v54, 0  ;;  %v956_v61 = vmul.f32 0.17677669, %v5563_v59 }
 0x27a   : > { %v5564_v27 = vpop.f32.mrb[14].mxu0  ;;  %5572 = vmatpush3.bf16.xpose.msra.mxu0 %v1214_v60  ;;  %5603 = vmatprep.subr.bf16.mxu1 %v7077_v58  ;;  %v954_v22 = vmul.f32 0.17677669, %v927_v17 }
 0x27b   : > { %v957_v62 = vmul.f32 0.17677669, %v5564_v27  ;;  %v930_v28 = vpop.f32.mrb[15].mxu0  ;;  %5604 = vmatpush3.bf16.msra.mxu1 %v7077_v58 }
 0x27c   : > { %v955_v63 = vmul.f32 0.17677669, %v930_v28  ;;  %v1128_v15 = vpop.f32.mrb[16].mxu1 }
 0x27d   : > { %v7087_v1 = vpack.c.bf16 %v957_v62, %v956_v61  ;;  %v1130_v2 = vpop.f32.mrb[17].mxu1 }
 0x27e   : > { %v7089_v5 = vpack.c.bf16 %v955_v63, %v954_v22  ;;  %v1132_v40 = vpop.f32.mrb[18].mxu1 }
 0x27f   : > { %v7091_v6 = vpack.c.bf16 %v1132_v40, %v1128_v15  ;;  %v1134_v7 = vpop.f32.mrb[19].mxu1 }
 0x280   : > { %v7093_v8 = vpack.c.bf16 %v1134_v7, %v1130_v2 }
 0x281   : > { %5574 = vmatmul.mubr.msk.bf16.vlgmr.msra.gmra.mrb[16].mxu0 %vm1191_vm0, %v7037_v18  ;;  %5873 = vmatprep.subr.msk.bf16.mxu0 %vm1191_vm0, %v7091_v6  ;;  %v1294_v9 = vsel %vm1191_vm0, %v7091_v6, 0 }
 0x282   : > { %5577 = vmatprep.mubr.msk.bf16.mxu0 %vm1191_vm0, %v7057_v36  ;;  %5582 = vmatpush3.bf16.xpose.msra.mxu0 %v1294_v9 }
 0x284   : > { %v1138_v16 = vpop.f32.mrb[20].mxu1 }
 0x285   : > { %v1140_v10 = vpop.f32.mrb[21].mxu1 }
 0x286   : > { %v1142_v41 = vpop.f32.mrb[22].mxu1 }
 0x287   : > { %v7103_v20 = vpack.c.bf16 %v1142_v41, %v1138_v16  ;;  %v1144_v48 = vpop.f32.mrb[23].mxu1 }
 0x288   : > { %v7105_v26 = vpack.c.bf16 %v1144_v48, %v1140_v10 }
 0x289   : > { %5578 = vmatmul.mubr.msk.bf16.gmra.mrb[20].mxu0 %vm1191_vm0, %v7055_v14  ;;  %5874 = vmatprep.subr.msk.bf16.mxu0 %vm1191_vm0, %v7103_v20  ;;  %v1297_v12 = vsel %vm1191_vm0, %v7103_v20, 0 }
 0x28a   : > { %5584 = vmatpush3.bf16.xpose.msra.mxu0 %v1297_v12  ;;  %5589 = vmatprep.mubr.msk.bf16.mxu0 %vm1191_vm0, %v7073_v52 }
 0x28c   : > { %v1148_v13 = vpop.f32.mrb[24].mxu1 }
 0x28d   : > { %v1150_v29 = vpop.f32.mrb[25].mxu1 }
 0x28e   : > { %v1152_v30 = vpop.f32.mrb[26].mxu1 }
 0x28f   : > { %v7115_v31 = vpack.c.bf16 %v1152_v30, %v1148_v13  ;;  %v1154_v34 = vpop.f32.mrb[27].mxu1 }
 0x290   : > { %v7117_v24 = vpack.c.bf16 %v1154_v34, %v1150_v29 }
 0x291   : > { %5875 = vmatprep.subr.msk.bf16.mxu0 %vm1191_vm0, %v7115_v31  ;;  %v1300_v49 = vsel %vm1191_vm0, %v7115_v31, 0 }
 0x292   : > { %5586 = vmatpush3.bf16.xpose.msra.mxu0 %v1300_v49 }
 0x294   : > { %v1158_v56 = vpop.f32.mrb[28].mxu1 }
 0x295   : > { %v1160_v35 = vpop.f32.mrb[29].mxu1 }
 0x296   : > { %v1162_v37 = vpop.f32.mrb[30].mxu1 }
 0x297   : > { %v7123_v39 = vpack.c.bf16 %v1162_v37, %v1158_v56  ;;  %v1164_v57 = vpop.f32.mrb[31].mxu1 }
 0x298   : > { %v7125_v42 = vpack.c.bf16 %v1164_v57, %v1160_v35 }
 0x299   : > { %5876 = vmatprep.subr.msk.bf16.mxu0 %vm1191_vm0, %v7123_v39  ;;  %v1303_v43 = vsel %vm1191_vm0, %v7123_v39, 0 }
 0x29a   : > { %5588 = vmatpush3.bf16.xpose.msra.mxu0 %v1303_v43 }
 0x29b   : > { %5613 = vmatprep.subr.bf16.mxu0 %v7093_v8 }
 0x2a1   : > { %5590 = vmatmul.mubr.msk.bf16.vlgmr.msra.gmra.mrb[24].mxu0 %vm1191_vm0, %v7071_v4 }
 0x2a2   : > { %5593 = vmatprep.mubr.msk.bf16.mxu0 %vm1191_vm0, %v7089_v5  ;;  %5614 = vmatpush3.bf16.msra.mxu0 %v7093_v8 }
 0x2a3   : > { %5615 = vmatprep.subr.bf16.mxu0 %v7105_v26 }
 0x2a6   : > { %5616 = vmatpush3.bf16.msra.mxu0 %v7105_v26 }
 0x2a7   : > { %5617 = vmatprep.subr.bf16.mxu0 %v7117_v24 }
 0x2a9   : > { %5594 = vmatmul.mubr.msk.bf16.gmra.mrb[28].mxu0 %vm1191_vm0, %v7087_v1 }
 0x2aa   : > { %5618 = vmatpush3.bf16.msra.mxu0 %v7117_v24 }
 0x2ab   : > { %5619 = vmatprep.subr.bf16.mxu0 %v7125_v42 }
 0x2ae   : > { %5620 = vmatpush3.bf16.msra.mxu0 %v7125_v42 }
 0x2d3   : > { %v7145_v44 = vpop.permute.xlu0 %1725 }
 0x2d4   : > { %5877 = vmatprep.subr.msk.bf16.mxu1 %vm1191_vm0, %v7145_v44 }
 0x2db   : > { %v7213_v35 = vpop.permute.xlu1 %1727 }
 0x2e3   : > { %v7209_v49 = vpop.permute.xlu0 %1729 }
 0x2eb   : > { %v7211_v56 = vpop.permute.xlu0 %1731 }
 0x354   : > { %v5575_v3 = vpop.f32.mrb[16].mxu0 }
 0x355   : > { %v7149_v45 = vpop.f32.mrb[17].mxu0  ;;  %v1377_v47 = vsel %vm1370_vm1, %v5575_v3, -inf }
 0x356   : > { %1378 = vmax.xlane.f32.xlu0 %v1377_v47  ;;  %v5576_v50 = vpop.f32.mrb[18].mxu0  ;;  %v1371_v11 = vsel %vm1370_vm1, %v7149_v45, -inf }
 0x357   : > { %v7152_v51 = vpop.f32.mrb[19].mxu0  ;;  %v1380_v25 = vsel %vm1370_vm1, %v5576_v50, -inf }
 0x358   : > { %1381 = vmax.xlane.f32.xlu1 %v1380_v25  ;;  %v1374_v53 = vsel %vm1370_vm1, %v7152_v51, -inf }
 0x35a   : > { %1372 = vmax.xlane.f32.xlu0 %v1371_v11 }
 0x35c   : > { %1375 = vmax.xlane.f32.xlu1 %v1374_v53  ;;  %v5579_v55 = vpop.f32.mrb[20].mxu0 }
 0x35d   : > { %v7159_v59 = vpop.f32.mrb[21].mxu0  ;;  %v1389_v17 = vsel %vm1370_vm1, %v5579_v55, -inf }
 0x35e   : > { %1390 = vmax.xlane.f32.xlu0 %v1389_v17  ;;  %v5580_v60 = vpop.f32.mrb[22].mxu0  ;;  %v1383_v62 = vsel %vm1370_vm1, %v7159_v59, -inf }
 0x35f   : > { %v7162_v27 = vpop.f32.mrb[23].mxu0  ;;  %v1392_v61 = vsel %vm1370_vm1, %v5580_v60, -inf }
 0x360   : > { %1393 = vmax.xlane.f32.xlu1 %v1392_v61  ;;  %v1386_v28 = vsel %vm1370_vm1, %v7162_v27, -inf }
 0x362   : > { %1384 = vmax.xlane.f32.xlu0 %v1383_v62 }
 0x364   : > { %1387 = vmax.xlane.f32.xlu1 %v1386_v28 }
 0x374   : > { %v7169_v22 = vpop.f32.mrb[24].mxu0 }
 0x375   : > { %v7171_v63 = vpop.f32.mrb[25].mxu0  ;;  %v1401_v15 = vsel %vm1370_vm1, %v7169_v22, -inf }
 0x376   : > { %1402 = vmax.xlane.f32.xlu0 %v1401_v15  ;;  %v7175_v2 = vpop.f32.mrb[26].mxu0  ;;  %v1395_v9 = vsel %vm1370_vm1, %v7171_v63, -inf }
 0x377   : > { %v7177_v40 = vpop.f32.mrb[27].mxu0  ;;  %v1404_v7 = vsel %vm1370_vm1, %v7175_v2, -inf }
 0x378   : > { %1405 = vmax.xlane.f32.xlu1 %v1404_v7  ;;  %v1398_v16 = vsel %vm1370_vm1, %v7177_v40, -inf }
 0x37a   : > { %1396 = vmax.xlane.f32.xlu0 %v1395_v9 }
 0x37c   : > { %1399 = vmax.xlane.f32.xlu1 %v1398_v16  ;;  %v7185_v10 = vpop.f32.mrb[28].mxu0 }
 0x37d   : > { %v7187_v41 = vpop.f32.mrb[29].mxu0  ;;  %v1413_v48 = vsel %vm1370_vm1, %v7185_v10, -inf }
 0x37e   : > { %1414 = vmax.xlane.f32.xlu0 %v1413_v48  ;;  %v7191_v12 = vpop.f32.mrb[30].mxu0  ;;  %v1407_v29 = vsel %vm1370_vm1, %v7187_v41, -inf }
 0x37f   : > { %v7193_v13 = vpop.f32.mrb[31].mxu0  ;;  %v1416_v30 = vsel %vm1370_vm1, %v7191_v12, -inf }
 0x380   : > { %v1410_v34 = vsel %vm1370_vm1, %v7193_v13, -inf }
 0x382   : > { %1408 = vmax.xlane.f32.xlu0 %v1407_v29 }
 0x38d   : > { %1715 = vrot.lane.b32.xlu1 %v7037_v18, %s6613_s13 }
 0x391   : > { %1838 = vrot.lane.b32.xlu1 %v7091_v6, %s6613_s13 }
 0x395   : > { %1840 = vrot.lane.b32.xlu1 %v7103_v20, %s6613_s13 }
 0x398   : > { %1713 = vrot.lane.b32.xlu0 %v7039_v19, %s6613_s13 }
 0x3b9   : > { %1417 = vmax.xlane.f32.xlu1 %v1416_v30 }
 0x3bd   : > { %1411 = vmax.xlane.f32.xlu1 %v1410_v34 }
 0x3e3   : > { %v1379_v37 = vpop.xlane.xlu0 %1378 }
 0x3e4   : > { %v1421_v57 = vsub.f32 %v5575_v3, %v1379_v37 }
 0x3e5   : > { %v1382_v43 = vpop.xlane.xlu1 %1381 }
 0x3e6   : > { %v1439_v47 = vmul.f32 1.442695, %v1421_v57  ;;  %v1422_v25 = vsub.f32 %v5576_v50, %v1382_v43 }
 0x3e7   : > { %v1373_v11 = vpop.xlane.xlu0 %1372 }
 0x3e8   : > { %6168 = vpow2.f32 %v1439_v47  ;;  %v1441_v53 = vmul.f32 1.442695, %v1422_v25  ;;  %v1419_v17 = vsub.f32 %v7149_v45, %v1373_v11 }
 0x3e9   : > { %v1376_v61 = vpop.xlane.xlu1 %1375 }
 0x3ea   : > { %6170 = vpow2.f32 %v1441_v53  ;;  %v1435_v62 = vmul.f32 1.442695, %v1419_v17  ;;  %v1420_v28 = vsub.f32 %v7152_v51, %v1376_v61 }
 0x3eb   : > { %v1391_v15 = vpop.xlane.xlu0 %1390 }
 0x3ec   : > { %6172 = vpow2.f32 %v1435_v62  ;;  %v1437_v7 = vmul.f32 1.442695, %v1420_v28  ;;  %v1425_v9 = vsub.f32 %v5579_v55, %v1391_v15 }
 0x3ed   : > { %v1394_v16 = vpop.xlane.xlu1 %1393 }
 0x3ee   : > { %6174 = vpow2.f32 %v1437_v7  ;;  %v1447_v3 = vmul.f32 1.442695, %v1425_v9  ;;  %v1426_v48 = vsub.f32 %v5580_v60, %v1394_v16 }
 0x3ef   : > { %v1385_v29 = vpop.xlane.xlu0 %1384 }
 0x3f0   : > { %6176 = vpow2.f32 %v1447_v3  ;;  %v1449_v50 = vmul.f32 1.442695, %v1426_v48  ;;  %v1423_v30 = vsub.f32 %v7159_v59, %v1385_v29 }
 0x3f1   : > { %v1388_v34 = vpop.xlane.xlu1 %1387 }
 0x3f2   : > { %v7218_v45 = vpop.eup %6168  ;;  %6178 = vpow2.f32 %v1449_v50  ;;  %v1443_v37 = vmul.f32 1.442695, %v1423_v30  ;;  %v1424_v51 = vsub.f32 %v7162_v27, %v1388_v34 }
 0x3f3   : > { %v1473_v57 = vsel %vm1370_vm1, %v7218_v45, 0.0 }
 0x3f4   : > { %v7223_v55 = vpop.eup %6170  ;;  %6180 = vpow2.f32 %v1443_v37  ;;  %v1445_v43 = vmul.f32 1.442695, %v1424_v51  ;;  %1474 = vadd.xlane.f32.xlu0 %v1473_v57 }
 0x3f5   : > { %v1476_v60 = vsel %vm1370_vm1, %v7223_v55, 0.0 }
 0x3f6   : > { %v7227_v47 = vpop.eup %6172  ;;  %6182 = vpow2.f32 %v1445_v43  ;;  %1477 = vadd.xlane.f32.xlu1 %v1476_v60 }
 0x3f7   : > { %v1467_v59 = vsel %vm1370_vm1, %v7227_v47, 0.0 }
 0x3f8   : > { %v7231_v25 = vpop.eup %6174  ;;  %1468 = vadd.xlane.f32.xlu0 %v1467_v59 }
 0x3f9   : > { %v1470_v27 = vsel %vm1370_vm1, %v7231_v25, 0.0 }
 0x3fa   : > { %v7235_v11 = vpop.eup %6176  ;;  %1471 = vadd.xlane.f32.xlu1 %v1470_v27 }
 0x3fb   : > { %v1485_v53 = vsel %vm1370_vm1, %v7235_v11, 0.0 }
 0x3fc   : > { %v7239_v17 = vpop.eup %6178  ;;  %1486 = vadd.xlane.f32.xlu0 %v1485_v53 }
 0x3fd   : > { %v1488_v61 = vsel %vm1370_vm1, %v7239_v17, 0.0 }
 0x3fe   : > { %v7243_v62 = vpop.eup %6180  ;;  %1489 = vadd.xlane.f32.xlu1 %v1488_v61 }
 0x3ff   : > { %v1479_v28 = vsel %vm1370_vm1, %v7243_v62, 0.0 }
 0x400   : > { %v7247_v15 = vpop.eup %6182  ;;  %1480 = vadd.xlane.f32.xlu0 %v1479_v28 }
 0x401   : > { %v1482_v7 = vsel %vm1370_vm1, %v7247_v15, 0.0 }
 0x402   : > { %1483 = vadd.xlane.f32.xlu1 %v1482_v7 }
 0x403   : > { %v1403_v9 = vpop.xlane.xlu0 %1402 }
 0x404   : > { %v1429_v16 = vsub.f32 %v7169_v22, %v1403_v9 }
 0x405   : > { %v1406_v3 = vpop.xlane.xlu1 %1405 }
 0x406   : > { %v1455_v48 = vmul.f32 1.442695, %v1429_v16  ;;  %v1430_v29 = vsub.f32 %v7175_v2, %v1406_v3 }
 0x407   : > { %v1397_v50 = vpop.xlane.xlu0 %1396 }
 0x408   : > { %6184 = vpow2.f32 %v1455_v48  ;;  %v1427_v30 = vsub.f32 %v7171_v63, %v1397_v50  ;;  %v1457_v37 = vmul.f32 1.442695, %v1430_v29 }
 0x409   : > { %v1400_v34 = vpop.xlane.xlu1 %1399 }
 0x40a   : > { %v1451_v51 = vmul.f32 1.442695, %v1427_v30  ;;  %v1428_v57 = vsub.f32 %v7177_v40, %v1400_v34 }
 0x40b   : > { %v1415_v53 = vpop.xlane.xlu0 %1414 }
 0x40c   : > { %6186 = vpow2.f32 %v1451_v51  ;;  %v1453_v60 = vmul.f32 1.442695, %v1428_v57  ;;  %v1433_v7 = vsub.f32 %v7185_v10, %v1415_v53 }
 0x40d   : > { %v7255_v43 = vpop.permute.xlu1 %1715  ;;  %6188 = vpow2.f32 %v1457_v37 }
 0x40e   : > { %6190 = vpow2.f32 %v1453_v60  ;;  %v1463_v3 = vmul.f32 1.442695, %v1433_v7 }
 0x40f   : > { %v1409_v16 = vpop.xlane.xlu0 %1408 }
 0x410   : > { %v1431_v48 = vsub.f32 %v7187_v41, %v1409_v16  ;;  %6192 = vpow2.f32 %v1463_v3 }
 0x411   : > { %v7257_v59 = vpop.permute.xlu1 %1838 }
 0x412   : > { %v7259_v22 = vpop.eup %6184  ;;  %5881 = vmatprep.subr.msk.bf16.mxu0 %vm1191_vm0, %v7257_v59  ;;  %v1459_v29 = vmul.f32 1.442695, %v1431_v48 }
 0x413   : > { %v1497_v63 = vsel %vm1370_vm1, %v7259_v22, 0.0 }
 0x414   : > { %1498 = vadd.xlane.f32.xlu1 %v1497_v63  ;;  %6194 = vpow2.f32 %v1459_v29 }
 0x415   : > { %v7291_v37 = vpop.permute.xlu1 %1840 }
 0x416   : > { %v7265_v2 = vpop.eup %6186  ;;  %1842 = vrot.lane.b32.xlu0 %v7115_v31, %s6613_s13 }
 0x417   : > { %v1491_v40 = vsel %vm1370_vm1, %v7265_v2, 0.0  ;;  %v7271_v27 = vpop.eup %6188 }
 0x418   : > { %1492 = vadd.xlane.f32.xlu1 %v1491_v40  ;;  %v1500_v61 = vsel %vm1370_vm1, %v7271_v27, 0.0  ;;  %v7275_v28 = vpop.eup %6190 }
 0x419   : > { %v1494_v9 = vsel %vm1370_vm1, %v7275_v28, 0.0 }
 0x41a   : > { %v7281_v50 = vpop.eup %6192 }
 0x41b   : > { %v1509_v30 = vsel %vm1370_vm1, %v7281_v50, 0.0 }
 0x41c   : > { %1501 = vadd.xlane.f32.xlu1 %v1500_v61 }
 0x41e   : > { %v7287_v10 = vpop.eup %6194 }
 0x41f   : > { %v1503_v34 = vsel %vm1370_vm1, %v7287_v10, 0.0 }
 0x420   : > { %1495 = vadd.xlane.f32.xlu1 %v1494_v9 }
 0x431   : > { %1717 = vrot.lane.b32.xlu1 %v7057_v36, %s6613_s13 }
 0x435   : > { %1510 = vadd.xlane.f32.xlu0 %v1509_v30 }
 0x439   : > { %1504 = vadd.xlane.f32.xlu0 %v1503_v34 }
 0x446   : > { %v1418_v41 = vpop.xlane.xlu1 %1417 }
 0x447   : > { %v1434_v51 = vsub.f32 %v7191_v12, %v1418_v41  ;;  %v1714_v12 = vpop.permute.xlu0 %1713 }
 0x449   : > { %v1465_v57 = vmul.f32 1.442695, %v1434_v51 }
 0x44a   : > { %v1412_v60 = vpop.xlane.xlu1 %1411 }
 0x44b   : > { %6196 = vpow2.f32 %v1465_v57  ;;  %v1432_v63 = vsub.f32 %v7193_v13, %v1412_v60 }
 0x44d   : > { %v1461_v40 = vmul.f32 1.442695, %v1432_v63 }
 0x44f   : > { %6198 = vpow2.f32 %v1461_v40 }
 0x455   : > { %v7295_v53 = vpop.eup %6196 }
 0x456   : > { %v1512_v61 = vsel %vm1370_vm1, %v7295_v53, 0.0 }
 0x457   : > { %1513 = vadd.xlane.f32.xlu0 %v1512_v61 }
 0x459   : > { %v7299_v7 = vpop.eup %6198 }
 0x45a   : > { %v1506_v9 = vsel %vm1370_vm1, %v7299_v7, 0.0 }
 0x45b   : > { %1507 = vadd.xlane.f32.xlu1 %v1506_v9 }
 0x46c   : > { %1844 = vrot.lane.b32.xlu1 %v7123_v39, %s6613_s13 }
 0x46d   : > { %1719 = vrot.lane.b32.xlu0 %v7055_v14, %s6613_s13 }
 0x470   : > { %1828 = vrot.lane.b32.xlu1 %v7071_v4, %s6613_s13 }
 0x471   : > { %1826 = vrot.lane.b32.xlu0 %v7073_v52, %s6613_s13 }
 0x474   : > { %1832 = vrot.lane.b32.xlu1 %v7087_v1, %s6613_s13 }
 0x475   : > { %1830 = vrot.lane.b32.xlu0 %v7089_v5, %s6613_s13 }
 0x478   : > { %2125 = vrot.lane.b32.xlu1 %v7043_v23, %s6613_s13 }
 0x479   : > { %2123 = vrot.lane.b32.xlu0 %v7027_v0, %s6613_s13 }
 0x47c   : > { %2127 = vrot.lane.b32.xlu1 %v7061_v32, %s6613_s13 }
 0x47d   : > { %2313 = vrot.lane.b32.xlu0 %v7025_v33, %s6614_s25 }
 0x480   : > { %2129 = vrot.lane.b32.xlu1 %v7077_v58, %s6613_s13 }
 0x481   : > { %2216 = vrot.lane.b32.xlu0 %v7093_v8, %s6613_s13  ;;  %v1475_v13 = vpop.xlane.xlu0 %1474 }
 0x483   : > { %v1478_v16 = vpop.xlane.xlu1 %1477 }
 0x484   : > { %2315 = vrot.lane.b32.xlu1 %v7041_v21, %s6614_s25  ;;  %6200 = vrcp.f32 %v1478_v16 }
 0x485   : > { %2218 = vrot.lane.b32.xlu0 %v7105_v26, %s6613_s13  ;;  %v1469_v3 = vpop.xlane.xlu0 %1468 }
 0x486   : > { %6202 = vrcp.f32 %v1469_v3 }
 0x487   : > { %6204 = vrcp.f32 %v1475_v13  ;;  %v1472_v48 = vpop.xlane.xlu1 %1471 }
 0x488   : > { %6206 = vrcp.f32 %v1472_v48  ;;  %2220 = vrot.lane.b32.xlu1 %v7117_v24, %s6613_s13 }
 0x489   : > { %2317 = vrot.lane.b32.xlu0 %v7059_v38, %s6614_s25  ;;  %v1487_v29 = vpop.xlane.xlu0 %1486 }
 0x48b   : > { %v1490_v30 = vpop.xlane.xlu1 %1489 }
 0x48c   : > { %2319 = vrot.lane.b32.xlu1 %v7075_v54, %s6614_s25  ;;  %6208 = vrcp.f32 %v1490_v30 }
 0x48d   : > { %2222 = vrot.lane.b32.xlu0 %v7125_v42, %s6613_s13  ;;  %v1481_v34 = vpop.xlane.xlu0 %1480 }
 0x48e   : > { %6210 = vrcp.f32 %v1481_v34  ;;  %v6201_v41 = vpop.eup %6200 }
 0x48f   : > { %6212 = vrcp.f32 %v1487_v29  ;;  %v1484_v51 = vpop.xlane.xlu1 %1483  ;;  %v1534_v40 = vmul.f32 %v6201_v41, %v7223_v55  ;;  %v1746_v29 = vsel %vm1191_vm0, %v7145_v44, 0  ;;  %v1749_v44 = vsel %vm1191_vm0, %v7213_v35, 0 }
 0x490   : > { %v6203_v57 = vpop.eup %6202  ;;  %6214 = vrcp.f32 %v1484_v51 }
 0x491   : > { %v6205_v60 = vpop.eup %6204  ;;  %v1531_v61 = vmul.f32 %v6203_v57, %v7227_v47 }
 0x492   : > { %v6207_v63 = vpop.eup %6206  ;;  %v1533_v13 = vmul.f32 %v6205_v60, %v7218_v45 }
 0x493   : > { %v1532_v9 = vmul.f32 %v6207_v63, %v7231_v25 }
 0x494   : > { %v1548_v3 = vpack.c.bf16 %v1534_v40, %v1533_v13 }
 0x495   : > { %v1547_v16 = vpack.c.bf16 %v1532_v9, %v1531_v61 }
 0x496   : > { %v6209_v48 = vpop.eup %6208 }
 0x497   : > { %5605 = vmatprep.mubr.msk.bf16.mxu1 %vm1370_vm1, %v1547_v16  ;;  %v1538_v47 = vmul.f32 %v6209_v48, %v7239_v17 }
 0x498   : > { %v6211_v30 = vpop.eup %6210  ;;  %5606 = vmatmul.mubr.msk.bf16.vlgmr.msra.gmra.mrb[32].mxu1 %vm1370_vm1, %v1548_v3 }
 0x499   : > { %v6213_v34 = vpop.eup %6212  ;;  %5630 = vmatpush3.bf16.xpose.msra.mxu1 %v1746_v29  ;;  %v1535_v45 = vmul.f32 %v6211_v30, %v7243_v62 }
 0x49a   : > { %v6215_v55 = vpop.eup %6214  ;;  %5878 = vmatprep.subr.msk.bf16.mxu1 %vm1191_vm0, %v7213_v35  ;;  %v1537_v41 = vmul.f32 %v6213_v34, %v7235_v11  ;;  %v1752_v11 = vsel %vm1191_vm0, %v7209_v49, 0 }
 0x49b   : > { %v1536_v25 = vmul.f32 %v6215_v55, %v7247_v15  ;;  %v1755_v15 = vsel %vm1191_vm0, %v7211_v56, 0 }
 0x49c   : > { %v1550_v57 = vpack.c.bf16 %v1538_v47, %v1537_v41 }
 0x49d   : > { %v1549_v51 = vpack.c.bf16 %v1536_v25, %v1535_v45 }
 0x49f   : > { %5609 = vmatprep.mubr.msk.bf16.mxu1 %vm1370_vm1, %v1549_v51 }
 0x4a0   : > { %5610 = vmatmul.mubr.msk.bf16.gmra.mrb[36].mxu1 %vm1370_vm1, %v1550_v57 }
 0x4a1   : > { %5632 = vmatpush3.bf16.xpose.msra.mxu1 %v1749_v44  ;;  %v1499_v60 = vpop.xlane.xlu1 %1498  ;;  %5637 = vmatprep.mubr.msk.bf16.mxu1 %vm1191_vm0, %v1714_v12 }
 0x4a2   : > { %5879 = vmatprep.subr.msk.bf16.mxu1 %vm1191_vm0, %v7209_v49 }
 0x4a5   : > { %v1493_v17 = vpop.xlane.xlu1 %1492 }
 0x4a9   : > { %5634 = vmatpush3.bf16.xpose.msra.mxu1 %v1752_v11  ;;  %v1502_v62 = vpop.xlane.xlu1 %1501 }
 0x4aa   : > { %5880 = vmatprep.subr.msk.bf16.mxu1 %vm1191_vm0, %v7211_v56  ;;  %6216 = vrcp.f32 %v1502_v62 }
 0x4ab   : > { %6218 = vrcp.f32 %v1493_v17 }
 0x4ac   : > { %6220 = vrcp.f32 %v1499_v60 }
 0x4ad   : > { %v1496_v35 = vpop.xlane.xlu1 %1495 }
 0x4ae   : > { %6222 = vrcp.f32 %v1496_v35 }
 0x4b1   : > { %5636 = vmatpush3.bf16.xpose.msra.mxu1 %v1755_v15  ;;  %v1718_v9 = vpop.permute.xlu1 %1717 }
 0x4b4   : > { %v6217_v12 = vpop.eup %6216 }
 0x4b5   : > { %v6219_v63 = vpop.eup %6218  ;;  %v1542_v49 = vmul.f32 %v6217_v12, %v7271_v27  ;;  %v1859_v27 = vsel %vm1191_vm0, %v7257_v59, 0 }
 0x4b6   : > { %v6221_v40 = vpop.eup %6220  ;;  %v1539_v13 = vmul.f32 %v6219_v63, %v7265_v2  ;;  %v1843_v2 = vpop.permute.xlu0 %1842 }
 0x4b7   : > { %v1541_v3 = vmul.f32 %v6221_v40, %v7259_v22  ;;  %v1865_v22 = vsel %vm1191_vm0, %v1843_v2, 0 }
 0x4b8   : > { %v6223_v61 = vpop.eup %6222  ;;  %5638 = vmatmul.mubr.msk.bf16.vlgmr.msra.gmra.mrb[40].mxu1 %vm1191_vm0, %v7255_v43  ;;  %v1862_v43 = vsel %vm1191_vm0, %v7291_v37, 0 }
 0x4b9   : > { %5641 = vmatprep.mubr.msk.bf16.mxu1 %vm1191_vm0, %v1718_v9  ;;  %v1540_v16 = vmul.f32 %v6223_v61, %v7275_v28  ;;  %v1552_v48 = vpack.c.bf16 %v1542_v49, %v1541_v3 }
 0x4bb   : > { %v1551_v56 = vpack.c.bf16 %v1540_v16, %v1539_v13 }
 0x4bd   : > { %5621 = vmatprep.mubr.msk.bf16.mxu0 %vm1370_vm1, %v1551_v56 }
 0x4be   : > { %5622 = vmatmul.mubr.msk.bf16.vlgmr.msra.gmra.mrb[32].mxu0 %vm1370_vm1, %v1552_v48 }
 0x4bf   : > { %5646 = vmatpush3.bf16.xpose.msra.mxu0 %v1859_v27 }
 0x4c0   : > { %5882 = vmatprep.subr.msk.bf16.mxu0 %vm1191_vm0, %v7291_v37 }
 0x4c2   : > { %v1511_v28 = vpop.xlane.xlu0 %1510 }
 0x4c6   : > { %v1505_v30 = vpop.xlane.xlu0 %1504 }
 0x4c7   : > { %5648 = vmatpush3.bf16.xpose.msra.mxu0 %v1862_v43 }
 0x4c8   : > { %5883 = vmatprep.subr.msk.bf16.mxu0 %vm1191_vm0, %v1843_v2 }
 0x4cf   : > { %5650 = vmatpush3.bf16.xpose.msra.mxu0 %v1865_v22 }
 0x4e4   : > { %v1514_v29 = vpop.xlane.xlu0 %1513 }
 0x4e5   : > { %6224 = vrcp.f32 %v1514_v29 }
 0x4e6   : > { %6226 = vrcp.f32 %v1505_v30 }
 0x4e7   : > { %6228 = vrcp.f32 %v1511_v28 }
 0x4e8   : > { %v1508_v59 = vpop.xlane.xlu1 %1507  ;;  %v1720_v34 = vpop.permute.xlu0 %1719 }
 0x4e9   : > { %6230 = vrcp.f32 %v1508_v59  ;;  %5642 = vmatmul.mubr.msk.bf16.gmra.mrb[44].mxu1 %vm1191_vm0, %v1720_v34 }
 0x4ec   : > { %v1845_v55 = vpop.permute.xlu1 %1844  ;;  %v1827_v37 = vpop.permute.xlu0 %1826 }
 0x4ed   : > { %5884 = vmatprep.subr.msk.bf16.mxu0 %vm1191_vm0, %v1845_v55  ;;  %v1868_v47 = vsel %vm1191_vm0, %v1845_v55, 0 }
 0x4ee   : > { %5652 = vmatpush3.bf16.xpose.msra.mxu0 %v1868_v47 }
 0x4ef   : > { %v6225_v45 = vpop.eup %6224 }
 0x4f0   : > { %v1829_v25 = vpop.permute.xlu1 %1828  ;;  %v1831_v41 = vpop.permute.xlu0 %1830  ;;  %v1546_v60 = vmul.f32 %v6225_v45, %v7295_v53 }
 0x4f1   : > { %v6227_v51 = vpop.eup %6226 }
 0x4f2   : > { %v6229_v57 = vpop.eup %6228  ;;  %v1543_v62 = vmul.f32 %v6227_v51, %v7287_v10 }
 0x4f3   : > { %v6231_v44 = vpop.eup %6230  ;;  %v1545_v15 = vmul.f32 %v6229_v57, %v7281_v50 }
 0x4f4   : > { %v1833_v17 = vpop.permute.xlu1 %1832  ;;  %v2124_v11 = vpop.permute.xlu0 %2123  ;;  %v1544_v35 = vmul.f32 %v6231_v44, %v7299_v7 }
 0x4f5   : > { %5661 = vmatprep.subr.bf16.mxu1 %v2124_v11  ;;  %v1554_v63 = vpack.c.bf16 %v1546_v60, %v1545_v15 }
 0x4f6   : > { %5662 = vmatpush3.bf16.msra.mxu1 %v2124_v11  ;;  %v1553_v12 = vpack.c.bf16 %v1544_v35, %v1543_v62 }
 0x4f8   : > { %v2126_v40 = vpop.permute.xlu1 %2125  ;;  %5625 = vmatprep.mubr.msk.bf16.mxu0 %vm1370_vm1, %v1553_v12  ;;  %v7391_v61 = vpop.permute.xlu0 %2313 }
 0x4f9   : > { %5626 = vmatmul.mubr.msk.bf16.gmra.mrb[36].mxu0 %vm1370_vm1, %v1554_v63  ;;  %5663 = vmatprep.subr.bf16.mxu1 %v2126_v40 }
 0x4fa   : > { %5653 = vmatprep.mubr.msk.bf16.mxu0 %vm1191_vm0, %v1827_v37  ;;  %5664 = vmatpush3.bf16.msra.mxu1 %v2126_v40 }
 0x4fc   : > { %v2128_v10 = vpop.permute.xlu1 %2127  ;;  %v2217_v53 = vpop.permute.xlu0 %2216 }
 0x4fd   : > { %5665 = vmatprep.subr.bf16.mxu1 %v2128_v10  ;;  %5677 = vmatprep.subr.bf16.mxu0 %v2217_v53 }
 0x4fe   : > { %5666 = vmatpush3.bf16.msra.mxu1 %v2128_v10 }
 0x500   : > { %v2130_v50 = vpop.permute.xlu1 %2129  ;;  %v2219_v7 = vpop.permute.xlu0 %2218 }
 0x501   : > { %5654 = vmatmul.mubr.msk.bf16.vlgmr.msra.gmra.mrb[40].mxu0 %vm1191_vm0, %v1829_v25  ;;  %5667 = vmatprep.subr.bf16.mxu1 %v2130_v50 }
 0x502   : > { %5678 = vmatpush3.bf16.msra.mxu0 %v2217_v53  ;;  %5657 = vmatprep.mubr.msk.bf16.mxu0 %vm1191_vm0, %v1831_v41 }
 0x503   : > { %5668 = vmatpush3.bf16.msra.mxu1 %v2130_v50  ;;  %5679 = vmatprep.subr.bf16.mxu0 %v2219_v7 }
 0x504   : > { %5885 = vmatprep.subr.msk.bf16.mxu1 %vm1191_vm0, %v7391_v61  ;;  %v7399_v49 = vpop.permute.xlu1 %2315  ;;  %v7401_v9 = vpop.permute.xlu0 %2317 }
 0x506   : > { %5680 = vmatpush3.bf16.msra.mxu0 %v2219_v7 }
 0x508   : > { %v2221_v13 = vpop.permute.xlu1 %2220  ;;  %v2223_v16 = vpop.permute.xlu0 %2222 }
 0x509   : > { %5658 = vmatmul.mubr.msk.bf16.gmra.mrb[44].mxu0 %vm1191_vm0, %v1833_v17  ;;  %5681 = vmatprep.subr.bf16.mxu0 %v2221_v13 }
 0x50a   : > { %5682 = vmatpush3.bf16.msra.mxu0 %v2221_v13 }
 0x50b   : > { %5683 = vmatprep.subr.bf16.mxu0 %v2223_v16 }
 0x50e   : > { %5684 = vmatpush3.bf16.msra.mxu0 %v2223_v16 }
 0x56b   : > { %v7404_v3 = vpop.f32.mrb[32].mxu1 }
 0x56c   : > { %8964 = vst [vmem:[#allocation8_spill] sm:$0xff] %v7404_v3  ;;  %v7406_v56 = vpop.f32.mrb[33].mxu1 }
 0x56d   : > { %8965 = vst [vmem:[#allocation9_spill] sm:$0xff] %v7406_v56  ;;  %v7408_v48 = vpop.f32.mrb[34].mxu1 }
 0x56e   : > { %8966 = vst [vmem:[#allocation10_spill] sm:$0xff] %v7408_v48  ;;  %v7410_v27 = vpop.f32.mrb[35].mxu1 }
 0x56f   : > { %8967 = vst [vmem:[#allocation11_spill] sm:$0xff] %v7410_v27 }
 0x573   : > { %v7412_v43 = vpop.f32.mrb[36].mxu1 }
 0x574   : > { %8968 = vst [vmem:[#allocation12_spill] sm:$0xff] %v7412_v43  ;;  %v7414_v2 = vpop.f32.mrb[37].mxu1 }
 0x575   : > { %8969 = vst [vmem:[#allocation13_spill] sm:$0xff] %v7414_v2  ;;  %v7416_v22 = vpop.f32.mrb[38].mxu1 }
 0x576   : > { %8970 = vst [vmem:[#allocation14_spill] sm:$0xff] %v7416_v22  ;;  %v7418_v28 = vpop.f32.mrb[39].mxu1 }
 0x577   : > { %8971 = vst [vmem:[#allocation15_spill] sm:$0xff] %v7418_v28 }
 0x58b   : > { %v5639_v30 = vpop.f32.mrb[40].mxu1 }
 0x58c   : > { %v7420_v29 = vpop.f32.mrb[41].mxu1  ;;  %v1941_v59 = vsel %vm1370_vm1, %v5639_v30, -inf }
 0x58d   : > { %1942 = vmax.xlane.f32.xlu0 %v1941_v59  ;;  %v7423_v34 = vpop.f32.mrb[42].mxu1  ;;  %v1935_v47 = vsel %vm1370_vm1, %v7420_v29, -inf }
 0x58e   : > { %v7425_v55 = vpop.f32.mrb[43].mxu1  ;;  %v1944_v57 = vsel %vm1370_vm1, %v7423_v34, -inf }
 0x58f   : > { %v1938_v37 = vsel %vm1370_vm1, %v7425_v55, -inf }
 0x590   : > { %1939 = vmax.xlane.f32.xlu1 %v1938_v37 }
 0x591   : > { %1936 = vmax.xlane.f32.xlu0 %v1935_v47  ;;  %v7431_v45 = vpop.f32.mrb[32].mxu0 }
 0x592   : > { %8972 = vst [vmem:[#allocation16_spill] sm:$0xff] %v7431_v45  ;;  %v7433_v25 = vpop.f32.mrb[33].mxu0 }
 0x593   : > { %8973 = vst [vmem:[#allocation17_spill] sm:$0xff] %v7433_v25  ;;  %v7435_v41 = vpop.f32.mrb[34].mxu0 }
 0x594   : > { %8974 = vst [vmem:[#allocation18_spill] sm:$0xff] %v7435_v41  ;;  %v7437_v51 = vpop.f32.mrb[35].mxu0 }
 0x595   : > { %8975 = vst [vmem:[#allocation19_spill] sm:$0xff] %v7437_v51  ;;  %1945 = vmax.xlane.f32.xlu0 %v1944_v57 }
 0x5bc   : > { %v7441_v44 = vpop.f32.mrb[44].mxu1 }
 0x5bd   : > { %v7443_v60 = vpop.f32.mrb[45].mxu1  ;;  %v1953_v17 = vsel %vm1370_vm1, %v7441_v44, -inf }
 0x5be   : > { %1954 = vmax.xlane.f32.xlu0 %v1953_v17  ;;  %v7447_v11 = vpop.f32.mrb[46].mxu1  ;;  %v1947_v15 = vsel %vm1370_vm1, %v7443_v60, -inf }
 0x5bf   : > { %v7449_v62 = vpop.f32.mrb[47].mxu1  ;;  %v1956_v35 = vsel %vm1370_vm1, %v7447_v11, -inf }
 0x5c0   : > { %1957 = vmax.xlane.f32.xlu1 %v1956_v35  ;;  %v1950_v12 = vsel %vm1370_vm1, %v7449_v62, -inf }
 0x5c2   : > { %1948 = vmax.xlane.f32.xlu0 %v1947_v15 }
 0x5c4   : > { %1951 = vmax.xlane.f32.xlu1 %v1950_v12 }
 0x5cc   : > { %v7457_v63 = vpop.f32.mrb[36].mxu0 }
 0x5cd   : > { %8976 = vst [vmem:[#allocation20_spill] sm:$0xff] %v7457_v63  ;;  %v7459_v40 = vpop.f32.mrb[37].mxu0 }
 0x5ce   : > { %8977 = vst [vmem:[#allocation21_spill] sm:$0xff] %v7459_v40  ;;  %v7461_v10 = vpop.f32.mrb[38].mxu0 }
 0x5cf   : > { %8978 = vst [vmem:[#allocation22_spill] sm:$0xff] %v7461_v10  ;;  %v7463_v53 = vpop.f32.mrb[39].mxu0 }
 0x5d0   : > { %8979 = vst [vmem:[#allocation23_spill] sm:$0xff] %v7463_v53 }
 0x5d4   : > { %v7465_v50 = vpop.f32.mrb[40].mxu0 }
 0x5d5   : > { %v7467_v7 = vpop.f32.mrb[41].mxu0  ;;  %v1965_v13 = vsel %vm1370_vm1, %v7465_v50, -inf }
 0x5d6   : > { %1966 = vmax.xlane.f32.xlu0 %v1965_v13  ;;  %v7471_v16 = vpop.f32.mrb[42].mxu0  ;;  %v1959_v47 = vsel %vm1370_vm1, %v7467_v7, -inf }
 0x5d7   : > { %v7473_v59 = vpop.f32.mrb[43].mxu0  ;;  %v1968_v37 = vsel %vm1370_vm1, %v7471_v16, -inf }
 0x5d8   : > { %1969 = vmax.xlane.f32.xlu1 %v1968_v37  ;;  %v1962_v57 = vsel %vm1370_vm1, %v7473_v59, -inf }
 0x5da   : > { %1960 = vmax.xlane.f32.xlu0 %v1959_v47 }
 0x5dc   : > { %1963 = vmax.xlane.f32.xlu1 %v1962_v57  ;;  %v7481_v17 = vpop.f32.mrb[44].mxu0 }
 0x5dd   : > { %v7483_v35 = vpop.f32.mrb[45].mxu0  ;;  %v1977_v15 = vsel %vm1370_vm1, %v7481_v17, -inf }
 0x5de   : > { %1978 = vmax.xlane.f32.xlu0 %v1977_v15  ;;  %v7487_v12 = vpop.f32.mrb[46].mxu0  ;;  %v1971_v37 = vsel %vm1370_vm1, %v7483_v35, -inf }
 0x5df   : > { %v7489_v13 = vpop.f32.mrb[47].mxu0  ;;  %v1980_v47 = vsel %vm1370_vm1, %v7487_v12, -inf }
 0x5e0   : > { %v1974_v57 = vsel %vm1370_vm1, %v7489_v13, -inf }
 0x5e2   : > { %1972 = vmax.xlane.f32.xlu0 %v1971_v37 }
 0x5ed   : > { %2307 = vrot.lane.b32.xlu1 %v7037_v18, %s6614_s25 }
 0x5f1   : > { %2418 = vrot.lane.b32.xlu1 %v7091_v6, %s6614_s25 }
 0x5f8   : > { %2305 = vrot.lane.b32.xlu0 %v7039_v19, %s6614_s25 }
 0x615   : > { %1981 = vmax.xlane.f32.xlu1 %v1980_v47 }
 0x619   : > { %1975 = vmax.xlane.f32.xlu1 %v1974_v57 }
 0x61a   : > { %v1943_v15 = vpop.xlane.xlu0 %1942 }
 0x61b   : > { %v1985_v46 = vsub.f32 %v5639_v30, %v1943_v15  ;;  %v7514_v30 = vpop.permute.xlu1 %2319 }
 0x61d   : > { %v2003_v37 = vmul.f32 1.442695, %v1985_v46 }
 0x61e   : > { %v1937_v40 = vpop.xlane.xlu0 %1936 }
 0x61f   : > { %6232 = vpow2.f32 %v2003_v37  ;;  %v1983_v53 = vsub.f32 %v7420_v29, %v1937_v40  ;;  %v1940_v40 = vpop.xlane.xlu1 %1939 }
 0x621   : > { %v1999_v63 = vmul.f32 1.442695, %v1983_v53  ;;  %v1984_v53 = vsub.f32 %v7425_v55, %v1940_v40 }
 0x622   : > { %v1946_v29 = vpop.xlane.xlu0 %1945 }
 0x623   : > { %6234 = vpow2.f32 %v1999_v63  ;;  %v1986_v63 = vsub.f32 %v7423_v34, %v1946_v29  ;;  %v2001_v15 = vmul.f32 1.442695, %v1984_v53 }
 0x625   : > { %v2005_v57 = vmul.f32 1.442695, %v1986_v63 }
 0x627   : > { %6236 = vpow2.f32 %v2005_v57 }
 0x628   : > { %6238 = vpow2.f32 %v2001_v15 }
 0x629   : > { %v7504_v10 = vpop.eup %6232 }
 0x62a   : > { %2420 = vrot.lane.b32.xlu1 %v7103_v20, %s6614_s25  ;;  %v2037_v47 = vsel %vm1370_vm1, %v7504_v10, 0.0 }
 0x62b   : > { %2038 = vadd.xlane.f32.xlu0 %v2037_v47 }
 0x62d   : > { %v7510_v25 = vpop.eup %6234 }
 0x62e   : > { %v2031_v46 = vsel %vm1370_vm1, %v7510_v25, 0.0 }
 0x62f   : > { %2032 = vadd.xlane.f32.xlu0 %v2031_v46 }
 0x631   : > { %v7518_v37 = vpop.eup %6236 }
 0x632   : > { %v2040_v46 = vsel %vm1370_vm1, %v7518_v37, 0.0  ;;  %v7523_v41 = vpop.eup %6238 }
 0x633   : > { %v2034_v53 = vsel %vm1370_vm1, %v7523_v41, 0.0 }
 0x64b   : > { %v1955_v47 = vpop.xlane.xlu0 %1954 }
 0x64c   : > { %v1989_v51 = vsub.f32 %v7441_v44, %v1955_v47 }
 0x64d   : > { %v1958_v45 = vpop.xlane.xlu1 %1957 }
 0x64e   : > { %v2011_v2 = vmul.f32 1.442695, %v1989_v51  ;;  %v1990_v34 = vsub.f32 %v7447_v11, %v1958_v45  ;;  %2041 = vadd.xlane.f32.xlu1 %v2040_v46 }
 0x64f   : > { %v1949_v55 = vpop.xlane.xlu0 %1948 }
 0x650   : > { %6240 = vpow2.f32 %v2011_v2  ;;  %v1987_v29 = vsub.f32 %v7443_v60, %v1949_v55  ;;  %v2013_v63 = vmul.f32 1.442695, %v1990_v34 }
 0x651   : > { %v1952_v40 = vpop.xlane.xlu1 %1951 }
 0x652   : > { %v2007_v44 = vmul.f32 1.442695, %v1987_v29  ;;  %v1988_v57 = vsub.f32 %v7449_v62, %v1952_v40  ;;  %2035 = vadd.xlane.f32.xlu1 %v2034_v53 }
 0x654   : > { %6242 = vpow2.f32 %v2007_v44  ;;  %v2009_v15 = vmul.f32 1.442695, %v1988_v57 }
 0x655   : > { %6244 = vpow2.f32 %v2013_v63 }
 0x656   : > { %6246 = vpow2.f32 %v2009_v15 }
 0x65a   : > { %v7530_v51 = vpop.eup %6240 }
 0x65b   : > { %v2049_v2 = vsel %vm1370_vm1, %v7530_v51, 0.0 }
 0x65c   : > { %2050 = vadd.xlane.f32.xlu0 %v2049_v2 }
 0x65e   : > { %v7534_v45 = vpop.eup %6242 }
 0x65f   : > { %v7536_v60 = vpop.eup %6244  ;;  %v2043_v11 = vsel %vm1370_vm1, %v7534_v45, 0.0 }
 0x660   : > { %v7540_v47 = vpop.eup %6246  ;;  %2044 = vadd.xlane.f32.xlu0 %v2043_v11  ;;  %v2052_v34 = vsel %vm1370_vm1, %v7536_v60, 0.0 }
 0x661   : > { %v2046_v62 = vsel %vm1370_vm1, %v7540_v47, 0.0 }
 0x662   : > { %2047 = vadd.xlane.f32.xlu1 %v2046_v62 }
 0x663   : > { %v1967_v46 = vpop.xlane.xlu0 %1966 }
 0x664   : > { %v1993_v55 = vsub.f32 %v7465_v50, %v1967_v46  ;;  %2053 = vadd.xlane.f32.xlu0 %v2052_v34 }
 0x665   : > { %v1970_v29 = vpop.xlane.xlu1 %1969 }
 0x666   : > { %v2019_v63 = vmul.f32 1.442695, %v1993_v55  ;;  %v1994_v40 = vsub.f32 %v7471_v16, %v1970_v29 }
 0x667   : > { %v1961_v53 = vpop.xlane.xlu0 %1960 }
 0x668   : > { %6248 = vpow2.f32 %v2019_v63  ;;  %v1991_v44 = vsub.f32 %v7467_v7, %v1961_v53  ;;  %v2021_v15 = vmul.f32 1.442695, %v1994_v40 }
 0x669   : > { %v1964_v57 = vpop.xlane.xlu1 %1963 }
 0x66a   : > { %v2015_v2 = vmul.f32 1.442695, %v1991_v44  ;;  %v1992_v11 = vsub.f32 %v7473_v59, %v1964_v57 }
 0x66b   : > { %v1979_v29 = vpop.xlane.xlu0 %1978 }
 0x66c   : > { %6250 = vpow2.f32 %v2015_v2  ;;  %v2017_v28 = vmul.f32 1.442695, %v1992_v11  ;;  %v1997_v40 = vsub.f32 %v7481_v17, %v1979_v29 }
 0x66d   : > { %v7550_v62 = vpop.permute.xlu1 %2307  ;;  %6252 = vpow2.f32 %v2021_v15 }
 0x66e   : > { %6254 = vpow2.f32 %v2017_v28  ;;  %v2027_v44 = vmul.f32 1.442695, %v1997_v40 }
 0x66f   : > { %v1973_v53 = vpop.xlane.xlu0 %1972 }
 0x670   : > { %v1995_v57 = vsub.f32 %v7483_v35, %v1973_v53  ;;  %6256 = vpow2.f32 %v2027_v44 }
 0x671   : > { %v7552_v50 = vpop.permute.xlu1 %2418 }
 0x672   : > { %v7554_v46 = vpop.eup %6248  ;;  %5889 = vmatprep.subr.msk.bf16.mxu0 %vm1191_vm0, %v7552_v50  ;;  %v2023_v15 = vmul.f32 1.442695, %v1995_v57 }
 0x673   : > { %v2061_v7 = vsel %vm1370_vm1, %v7554_v46, 0.0 }
 0x674   : > { %2062 = vadd.xlane.f32.xlu1 %v2061_v7  ;;  %6258 = vpow2.f32 %v2023_v15 }
 0x676   : > { %v7560_v16 = vpop.eup %6250 }
 0x677   : > { %v2055_v59 = vsel %vm1370_vm1, %v7560_v16, 0.0  ;;  %v7564_v34 = vpop.eup %6252 }
 0x678   : > { %2056 = vadd.xlane.f32.xlu1 %v2055_v59  ;;  %v2064_v28 = vsel %vm1370_vm1, %v7564_v34, 0.0  ;;  %v7570_v55 = vpop.eup %6254 }
 0x679   : > { %v2058_v63 = vsel %vm1370_vm1, %v7570_v55, 0.0 }
 0x67a   : > { %2422 = vrot.lane.b32.xlu0 %v7115_v31, %s6614_s25  ;;  %v7578_v2 = vpop.eup %6256 }
 0x67b   : > { %v2073_v11 = vsel %vm1370_vm1, %v7578_v2, 0.0 }
 0x67c   : > { %2065 = vadd.xlane.f32.xlu1 %v2064_v28 }
 0x67e   : > { %v7582_v7 = vpop.eup %6258 }
 0x67f   : > { %v2067_v17 = vsel %vm1370_vm1, %v7582_v7, 0.0 }
 0x680   : > { %2059 = vadd.xlane.f32.xlu1 %v2058_v63 }
 0x691   : > { %2309 = vrot.lane.b32.xlu1 %v7057_v36, %s6614_s25 }
 0x699   : > { %2074 = vadd.xlane.f32.xlu0 %v2073_v11 }
 0x69d   : > { %2068 = vadd.xlane.f32.xlu0 %v2067_v17 }
 0x6a2   : > { %v1982_v59 = vpop.xlane.xlu1 %1981 }
 0x6a3   : > { %v1998_v35 = vsub.f32 %v7487_v12, %v1982_v59  ;;  %v7606_v12 = vpop.permute.xlu0 %2305 }
 0x6a5   : > { %v2029_v28 = vmul.f32 1.442695, %v1998_v35 }
 0x6a6   : > { %v1976_v29 = vpop.xlane.xlu1 %1975 }
 0x6a7   : > { %6260 = vpow2.f32 %v2029_v28  ;;  %v1996_v63 = vsub.f32 %v7489_v13, %v1976_v29 }
 0x6a9   : > { %v2025_v40 = vmul.f32 1.442695, %v1996_v63 }
 0x6aa   : > { %v7614_v11 = vpop.permute.xlu1 %2420 }
 0x6ab   : > { %6262 = vpow2.f32 %v2025_v40 }
 0x6b1   : > { %v7588_v53 = vpop.eup %6260 }
 0x6b2   : > { %v2076_v44 = vsel %vm1370_vm1, %v7588_v53, 0.0 }
 0x6b3   : > { %2077 = vadd.xlane.f32.xlu0 %v2076_v44 }
 0x6b5   : > { %v7592_v57 = vpop.eup %6262 }
 0x6b6   : > { %v2070_v15 = vsel %vm1370_vm1, %v7592_v57, 0.0 }
 0x6b7   : > { %2071 = vadd.xlane.f32.xlu1 %v2070_v15 }
 0x6b8   : > { %v2039_v13 = vpop.xlane.xlu0 %2038 }
 0x6bc   : > { %v2033_v17 = vpop.xlane.xlu0 %2032 }
 0x6c8   : > { %2424 = vrot.lane.b32.xlu1 %v7123_v39, %s6614_s25 }
 0x6c9   : > { %2311 = vrot.lane.b32.xlu0 %v7055_v14, %s6614_s25 }
 0x6cc   : > { %2412 = vrot.lane.b32.xlu1 %v7071_v4, %s6614_s25 }
 0x6cd   : > { %2410 = vrot.lane.b32.xlu0 %v7073_v52, %s6614_s25 }
 0x6d0   : > { %2416 = vrot.lane.b32.xlu1 %v7087_v1, %s6614_s25 }
 0x6d1   : > { %2414 = vrot.lane.b32.xlu0 %v7089_v5, %s6614_s25 }
 0x6d4   : > { %2701 = vrot.lane.b32.xlu1 %v7043_v23, %s6614_s25 }
 0x6d5   : > { %2699 = vrot.lane.b32.xlu0 %v7027_v0, %s6614_s25 }
 0x6d8   : > { %2703 = vrot.lane.b32.xlu1 %v7061_v32, %s6614_s25 }
 0x6d9   : > { %2885 = vrot.lane.b32.xlu0 %v7025_v33, %s6615_s24 }
 0x6db   : > { %v2042_v59 = vpop.xlane.xlu1 %2041 }
 0x6dc   : > { %2705 = vrot.lane.b32.xlu1 %v7077_v58, %s6614_s25  ;;  %6264 = vrcp.f32 %v2042_v59 }
 0x6dd   : > { %2788 = vrot.lane.b32.xlu0 %v7093_v8, %s6614_s25  ;;  %6266 = vrcp.f32 %v2033_v17 }
 0x6de   : > { %6268 = vrcp.f32 %v2039_v13 }
 0x6df   : > { %v2036_v35 = vpop.xlane.xlu1 %2035 }
 0x6e0   : > { %6270 = vrcp.f32 %v2036_v35  ;;  %2887 = vrot.lane.b32.xlu1 %v7041_v21, %s6615_s24 }
 0x6e1   : > { %2790 = vrot.lane.b32.xlu0 %v7105_v26, %s6614_s25 }
 0x6e4   : > { %2792 = vrot.lane.b32.xlu1 %v7117_v24, %s6614_s25 }
 0x6e5   : > { %2889 = vrot.lane.b32.xlu0 %v7059_v38, %s6615_s24 }
 0x6e6   : > { %v6265_v33 = vpop.eup %6264 }
 0x6e7   : > { %v6267_v28 = vpop.eup %6266  ;;  %v2098_v40 = vmul.f32 %v6265_v33, %v7518_v37  ;;  %v2334_v37 = vsel %vm1191_vm0, %v7391_v61, 0 }
 0x6e8   : > { %2891 = vrot.lane.b32.xlu1 %v7075_v54, %s6615_s24  ;;  %v6269_v29 = vpop.eup %6268  ;;  %v2095_v44 = vmul.f32 %v6267_v28, %v7510_v25 }
 0x6e9   : > { %2794 = vrot.lane.b32.xlu0 %v7125_v42, %s6614_s25  ;;  %v2051_v63 = vpop.xlane.xlu0 %2050  ;;  %v2097_v13 = vmul.f32 %v6269_v29, %v7504_v10  ;;  %v2337_v10 = vsel %vm1191_vm0, %v7399_v49, 0 }
 0x6ea   : > { %v6271_v21 = vpop.eup %6270 }
 0x6eb   : > { %v2096_v15 = vmul.f32 %v6271_v21, %v7523_v41  ;;  %v2112_v59 = vpack.c.bf16 %v2098_v40, %v2097_v13 }
 0x6ed   : > { %v2045_v38 = vpop.xlane.xlu0 %2044  ;;  %v2111_v17 = vpack.c.bf16 %v2096_v15, %v2095_v44 }
 0x6ee   : > { %6272 = vrcp.f32 %v2045_v38 }
 0x6ef   : > { %6274 = vrcp.f32 %v2051_v63  ;;  %v2048_v54 = vpop.xlane.xlu1 %2047  ;;  %5669 = vmatprep.mubr.msk.bf16.mxu1 %vm1370_vm1, %v2111_v17 }
 0x6f0   : > { %6276 = vrcp.f32 %v2048_v54  ;;  %5670 = vmatmul.mubr.msk.bf16.vlgmr.msra.gmra.mrb[48].mxu1 %vm1370_vm1, %v2112_v59 }
 0x6f1   : > { %5694 = vmatpush3.bf16.xpose.msra.mxu1 %v2334_v37  ;;  %v2054_v25 = vpop.xlane.xlu0 %2053 }
 0x6f2   : > { %5886 = vmatprep.subr.msk.bf16.mxu1 %vm1191_vm0, %v7399_v49  ;;  %6278 = vrcp.f32 %v2054_v25  ;;  %v2340_v49 = vsel %vm1191_vm0, %v7401_v9, 0 }
 0x6f8   : > { %v6273_v41 = vpop.eup %6272 }
 0x6f9   : > { %v6275_v35 = vpop.eup %6274  ;;  %5696 = vmatpush3.bf16.xpose.msra.mxu1 %v2337_v10  ;;  %v2099_v28 = vmul.f32 %v6273_v41, %v7534_v45 }
 0x6fa   : > { %v6277_v33 = vpop.eup %6276  ;;  %5887 = vmatprep.subr.msk.bf16.mxu1 %vm1191_vm0, %v7401_v9  ;;  %v2101_v21 = vmul.f32 %v6275_v35, %v7530_v51  ;;  %v2343_v51 = vsel %vm1191_vm0, %v7514_v30, 0 }
 0x6fb   : > { %v2100_v61 = vmul.f32 %v6277_v33, %v7540_v47 }
 0x6fc   : > { %v6279_v29 = vpop.eup %6278 }
 0x6fd   : > { %v2113_v63 = vpack.c.bf16 %v2100_v61, %v2099_v28  ;;  %v2102_v40 = vmul.f32 %v6279_v29, %v7536_v60 }
 0x6ff   : > { %5673 = vmatprep.mubr.msk.bf16.mxu1 %vm1370_vm1, %v2113_v63  ;;  %v2114_v44 = vpack.c.bf16 %v2102_v40, %v2101_v21 }
 0x701   : > { %5698 = vmatpush3.bf16.xpose.msra.mxu1 %v2340_v49  ;;  %v2063_v15 = vpop.xlane.xlu1 %2062 }
 0x702   : > { %5674 = vmatmul.mubr.msk.bf16.gmra.mrb[52].mxu1 %vm1370_vm1, %v2114_v44  ;;  %5888 = vmatprep.subr.msk.bf16.mxu1 %vm1191_vm0, %v7514_v30 }
 0x703   : > { %5701 = vmatprep.mubr.msk.bf16.mxu1 %vm1191_vm0, %v7606_v12 }
 0x705   : > { %v2057_v45 = vpop.xlane.xlu1 %2056 }
 0x709   : > { %5700 = vmatpush3.bf16.xpose.msra.mxu1 %v2343_v51  ;;  %v2066_v60 = vpop.xlane.xlu1 %2065 }
 0x70a   : > { %6280 = vrcp.f32 %v2066_v60 }
 0x70b   : > { %6282 = vrcp.f32 %v2057_v45 }
 0x70c   : > { %6284 = vrcp.f32 %v2063_v15 }
 0x70d   : > { %v2060_v9 = vpop.xlane.xlu1 %2059 }
 0x70e   : > { %6286 = vrcp.f32 %v2060_v9 }
 0x710   : > { %5702 = vmatmul.mubr.msk.bf16.vlgmr.msra.gmra.mrb[56].mxu1 %vm1191_vm0, %v7550_v62  ;;  %v2439_v62 = vsel %vm1191_vm0, %v7552_v50, 0 }
 0x711   : > { %v2310_v47 = vpop.permute.xlu1 %2309 }
 0x712   : > { %5705 = vmatprep.mubr.msk.bf16.mxu1 %vm1191_vm0, %v2310_v47 }
 0x714   : > { %v6281_v13 = vpop.eup %6280 }
 0x715   : > { %v6283_v38 = vpop.eup %6282  ;;  %v2106_v59 = vmul.f32 %v6281_v13, %v7564_v34  ;;  %v2423_v34 = vpop.permute.xlu0 %2422 }
 0x716   : > { %v6285_v12 = vpop.eup %6284  ;;  %v2103_v30 = vmul.f32 %v6283_v38, %v7560_v16  ;;  %v2442_v16 = vsel %vm1191_vm0, %v7614_v11, 0 }
 0x717   : > { %v2105_v37 = vmul.f32 %v6285_v12, %v7554_v46  ;;  %v2445_v46 = vsel %vm1191_vm0, %v2423_v34, 0 }
 0x718   : > { %v6287_v17 = vpop.eup %6286 }
 0x719   : > { %v2104_v54 = vmul.f32 %v6287_v17, %v7570_v55  ;;  %v2116_v41 = vpack.c.bf16 %v2106_v59, %v2105_v37 }
 0x71b   : > { %v2115_v25 = vpack.c.bf16 %v2104_v54, %v2103_v30 }
 0x71d   : > { %5685 = vmatprep.mubr.msk.bf16.mxu0 %vm1370_vm1, %v2115_v25 }
 0x71e   : > { %5686 = vmatmul.mubr.msk.bf16.vlgmr.msra.gmra.mrb[48].mxu0 %vm1370_vm1, %v2116_v41 }
 0x71f   : > { %5710 = vmatpush3.bf16.xpose.msra.mxu0 %v2439_v62 }
 0x720   : > { %5890 = vmatprep.subr.msk.bf16.mxu0 %vm1191_vm0, %v7614_v11 }
 0x726   : > { %v2075_v55 = vpop.xlane.xlu0 %2074 }
 0x727   : > { %5712 = vmatpush3.bf16.xpose.msra.mxu0 %v2442_v16 }
 0x728   : > { %5891 = vmatprep.subr.msk.bf16.mxu0 %vm1191_vm0, %v2423_v34 }
 0x72a   : > { %v2069_v10 = vpop.xlane.xlu0 %2068 }
 0x72f   : > { %5714 = vmatpush3.bf16.xpose.msra.mxu0 %v2445_v46 }
 0x740   : > { %v2078_v35 = vpop.xlane.xlu0 %2077 }
 0x741   : > { %6288 = vrcp.f32 %v2078_v35 }
 0x742   : > { %6290 = vrcp.f32 %v2069_v10 }
 0x743   : > { %6292 = vrcp.f32 %v2075_v55 }
 0x744   : > { %v2072_v50 = vpop.xlane.xlu1 %2071  ;;  %v2312_v33 = vpop.permute.xlu0 %2311 }
 0x745   : > { %6294 = vrcp.f32 %v2072_v50  ;;  %5706 = vmatmul.mubr.msk.bf16.gmra.mrb[60].mxu1 %vm1191_vm0, %v2312_v33 }
 0x748   : > { %v2425_v28 = vpop.permute.xlu1 %2424  ;;  %v2411_v11 = vpop.permute.xlu0 %2410 }
 0x749   : > { %5892 = vmatprep.subr.msk.bf16.mxu0 %vm1191_vm0, %v2425_v28  ;;  %v2448_v61 = vsel %vm1191_vm0, %v2425_v28, 0 }
 0x74a   : > { %5716 = vmatpush3.bf16.xpose.msra.mxu0 %v2448_v61 }
 0x74b   : > { %v6289_v29 = vpop.eup %6288 }
 0x74c   : > { %v2413_v63 = vpop.permute.xlu1 %2412  ;;  %v2415_v21 = vpop.permute.xlu0 %2414  ;;  %v2110_v15 = vmul.f32 %v6289_v29, %v7588_v53 }
 0x74d   : > { %v6291_v40 = vpop.eup %6290 }
 0x74e   : > { %v6293_v44 = vpop.eup %6292  ;;  %v2107_v60 = vmul.f32 %v6291_v40, %v7582_v7 }
 0x74f   : > { %v6295_v49 = vpop.eup %6294  ;;  %v2109_v47 = vmul.f32 %v6293_v44, %v7578_v2 }
 0x750   : > { %v2417_v45 = vpop.permute.xlu1 %2416  ;;  %v2700_v51 = vpop.permute.xlu0 %2699  ;;  %v2108_v9 = vmul.f32 %v6295_v49, %v7592_v57 }
 0x751   : > { %5725 = vmatprep.subr.bf16.mxu1 %v2700_v51  ;;  %v2118_v38 = vpack.c.bf16 %v2110_v15, %v2109_v47 }
 0x752   : > { %5726 = vmatpush3.bf16.msra.mxu1 %v2700_v51  ;;  %v2117_v13 = vpack.c.bf16 %v2108_v9, %v2107_v60 }
 0x754   : > { %v2702_v12 = vpop.permute.xlu1 %2701  ;;  %5689 = vmatprep.mubr.msk.bf16.mxu0 %vm1370_vm1, %v2117_v13  ;;  %v7689_v17 = vpop.permute.xlu0 %2885 }
 0x755   : > { %5690 = vmatmul.mubr.msk.bf16.gmra.mrb[52].mxu0 %vm1370_vm1, %v2118_v38  ;;  %5727 = vmatprep.subr.bf16.mxu1 %v2702_v12 }
 0x756   : > { %5717 = vmatprep.mubr.msk.bf16.mxu0 %vm1191_vm0, %v2411_v11  ;;  %5728 = vmatpush3.bf16.msra.mxu1 %v2702_v12 }
 0x758   : > { %v2704_v7 = vpop.permute.xlu1 %2703  ;;  %v2789_v53 = vpop.permute.xlu0 %2788 }
 0x759   : > { %5729 = vmatprep.subr.bf16.mxu1 %v2704_v7  ;;  %5741 = vmatprep.subr.bf16.mxu0 %v2789_v53 }
 0x75a   : > { %5730 = vmatpush3.bf16.msra.mxu1 %v2704_v7 }
 0x75c   : > { %v2706_v2 = vpop.permute.xlu1 %2705  ;;  %v2791_v57 = vpop.permute.xlu0 %2790 }
 0x75d   : > { %5718 = vmatmul.mubr.msk.bf16.vlgmr.msra.gmra.mrb[56].mxu0 %vm1191_vm0, %v2413_v63  ;;  %5731 = vmatprep.subr.bf16.mxu1 %v2706_v2 }
 0x75e   : > { %5742 = vmatpush3.bf16.msra.mxu0 %v2789_v53  ;;  %5721 = vmatprep.mubr.msk.bf16.mxu0 %vm1191_vm0, %v2415_v21 }
 0x75f   : > { %5732 = vmatpush3.bf16.msra.mxu1 %v2706_v2  ;;  %5743 = vmatprep.subr.bf16.mxu0 %v2791_v57 }
 0x760   : > { %5893 = vmatprep.subr.msk.bf16.mxu1 %vm1191_vm0, %v7689_v17  ;;  %v7697_v59 = vpop.permute.xlu1 %2887  ;;  %v7699_v30 = vpop.permute.xlu0 %2889 }
 0x762   : > { %5744 = vmatpush3.bf16.msra.mxu0 %v2791_v57 }
 0x764   : > { %v2793_v54 = vpop.permute.xlu1 %2792  ;;  %v2795_v37 = vpop.permute.xlu0 %2794 }
 0x765   : > { %5722 = vmatmul.mubr.msk.bf16.gmra.mrb[60].mxu0 %vm1191_vm0, %v2417_v45  ;;  %5745 = vmatprep.subr.bf16.mxu0 %v2793_v54 }
 0x766   : > { %5746 = vmatpush3.bf16.msra.mxu0 %v2793_v54 }
 0x767   : > { %5747 = vmatprep.subr.bf16.mxu0 %v2795_v37 }
 0x76a   : > { %5748 = vmatpush3.bf16.msra.mxu0 %v2795_v37 }
 0x7c3   : > { %v7702_v25 = vpop.f32.mrb[48].mxu1 }
 0x7c4   : > { %v7704_v41 = vpop.f32.mrb[49].mxu1 }
 0x7c5   : > { %v7706_v62 = vpop.f32.mrb[50].mxu1 }
 0x7c6   : > { %v7710_v34 = vpop.f32.mrb[51].mxu1 }
 0x7d5   : > { %v7714_v55 = vpop.f32.mrb[52].mxu1 }
 0x7d6   : > { %v7716_v10 = vpop.f32.mrb[53].mxu1 }
 0x7d7   : > { %v7718_v35 = vpop.f32.mrb[54].mxu1 }
 0x7d8   : > { %v7722_v33 = vpop.f32.mrb[55].mxu1 }
 0x7e3   : > { %v7726_v11 = vpop.f32.mrb[56].mxu1 }
 0x7e4   : > { %v7728_v61 = vpop.f32.mrb[57].mxu1  ;;  %v2521_v29 = vsel %vm1370_vm1, %v7726_v11, -inf }
 0x7e5   : > { %2522 = vmax.xlane.f32.xlu0 %v2521_v29  ;;  %v7732_v63 = vpop.f32.mrb[58].mxu1  ;;  %v2515_v44 = vsel %vm1370_vm1, %v7728_v61, -inf }
 0x7e6   : > { %v7734_v21 = vpop.f32.mrb[59].mxu1  ;;  %v2524_v49 = vsel %vm1370_vm1, %v7732_v63, -inf }
 0x7e7   : > { %v2518_v40 = vsel %vm1370_vm1, %v7734_v21, -inf }
 0x7e8   : > { %2519 = vmax.xlane.f32.xlu1 %v2518_v40 }
 0x7e9   : > { %2516 = vmax.xlane.f32.xlu0 %v2515_v44 }
 0x7ed   : > { %2525 = vmax.xlane.f32.xlu0 %v2524_v49 }
 0x7f1   : > { %v7742_v15 = vpop.f32.mrb[48].mxu0 }
 0x7f2   : > { %v7744_v45 = vpop.f32.mrb[49].mxu0 }
 0x7f3   : > { %v7746_v51 = vpop.f32.mrb[50].mxu0 }
 0x7f4   : > { %v7750_v9 = vpop.f32.mrb[51].mxu0 }
 0x818   : > { %v7754_v13 = vpop.f32.mrb[60].mxu1 }
 0x819   : > { %v7756_v38 = vpop.f32.mrb[61].mxu1  ;;  %v2533_v12 = vsel %vm1370_vm1, %v7754_v13, -inf }
 0x81a   : > { %2534 = vmax.xlane.f32.xlu0 %v2533_v12  ;;  %v7760_v7 = vpop.f32.mrb[62].mxu1  ;;  %v2527_v57 = vsel %vm1370_vm1, %v7756_v38, -inf }
 0x81b   : > { %v7762_v53 = vpop.f32.mrb[63].mxu1  ;;  %v2536_v2 = vsel %vm1370_vm1, %v7760_v7, -inf }
 0x81c   : > { %2537 = vmax.xlane.f32.xlu1 %v2536_v2  ;;  %v2530_v54 = vsel %vm1370_vm1, %v7762_v53, -inf }
 0x81e   : > { %2528 = vmax.xlane.f32.xlu0 %v2527_v57 }
 0x820   : > { %2531 = vmax.xlane.f32.xlu1 %v2530_v54 }
 0x828   : > { %v7770_v37 = vpop.f32.mrb[52].mxu0 }
 0x829   : > { %v7772_v29 = vpop.f32.mrb[53].mxu0 }
 0x82a   : > { %8980 = vst [vmem:[#allocation24_spill] sm:$0xff] %v7772_v29  ;;  %v7774_v40 = vpop.f32.mrb[54].mxu0 }
 0x82b   : > { %v7778_v49 = vpop.f32.mrb[55].mxu0 }
 0x830   : > { %v7782_v2 = vpop.f32.mrb[56].mxu0 }
 0x831   : > { %2879 = vrot.lane.b32.xlu1 %v7037_v18, %s6615_s24  ;;  %v7786_v57 = vpop.f32.mrb[57].mxu0  ;;  %v2545_v54 = vsel %vm1370_vm1, %v7782_v2, -inf }
 0x832   : > { %2546 = vmax.xlane.f32.xlu0 %v2545_v54  ;;  %v7790_v47 = vpop.f32.mrb[58].mxu0  ;;  %v2539_v12 = vsel %vm1370_vm1, %v7786_v57, -inf }
 0x833   : > { %v7792_v60 = vpop.f32.mrb[59].mxu0  ;;  %v2548_v54 = vsel %vm1370_vm1, %v7790_v47, -inf }
 0x835   : > { %2990 = vrot.lane.b32.xlu1 %v7091_v6, %s6615_s24  ;;  %v2542_v6 = vsel %vm1370_vm1, %v7792_v60, -inf }
 0x836   : > { %2540 = vmax.xlane.f32.xlu0 %v2539_v12 }
 0x838   : > { %v7798_v44 = vpop.f32.mrb[60].mxu0 }
 0x839   : > { %v7800_v18 = vpop.f32.mrb[61].mxu0  ;;  %v2557_v46 = vsel %vm1370_vm1, %v7798_v44, -inf }
 0x83a   : > { %v7802_v28 = vpop.f32.mrb[62].mxu0 }
 0x83b   : > { %v7804_v50 = vpop.f32.mrb[63].mxu0  ;;  %v2560_v12 = vsel %vm1370_vm1, %v7802_v28, -inf }
 0x83c   : > { %v2554_v16 = vsel %vm1370_vm1, %v7804_v50, -inf }
 0x84c   : > { %2877 = vrot.lane.b32.xlu0 %v7039_v19, %s6615_s24  ;;  %v2551_v19 = vsel %vm1370_vm1, %v7800_v18, -inf }
 0x859   : > { %2549 = vmax.xlane.f32.xlu1 %v2548_v54 }
 0x85d   : > { %2543 = vmax.xlane.f32.xlu1 %v2542_v6 }
 0x861   : > { %2561 = vmax.xlane.f32.xlu1 %v2560_v12 }
 0x865   : > { %2555 = vmax.xlane.f32.xlu1 %v2554_v16 }
 0x86b   : > { %2558 = vmax.xlane.f32.xlu0 %v2557_v46  ;;  %v7826_v46 = vpop.permute.xlu1 %2891 }
 0x86f   : > { %2552 = vmax.xlane.f32.xlu0 %v2551_v19 }
 0x872   : > { %v2523_v54 = vpop.xlane.xlu0 %2522 }
 0x873   : > { %v2565_v43 = vsub.f32 %v7726_v11, %v2523_v54 }
 0x875   : > { %v2583_v6 = vmul.f32 1.442695, %v2565_v43  ;;  %v2520_v54 = vpop.xlane.xlu1 %2519 }
 0x876   : > { %v2517_v22 = vpop.xlane.xlu0 %2516  ;;  %2992 = vrot.lane.b32.xlu1 %v7103_v20, %s6615_s24 }
 0x877   : > { %6296 = vpow2.f32 %v2583_v6  ;;  %v2563_v12 = vsub.f32 %v7728_v61, %v2517_v22  ;;  %v2564_v22 = vsub.f32 %v7734_v21, %v2520_v54 }
 0x879   : > { %v2579_v16 = vmul.f32 1.442695, %v2563_v12  ;;  %v2581_v6 = vmul.f32 1.442695, %v2564_v22 }
 0x87a   : > { %v2526_v48 = vpop.xlane.xlu0 %2525 }
 0x87b   : > { %6298 = vpow2.f32 %v2579_v16  ;;  %v2566_v43 = vsub.f32 %v7732_v63, %v2526_v48 }
 0x87d   : > { %v2585_v61 = vmul.f32 1.442695, %v2566_v43 }
 0x87f   : > { %6300 = vpow2.f32 %v2585_v61 }
 0x880   : > { %6302 = vpow2.f32 %v2581_v6 }
 0x881   : > { %v7824_v3 = vpop.eup %6296 }
 0x882   : > { %v2617_v19 = vsel %vm1370_vm1, %v7824_v3, 0.0 }
 0x883   : > { %2618 = vadd.xlane.f32.xlu0 %v2617_v19 }
 0x885   : > { %v7831_v11 = vpop.eup %6298 }
 0x886   : > { %v2611_v20 = vsel %vm1370_vm1, %v7831_v11, 0.0 }
 0x887   : > { %2612 = vadd.xlane.f32.xlu0 %v2611_v20 }
 0x889   : > { %v7836_v12 = vpop.eup %6300 }
 0x88a   : > { %v2620_v16 = vsel %vm1370_vm1, %v7836_v12, 0.0  ;;  %v7840_v19 = vpop.eup %6302 }
 0x88b   : > { %v2614_v48 = vsel %vm1370_vm1, %v7840_v19, 0.0 }
 0x89a   : > { %2621 = vadd.xlane.f32.xlu1 %v2620_v16 }
 0x89e   : > { %2615 = vadd.xlane.f32.xlu1 %v2614_v48 }
 0x8a7   : > { %v2535_v63 = vpop.xlane.xlu0 %2534 }
 0x8a8   : > { %v2569_v20 = vsub.f32 %v7754_v13, %v2535_v63 }
 0x8a9   : > { %v2538_v21 = vpop.xlane.xlu1 %2537 }
 0x8aa   : > { %v2591_v43 = vmul.f32 1.442695, %v2569_v20  ;;  %v2570_v54 = vsub.f32 %v7760_v7, %v2538_v21 }
 0x8ab   : > { %v2529_v22 = vpop.xlane.xlu0 %2528 }
 0x8ac   : > { %6304 = vpow2.f32 %v2591_v43  ;;  %v2567_v61 = vsub.f32 %v7756_v38, %v2529_v22  ;;  %v2593_v6 = vmul.f32 1.442695, %v2570_v54 }
 0x8ad   : > { %v2532_v56 = vpop.xlane.xlu1 %2531 }
 0x8ae   : > { %v2587_v27 = vmul.f32 1.442695, %v2567_v61  ;;  %v2568_v16 = vsub.f32 %v7762_v53, %v2532_v56 }
 0x8b0   : > { %6306 = vpow2.f32 %v2587_v27  ;;  %v2589_v29 = vmul.f32 1.442695, %v2568_v16 }
 0x8b1   : > { %6308 = vpow2.f32 %v2593_v6  ;;  %v7848_v48 = vpop.permute.xlu1 %2879 }
 0x8b2   : > { %6310 = vpow2.f32 %v2589_v29 }
 0x8b5   : > { %v7850_v13 = vpop.permute.xlu1 %2990 }
 0x8b6   : > { %v7852_v63 = vpop.eup %6304  ;;  %5897 = vmatprep.subr.msk.bf16.mxu0 %vm1191_vm0, %v7850_v13 }
 0x8b7   : > { %v2629_v38 = vsel %vm1370_vm1, %v7852_v63, 0.0 }
 0x8b8   : > { %2630 = vadd.xlane.f32.xlu0 %v2629_v38 }
 0x8ba   : > { %v7858_v7 = vpop.eup %6306 }
 0x8bb   : > { %v7860_v56 = vpop.eup %6308  ;;  %v2623_v27 = vsel %vm1370_vm1, %v7858_v7, 0.0 }
 0x8bc   : > { %v7864_v53 = vpop.eup %6310  ;;  %2624 = vadd.xlane.f32.xlu0 %v2623_v27  ;;  %v2632_v21 = vsel %vm1370_vm1, %v7860_v56, 0.0 }
 0x8bd   : > { %v2626_v29 = vsel %vm1370_vm1, %v7864_v53, 0.0 }
 0x8be   : > { %2627 = vadd.xlane.f32.xlu1 %v2626_v29 }
 0x8bf   : > { %v2547_v20 = vpop.xlane.xlu0 %2546 }
 0x8c0   : > { %v2573_v43 = vsub.f32 %v7782_v2, %v2547_v20  ;;  %2633 = vadd.xlane.f32.xlu0 %v2632_v21 }
 0x8c2   : > { %v2599_v54 = vmul.f32 1.442695, %v2573_v43 }
 0x8c3   : > { %v2541_v22 = vpop.xlane.xlu0 %2540 }
 0x8c4   : > { %6312 = vpow2.f32 %v2599_v54  ;;  %v2571_v61 = vsub.f32 %v7786_v57, %v2541_v22 }
 0x8c6   : > { %v2595_v6 = vmul.f32 1.442695, %v2571_v61 }
 0x8c7   : > { %v7884_v22 = vpop.permute.xlu0 %2877 }
 0x8c8   : > { %6314 = vpow2.f32 %v2595_v6 }
 0x8ce   : > { %v7872_v16 = vpop.eup %6312 }
 0x8cf   : > { %v2641_v38 = vsel %vm1370_vm1, %v7872_v16, 0.0 }
 0x8d0   : > { %2642 = vadd.xlane.f32.xlu1 %v2641_v38 }
 0x8d2   : > { %v7876_v27 = vpop.eup %6314 }
 0x8d3   : > { %v2635_v29 = vsel %vm1370_vm1, %v7876_v27, 0.0 }
 0x8d4   : > { %2636 = vadd.xlane.f32.xlu1 %v2635_v29 }
 0x8d6   : > { %2881 = vrot.lane.b32.xlu0 %v7057_v36, %s6615_s24 }
 0x8e6   : > { %v2550_v2 = vpop.xlane.xlu1 %2549 }
 0x8e7   : > { %v2574_v57 = vsub.f32 %v7790_v47, %v2550_v2 }
 0x8e9   : > { %v2601_v20 = vmul.f32 1.442695, %v2574_v57 }
 0x8ea   : > { %v2544_v21 = vpop.xlane.xlu1 %2543 }
 0x8eb   : > { %6316 = vpow2.f32 %v2601_v20  ;;  %v2572_v43 = vsub.f32 %v7792_v60, %v2544_v21 }
 0x8ed   : > { %v2597_v54 = vmul.f32 1.442695, %v2572_v43 }
 0x8ee   : > { %v2562_v38 = vpop.xlane.xlu1 %2561 }
 0x8ef   : > { %6318 = vpow2.f32 %v2597_v54  ;;  %v2578_v60 = vsub.f32 %v7802_v28, %v2562_v38 }
 0x8f1   : > { %v2609_v43 = vmul.f32 1.442695, %v2578_v60 }
 0x8f5   : > { %v7886_v61 = vpop.eup %6316 }
 0x8f6   : > { %v2644_v6 = vsel %vm1370_vm1, %v7886_v61, 0.0 }
 0x8f7   : > { %2645 = vadd.xlane.f32.xlu1 %v2644_v6 }
 0x8f8   : > { %v2559_v36 = vpop.xlane.xlu0 %2558 }
 0x8f9   : > { %v7890_v29 = vpop.eup %6318  ;;  %v2577_v47 = vsub.f32 %v7798_v44, %v2559_v36 }
 0x8fa   : > { %v2638_v2 = vsel %vm1370_vm1, %v7890_v29, 0.0 }
 0x8fb   : > { %v2607_v57 = vmul.f32 1.442695, %v2577_v47  ;;  %2639 = vadd.xlane.f32.xlu1 %v2638_v2  ;;  %v2556_v47 = vpop.xlane.xlu1 %2555 }
 0x8fc   : > { %v2553_v20 = vpop.xlane.xlu0 %2552  ;;  %v2576_v2 = vsub.f32 %v7804_v50, %v2556_v47 }
 0x8fd   : > { %6320 = vpow2.f32 %v2607_v57  ;;  %v2575_v21 = vsub.f32 %v7800_v18, %v2553_v20 }
 0x8fe   : > { %v2605_v60 = vmul.f32 1.442695, %v2576_v2 }
 0x8ff   : > { %v2603_v54 = vmul.f32 1.442695, %v2575_v21  ;;  %v7912_v20 = vpop.permute.xlu1 %2992 }
 0x901   : > { %6322 = vpow2.f32 %v2603_v54 }
 0x902   : > { %6324 = vpow2.f32 %v2609_v43 }
 0x903   : > { %6326 = vpow2.f32 %v2605_v60 }
 0x907   : > { %v7897_v6 = vpop.eup %6320 }
 0x908   : > { %v2653_v44 = vsel %vm1370_vm1, %v7897_v6, 0.0 }
 0x909   : > { %2654 = vadd.xlane.f32.xlu0 %v2653_v44 }
 0x90b   : > { %v7901_v36 = vpop.eup %6322 }
 0x90c   : > { %2883 = vrot.lane.b32.xlu1 %v7055_v14, %s6615_s24  ;;  %v2647_v28 = vsel %vm1370_vm1, %v7901_v36, 0.0  ;;  %v7907_v38 = vpop.eup %6324 }
 0x90d   : > { %2648 = vadd.xlane.f32.xlu0 %v2647_v28  ;;  %v2656_v18 = vsel %vm1370_vm1, %v7907_v38, 0.0  ;;  %v7918_v54 = vpop.eup %6326 }
 0x90e   : > { %v2650_v50 = vsel %vm1370_vm1, %v7918_v54, 0.0 }
 0x910   : > { %v2619_v57 = vpop.xlane.xlu0 %2618 }
 0x911   : > { %2657 = vadd.xlane.f32.xlu0 %v2656_v18 }
 0x914   : > { %v2613_v21 = vpop.xlane.xlu0 %2612 }
 0x927   : > { %v2622_v14 = vpop.xlane.xlu1 %2621  ;;  %2994 = vrot.lane.b32.xlu0 %v7115_v31, %s6615_s24 }
 0x928   : > { %6328 = vrcp.f32 %v2622_v14 }
 0x929   : > { %6330 = vrcp.f32 %v2613_v21 }
 0x92a   : > { %6332 = vrcp.f32 %v2619_v57 }
 0x92b   : > { %v2616_v43 = vpop.xlane.xlu1 %2615  ;;  %2982 = vrot.lane.b32.xlu0 %v7073_v52, %s6615_s24 }
 0x92c   : > { %6334 = vrcp.f32 %v2616_v43 }
 0x92f   : > { %2986 = vrot.lane.b32.xlu0 %v7089_v5, %s6615_s24 }
 0x930   : > { %2651 = vadd.xlane.f32.xlu1 %v2650_v50 }
 0x932   : > { %v6329_v44 = vpop.eup %6328 }
 0x933   : > { %3271 = vrot.lane.b32.xlu0 %v7027_v0, %s6615_s24  ;;  %v6331_v31 = vpop.eup %6330  ;;  %v2678_v47 = vmul.f32 %v6329_v44, %v7836_v12  ;;  %v2906_v0 = vsel %vm1191_vm0, %v7689_v17, 0 }
 0x934   : > { %v6333_v28 = vpop.eup %6332  ;;  %v2675_v52 = vmul.f32 %v6331_v31, %v7831_v11  ;;  %v2909_v11 = vsel %vm1191_vm0, %v7697_v59, 0 }
 0x935   : > { %v2677_v60 = vmul.f32 %v6333_v28, %v7824_v3 }
 0x936   : > { %v6335_v18 = vpop.eup %6334 }
 0x937   : > { %v2676_v2 = vmul.f32 %v6335_v18, %v7840_v19  ;;  %v2692_v57 = vpack.c.bf16 %v2678_v47, %v2677_v60  ;;  %v2915_v19 = vsel %vm1191_vm0, %v7826_v46, 0 }
 0x939   : > { %v2691_v5 = vpack.c.bf16 %v2676_v2, %v2675_v52 }
 0x93b   : > { %5733 = vmatprep.mubr.msk.bf16.mxu1 %vm1370_vm1, %v2691_v5 }
 0x93c   : > { %5734 = vmatmul.mubr.msk.bf16.vlgmr.msra.gmra.mrb[64].mxu1 %vm1370_vm1, %v2692_v57 }
 0x93d   : > { %5758 = vmatpush3.bf16.xpose.msra.mxu1 %v2906_v0 }
 0x93e   : > { %5894 = vmatprep.subr.msk.bf16.mxu1 %vm1191_vm0, %v7697_v59 }
 0x941   : > { %2996 = vrot.lane.b32.xlu1 %v7123_v39, %s6615_s24  ;;  %v2912_v39 = vsel %vm1191_vm0, %v7699_v30, 0 }
 0x945   : > { %5760 = vmatpush3.bf16.xpose.msra.mxu1 %v2909_v11  ;;  %2984 = vrot.lane.b32.xlu1 %v7071_v4, %s6615_s24  ;;  %v2631_v3 = vpop.xlane.xlu0 %2630 }
 0x946   : > { %5895 = vmatprep.subr.msk.bf16.mxu1 %vm1191_vm0, %v7699_v30 }
 0x949   : > { %2988 = vrot.lane.b32.xlu1 %v7087_v1, %s6615_s24  ;;  %v2625_v17 = vpop.xlane.xlu0 %2624 }
 0x94a   : > { %6336 = vrcp.f32 %v2625_v17  ;;  %v3011_v17 = vsel %vm1191_vm0, %v7850_v13, 0 }
 0x94b   : > { %6338 = vrcp.f32 %v2631_v3  ;;  %v2628_v12 = vpop.xlane.xlu1 %2627 }
 0x94c   : > { %6340 = vrcp.f32 %v2628_v12 }
 0x94d   : > { %5762 = vmatpush3.bf16.xpose.msra.mxu1 %v2912_v39  ;;  %v2634_v59 = vpop.xlane.xlu0 %2633 }
 0x94e   : > { %5896 = vmatprep.subr.msk.bf16.mxu1 %vm1191_vm0, %v7826_v46  ;;  %6342 = vrcp.f32 %v2634_v59 }
 0x951   : > { %v2882_v46 = vpop.permute.xlu0 %2881 }
 0x954   : > { %v6337_v4 = vpop.eup %6336 }
 0x955   : > { %v6339_v21 = vpop.eup %6338  ;;  %5764 = vmatpush3.bf16.xpose.msra.mxu1 %v2915_v19  ;;  %v2679_v14 = vmul.f32 %v6337_v4, %v7858_v7 }
 0x956   : > { %v6341_v1 = vpop.eup %6340  ;;  %v2681_v30 = vmul.f32 %v6339_v21, %v7852_v63 }
 0x957   : > { %v2680_v43 = vmul.f32 %v6341_v1, %v7864_v53 }
 0x958   : > { %v6343_v50 = vpop.eup %6342 }
 0x959   : > { %v2693_v44 = vpack.c.bf16 %v2680_v43, %v2679_v14  ;;  %v2682_v31 = vmul.f32 %v6343_v50, %v7860_v56 }
 0x95b   : > { %5737 = vmatprep.mubr.msk.bf16.mxu1 %vm1370_vm1, %v2693_v44  ;;  %v2694_v28 = vpack.c.bf16 %v2682_v31, %v2681_v30 }
 0x95d   : > { %5738 = vmatmul.mubr.msk.bf16.gmra.mrb[68].mxu1 %vm1370_vm1, %v2694_v28  ;;  %v2643_v7 = vpop.xlane.xlu1 %2642 }
 0x95e   : > { %5765 = vmatprep.mubr.msk.bf16.mxu1 %vm1191_vm0, %v7884_v22 }
 0x961   : > { %v2637_v53 = vpop.xlane.xlu1 %2636 }
 0x965   : > { %5766 = vmatmul.mubr.msk.bf16.vlgmr.msra.gmra.mrb[72].mxu1 %vm1191_vm0, %v7848_v48 }
 0x966   : > { %5769 = vmatprep.mubr.msk.bf16.mxu1 %vm1191_vm0, %v2882_v46 }
 0x984   : > { %v2646_v18 = vpop.xlane.xlu1 %2645 }
 0x985   : > { %6344 = vrcp.f32 %v2646_v18 }
 0x986   : > { %6346 = vrcp.f32 %v2637_v53 }
 0x987   : > { %6348 = vrcp.f32 %v2643_v7 }
 0x988   : > { %v2640_v63 = vpop.xlane.xlu1 %2639 }
 0x989   : > { %6350 = vrcp.f32 %v2640_v63 }
 0x98c   : > { %v2884_v56 = vpop.permute.xlu1 %2883 }
 0x98d   : > { %5770 = vmatmul.mubr.msk.bf16.gmra.mrb[76].mxu1 %vm1191_vm0, %v2884_v56 }
 0x98f   : > { %v6345_v47 = vpop.eup %6344 }
 0x990   : > { %v6347_v52 = vpop.eup %6346  ;;  %v2686_v60 = vmul.f32 %v6345_v47, %v7886_v61  ;;  %v3014_v61 = vsel %vm1191_vm0, %v7912_v20, 0 }
 0x991   : > { %v6349_v22 = vpop.eup %6348  ;;  %v2683_v48 = vmul.f32 %v6347_v52, %v7876_v27 }
 0x992   : > { %v2685_v57 = vmul.f32 %v6349_v22, %v7872_v16 }
 0x993   : > { %v6351_v2 = vpop.eup %6350 }
 0x994   : > { %v2684_v5 = vmul.f32 %v6351_v2, %v7890_v29  ;;  %v2696_v3 = vpack.c.bf16 %v2686_v60, %v2685_v57 }
 0x996   : > { %v2655_v0 = vpop.xlane.xlu0 %2654  ;;  %v2695_v11 = vpack.c.bf16 %v2684_v5, %v2683_v48 }
 0x998   : > { %5749 = vmatprep.mubr.msk.bf16.mxu0 %vm1370_vm1, %v2695_v11 }
 0x999   : > { %5750 = vmatmul.mubr.msk.bf16.vlgmr.msra.gmra.mrb[64].mxu0 %vm1370_vm1, %v2696_v3 }
 0x99a   : > { %5774 = vmatpush3.bf16.xpose.msra.mxu0 %v3011_v17  ;;  %v2649_v12 = vpop.xlane.xlu0 %2648 }
 0x99b   : > { %5898 = vmatprep.subr.msk.bf16.mxu0 %vm1191_vm0, %v7912_v20 }
 0x99e   : > { %v2658_v27 = vpop.xlane.xlu0 %2657 }
 0x99f   : > { %6352 = vrcp.f32 %v2658_v27 }
 0x9a0   : > { %6354 = vrcp.f32 %v2649_v12 }
 0x9a1   : > { %6356 = vrcp.f32 %v2655_v0 }
 0x9a2   : > { %5776 = vmatpush3.bf16.xpose.msra.mxu0 %v3014_v61  ;;  %v2995_v16 = vpop.permute.xlu0 %2994 }
 0x9a3   : > { %5899 = vmatprep.subr.msk.bf16.mxu0 %vm1191_vm0, %v2995_v16  ;;  %v3017_v39 = vsel %vm1191_vm0, %v2995_v16, 0 }
 0x9a6   : > { %v2983_v29 = vpop.permute.xlu0 %2982 }
 0x9a9   : > { %v6353_v21 = vpop.eup %6352 }
 0x9aa   : > { %5778 = vmatpush3.bf16.xpose.msra.mxu0 %v3017_v39  ;;  %v2987_v59 = vpop.permute.xlu0 %2986  ;;  %v6355_v1 = vpop.eup %6354  ;;  %v2690_v50 = vmul.f32 %v6353_v21, %v7907_v38 }
 0x9ab   : > { %v6357_v14 = vpop.eup %6356  ;;  %v2687_v44 = vmul.f32 %v6355_v1, %v7901_v36 }
 0x9ac   : > { %v2689_v31 = vmul.f32 %v6357_v14, %v7897_v6 }
 0x9ae   : > { %v3272_v4 = vpop.permute.xlu0 %3271  ;;  %v2698_v46 = vpack.c.bf16 %v2690_v50, %v2689_v31 }
 0x9af   : > { %5789 = vmatprep.subr.bf16.mxu1 %v3272_v4 }
 0x9b0   : > { %5790 = vmatpush3.bf16.msra.mxu1 %v3272_v4 }
 0x9bd   : > { %v2652_v13 = vpop.xlane.xlu1 %2651 }
 0x9be   : > { %6358 = vrcp.f32 %v2652_v13 }
 0x9c1   : > { %v2997_v19 = vpop.permute.xlu1 %2996 }
 0x9c2   : > { %5900 = vmatprep.subr.msk.bf16.mxu0 %vm1191_vm0, %v2997_v19  ;;  %v3020_v20 = vsel %vm1191_vm0, %v2997_v19, 0 }
 0x9c3   : > { %5780 = vmatpush3.bf16.xpose.msra.mxu0 %v3020_v20 }
 0x9c5   : > { %v2985_v7 = vpop.permute.xlu1 %2984 }
 0x9c8   : > { %v6359_v43 = vpop.eup %6358 }
 0x9c9   : > { %v2688_v30 = vmul.f32 %v6359_v43, %v7918_v54  ;;  %v2989_v38 = vpop.permute.xlu1 %2988 }
 0x9cb   : > { %v2697_v28 = vpack.c.bf16 %v2688_v30, %v2687_v44 }
 0x9cd   : > { %5753 = vmatprep.mubr.msk.bf16.mxu0 %vm1370_vm1, %v2697_v28 }
 0x9ce   : > { %5754 = vmatmul.mubr.msk.bf16.gmra.mrb[68].mxu0 %vm1370_vm1, %v2698_v46 }
 0x9cf   : > { %5781 = vmatprep.mubr.msk.bf16.mxu0 %vm1191_vm0, %v2983_v29 }
 0x9d6   : > { %5782 = vmatmul.mubr.msk.bf16.vlgmr.msra.gmra.mrb[72].mxu0 %vm1191_vm0, %v2985_v7 }
 0x9d7   : > { %5785 = vmatprep.mubr.msk.bf16.mxu0 %vm1191_vm0, %v2987_v59 }
 0x9de   : > { %5786 = vmatmul.mubr.msk.bf16.gmra.mrb[76].mxu0 %vm1191_vm0, %v2989_v38 }
 0xa0f   : > { %v7990_v36 = vpop.f32.mrb[64].mxu1 }
 0xa10   : > { %v7992_v54 = vpop.f32.mrb[65].mxu1 }
 0xa11   : > { %v7994_v6 = vpop.f32.mrb[66].mxu1 }
 0xa12   : > { %v7998_v18 = vpop.f32.mrb[67].mxu1 }
 0xa30   : > { %v8002_v56 = vpop.f32.mrb[68].mxu1 }
 0xa31   : > { %v8004_v47 = vpop.f32.mrb[69].mxu1 }
 0xa32   : > { %v8006_v52 = vpop.f32.mrb[70].mxu1 }
 0xa33   : > { %v8010_v2 = vpop.f32.mrb[71].mxu1 }
 0xa38   : > { %v8014_v48 = vpop.f32.mrb[72].mxu1 }
 0xa39   : > { %v8016_v5 = vpop.f32.mrb[73].mxu1  ;;  %v3093_v57 = vsel %vm1370_vm1, %v8014_v48, -inf }
 0xa3a   : > { %3094 = vmax.xlane.f32.xlu0 %v3093_v57  ;;  %v8020_v0 = vpop.f32.mrb[74].mxu1  ;;  %v3087_v17 = vsel %vm1370_vm1, %v8016_v5, -inf }
 0xa3b   : > { %v8022_v11 = vpop.f32.mrb[75].mxu1  ;;  %v3096_v12 = vsel %vm1370_vm1, %v8020_v0, -inf }
 0xa3c   : > { %v3090_v3 = vsel %vm1370_vm1, %v8022_v11, -inf }
 0xa3d   : > { %3091 = vmax.xlane.f32.xlu1 %v3090_v3 }
 0xa3e   : > { %3088 = vmax.xlane.f32.xlu0 %v3087_v17 }
 0xa42   : > { %3097 = vmax.xlane.f32.xlu0 %v3096_v12 }
 0xa60   : > { %v8030_v27 = vpop.f32.mrb[76].mxu1 }
 0xa61   : > { %v8032_v61 = vpop.f32.mrb[77].mxu1  ;;  %v3105_v16 = vsel %vm1370_vm1, %v8030_v27, -inf }
 0xa62   : > { %3106 = vmax.xlane.f32.xlu0 %v3105_v16  ;;  %v8036_v29 = vpop.f32.mrb[78].mxu1  ;;  %v3099_v4 = vsel %vm1370_vm1, %v8032_v61, -inf }
 0xa63   : > { %v8038_v39 = vpop.f32.mrb[79].mxu1  ;;  %v3108_v59 = vsel %vm1370_vm1, %v8036_v29, -inf }
 0xa64   : > { %3109 = vmax.xlane.f32.xlu1 %v3108_v59  ;;  %v3102_v13 = vsel %vm1370_vm1, %v8038_v39, -inf }
 0xa66   : > { %3100 = vmax.xlane.f32.xlu0 %v3099_v4 }
 0xa68   : > { %3103 = vmax.xlane.f32.xlu1 %v3102_v13 }
 0xa6c   : > { %v8046_v19 = vpop.f32.mrb[64].mxu0 }
 0xa6d   : > { %v8048_v20 = vpop.f32.mrb[65].mxu0 }
 0xa6e   : > { %v8050_v21 = vpop.f32.mrb[66].mxu0 }
 0xa6f   : > { %v8054_v14 = vpop.f32.mrb[67].mxu0 }
 0xaa1   : > { %v8058_v50 = vpop.f32.mrb[68].mxu0 }
 0xaa2   : > { %v8060_v44 = vpop.f32.mrb[69].mxu0 }
 0xaa3   : > { %8981 = vst [vmem:[#allocation25_spill] sm:$0xff] %v8060_v44  ;;  %v8062_v30 = vpop.f32.mrb[70].mxu0 }
 0xaa4   : > { %v8066_v28 = vpop.f32.mrb[71].mxu0 }
 0xaa9   : > { %v8070_v7 = vpop.f32.mrb[72].mxu0 }
 0xaaa   : > { %v8072_v38 = vpop.f32.mrb[73].mxu0  ;;  %v3117_v57 = vsel %vm1370_vm1, %v8070_v7, -inf }
 0xaab   : > { %3118 = vmax.xlane.f32.xlu0 %v3117_v57  ;;  %v8076_v3 = vpop.f32.mrb[74].mxu0  ;;  %v3111_v16 = vsel %vm1370_vm1, %v8072_v38, -inf }
 0xaac   : > { %v8078_v17 = vpop.f32.mrb[75].mxu0  ;;  %v3120_v12 = vsel %vm1370_vm1, %v8076_v3, -inf }
 0xaad   : > { %3121 = vmax.xlane.f32.xlu1 %v3120_v12  ;;  %v3114_v59 = vsel %vm1370_vm1, %v8078_v17, -inf }
 0xaaf   : > { %3112 = vmax.xlane.f32.xlu0 %v3111_v16 }
 0xab1   : > { %3115 = vmax.xlane.f32.xlu1 %v3114_v59  ;;  %v8086_v4 = vpop.f32.mrb[76].mxu0 }
 0xab2   : > { %v8088_v13 = vpop.f32.mrb[77].mxu0  ;;  %v3129_v57 = vsel %vm1370_vm1, %v8086_v4, -inf }
 0xab3   : > { %3130 = vmax.xlane.f32.xlu0 %v3129_v57  ;;  %v8092_v46 = vpop.f32.mrb[78].mxu0  ;;  %v3123_v16 = vsel %vm1370_vm1, %v8088_v13, -inf }
 0xab4   : > { %v8094_v31 = vpop.f32.mrb[79].mxu0  ;;  %v3132_v12 = vsel %vm1370_vm1, %v8092_v46, -inf }
 0xab5   : > { %3133 = vmax.xlane.f32.xlu1 %v3132_v12  ;;  %v3126_v59 = vsel %vm1370_vm1, %v8094_v31, -inf }
 0xab7   : > { %3124 = vmax.xlane.f32.xlu0 %v3123_v16 }
 0xab9   : > { %3127 = vmax.xlane.f32.xlu1 %v3126_v59 }
 0xac7   : > { %v3095_v43 = vpop.xlane.xlu0 %3094 }
 0xac8   : > { %v3137_v16 = vsub.f32 %v8014_v48, %v3095_v43 }
 0xaca   : > { %3273 = vrot.lane.b32.xlu1 %v7043_v23, %s6615_s24  ;;  %v3092_v60 = vpop.xlane.xlu1 %3091  ;;  %v3155_v53 = vmul.f32 1.442695, %v3137_v16 }
 0xacb   : > { %v3089_v57 = vpop.xlane.xlu0 %3088  ;;  %v3136_v22 = vsub.f32 %v8022_v11, %v3092_v60 }
 0xacc   : > { %v3135_v63 = vsub.f32 %v8016_v5, %v3089_v57 }
 0xacd   : > { %3275 = vrot.lane.b32.xlu0 %v7061_v32, %s6615_s24  ;;  %v3153_v23 = vmul.f32 1.442695, %v3136_v22 }
 0xace   : > { %v3151_v32 = vmul.f32 1.442695, %v3135_v63 }
 0xacf   : > { %v3098_v12 = vpop.xlane.xlu0 %3097 }
 0xad0   : > { %v3138_v1 = vsub.f32 %v8020_v0, %v3098_v12 }
 0xad1   : > { %3277 = vrot.lane.b32.xlu0 %v7077_v58, %s6615_s24 }
 0xad2   : > { %v3157_v59 = vmul.f32 1.442695, %v3138_v1 }
 0xad4   : > { %6360 = vpow2.f32 %v3157_v59 }
 0xad5   : > { %6362 = vpow2.f32 %v3155_v53 }
 0xad6   : > { %6364 = vpow2.f32 %v3153_v23 }
 0xad7   : > { %6366 = vpow2.f32 %v3151_v32 }
 0xade   : > { %v8112_v44 = vpop.eup %6360 }
 0xadf   : > { %v8114_v58 = vpop.eup %6362  ;;  %v3192_v0 = vsel %vm1370_vm1, %v8112_v44, 0.0 }
 0xae0   : > { %v8118_v48 = vpop.eup %6364  ;;  %v3189_v5 = vsel %vm1370_vm1, %v8114_v58, 0.0 }
 0xae1   : > { %v8122_v22 = vpop.eup %6366  ;;  %v3186_v11 = vsel %vm1370_vm1, %v8118_v48, 0.0 }
 0xae2   : > { %v3183_v12 = vsel %vm1370_vm1, %v8122_v22, 0.0 }
 0xaee   : > { %3193 = vadd.xlane.f32.xlu1 %v3192_v0 }
 0xaef   : > { %v3107_v60 = vpop.xlane.xlu0 %3106 }
 0xaf0   : > { %v3141_v53 = vsub.f32 %v8030_v27, %v3107_v60  ;;  %3190 = vadd.xlane.f32.xlu0 %v3189_v5 }
 0xaf1   : > { %v3110_v63 = vpop.xlane.xlu1 %3109 }
 0xaf2   : > { %v3163_v1 = vmul.f32 1.442695, %v3141_v53  ;;  %v3142_v43 = vsub.f32 %v8036_v29, %v3110_v63  ;;  %3187 = vadd.xlane.f32.xlu1 %v3186_v11 }
 0xaf3   : > { %v3101_v57 = vpop.xlane.xlu0 %3100 }
 0xaf4   : > { %6368 = vpow2.f32 %v3163_v1  ;;  %v3139_v16 = vsub.f32 %v8032_v61, %v3101_v57  ;;  %3184 = vadd.xlane.f32.xlu0 %v3183_v12  ;;  %v3165_v23 = vmul.f32 1.442695, %v3142_v43 }
 0xaf5   : > { %v3104_v59 = vpop.xlane.xlu1 %3103 }
 0xaf6   : > { %v3159_v27 = vmul.f32 1.442695, %v3139_v16  ;;  %v3140_v32 = vsub.f32 %v8038_v39, %v3104_v59 }
 0xaf8   : > { %6370 = vpow2.f32 %v3159_v27  ;;  %v3161_v0 = vmul.f32 1.442695, %v3140_v32 }
 0xaf9   : > { %6372 = vpow2.f32 %v3165_v23 }
 0xafa   : > { %6374 = vpow2.f32 %v3161_v0 }
 0xafe   : > { %v8132_v60 = vpop.eup %6368 }
 0xaff   : > { %v3201_v29 = vsel %vm1370_vm1, %v8132_v60, 0.0 }
 0xb00   : > { %3202 = vadd.xlane.f32.xlu1 %v3201_v29 }
 0xb02   : > { %v8136_v5 = vpop.eup %6370 }
 0xb03   : > { %v3195_v61 = vsel %vm1370_vm1, %v8136_v5, 0.0  ;;  %v8140_v53 = vpop.eup %6372 }
 0xb04   : > { %3196 = vadd.xlane.f32.xlu1 %v3195_v61  ;;  %v3204_v39 = vsel %vm1370_vm1, %v8140_v53, 0.0  ;;  %v8144_v63 = vpop.eup %6374 }
 0xb05   : > { %v3198_v11 = vsel %vm1370_vm1, %v8144_v63, 0.0 }
 0xb08   : > { %3205 = vadd.xlane.f32.xlu1 %v3204_v39 }
 0xb0a   : > { %3360 = vrot.lane.b32.xlu0 %v7093_v8, %s6615_s24 }
 0xb0c   : > { %3199 = vadd.xlane.f32.xlu1 %v3198_v11 }
 0xb38   : > { %v3119_v1 = vpop.xlane.xlu0 %3118 }
 0xb39   : > { %v3145_v43 = vsub.f32 %v8070_v7, %v3119_v1 }
 0xb3a   : > { %v3122_v57 = vpop.xlane.xlu1 %3121 }
 0xb3b   : > { %v3171_v12 = vmul.f32 1.442695, %v3145_v43  ;;  %v3146_v16 = vsub.f32 %v8076_v3, %v3122_v57 }
 0xb3c   : > { %v3113_v59 = vpop.xlane.xlu0 %3112 }
 0xb3d   : > { %6376 = vpow2.f32 %v3171_v12  ;;  %v3143_v23 = vsub.f32 %v8072_v38, %v3113_v59  ;;  %v3173_v27 = vmul.f32 1.442695, %v3146_v16 }
 0xb3e   : > { %v3116_v32 = vpop.xlane.xlu1 %3115 }
 0xb3f   : > { %v3167_v0 = vmul.f32 1.442695, %v3143_v23  ;;  %v3144_v8 = vsub.f32 %v8078_v17, %v3116_v32 }
 0xb40   : > { %v3131_v29 = vpop.xlane.xlu0 %3130 }
 0xb41   : > { %6378 = vpow2.f32 %v3167_v0  ;;  %v3169_v61 = vmul.f32 1.442695, %v3144_v8  ;;  %v3149_v39 = vsub.f32 %v8086_v4, %v3131_v29 }
 0xb42   : > { %6380 = vpow2.f32 %v3173_v27  ;;  %v3134_v7 = vpop.xlane.xlu1 %3133 }
 0xb43   : > { %6382 = vpow2.f32 %v3169_v61  ;;  %v3179_v11 = vmul.f32 1.442695, %v3149_v39  ;;  %v3150_v3 = vsub.f32 %v8092_v46, %v3134_v7 }
 0xb44   : > { %v3125_v1 = vpop.xlane.xlu0 %3124 }
 0xb45   : > { %6384 = vpow2.f32 %v3179_v11  ;;  %v3147_v38 = vsub.f32 %v8088_v13, %v3125_v1  ;;  %v3181_v16 = vmul.f32 1.442695, %v3150_v3 }
 0xb46   : > { %v3128_v43 = vpop.xlane.xlu1 %3127 }
 0xb47   : > { %v8157_v57 = vpop.eup %6376  ;;  %v3175_v12 = vmul.f32 1.442695, %v3147_v38  ;;  %v3148_v4 = vsub.f32 %v8094_v31, %v3128_v43 }
 0xb48   : > { %v3213_v17 = vsel %vm1370_vm1, %v8157_v57, 0.0  ;;  %v3276_v59 = vpop.permute.xlu0 %3275 }
 0xb49   : > { %6386 = vpow2.f32 %v3175_v12  ;;  %3214 = vadd.xlane.f32.xlu0 %v3213_v17  ;;  %v3177_v0 = vmul.f32 1.442695, %v3148_v4  ;;  %v8982_v12 = vpack.i.bf16 %v7710_v34, %v7704_v41  ;;  %v8983_v17 = vpack.i.bf16 %v7998_v18, %v7992_v54 }
 0xb4a   : > { %v3274_v23 = vpop.permute.xlu1 %3273  ;;  %6388 = vpow2.f32 %v3181_v16 }
 0xb4b   : > { %v8162_v27 = vpop.eup %6378  ;;  %5791 = vmatprep.subr.bf16.mxu1 %v3274_v23  ;;  %6390 = vpow2.f32 %v3177_v0 }
 0xb4c   : > { %v8164_v46 = vpop.eup %6380  ;;  %5792 = vmatpush3.bf16.msra.mxu1 %v3274_v23  ;;  %v3207_v13 = vsel %vm1370_vm1, %v8162_v27, 0.0  ;;  %v3278_v29 = vpop.permute.xlu0 %3277 }
 0xb4d   : > { %v8168_v32 = vpop.eup %6382  ;;  %3208 = vadd.xlane.f32.xlu0 %v3207_v13  ;;  %5793 = vmatprep.subr.bf16.mxu1 %v3276_v59  ;;  %v3216_v61 = vsel %vm1370_vm1, %v8164_v46, 0.0 }
 0xb4e   : > { %v3210_v31 = vsel %vm1370_vm1, %v8168_v32, 0.0 }
 0xb4f   : > { %v8172_v8 = vpop.eup %6384  ;;  %3211 = vadd.xlane.f32.xlu1 %v3210_v31 }
 0xb50   : > { %5794 = vmatpush3.bf16.msra.mxu1 %v3276_v59  ;;  %v3225_v39 = vsel %vm1370_vm1, %v8172_v8, 0.0 }
 0xb51   : > { %3217 = vadd.xlane.f32.xlu0 %v3216_v61  ;;  %5795 = vmatprep.subr.bf16.mxu1 %v3278_v29 }
 0xb53   : > { %v8178_v7 = vpop.eup %6386  ;;  %3226 = vadd.xlane.f32.xlu1 %v3225_v39 }
 0xb54   : > { %5796 = vmatpush3.bf16.msra.mxu1 %v3278_v29  ;;  %v3219_v11 = vsel %vm1370_vm1, %v8178_v7, 0.0  ;;  %v8182_v1 = vpop.eup %6388 }
 0xb55   : > { %v3228_v3 = vsel %vm1370_vm1, %v8182_v1, 0.0  ;;  %v8186_v38 = vpop.eup %6390 }
 0xb56   : > { %v3222_v43 = vsel %vm1370_vm1, %v8186_v38, 0.0 }
 0xb57   : > { %3220 = vadd.xlane.f32.xlu1 %v3219_v11 }
 0xb5b   : > { %3229 = vadd.xlane.f32.xlu1 %v3228_v3 }
 0xb5f   : > { %3223 = vadd.xlane.f32.xlu1 %v3222_v43 }
 0xb67   : > { %3364 = vrot.lane.b32.xlu0 %v7117_v24, %s6615_s24  ;;  %v8984_v24 = vpack.i.bf16 %v7706_v62, %v7702_v25 }
 0xb6b   : > { %3366 = vrot.lane.b32.xlu0 %v7125_v42, %s6615_s24  ;;  %v8985_v42 = vpack.i.bf16 %v7994_v6, %v7990_v36 }
 0xb6f   : > { %5937 = vrot.lane.b32.xlu0 %v8982_v12, %s6615_s24 }
 0xb70   : > { %3362 = vrot.lane.b32.xlu1 %v7105_v26, %s6615_s24 }
 0xb73   : > { %5947 = vrot.lane.b32.xlu0 %v8983_v17, %s6614_s25 }
 0xb74   : > { %5942 = vrot.lane.b32.xlu1 %v8984_v24, %s6615_s24 }
 0xb78   : > { %5952 = vrot.lane.b32.xlu1 %v8985_v42, %s6614_s25 }
 0xb7b   : > { %v3194_v41 = vpop.xlane.xlu1 %3193 }
 0xb7d   : > { %v3191_v34 = vpop.xlane.xlu0 %3190 }
 0xb7e   : > { %6392 = vrcp.f32 %v3191_v34 }
 0xb7f   : > { %v3188_v16 = vpop.xlane.xlu1 %3187 }
 0xb80   : > { %6394 = vrcp.f32 %v3188_v16 }
 0xb81   : > { %6396 = vrcp.f32 %v3194_v41  ;;  %v3185_v26 = vpop.xlane.xlu0 %3184 }
 0xb82   : > { %6398 = vrcp.f32 %v3185_v26 }
 0xb85   : > { %v3361_v54 = vpop.permute.xlu0 %3360 }
 0xb86   : > { %5805 = vmatprep.subr.bf16.mxu0 %v3361_v54 }
 0xb87   : > { %5806 = vmatpush3.bf16.msra.mxu0 %v3361_v54 }
 0xb88   : > { %v6393_v18 = vpop.eup %6392 }
 0xb89   : > { %v3249_v59 = vmul.f32 %v6393_v18, %v8114_v58 }
 0xb8a   : > { %v6395_v4 = vpop.eup %6394 }
 0xb8b   : > { %v6397_v25 = vpop.eup %6396  ;;  %v3248_v6 = vmul.f32 %v6395_v4, %v8118_v48 }
 0xb8c   : > { %v6399_v62 = vpop.eup %6398  ;;  %v3250_v13 = vmul.f32 %v6397_v25, %v8112_v44 }
 0xb8d   : > { %v3203_v23 = vpop.xlane.xlu1 %3202  ;;  %v3247_v36 = vmul.f32 %v6399_v62, %v8122_v22 }
 0xb8e   : > { %v3264_v31 = vpack.c.bf16 %v3250_v13, %v3249_v59 }
 0xb8f   : > { %v3263_v0 = vpack.c.bf16 %v3248_v6, %v3247_v36 }
 0xb91   : > { %v3197_v29 = vpop.xlane.xlu1 %3196  ;;  %5797 = vmatprep.mubr.msk.bf16.mxu1 %vm1370_vm1, %v3263_v0 }
 0xb92   : > { %5798 = vmatmul.mubr.msk.bf16.vlgmr.msra.gmra.mrb[80].mxu1 %vm1370_vm1, %v3264_v31 }
 0xb95   : > { %v3206_v61 = vpop.xlane.xlu1 %3205 }
 0xb96   : > { %6400 = vrcp.f32 %v3206_v61 }
 0xb97   : > { %6402 = vrcp.f32 %v3197_v29 }
 0xb98   : > { %6404 = vrcp.f32 %v3203_v23 }
 0xb99   : > { %v3200_v39 = vpop.xlane.xlu1 %3199 }
 0xb9a   : > { %6406 = vrcp.f32 %v3200_v39 }
 0xba0   : > { %v6401_v58 = vpop.eup %6400 }
 0xba1   : > { %v6403_v11 = vpop.eup %6402  ;;  %v3254_v48 = vmul.f32 %v6401_v58, %v8140_v53 }
 0xba2   : > { %v6405_v22 = vpop.eup %6404  ;;  %v3251_v44 = vmul.f32 %v6403_v11, %v8136_v5 }
 0xba3   : > { %v3253_v12 = vmul.f32 %v6405_v22, %v8132_v60 }
 0xba4   : > { %v6407_v3 = vpop.eup %6406 }
 0xba5   : > { %v3252_v43 = vmul.f32 %v6407_v3, %v8144_v63  ;;  %v3266_v24 = vpack.c.bf16 %v3254_v48, %v3253_v12  ;;  %v6092_v48 = vld [vmem:[%s8939_s5 + $0x20] sm:$0xff]   ;;  %v6095_v12 = vld [vmem:[%s8939_s5 + $0x38] sm:$0xff]  }
 0xba7   : > { %v3265_v17 = vpack.c.bf16 %v3252_v43, %v3251_v44  ;;  %v6093_v44 = vld [vmem:[%s8939_s5 + $0x28] sm:$0xff]   ;;  %v6094_v43 = vld [vmem:[%s8939_s5 + $0x30] sm:$0xff]  }
 0xba9   : > { %5801 = vmatprep.mubr.msk.bf16.mxu1 %vm1370_vm1, %v3265_v17 }
 0xbaa   : > { %5802 = vmatmul.mubr.msk.bf16.gmra.mrb[84].mxu1 %vm1370_vm1, %v3266_v24 }
 0xbd6   : > { %v3215_v42 = vpop.xlane.xlu0 %3214 }
 0xbda   : > { %v3209_v41 = vpop.xlane.xlu0 %3208 }
 0xbdb   : > { %6408 = vrcp.f32 %v3209_v41 }
 0xbdc   : > { %v3212_v34 = vpop.xlane.xlu1 %3211 }
 0xbdd   : > { %6410 = vrcp.f32 %v3212_v34 }
 0xbde   : > { %v3218_v5 = vpop.xlane.xlu0 %3217 }
 0xbdf   : > { %6412 = vrcp.f32 %v3218_v5  ;;  %v8990_v5 = vpack.i.bf16 %v8010_v2, %v8004_v47  ;;  %v8994_v47 = vpack.i.bf16 %v8054_v14, %v8048_v20  ;;  %v8995_v14 = vpack.i.bf16 %v7774_v40, %v7770_v37 }
 0xbe0   : > { %v3227_v16 = vpop.xlane.xlu1 %3226  ;;  %6414 = vrcp.f32 %v3215_v42 }
 0xbe2   : > { %v3365_v62 = vpop.permute.xlu0 %3364 }
 0xbe4   : > { %v3221_v26 = vpop.xlane.xlu1 %3220 }
 0xbe5   : > { %v6409_v53 = vpop.eup %6408  ;;  %6416 = vrcp.f32 %v3221_v26  ;;  %v8987_v26 = vpack.i.bf16 %v7718_v35, %v7714_v55 }
 0xbe6   : > { %v3255_v63 = vmul.f32 %v6409_v53, %v8162_v27  ;;  %v3367_v6 = vpop.permute.xlu0 %3366  ;;  %v8988_v53 = vpack.i.bf16 %v7722_v33, %v7716_v10  ;;  %v8991_v10 = vpack.i.bf16 %v7746_v51, %v7742_v15  ;;  %v8992_v33 = vpack.i.bf16 %v7750_v9, %v7744_v45 }
 0xbe7   : > { %v6411_v54 = vpop.eup %6410 }
 0xbe8   : > { %v3230_v18 = vpop.xlane.xlu1 %3229  ;;  %v3256_v60 = vmul.f32 %v6411_v54, %v8168_v32  ;;  %v8989_v54 = vpack.i.bf16 %v8006_v52, %v8002_v56  ;;  %v8993_v56 = vpack.i.bf16 %v8050_v21, %v8046_v19 }
 0xbe9   : > { %v6413_v23 = vpop.eup %6412 }
 0xbea   : > { %v3267_v4 = vpack.c.bf16 %v3256_v60, %v3255_v63  ;;  %v6415_v36 = vpop.eup %6414  ;;  %v3258_v13 = vmul.f32 %v6413_v23, %v8164_v46  ;;  %v5938_v15 = vpop.permute.xlu0 %5937 }
 0xbeb   : > { %v3257_v31 = vmul.f32 %v6415_v36, %v8157_v57  ;;  %v6088_v57 = vld [vmem:[%s8939_s5] sm:$0xff]   ;;  %v5940_v9 = vunpack.i.h.bf16 %v5938_v15  ;;  %v5939_v19 = vunpack.i.l.bf16 %v5938_v15  ;;  %v9005_v15 = vld [vmem:[#allocation14_spill] sm:$0xff] }
 0xbec   : > { %v3224_v25 = vpop.xlane.xlu1 %3223  ;;  %5813 = vmatprep.mubr.msk.bf16.mxu0 %vm1370_vm1, %v3267_v4  ;;  %5821 = vmatprep.subr.bf16.mxu1 %v6088_v57 }
 0xbed   : > { %6418 = vrcp.f32 %v3224_v25  ;;  %v3268_v61 = vpack.c.bf16 %v3258_v13, %v3257_v31  ;;  %5822 = vmatpush3.bf16.msra.mxu1 %v6088_v57 }
 0xbee   : > { %6420 = vrcp.f32 %v3230_v18  ;;  %v5948_v21 = vpop.permute.xlu0 %5947 }
 0xbef   : > { %6422 = vrcp.f32 %v3227_v16  ;;  %v6417_v27 = vpop.eup %6416 }
 0xbf0   : > { %v3363_v59 = vpop.permute.xlu1 %3362  ;;  %v3259_v29 = vmul.f32 %v6417_v27, %v8178_v7  ;;  %v6089_v7 = vld [vmem:[%s8939_s5 + $0x8] sm:$0xff]  }
 0xbf1   : > { %5807 = vmatprep.subr.bf16.mxu0 %v3363_v59  ;;  %5823 = vmatprep.subr.bf16.mxu1 %v6089_v7 }
 0xbf2   : > { %5808 = vmatpush3.bf16.msra.mxu0 %v3363_v59  ;;  %5824 = vmatpush3.bf16.msra.mxu1 %v6089_v7  ;;  %v9000_v7 = vld [vmem:[#allocation10_spill] sm:$0xff] }
 0xbf3   : > { %5809 = vmatprep.subr.bf16.mxu0 %v3365_v62 }
 0xbf4   : > { %v5943_v2 = vpop.permute.xlu1 %5942 }
 0xbf5   : > { %v5945_v27 = vunpack.i.h.bf16 %v5943_v2  ;;  %v5944_v20 = vunpack.i.l.bf16 %v5943_v2 }
 0xbf6   : > { %5810 = vmatpush3.bf16.msra.mxu0 %v3365_v62 }
 0xbf7   : > { %v6419_v32 = vpop.eup %6418  ;;  %5811 = vmatprep.subr.bf16.mxu0 %v3367_v6 }
 0xbf8   : > { %v3260_v0 = vmul.f32 %v6419_v32, %v8186_v38  ;;  %v6421_v39 = vpop.eup %6420  ;;  %v8986_v38 = vmov 0   ;;  %v5953_v45 = vpop.permute.xlu1 %5952 }
 0xbf9   : > { %v6423_v11 = vpop.eup %6422  ;;  %v3262_v22 = vmul.f32 %v6421_v39, %v8182_v1  ;;  %v6091_v1 = vld [vmem:[%s8939_s5 + $0x18] sm:$0xff]   ;;  %v5955_v32 = vunpack.i.h.bf16 %v5953_v45  ;;  %v5954_v13 = vunpack.i.l.bf16 %v5953_v45  ;;  %v5949_v39 = vunpack.i.l.bf16 %v5948_v21 }
 0xbfa   : > { %5812 = vmatpush3.bf16.msra.mxu0 %v3367_v6  ;;  %v3269_v58 = vpack.c.bf16 %v3260_v0, %v3259_v29  ;;  %v3261_v46 = vmul.f32 %v6423_v11, %v8172_v8  ;;  %v6090_v8 = vld [vmem:[%s8939_s5 + $0x10] sm:$0xff]   ;;  %v8996_v0 = vld [vmem:[#allocation24_spill] sm:$0xff]  ;;  %v9007_v45 = vld [vmem:[#allocation15_spill] sm:$0xff] }
 0xbfb   : > { %5825 = vmatprep.subr.bf16.mxu1 %v6090_v8  ;;  %v8997_v31 = vpack.i.bf16 %v7778_v49, %v8996_v0 }
 0xbfc   : > { %v3270_v3 = vpack.c.bf16 %v3262_v22, %v3261_v46  ;;  %5826 = vmatpush3.bf16.msra.mxu1 %v6090_v8  ;;  %v8998_v22 = vld [vmem:[#allocation11_spill] sm:$0xff]  ;;  %v3644_v8 = vsel %vm1191_vm0, %v9000_v7, %v5945_v27 }
 0xbfd   : > { %5814 = vmatmul.mubr.msk.bf16.vlgmr.msra.gmra.mrb[80].mxu0 %vm1370_vm1, %v3268_v61  ;;  %5827 = vmatprep.subr.bf16.mxu1 %v6091_v1  ;;  %v5950_v61 = vunpack.i.h.bf16 %v5948_v21  ;;  %v3642_v46 = vsel %vm1191_vm0, %v8998_v22, %v5940_v9 }
 0xbfe   : > { %5817 = vmatprep.mubr.msk.bf16.mxu0 %vm1370_vm1, %v3269_v58 }
 0xc00   : > { %5828 = vmatpush3.bf16.msra.mxu1 %v6091_v1  ;;  %v9001_v1 = vld [vmem:[#allocation8_spill] sm:$0xff] }
 0xc01   : > { %5829 = vmatprep.subr.bf16.mxu1 %v6092_v48  ;;  %v3643_v49 = vsel %vm1191_vm0, %v9001_v1, %v5944_v20 }
 0xc04   : > { %5830 = vmatpush3.bf16.msra.mxu1 %v6092_v48 }
 0xc05   : > { %5818 = vmatmul.mubr.msk.bf16.gmra.mrb[84].mxu0 %vm1370_vm1, %v3270_v3  ;;  %5831 = vmatprep.subr.bf16.mxu1 %v6093_v44  ;;  %v8999_v3 = vld [vmem:[#allocation9_spill] sm:$0xff] }
 0xc06   : > { %4268 = vmatprep.mubr.bf16.mxu0 %v8986_v38  ;;  %v3641_v37 = vsel %vm1191_vm0, %v8999_v3, %v5939_v19  ;;  %v9008_v19 = vld [vmem:[#allocation13_spill] sm:$0xff] }
 0xc08   : > { %5832 = vmatpush3.bf16.msra.mxu1 %v6093_v44 }
 0xc09   : > { %5833 = vmatprep.subr.bf16.mxu1 %v6094_v43 }
 0xc0c   : > { %5834 = vmatpush3.bf16.msra.mxu1 %v6094_v43  ;;  %v9002_v43 = vpack.i.bf16 %v8062_v30, %v8058_v50 }
 0xc0d   : > { %5835 = vmatprep.subr.bf16.mxu1 %v6095_v12 }
 0xc10   : > { %5836 = vmatpush3.bf16.msra.mxu1 %v6095_v12 }
 0xc65   : > { %v5799_v17 = vpop.f32.mrb[80].mxu1 }
 0xc66   : > { %v3329_v24 = vpop.f32.mrb[81].mxu1 }
 0xc67   : > { %v5800_v42 = vpop.f32.mrb[82].mxu1 }
 0xc68   : > { %v5961_v41 = vpack.i.bf16 %v5800_v42, %v5799_v17  ;;  %v3332_v34 = vpop.f32.mrb[83].mxu1  ;;  %v3659_v17 = vsel %vm1370_vm1, %v3643_v49, %v5954_v13 }
 0xc69   : > { %v5956_v16 = vpack.i.bf16 %v3332_v34, %v3329_v24  ;;  %v3660_v24 = vsel %vm1370_vm1, %v3644_v8, %v5955_v32  ;;  %v9003_v34 = vld [vmem:[#allocation25_spill] sm:$0xff] }
 0xc6a   : > { %5962 = vrot.lane.b32.xlu1 %v5961_v41, %s6613_s13 }
 0xc6b   : > { %5957 = vrot.lane.b32.xlu0 %v5956_v16, %s6613_s13  ;;  %v9004_v16 = vpack.i.bf16 %v8066_v28, %v9003_v34  ;;  %v9011_v34 = vld [vmem:[#allocation19_spill] sm:$0xff] }
 0xc6e   : > { %5972 = vrot.lane.b32.xlu1 %v8987_v26, %s6615_s24  ;;  %v3657_v26 = vsel %vm1370_vm1, %v3641_v37, %v5949_v39 }
 0xc6f   : > { %5967 = vrot.lane.b32.xlu0 %v8988_v53, %s6615_s24  ;;  %v3658_v53 = vsel %vm1370_vm1, %v3642_v46, %v5950_v61 }
 0xc72   : > { %5982 = vrot.lane.b32.xlu1 %v8989_v54, %s6614_s25 }
 0xc73   : > { %5977 = vrot.lane.b32.xlu0 %v8990_v5, %s6614_s25 }
 0xc7d   : > { %v5803_v18 = vpop.f32.mrb[84].mxu1 }
 0xc7e   : > { %v3345_v63 = vpop.f32.mrb[85].mxu1 }
 0xc7f   : > { %v5804_v60 = vpop.f32.mrb[86].mxu1 }
 0xc80   : > { %v5991_v55 = vpack.i.bf16 %v5804_v60, %v5803_v18  ;;  %v3348_v35 = vpop.f32.mrb[87].mxu1 }
 0xc81   : > { %v5986_v4 = vpack.i.bf16 %v3348_v35, %v3345_v63 }
 0xc82   : > { %5992 = vrot.lane.b32.xlu1 %v5991_v55, %s6613_s13 }
 0xc83   : > { %5987 = vrot.lane.b32.xlu0 %v5986_v4, %s6613_s13 }
 0xc86   : > { %6002 = vrot.lane.b32.xlu1 %v8991_v10, %s6615_s24 }
 0xc87   : > { %5997 = vrot.lane.b32.xlu0 %v8992_v33, %s6615_s24 }
 0xc8a   : > { %6012 = vrot.lane.b32.xlu1 %v8993_v56, %s6614_s25 }
 0xc8b   : > { %6007 = vrot.lane.b32.xlu0 %v8994_v47, %s6614_s25 }
 0xcd0   : > { %v5815_v52 = vpop.f32.mrb[80].mxu0 }
 0xcd1   : > { %v3418_v25 = vpop.f32.mrb[81].mxu0 }
 0xcd2   : > { %v5816_v51 = vpop.f32.mrb[82].mxu0 }
 0xcd3   : > { %v6021_v62 = vpack.i.bf16 %v5816_v51, %v5815_v52  ;;  %v3421_v59 = vpop.f32.mrb[83].mxu0 }
 0xcd4   : > { %v6016_v23 = vpack.i.bf16 %v3421_v59, %v3418_v25 }
 0xcd5   : > { %6022 = vrot.lane.b32.xlu1 %v6021_v62, %s6613_s13  ;;  %v9006_v62 = vld [vmem:[#allocation12_spill] sm:$0xff] }
 0xcd6   : > { %6017 = vrot.lane.b32.xlu0 %v6016_v23, %s6613_s13 }
 0xcd8   : > { %v5819_v36 = vpop.f32.mrb[84].mxu0 }
 0xcd9   : > { %6032 = vrot.lane.b32.xlu1 %v8995_v14, %s6615_s24  ;;  %v3434_v6 = vpop.f32.mrb[85].mxu0 }
 0xcda   : > { %6027 = vrot.lane.b32.xlu0 %v8997_v31, %s6615_s24  ;;  %v5820_v29 = vpop.f32.mrb[86].mxu0 }
 0xcdb   : > { %v6051_v58 = vpack.i.bf16 %v5820_v29, %v5819_v36  ;;  %v3437_v11 = vpop.f32.mrb[87].mxu0 }
 0xcdc   : > { %v6046_v40 = vpack.i.bf16 %v3437_v11, %v3434_v6  ;;  %v5963_v57 = vpop.permute.xlu1 %5962 }
 0xcdd   : > { %v5965_v48 = vunpack.i.h.bf16 %v5963_v57  ;;  %v5964_v44 = vunpack.i.l.bf16 %v5963_v57  ;;  %6042 = vrot.lane.b32.xlu1 %v9002_v43, %s6614_s25  ;;  %v5958_v12 = vpop.permute.xlu0 %5957 }
 0xcde   : > { %v5960_v42 = vunpack.i.h.bf16 %v5958_v12  ;;  %v5959_v41 = vunpack.i.l.bf16 %v5958_v12  ;;  %6037 = vrot.lane.b32.xlu0 %v9004_v16, %s6614_s25  ;;  %v9009_v12 = vld [vmem:[#allocation18_spill] sm:$0xff] }
 0xcdf   : > { %v3677_v54 = vsel %vm3673_vm2, %v3660_v24, %v5965_v48  ;;  %v3676_v50 = vsel %vm3673_vm2, %v3659_v17, %v5964_v44  ;;  %v9010_v24 = vld [vmem:[#allocation16_spill] sm:$0xff] }
 0xce0   : > { %v3691_v30 = vpack.c.bf16 %v3677_v54, %v3676_v50  ;;  %v3674_v5 = vsel %vm3673_vm2, %v3657_v26, %v5959_v41  ;;  %v3675_v18 = vsel %vm3673_vm2, %v3658_v53, %v5960_v42  ;;  %v5973_v28 = vpop.permute.xlu1 %5972  ;;  %v9012_v26 = vld [vmem:[#allocation17_spill] sm:$0xff] }
 0xce1   : > { %6052 = vrot.lane.b32.xlu1 %v6051_v58, %s6613_s13  ;;  %v3690_v63 = vpack.c.bf16 %v3675_v18, %v3674_v5  ;;  %v5968_v60 = vpop.permute.xlu0 %5967  ;;  %v5975_v35 = vunpack.i.h.bf16 %v5973_v28  ;;  %v5974_v4 = vunpack.i.l.bf16 %v5973_v28 }
 0xce2   : > { %6047 = vrot.lane.b32.xlu0 %v6046_v40, %s6613_s13  ;;  %v5970_v33 = vunpack.i.h.bf16 %v5968_v60  ;;  %v5969_v56 = vunpack.i.l.bf16 %v5968_v60  ;;  %s8893_s13 = scalar_lea.vmem %s8949_s15, %s5245_s14 }
 0xce3   : > { %5837 = vmatprep.mubr.bf16.mxu1 %v3690_v63  ;;  %v3648_v51 = vsel %vm1191_vm0, %v9005_v15, %v5975_v35  ;;  %v3647_v59 = vsel %vm1191_vm0, %v9006_v62, %v5974_v4 }
 0xce4   : > { %5838 = vmatmul.mubr.bf16.vlgmr.msra.gmra.mrb[88].mxu1 %v3691_v30  ;;  %v5983_v55 = vpop.permute.xlu1 %5982  ;;  %v3646_v9 = vsel %vm1191_vm0, %v9007_v45, %v5970_v33  ;;  %v3645_v21 = vsel %vm1191_vm0, %v9008_v19, %v5969_v56 }
 0xce5   : > { %v5978_v10 = vpop.permute.xlu0 %5977  ;;  %v5985_v47 = vunpack.i.h.bf16 %v5983_v55  ;;  %v5984_v52 = vunpack.i.l.bf16 %v5983_v55 }
 0xce6   : > { %v5980_v2 = vunpack.i.h.bf16 %v5978_v10  ;;  %v5979_v25 = vunpack.i.l.bf16 %v5978_v10 }
 0xce7   : > { %v3663_v14 = vsel %vm1370_vm1, %v3647_v59, %v5984_v52  ;;  %v3664_v6 = vsel %vm1370_vm1, %v3648_v51, %v5985_v47 }
 0xce8   : > { %v3661_v0 = vsel %vm1370_vm1, %v3645_v21, %v5979_v25  ;;  %v3662_v31 = vsel %vm1370_vm1, %v3646_v9, %v5980_v2 }
 0xcf4   : > { %v5993_v23 = vpop.permute.xlu1 %5992 }
 0xcf5   : > { %v5995_v36 = vunpack.i.h.bf16 %v5993_v23  ;;  %v5994_v27 = vunpack.i.l.bf16 %v5993_v23  ;;  %v5988_v20 = vpop.permute.xlu0 %5987 }
 0xcf6   : > { %v5990_v32 = vunpack.i.h.bf16 %v5988_v20  ;;  %v5989_v13 = vunpack.i.l.bf16 %v5988_v20  ;;  %v9014_v20 = vld [vmem:[#allocation20_spill] sm:$0xff] }
 0xcf7   : > { %v3680_v29 = vsel %vm3673_vm2, %v3663_v14, %v5994_v27  ;;  %v3681_v61 = vsel %vm3673_vm2, %v3664_v6, %v5995_v36  ;;  %v9013_v36 = vld [vmem:[#allocation22_spill] sm:$0xff] }
 0xcf8   : > { %v3678_v39 = vsel %vm3673_vm2, %v3661_v0, %v5989_v13  ;;  %v3679_v58 = vsel %vm3673_vm2, %v3662_v31, %v5990_v32  ;;  %v3693_v11 = vpack.c.bf16 %v3681_v61, %v3680_v29  ;;  %v6003_v46 = vpop.permute.xlu1 %6002  ;;  %v9015_v32 = vld [vmem:[#allocation23_spill] sm:$0xff]  ;;  %v9016_v0 = vld [vmem:[#allocation21_spill] sm:$0xff] }
 0xcf9   : > { %v3692_v22 = vpack.c.bf16 %v3679_v58, %v3678_v39  ;;  %v5998_v3 = vpop.permute.xlu0 %5997  ;;  %v6005_v40 = vunpack.i.h.bf16 %v6003_v46  ;;  %v6004_v57 = vunpack.i.l.bf16 %v6003_v46 }
 0xcfa   : > { %v6000_v8 = vunpack.i.h.bf16 %v5998_v3  ;;  %v5999_v1 = vunpack.i.l.bf16 %v5998_v3 }
 0xcfb   : > { %5841 = vmatprep.mubr.bf16.mxu1 %v3692_v22  ;;  %v3652_v17 = vsel %vm1191_vm0, %v9009_v12, %v6005_v40  ;;  %v3651_v42 = vsel %vm1191_vm0, %v9010_v24, %v6004_v57  ;;  %v6520_v12 = vld [vmem:[%s6789_s22] sm:$0xff] }
 0xcfc   : > { %5842 = vmatmul.mubr.bf16.gmra.mrb[92].mxu1 %v3693_v11  ;;  %v6013_v37 = vpop.permute.xlu1 %6012  ;;  %v3650_v16 = vsel %vm1191_vm0, %v9011_v34, %v6000_v8  ;;  %v3649_v53 = vsel %vm1191_vm0, %v9012_v26, %v5999_v1  ;;  %v6522_v26 = vld [vmem:[%s6789_s22 + $0x8] sm:$0xff] }
 0xcfd   : > { %v6008_v7 = vpop.permute.xlu0 %6007  ;;  %v6015_v49 = vunpack.i.h.bf16 %v6013_v37  ;;  %v6014_v48 = vunpack.i.l.bf16 %v6013_v37 }
 0xcfe   : > { %v6010_v44 = vunpack.i.h.bf16 %v6008_v7  ;;  %v6009_v43 = vunpack.i.l.bf16 %v6008_v7 }
 0xcff   : > { %v3667_v5 = vsel %vm1370_vm1, %v3651_v42, %v6014_v48  ;;  %v3668_v18 = vsel %vm1370_vm1, %v3652_v17, %v6015_v49 }
 0xd00   : > { %v3665_v60 = vsel %vm1370_vm1, %v3649_v53, %v6009_v43  ;;  %v3666_v55 = vsel %vm1370_vm1, %v3650_v16, %v6010_v44  ;;  %v8384_v44 = vld [vmem:[%s8940_s6] ss:$0 sm:$0xff] }
 0xd47   : > { %v6023_v41 = vpop.permute.xlu1 %6022 }
 0xd48   : > { %v6025_v54 = vunpack.i.h.bf16 %v6023_v41  ;;  %v6024_v50 = vunpack.i.l.bf16 %v6023_v41  ;;  %v6018_v30 = vpop.permute.xlu0 %6017  ;;  %v6521_v41 = vld [vmem:[%s6789_s22 + $0x10] sm:$0xff] }
 0xd49   : > { %v6020_v63 = vunpack.i.h.bf16 %v6018_v30  ;;  %v6019_v28 = vunpack.i.l.bf16 %v6018_v30  ;;  %v6523_v30 = vld [vmem:[%s6789_s22 + $0x18] sm:$0xff] }
 0xd4a   : > { %v3684_v35 = vsel %vm3673_vm2, %v3667_v5, %v6024_v50  ;;  %v3685_v4 = vsel %vm3673_vm2, %v3668_v18, %v6025_v54 }
 0xd4b   : > { %v6033_v10 = vpop.permute.xlu1 %6032  ;;  %v3682_v33 = vsel %vm3673_vm2, %v3665_v60, %v6019_v28  ;;  %v3683_v56 = vsel %vm3673_vm2, %v3666_v55, %v6020_v63  ;;  %v3695_v47 = vpack.c.bf16 %v3685_v4, %v3684_v35  ;;  %v6524_v60 = vld [vmem:[%s6789_s22 + $0x20] sm:$0xff] }
 0xd4c   : > { %v6028_v52 = vpop.permute.xlu0 %6027  ;;  %v3694_v2 = vpack.c.bf16 %v3683_v56, %v3682_v33  ;;  %v6035_v25 = vunpack.i.h.bf16 %v6033_v10  ;;  %v6034_v15 = vunpack.i.l.bf16 %v6033_v10  ;;  %v6525_v10 = vld [vmem:[%s6789_s22 + $0x30] sm:$0xff] }
 0xd4d   : > { %v6030_v62 = vunpack.i.h.bf16 %v6028_v52  ;;  %v6029_v59 = vunpack.i.l.bf16 %v6028_v52 }
 0xd4e   : > { %5845 = vmatprep.mubr.bf16.mxu1 %v3694_v2  ;;  %v3656_v27 = vsel %vm1191_vm0, %v9013_v36, %v6035_v25  ;;  %v3655_v14 = vsel %vm1191_vm0, %v9014_v20, %v6034_v15  ;;  %v6527_v2 = vld [vmem:[%s6789_s22 + $0x38] sm:$0xff]  ;;  %v6529_v36 = vld [vmem:[%s6789_s22 + $0x50] sm:$0xff] }
 0xd4f   : > { %v6043_v51 = vpop.permute.xlu1 %6042  ;;  %5846 = vmatmul.mubr.bf16.gmra.mrb[96].mxu1 %v3695_v47  ;;  %v3654_v13 = vsel %vm1191_vm0, %v9015_v32, %v6030_v62  ;;  %v3653_v31 = vsel %vm1191_vm0, %v9016_v0, %v6029_v59  ;;  %v6526_v47 = vld [vmem:[%s6789_s22 + $0x28] sm:$0xff]  ;;  %v6531_v32 = vld [vmem:[%s6789_s22 + $0x58] sm:$0xff] }
 0xd50   : > { %v6038_v23 = vpop.permute.xlu0 %6037  ;;  %v6045_v45 = vunpack.i.h.bf16 %v6043_v51  ;;  %v6044_v9 = vunpack.i.l.bf16 %v6043_v51 }
 0xd51   : > { %v6040_v19 = vunpack.i.h.bf16 %v6038_v23  ;;  %v6039_v21 = vunpack.i.l.bf16 %v6038_v23 }
 0xd52   : > { %v3671_v58 = vsel %vm1370_vm1, %v3655_v14, %v6044_v9  ;;  %v3672_v11 = vsel %vm1370_vm1, %v3656_v27, %v6045_v45  ;;  %v6528_v45 = vld [vmem:[%s6789_s22 + $0x40] sm:$0xff]  ;;  %v6530_v14 = vld [vmem:[%s6789_s22 + $0x48] sm:$0xff] }
 0xd53   : > { %v6053_v6 = vpop.permute.xlu1 %6052  ;;  %v3669_v3 = vsel %vm1370_vm1, %v3653_v31, %v6039_v21  ;;  %v3670_v37 = vsel %vm1370_vm1, %v3654_v13, %v6040_v19 }
 0xd54   : > { %v6055_v29 = vunpack.i.h.bf16 %v6053_v6  ;;  %v6054_v61 = vunpack.i.l.bf16 %v6053_v6  ;;  %v6048_v39 = vpop.permute.xlu0 %6047 }
 0xd55   : > { %v6050_v22 = vunpack.i.h.bf16 %v6048_v39  ;;  %v6049_v46 = vunpack.i.l.bf16 %v6048_v39 }
 0xd56   : > { %v3688_v40 = vsel %vm3673_vm2, %v3671_v58, %v6054_v61  ;;  %v3689_v57 = vsel %vm3673_vm2, %v3672_v11, %v6055_v29  ;;  %v6532_v58 = vld [vmem:[%s6789_s22 + $0x60] sm:$0xff] }
 0xd57   : > { %v3686_v7 = vsel %vm3673_vm2, %v3669_v3, %v6049_v46  ;;  %v3687_v8 = vsel %vm3673_vm2, %v3670_v37, %v6050_v22  ;;  %v3697_v1 = vpack.c.bf16 %v3689_v57, %v3688_v40  ;;  %v6533_v3 = vld [vmem:[%s6789_s22 + $0x70] sm:$0xff]  ;;  %v6534_v57 = vld [vmem:[%s6789_s22 + $0x68] sm:$0xff] }
 0xd58   : > { %v3696_v49 = vpack.c.bf16 %v3687_v8, %v3686_v7  ;;  %v6535_v8 = vld [vmem:[%s6789_s22 + $0x78] sm:$0xff] }
 0xd5a   : > { %5849 = vmatprep.mubr.bf16.mxu1 %v3696_v49 }
 0xd5b   : > { %5850 = vmatmul.mubr.bf16.gmra.mrb[100].mxu1 %v3697_v1 }
 0xdb7   : > { %v5839_v48 = vpop.f32.mrb[88].mxu1 }
 0xdb8   : > { %v3796_v43 = vpop.f32.mrb[89].mxu1  ;;  %v3861_v34 = vadd.f32 %v6521_v41, %v5839_v48 }
 0xdb9   : > { %v3859_v17 = vadd.f32 %v6520_v12, %v3796_v43  ;;  %v5840_v24 = vpop.f32.mrb[90].mxu1 }
 0xdba   : > { %v3799_v42 = vpop.f32.mrb[91].mxu1  ;;  %v8397_v50 = vadd.f32 %v8384_v44, %v3861_v34  ;;  %v3862_v5 = vadd.f32 %v6523_v30, %v5840_v24 }
 0xdbb   : > { %v8389_v16 = vadd.f32 %v8384_v44, %v3859_v17  ;;  %v3860_v53 = vadd.f32 %v6522_v26, %v3799_v42  ;;  %v6096_v26 = vld [vmem:[%s8943_s9] ss:$8 sps:$4 sm:$0xff]  }
 0xdbc   : > { %v8403_v18 = vadd.f32 %v8384_v44, %v3862_v5 }
 0xdbd   : > { %v8393_v54 = vadd.f32 %v8384_v44, %v3860_v53  ;;  %3900 = vadd.xlane.f32.xlu0 %v8389_v16 }
 0xdbf   : > { %3902 = vadd.xlane.f32.xlu1 %v8393_v54 }
 0xdc1   : > { %3904 = vadd.xlane.f32.xlu0 %v8397_v50 }
 0xdc5   : > { %3906 = vadd.xlane.f32.xlu0 %v8403_v18 }
 0xdcf   : > { %v5843_v63 = vpop.f32.mrb[92].mxu1 }
 0xdd0   : > { %v3812_v28 = vpop.f32.mrb[93].mxu1  ;;  %v3865_v33 = vadd.f32 %v6525_v10, %v5843_v63  ;;  %v6101_v63 = vld [vmem:[%s8943_s9 + $0x14] ss:$8 sps:$4 sm:$0xff]  }
 0xdd1   : > { %v3863_v55 = vadd.f32 %v6524_v60, %v3812_v28  ;;  %v5844_v35 = vpop.f32.mrb[94].mxu1 }
 0xdd2   : > { %v3815_v4 = vpop.f32.mrb[95].mxu1  ;;  %v3866_v25 = vadd.f32 %v6527_v2, %v5844_v35  ;;  %v8418_v51 = vadd.f32 %v8384_v44, %v3865_v33  ;;  %v6102_v2 = vld [vmem:[%s8943_s9 + $0x20] ss:$8 sps:$4 sm:$0xff]  }
 0xdd3   : > { %v8409_v56 = vadd.f32 %v8384_v44, %v3863_v55  ;;  %v3864_v52 = vadd.f32 %v6526_v47, %v3815_v4  ;;  %v6099_v55 = vld [vmem:[%s8943_s9 + $0x10] ss:$8 sps:$4 sm:$0xff]  }
 0xdd4   : > { %v8422_v62 = vadd.f32 %v8384_v44, %v3866_v25 }
 0xdd5   : > { %v8414_v15 = vadd.f32 %v8384_v44, %v3864_v52  ;;  %3908 = vadd.xlane.f32.xlu0 %v8409_v56  ;;  %v6104_v52 = vld [vmem:[%s8943_s9 + $0x24] ss:$8 sps:$4 sm:$0xff]  }
 0xdd7   : > { %3910 = vadd.xlane.f32.xlu1 %v8414_v15 }
 0xdd9   : > { %3912 = vadd.xlane.f32.xlu0 %v8418_v51 }
 0xddb   : > { %3914 = vadd.xlane.f32.xlu1 %v8422_v62 }
 0xe22   : > { %v5847_v59 = vpop.f32.mrb[96].mxu1 }
 0xe23   : > { %v3828_v23 = vpop.f32.mrb[97].mxu1  ;;  %v3869_v27 = vadd.f32 %v6529_v36, %v5847_v59 }
 0xe24   : > { %v3867_v9 = vadd.f32 %v6528_v45, %v3828_v23  ;;  %v5848_v19 = vpop.f32.mrb[98].mxu1  ;;  %v6107_v45 = vld [vmem:[%s8943_s9 + $0x34] ss:$8 sps:$4 sm:$0xff]  }
 0xe25   : > { %v3831_v21 = vpop.f32.mrb[99].mxu1  ;;  %v3870_v13 = vadd.f32 %v6531_v32, %v5848_v19  ;;  %v8438_v31 = vadd.f32 %v8384_v44, %v3869_v27 }
 0xe26   : > { %v8429_v20 = vadd.f32 %v8384_v44, %v3867_v9  ;;  %v3868_v6 = vadd.f32 %v6530_v14, %v3831_v21  ;;  %v6105_v21 = vld [vmem:[%s8943_s9 + $0x30] ss:$8 sps:$4 sm:$0xff]  }
 0xe27   : > { %v8442_v29 = vadd.f32 %v8384_v44, %v3870_v13  ;;  %v6110_v13 = vld [vmem:[%s8943_s9 + $0x44] ss:$8 sps:$4 sm:$0xff]  }
 0xe28   : > { %v8434_v0 = vadd.f32 %v8384_v44, %v3868_v6  ;;  %3916 = vadd.xlane.f32.xlu0 %v8429_v20 }
 0xe2a   : > { %3918 = vadd.xlane.f32.xlu1 %v8434_v0 }
 0xe2c   : > { %3920 = vadd.xlane.f32.xlu0 %v8438_v31 }
 0xe2e   : > { %3922 = vadd.xlane.f32.xlu1 %v8442_v29  ;;  %v5851_v61 = vpop.f32.mrb[100].mxu1 }
 0xe2f   : > { %v3844_v39 = vpop.f32.mrb[101].mxu1  ;;  %v3873_v37 = vadd.f32 %v6533_v3, %v5851_v61  ;;  %v6113_v3 = vld [vmem:[%s8943_s9 + $0x54] ss:$8 sps:$4 sm:$0xff]  }
 0xe30   : > { %v3871_v11 = vadd.f32 %v6532_v58, %v3844_v39  ;;  %v5852_v22 = vpop.f32.mrb[102].mxu1 }
 0xe31   : > { %v3847_v46 = vpop.f32.mrb[103].mxu1  ;;  %v3874_v1 = vadd.f32 %v6535_v8, %v5852_v22  ;;  %v8458_v48 = vadd.f32 %v8384_v44, %v3873_v37  ;;  %v6114_v8 = vld [vmem:[%s8943_s9 + $0x60] ss:$8 sps:$4 sm:$0xff]  }
 0xe32   : > { %v8449_v40 = vadd.f32 %v8384_v44, %v3871_v11  ;;  %v3872_v7 = vadd.f32 %v6534_v57, %v3847_v46  ;;  %v6108_v11 = vld [vmem:[%s8943_s9 + $0x40] ss:$8 sps:$4 sm:$0xff]   ;;  %v6111_v57 = vld [vmem:[%s8943_s9 + $0x50] ss:$8 sps:$4 sm:$0xff]  }
 0xe33   : > { %v8462_v43 = vadd.f32 %v8384_v44, %v3874_v1  ;;  %v6119_v1 = vld [vmem:[%s8943_s9 + $0x74] ss:$8 sps:$4 sm:$0xff]  }
 0xe34   : > { %v8454_v49 = vadd.f32 %v8384_v44, %v3872_v7  ;;  %3924 = vadd.xlane.f32.xlu0 %v8449_v40  ;;  %v6098_v44 = vld [vmem:[%s8943_s9 + $0x4] ss:$8 sps:$4 sm:$0xff]  }
 0xe35   : > { %4236 = vmatprep.subr.bf16.mxu0 %v6098_v44  ;;  %v6116_v7 = vld [vmem:[%s8943_s9 + $0x64] ss:$8 sps:$4 sm:$0xff]  }
 0xe36   : > { %3926 = vadd.xlane.f32.xlu1 %v8454_v49  ;;  %4237 = vmatpush1.bf16.msra.mxu0 %v6096_v26 }
 0xe37   : > { %4238 = vmatprep.subr.bf16.mxu0 %v6101_v63 }
 0xe38   : > { %3928 = vadd.xlane.f32.xlu0 %v8458_v48 }
 0xe3a   : > { %3930 = vadd.xlane.f32.xlu1 %v8462_v43  ;;  %4239 = vmatpush1.bf16.msra.mxu0 %v6099_v55 }
 0xe3b   : > { %4240 = vmatprep.subr.bf16.mxu0 %v6104_v52 }
 0xe3e   : > { %4241 = vmatpush1.bf16.msra.mxu0 %v6102_v2 }
 0xe3f   : > { %4242 = vmatprep.subr.bf16.mxu0 %v6107_v45 }
 0xe42   : > { %4243 = vmatpush1.bf16.msra.mxu0 %v6105_v21 }
 0xe43   : > { %4244 = vmatprep.subr.bf16.mxu0 %v6110_v13 }
 0xe46   : > { %4245 = vmatpush1.bf16.msra.mxu0 %v6108_v11 }
 0xe47   : > { %4246 = vmatprep.subr.bf16.mxu0 %v6113_v3 }
 0xe4a   : > { %v3901_v12 = vpop.xlane.xlu0 %3900  ;;  %4247 = vmatpush1.bf16.msra.mxu0 %v6111_v57 }
 0xe4b   : > { %v3932_v17 = vmul.f32 0.0078125, %v3901_v12  ;;  %4248 = vmatprep.subr.bf16.mxu0 %v6116_v7  ;;  %v6117_v12 = vld [vmem:[%s8943_s9 + $0x70] ss:$8 sps:$4 sm:$0xff]  }
 0xe4c   : > { %v3903_v24 = vpop.xlane.xlu1 %3902 }
 0xe4d   : > { %v8467_v42 = vsub.f32 %v8389_v16, %v3932_v17  ;;  %v3933_v41 = vmul.f32 0.0078125, %v3903_v24 }
 0xe4e   : > { %v3905_v34 = vpop.xlane.xlu0 %3904  ;;  %4249 = vmatpush1.bf16.msra.mxu0 %v6114_v8 }
 0xe4f   : > { %v8476_v53 = vsub.f32 %v8393_v54, %v3933_v41  ;;  %v3934_v30 = vmul.f32 0.0078125, %v3905_v34  ;;  %v3964_v5 = vmul.f32 %v8467_v42, %v8467_v42  ;;  %4250 = vmatprep.subr.bf16.mxu0 %v6119_v1 }
 0xe51   : > { %v8484_v28 = vsub.f32 %v8397_v50, %v3934_v30  ;;  %3980 = vadd.xlane.f32.xlu0 %v3964_v5  ;;  %v3965_v60 = vmul.f32 %v8476_v53, %v8476_v53 }
 0xe52   : > { %v3907_v35 = vpop.xlane.xlu0 %3906  ;;  %4251 = vmatpush1.bf16.msra.mxu0 %v6117_v12 }
 0xe53   : > { %v3935_v4 = vmul.f32 0.0078125, %v3907_v35  ;;  %3982 = vadd.xlane.f32.xlu1 %v3965_v60  ;;  %v3966_v10 = vmul.f32 %v8484_v28, %v8484_v28 }
 0xe55   : > { %v8494_v33 = vsub.f32 %v8403_v18, %v3935_v4  ;;  %3984 = vadd.xlane.f32.xlu0 %v3966_v10 }
 0xe57   : > { %v3967_v47 = vmul.f32 %v8494_v33, %v8494_v33 }
 0xe59   : > { %3986 = vadd.xlane.f32.xlu1 %v3967_v47 }
 0xe62   : > { %v3909_v25 = vpop.xlane.xlu0 %3908 }
 0xe63   : > { %v3936_v59 = vmul.f32 0.0078125, %v3909_v25 }
 0xe64   : > { %v3911_v23 = vpop.xlane.xlu1 %3910 }
 0xe65   : > { %v8508_v9 = vsub.f32 %v8409_v56, %v3936_v59  ;;  %v3937_v19 = vmul.f32 0.0078125, %v3911_v23 }
 0xe66   : > { %v3913_v36 = vpop.xlane.xlu0 %3912 }
 0xe67   : > { %v8514_v27 = vsub.f32 %v8414_v15, %v3937_v19  ;;  %v3938_v14 = vmul.f32 0.0078125, %v3913_v36  ;;  %v3968_v6 = vmul.f32 %v8508_v9, %v8508_v9 }
 0xe68   : > { %v3915_v32 = vpop.xlane.xlu1 %3914 }
 0xe69   : > { %v8522_v61 = vsub.f32 %v8418_v51, %v3938_v14  ;;  %v3939_v39 = vmul.f32 0.0078125, %v3915_v32  ;;  %3988 = vadd.xlane.f32.xlu0 %v3968_v6  ;;  %v3969_v58 = vmul.f32 %v8514_v27, %v8514_v27 }
 0xe6b   : > { %v8530_v22 = vsub.f32 %v8422_v62, %v3939_v39  ;;  %3990 = vadd.xlane.f32.xlu1 %v3969_v58  ;;  %v3970_v46 = vmul.f32 %v8522_v61, %v8522_v61 }
 0xe6d   : > { %3992 = vadd.xlane.f32.xlu0 %v3970_v46  ;;  %v3971_v37 = vmul.f32 %v8530_v22, %v8530_v22 }
 0xe6f   : > { %3994 = vadd.xlane.f32.xlu1 %v3971_v37 }
 0xeb5   : > { %v3917_v17 = vpop.xlane.xlu0 %3916 }
 0xeb6   : > { %v3940_v24 = vmul.f32 0.0078125, %v3917_v17 }
 0xeb7   : > { %v3919_v41 = vpop.xlane.xlu1 %3918 }
 0xeb8   : > { %v8555_v34 = vsub.f32 %v8429_v20, %v3940_v24  ;;  %v3941_v26 = vmul.f32 0.0078125, %v3919_v41 }
 0xeb9   : > { %v3921_v44 = vpop.xlane.xlu0 %3920 }
 0xeba   : > { %v8558_v30 = vsub.f32 %v8434_v0, %v3941_v26  ;;  %v3942_v5 = vmul.f32 0.0078125, %v3921_v44  ;;  %v3972_v63 = vmul.f32 %v8555_v34, %v8555_v34 }
 0xebb   : > { %v3923_v60 = vpop.xlane.xlu1 %3922 }
 0xebc   : > { %v8563_v55 = vsub.f32 %v8438_v31, %v3942_v5  ;;  %v3943_v35 = vmul.f32 0.0078125, %v3923_v60  ;;  %3996 = vadd.xlane.f32.xlu0 %v3972_v63  ;;  %v3973_v4 = vmul.f32 %v8558_v30, %v8558_v30  ;;  %v8597_v63 = vld [vmem:[%s8941_s7] ss:$0 sm:$0xff] }
 0xebe   : > { %v8568_v10 = vsub.f32 %v8442_v29, %v3943_v35  ;;  %3998 = vadd.xlane.f32.xlu1 %v3973_v4  ;;  %v3974_v47 = vmul.f32 %v8563_v55, %v8563_v55 }
 0xec0   : > { %4000 = vadd.xlane.f32.xlu0 %v3974_v47  ;;  %v3975_v52 = vmul.f32 %v8568_v10, %v8568_v10 }
 0xec1   : > { %v3925_v2 = vpop.xlane.xlu0 %3924 }
 0xec2   : > { %v3944_v25 = vmul.f32 0.0078125, %v3925_v2  ;;  %4002 = vadd.xlane.f32.xlu1 %v3975_v52  ;;  %v8605_v2 = vld [vmem:[%s8942_s8] ss:$0 sm:$0xff] }
 0xec3   : > { %v3927_v59 = vpop.xlane.xlu1 %3926 }
 0xec4   : > { %v8575_v23 = vsub.f32 %v8449_v40, %v3944_v25  ;;  %v3945_v45 = vmul.f32 0.0078125, %v3927_v59 }
 0xec5   : > { %v3929_v19 = vpop.xlane.xlu0 %3928 }
 0xec6   : > { %v8578_v21 = vsub.f32 %v8454_v49, %v3945_v45  ;;  %v3946_v36 = vmul.f32 0.0078125, %v3929_v19  ;;  %v3976_v14 = vmul.f32 %v8575_v23, %v8575_v23 }
 0xec7   : > { %v3931_v6 = vpop.xlane.xlu1 %3930 }
 0xec8   : > { %v8583_v32 = vsub.f32 %v8458_v48, %v3946_v36  ;;  %v3947_v13 = vmul.f32 0.0078125, %v3931_v6  ;;  %4004 = vadd.xlane.f32.xlu0 %v3976_v14  ;;  %v3977_v39 = vmul.f32 %v8578_v21, %v8578_v21 }
 0xeca   : > { %v8588_v58 = vsub.f32 %v8462_v43, %v3947_v13  ;;  %4006 = vadd.xlane.f32.xlu1 %v3977_v39  ;;  %v3978_v11 = vmul.f32 %v8583_v32, %v8583_v32 }
 0xecc   : > { %4008 = vadd.xlane.f32.xlu0 %v3978_v11  ;;  %v3979_v46 = vmul.f32 %v8588_v58, %v8588_v58 }
 0xece   : > { %4010 = vadd.xlane.f32.xlu1 %v3979_v46 }
 0xede   : > { %v3981_v3 = vpop.xlane.xlu0 %3980 }
 0xedf   : > { %v4012_v37 = vmul.f32 0.0078125, %v3981_v3 }
 0xee0   : > { %v3983_v57 = vpop.xlane.xlu1 %3982 }
 0xee1   : > { %v4028_v7 = vadd.f32 1e-05, %v4012_v37  ;;  %v4013_v8 = vmul.f32 0.0078125, %v3983_v57 }
 0xee2   : > { %v3985_v1 = vpop.xlane.xlu0 %3984 }
 0xee3   : > { %6424 = vrsqrt.f32 %v4028_v7  ;;  %v4029_v12 = vadd.f32 1e-05, %v4013_v8  ;;  %v4014_v17 = vmul.f32 0.0078125, %v3985_v1 }
 0xee5   : > { %6426 = vrsqrt.f32 %v4029_v12  ;;  %v4030_v24 = vadd.f32 1e-05, %v4014_v17 }
 0xee6   : > { %v3987_v41 = vpop.xlane.xlu1 %3986 }
 0xee7   : > { %6428 = vrsqrt.f32 %v4030_v24  ;;  %v4015_v26 = vmul.f32 0.0078125, %v3987_v41 }
 0xee9   : > { %v4031_v44 = vadd.f32 1e-05, %v4015_v26 }
 0xeeb   : > { %6430 = vrsqrt.f32 %v4031_v44 }
 0xeed   : > { %v6425_v5 = vpop.eup %6424 }
 0xeee   : > { %v4060_v60 = vmul.f32 %v6425_v5, %v8467_v42 }
 0xeef   : > { %v6427_v35 = vpop.eup %6426 }
 0xef0   : > { %v4082_v4 = vmul.f32 %v8597_v63, %v4060_v60  ;;  %v4061_v47 = vmul.f32 %v6427_v35, %v8476_v53 }
 0xef1   : > { %v6429_v52 = vpop.eup %6428 }
 0xef2   : > { %v4083_v25 = vmul.f32 %v8597_v63, %v4061_v47  ;;  %v4104_v59 = vadd.f32 %v8605_v2, %v4082_v4  ;;  %v4062_v19 = vmul.f32 %v6429_v52, %v8484_v28 }
 0xef4   : > { %v4105_v45 = vadd.f32 %v8605_v2, %v4083_v25  ;;  %v4084_v39 = vmul.f32 %v8597_v63, %v4062_v19 }
 0xef5   : > { %v6431_v42 = vpop.eup %6430 }
 0xef6   : > { %v3989_v36 = vpop.xlane.xlu0 %3988  ;;  %v4120_v14 = vpack.c.bf16 %v4105_v45, %v4104_v59  ;;  %v4063_v6 = vmul.f32 %v6431_v42, %v8494_v33  ;;  %v4106_v33 = vadd.f32 %v8605_v2, %v4084_v39 }
 0xef7   : > { %v4016_v53 = vmul.f32 0.0078125, %v3989_v36 }
 0xef8   : > { %4269 = vmatmul.mubr.bf16.vlgmr.msra.gmra.mrb[88].mxu0 %v4120_v14  ;;  %v3991_v13 = vpop.xlane.xlu1 %3990  ;;  %v4085_v11 = vmul.f32 %v8597_v63, %v4063_v6 }
 0xef9   : > { %v4032_v46 = vadd.f32 1e-05, %v4016_v53  ;;  %v4017_v3 = vmul.f32 0.0078125, %v3991_v13  ;;  %4278 = vmatprep.mubr.bf16.mxu0 %v8986_v38 }
 0xefa   : > { %v3993_v37 = vpop.xlane.xlu0 %3992  ;;  %v4107_v57 = vadd.f32 %v8605_v2, %v4085_v11  ;;  %v6120_v11 = vld [vmem:[#allocation4 + $0x40] sm:$0xff]  }
 0xefb   : > { %6432 = vrsqrt.f32 %v4032_v46  ;;  %v4033_v28 = vadd.f32 1e-05, %v4017_v3  ;;  %v4018_v7 = vmul.f32 0.0078125, %v3993_v37  ;;  %v6121_v37 = vld [vmem:[#allocation4] sm:$0xff]   ;;  %5469 = vmatprep.subr.bf16.mxu0 %v6120_v11  ;;  %5853 = vmatprep.subr.bf16.mxu1 %v6120_v11 }
 0xefc   : > { %v3995_v8 = vpop.xlane.xlu1 %3994  ;;  %v4121_v17 = vpack.c.bf16 %v4107_v57, %v4106_v33  ;;  %5470 = vmatpush3.bf16.msra.mxu0 %v6121_v37  ;;  %5861 = vmatpush3.bf16.msra.mxu1 %v6121_v37  ;;  %v6130_v37 = vld [vmem:[#allocation4 + $0x68] sm:$0xff]  }
 0xefd   : > { %6434 = vrsqrt.f32 %v4033_v28  ;;  %v4034_v1 = vadd.f32 1e-05, %v4018_v7  ;;  %v4019_v12 = vmul.f32 0.0078125, %v3995_v8  ;;  %v6122_v8 = vld [vmem:[#allocation4 + $0x48] sm:$0xff]  }
 0xefe   : > { %5471 = vmatprep.subr.bf16.mxu0 %v6122_v8  ;;  %5854 = vmatprep.subr.bf16.mxu1 %v6122_v8 }
 0xeff   : > { %6436 = vrsqrt.f32 %v4034_v1  ;;  %v4035_v24 = vadd.f32 1e-05, %v4019_v12  ;;  %v6123_v1 = vld [vmem:[#allocation4 + $0x8] sm:$0xff]  }
 0xf00   : > { %4279 = vmatmul.mubr.bf16.gmra.mrb[92].mxu0 %v4121_v17  ;;  %5862 = vmatpush3.bf16.msra.mxu1 %v6123_v1  ;;  %v6124_v17 = vld [vmem:[#allocation4 + $0x50] sm:$0xff]  }
 0xf01   : > { %6438 = vrsqrt.f32 %v4035_v24  ;;  %4288 = vmatprep.mubr.bf16.mxu0 %v8986_v38  ;;  %5472 = vmatpush3.bf16.msra.mxu0 %v6123_v1 }
 0xf02   : > { %5473 = vmatprep.subr.bf16.mxu0 %v6124_v17  ;;  %5855 = vmatprep.subr.bf16.mxu1 %v6124_v17 }
 0xf05   : > { %v6433_v41 = vpop.eup %6432 }
 0xf06   : > { %v4064_v26 = vmul.f32 %v6433_v41, %v8508_v9  ;;  %v6125_v41 = vld [vmem:[#allocation4 + $0x10] sm:$0xff]  }
 0xf07   : > { %v6435_v44 = vpop.eup %6434  ;;  %5474 = vmatpush3.bf16.msra.mxu0 %v6125_v41  ;;  %5863 = vmatpush3.bf16.msra.mxu1 %v6125_v41 }
 0xf08   : > { %v4065_v5 = vmul.f32 %v6435_v44, %v8514_v27  ;;  %v4086_v60 = vmul.f32 %v8597_v63, %v4064_v26 }
 0xf09   : > { %v6437_v35 = vpop.eup %6436 }
 0xf0a   : > { %v4087_v4 = vmul.f32 %v8597_v63, %v4065_v5  ;;  %v4108_v52 = vadd.f32 %v8605_v2, %v4086_v60  ;;  %v4066_v59 = vmul.f32 %v6437_v35, %v8522_v61 }
 0xf0b   : > { %v6439_v47 = vpop.eup %6438 }
 0xf0c   : > { %v4109_v25 = vadd.f32 %v8605_v2, %v4087_v4  ;;  %v4067_v45 = vmul.f32 %v6439_v47, %v8530_v22  ;;  %v4088_v27 = vmul.f32 %v8597_v63, %v4066_v59  ;;  %v6126_v47 = vld [vmem:[#allocation4 + $0x58] sm:$0xff]  }
 0xf0d   : > { %5475 = vmatprep.subr.bf16.mxu0 %v6126_v47  ;;  %5856 = vmatprep.subr.bf16.mxu1 %v6126_v47 }
 0xf0e   : > { %v4122_v19 = vpack.c.bf16 %v4109_v25, %v4108_v52  ;;  %v4089_v9 = vmul.f32 %v8597_v63, %v4067_v45  ;;  %v4110_v36 = vadd.f32 %v8605_v2, %v4088_v27  ;;  %v6127_v45 = vld [vmem:[#allocation4 + $0x18] sm:$0xff]  }
 0xf0f   : > { %5476 = vmatpush3.bf16.msra.mxu0 %v6127_v45  ;;  %5864 = vmatpush3.bf16.msra.mxu1 %v6127_v45 }
 0xf10   : > { %4289 = vmatmul.mubr.bf16.gmra.mrb[96].mxu0 %v4122_v19  ;;  %v4111_v42 = vadd.f32 %v8605_v2, %v4089_v9 }
 0xf11   : > { %4298 = vmatprep.mubr.bf16.mxu0 %v8986_v38 }
 0xf12   : > { %v4123_v14 = vpack.c.bf16 %v4111_v42, %v4110_v36 }
 0xf18   : > { %4299 = vmatmul.mubr.bf16.gmra.mrb[100].mxu0 %v4123_v14  ;;  %v6128_v14 = vld [vmem:[#allocation4 + $0x60] sm:$0xff]  }
 0xf19   : > { %4308 = vmatprep.mubr.bf16.mxu0 %v8986_v38  ;;  %5477 = vmatprep.subr.bf16.mxu0 %v6128_v14 }
 0xf1a   : > { %5857 = vmatprep.subr.bf16.mxu1 %v6128_v14 }
 0xf49   : > { %v3997_v6 = vpop.xlane.xlu0 %3996 }
 0xf4a   : > { %v4020_v61 = vmul.f32 0.0078125, %v3997_v6 }
 0xf4b   : > { %v3999_v53 = vpop.xlane.xlu1 %3998 }
 0xf4c   : > { %v4036_v22 = vadd.f32 1e-05, %v4020_v61  ;;  %v4021_v13 = vmul.f32 0.0078125, %v3999_v53 }
 0xf4d   : > { %v4001_v39 = vpop.xlane.xlu0 %4000 }
 0xf4e   : > { %6440 = vrsqrt.f32 %v4036_v22  ;;  %v4037_v46 = vadd.f32 1e-05, %v4021_v13  ;;  %v4022_v3 = vmul.f32 0.0078125, %v4001_v39  ;;  %v6129_v13 = vld [vmem:[#allocation4 + $0x20] sm:$0xff]  }
 0xf4f   : > { %v4003_v57 = vpop.xlane.xlu1 %4002  ;;  %5478 = vmatpush3.bf16.msra.mxu0 %v6129_v13  ;;  %5865 = vmatpush3.bf16.msra.mxu1 %v6129_v13 }
 0xf50   : > { %6442 = vrsqrt.f32 %v4037_v46  ;;  %v4038_v28 = vadd.f32 1e-05, %v4022_v3  ;;  %v4023_v7 = vmul.f32 0.0078125, %v4003_v57  ;;  %v6131_v57 = vld [vmem:[#allocation4 + $0x28] sm:$0xff]   ;;  %5479 = vmatprep.subr.bf16.mxu0 %v6130_v37  ;;  %5858 = vmatprep.subr.bf16.mxu1 %v6130_v37 }
 0xf52   : > { %6444 = vrsqrt.f32 %v4038_v28  ;;  %v4039_v33 = vadd.f32 1e-05, %v4023_v7 }
 0xf53   : > { %5480 = vmatpush3.bf16.msra.mxu0 %v6131_v57  ;;  %5866 = vmatpush3.bf16.msra.mxu1 %v6131_v57 }
 0xf54   : > { %6446 = vrsqrt.f32 %v4039_v33  ;;  %v6133_v33 = vld [vmem:[#allocation4 + $0x30] sm:$0xff]  }
 0xf55   : > { %v4005_v12 = vpop.xlane.xlu0 %4004 }
 0xf56   : > { %v4024_v24 = vmul.f32 0.0078125, %v4005_v12 }
 0xf57   : > { %v4007_v26 = vpop.xlane.xlu1 %4006 }
 0xf58   : > { %v6441_v44 = vpop.eup %6440  ;;  %v4040_v5 = vadd.f32 1e-05, %v4024_v24  ;;  %v4025_v60 = vmul.f32 0.0078125, %v4007_v26  ;;  %v6134_v26 = vld [vmem:[#allocation4 + $0x78] sm:$0xff]  }
 0xf59   : > { %v4009_v35 = vpop.xlane.xlu0 %4008  ;;  %v4068_v4 = vmul.f32 %v6441_v44, %v8555_v34 }
 0xf5a   : > { %v6443_v52 = vpop.eup %6442  ;;  %6448 = vrsqrt.f32 %v4040_v5  ;;  %v4041_v25 = vadd.f32 1e-05, %v4025_v60  ;;  %v4026_v59 = vmul.f32 0.0078125, %v4009_v35  ;;  %v6135_v5 = vld [vmem:[#allocation4 + $0x38] sm:$0xff]  }
 0xf5b   : > { %v4011_v19 = vpop.xlane.xlu1 %4010  ;;  %v4069_v9 = vmul.f32 %v6443_v52, %v8558_v30  ;;  %v4090_v27 = vmul.f32 %v8597_v63, %v4068_v4 }
 0xf5c   : > { %v6445_v42 = vpop.eup %6444  ;;  %6450 = vrsqrt.f32 %v4041_v25  ;;  %v4027_v36 = vmul.f32 0.0078125, %v4011_v19  ;;  %v4042_v61 = vadd.f32 1e-05, %v4026_v59 }
 0xf5d   : > { %v4091_v34 = vmul.f32 %v8597_v63, %v4069_v9  ;;  %v4112_v22 = vadd.f32 %v8605_v2, %v4090_v27  ;;  %v4070_v39 = vmul.f32 %v6445_v42, %v8563_v55 }
 0xf5e   : > { %v6447_v6 = vpop.eup %6446  ;;  %v4043_v53 = vadd.f32 1e-05, %v4027_v36 }
 0xf5f   : > { %v4113_v30 = vadd.f32 %v8605_v2, %v4091_v34  ;;  %v4071_v11 = vmul.f32 %v6447_v6, %v8568_v10  ;;  %v4092_v28 = vmul.f32 %v8597_v63, %v4070_v39  ;;  %v6132_v10 = vld [vmem:[#allocation4 + $0x70] sm:$0xff]  }
 0xf60   : > { %6452 = vrsqrt.f32 %v4043_v53  ;;  %5481 = vmatprep.subr.bf16.mxu0 %v6132_v10  ;;  %5859 = vmatprep.subr.bf16.mxu1 %v6132_v10 }
 0xf61   : > { %v4124_v46 = vpack.c.bf16 %v4113_v30, %v4112_v22  ;;  %v4093_v3 = vmul.f32 %v8597_v63, %v4071_v11  ;;  %6454 = vrsqrt.f32 %v4042_v61  ;;  %v4114_v1 = vadd.f32 %v8605_v2, %v4092_v28  ;;  %5482 = vmatpush3.bf16.msra.mxu0 %v6133_v33  ;;  %5867 = vmatpush3.bf16.msra.mxu1 %v6133_v33 }
 0xf62   : > { %5483 = vmatprep.subr.bf16.mxu0 %v6134_v26  ;;  %5860 = vmatprep.subr.bf16.mxu1 %v6134_v26 }
 0xf63   : > { %4309 = vmatmul.mubr.bf16.gmra.mrb[104].mxu0 %v4124_v46  ;;  %v4115_v55 = vadd.f32 %v8605_v2, %v4093_v3 }
 0xf64   : > { %v6449_v7 = vpop.eup %6448  ;;  %4318 = vmatprep.mubr.bf16.mxu0 %v8986_v38 }
 0xf65   : > { %v4072_v12 = vmul.f32 %v6449_v7, %v8575_v23  ;;  %v4125_v24 = vpack.c.bf16 %v4115_v55, %v4114_v1  ;;  %5484 = vmatpush3.bf16.msra.mxu0 %v6135_v5  ;;  %5868 = vmatpush3.bf16.msra.mxu1 %v6135_v5 }
 0xf66   : > { %v6451_v8 = vpop.eup %6450 }
 0xf67   : > { %v4073_v17 = vmul.f32 %v6451_v8, %v8578_v21  ;;  %v4094_v60 = vmul.f32 %v8597_v63, %v4072_v12 }
 0xf69   : > { %v4095_v41 = vmul.f32 %v8597_v63, %v4073_v17  ;;  %v4116_v4 = vadd.f32 %v8605_v2, %v4094_v60 }
 0xf6a   : > { %v6453_v44 = vpop.eup %6452 }
 0xf6b   : > { %4319 = vmatmul.mubr.bf16.gmra.mrb[108].mxu0 %v4125_v24  ;;  %v6455_v35 = vpop.eup %6454  ;;  %v4117_v23 = vadd.f32 %v8605_v2, %v4095_v41  ;;  %v4075_v21 = vmul.f32 %v6453_v44, %v8588_v58  ;;  %v4146_v58 = vlaneseq }
 0xf6c   : > { %4328 = vmatprep.mubr.bf16.mxu0 %v8986_v38  ;;  %v4074_v47 = vmul.f32 %v6455_v35, %v8583_v32  ;;  %v4144_v32 = vld [vmem:[%s8944_s10] sm:$0x3] }
 0xf6d   : > { %v4126_v52 = vpack.c.bf16 %v4117_v23, %v4116_v4  ;;  %v4097_v25 = vmul.f32 %v8597_v63, %v4075_v21  ;;  %v4147_v27 = vshrl.u32 %v4146_v58, 7 }
 0xf6e   : > { %v4096_v59 = vmul.f32 %v8597_v63, %v4074_v47 }
 0xf6f   : > { %v4119_v45 = vadd.f32 %v8605_v2, %v4097_v25  ;;  %v4148_v42 = vsub.s32 0, %v4147_v27  ;;  %v4152_v36 = vsub.s32 1, %v4147_v27 }
 0xf70   : > { %v4118_v19 = vadd.f32 %v8605_v2, %v4096_v59 }
 0xf71   : > { %v8662_v34 = vrot.slane %v4144_v32, %v4148_v42  ;;  %v8664_v14 = vrot.slane %v4144_v32, %v4152_v36 }
 0xf72   : > { %v4127_v9 = vpack.c.bf16 %v4119_v45, %v4118_v19 }
 0xf73   : > { %4329 = vmatmul.mubr.bf16.gmra.mrb[112].mxu0 %v4126_v52 }
 0xf74   : > { %4338 = vmatprep.mubr.bf16.mxu0 %v8986_v38 }
 0xf7b   : > { %4339 = vmatmul.mubr.bf16.gmra.mrb[116].mxu0 %v4127_v9 }
 0xfcb   : > { %v4270_v63 = vpop.f32.mrb[88].mxu0 }
 0xfcc   : > { %v4271_v38 = vadd.f32 %v4270_v63, %v8662_v34  ;;  %v4272_v6 = vpop.f32.mrb[89].mxu0 }
 0xfcd   : > { %v8668_v2 = vadd.f32 %v4272_v6, %v8664_v14  ;;  %v4274_v61 = vpop.f32.mrb[90].mxu0 }
 0xfce   : > { %v4381_v53 = vmul.f32 %v4271_v38, %v4271_v38  ;;  %v8671_v22 = vadd.f32 %v4274_v61, %v8662_v34  ;;  %v4276_v13 = vpop.f32.mrb[91].mxu0 }
 0xfcf   : > { %v4382_v30 = vmul.f32 %v8668_v2, %v8668_v2  ;;  %v8676_v39 = vadd.f32 %v4276_v13, %v8664_v14 }
 0xfd0   : > { %v4413_v11 = vmul.f32 %v4381_v53, %v4271_v38  ;;  %v4383_v46 = vmul.f32 %v8671_v22, %v8671_v22 }
 0xfd1   : > { %v4414_v3 = vmul.f32 %v4382_v30, %v8668_v2  ;;  %v4384_v37 = vmul.f32 %v8676_v39, %v8676_v39 }
 0xfd2   : > { %v4445_v57 = vmul.f32 0.044715, %v4413_v11  ;;  %v4415_v28 = vmul.f32 %v4383_v46, %v8671_v22 }
 0xfd3   : > { %v4446_v7 = vmul.f32 0.044715, %v4414_v3  ;;  %v4416_v55 = vmul.f32 %v4384_v37, %v8676_v39  ;;  %v4280_v10 = vpop.f32.mrb[92].mxu0 }
 0xfd4   : > { %v4477_v8 = vadd.f32 %v4445_v57, %v4271_v38  ;;  %v4447_v33 = vmul.f32 0.044715, %v4415_v28  ;;  %v8686_v1 = vadd.f32 %v4280_v10, %v8662_v34  ;;  %v4282_v12 = vpop.f32.mrb[93].mxu0 }
 0xfd5   : > { %v4478_v17 = vadd.f32 %v4446_v7, %v8668_v2  ;;  %v4448_v24 = vmul.f32 0.044715, %v4416_v55  ;;  %v8690_v41 = vadd.f32 %v4282_v12, %v8664_v14  ;;  %v4284_v26 = vpop.f32.mrb[94].mxu0  ;;  %v4349_v7 = vmul.f32 0.5, %v4271_v38 }
 0xfd6   : > { %v4509_v44 = vmul.f32 0.7978846, %v4477_v8  ;;  %v4479_v5 = vadd.f32 %v4447_v33, %v8671_v22  ;;  %v4385_v60 = vmul.f32 %v8686_v1, %v8686_v1  ;;  %v4286_v35 = vpop.f32.mrb[95].mxu0  ;;  %v4285_v47 = vadd.f32 %v4284_v26, %v8662_v34 }
 0xfd7   : > { %v4510_v23 = vmul.f32 0.7978846, %v4478_v17  ;;  %v4480_v21 = vadd.f32 %v4448_v24, %v8676_v39  ;;  %v4386_v4 = vmul.f32 %v8690_v41, %v8690_v41  ;;  %v8701_v59 = vadd.f32 %v4286_v35, %v8664_v14 }
 0xfd8   : > { %6456 = vtanh.f32 %v4509_v44  ;;  %v4511_v52 = vmul.f32 0.7978846, %v4479_v5  ;;  %v4417_v25 = vmul.f32 %v4385_v60, %v8686_v1  ;;  %v4387_v58 = vmul.f32 %v4285_v47, %v4285_v47 }
 0xfd9   : > { %6458 = vtanh.f32 %v4510_v23  ;;  %v4512_v45 = vmul.f32 0.7978846, %v4480_v21  ;;  %v4418_v19 = vmul.f32 %v4386_v4, %v8690_v41  ;;  %v4388_v27 = vmul.f32 %v8701_v59, %v8701_v59 }
 0xfda   : > { %6460 = vtanh.f32 %v4511_v52  ;;  %v4449_v9 = vmul.f32 0.044715, %v4417_v25  ;;  %v4419_v36 = vmul.f32 %v4387_v58, %v4285_v47  ;;  %v4350_v17 = vmul.f32 0.5, %v8668_v2 }
 0xfdb   : > { %6462 = vtanh.f32 %v4512_v45  ;;  %v4450_v42 = vmul.f32 0.044715, %v4418_v19  ;;  %v4420_v63 = vmul.f32 %v4388_v27, %v8701_v59  ;;  %v4351_v44 = vmul.f32 0.5, %v8671_v22 }
 0xfdc   : > { %v4481_v32 = vadd.f32 %v4449_v9, %v8686_v1  ;;  %v4451_v53 = vmul.f32 0.044715, %v4419_v36  ;;  %v4352_v38 = vmul.f32 0.5, %v8676_v39  ;;  %v4353_v27 = vmul.f32 0.5, %v8686_v1 }
 0xfdd   : > { %v4482_v6 = vadd.f32 %v4450_v42, %v8690_v41  ;;  %v4452_v13 = vmul.f32 0.044715, %v4420_v63  ;;  %v4354_v1 = vmul.f32 0.5, %v8690_v41 }
 0xfde   : > { %v4513_v61 = vmul.f32 0.7978846, %v4481_v32  ;;  %v4483_v11 = vadd.f32 %v4451_v53, %v4285_v47 }
 0xfdf   : > { %v4514_v30 = vmul.f32 0.7978846, %v4482_v6  ;;  %v4484_v46 = vadd.f32 %v4452_v13, %v8701_v59  ;;  %v4355_v6 = vmul.f32 0.5, %v4285_v47 }
 0xfe0   : > { %6464 = vtanh.f32 %v4513_v61  ;;  %v4515_v37 = vmul.f32 0.7978846, %v4483_v11 }
 0xfe1   : > { %6466 = vtanh.f32 %v4514_v30  ;;  %v4516_v57 = vmul.f32 0.7978846, %v4484_v46 }
 0xfe2   : > { %v6457_v3 = vpop.eup %6456  ;;  %6468 = vtanh.f32 %v4515_v37 }
 0xfe3   : > { %v6459_v28 = vpop.eup %6458  ;;  %v4573_v55 = vadd.f32 1.0, %v6457_v3  ;;  %v4290_v10 = vpop.f32.mrb[96].mxu0  ;;  %6470 = vtanh.f32 %v4516_v57 }
 0xfe4   : > { %v6461_v8 = vpop.eup %6460  ;;  %v8711_v33 = vadd.f32 %v4290_v10, %v8662_v34  ;;  %v4292_v12 = vpop.f32.mrb[97].mxu0  ;;  %v4574_v24 = vadd.f32 1.0, %v6459_v28 }
 0xfe5   : > { %v6463_v26 = vpop.eup %6462  ;;  %v4575_v5 = vadd.f32 1.0, %v6461_v8  ;;  %v8716_v60 = vadd.f32 %v4292_v12, %v8664_v14  ;;  %v4294_v35 = vpop.f32.mrb[98].mxu0  ;;  %v4605_v52 = vmul.f32 %v4573_v55, %v4349_v7 }
 0xfe6   : > { %v4389_v23 = vmul.f32 %v8711_v33, %v8711_v33  ;;  %v8722_v21 = vadd.f32 %v4294_v35, %v8662_v34  ;;  %v4296_v4 = vpop.f32.mrb[99].mxu0  ;;  %v4576_v2 = vadd.f32 1.0, %v6463_v26  ;;  %v4606_v9 = vmul.f32 %v4574_v24, %v4350_v17 }
 0xfe7   : > { %v4607_v25 = vmul.f32 %v4575_v5, %v4351_v44  ;;  %v4390_v22 = vmul.f32 %v8716_v60, %v8716_v60  ;;  %v8727_v45 = vadd.f32 %v4296_v4, %v8664_v14 }
 0xfe8   : > { %v4421_v19 = vmul.f32 %v4389_v23, %v8711_v33  ;;  %v4391_v39 = vmul.f32 %v8722_v21, %v8722_v21  ;;  %v4608_v58 = vmul.f32 %v4576_v2, %v4352_v38 }
 0xfe9   : > { %v4422_v42 = vmul.f32 %v4390_v22, %v8716_v60  ;;  %v4392_v32 = vmul.f32 %v8727_v45, %v8727_v45  ;;  %v4637_v36 = vpack.c.bf16 %v4607_v25, %v4605_v52 }
 0xfea   : > { %v6465_v63 = vpop.eup %6464  ;;  %v4453_v61 = vmul.f32 0.044715, %v4421_v19  ;;  %v4423_v53 = vmul.f32 %v4391_v39, %v8722_v21  ;;  %v4638_v13 = vpack.c.bf16 %v4608_v58, %v4606_v9 }
 0xfeb   : > { %v6467_v30 = vpop.eup %6466  ;;  %v4577_v11 = vadd.f32 1.0, %v6465_v63  ;;  %v4454_v46 = vmul.f32 0.044715, %v4422_v42  ;;  %v4424_v3 = vmul.f32 %v4392_v32, %v8727_v45  ;;  %v4300_v37 = vpop.f32.mrb[100].mxu0 }
 0xfec   : > { %v4485_v57 = vadd.f32 %v4453_v61, %v8711_v33  ;;  %v4455_v28 = vmul.f32 0.044715, %v4423_v53  ;;  %v8741_v7 = vadd.f32 %v4300_v37, %v8662_v34  ;;  %v4302_v55 = vpop.f32.mrb[101].mxu0  ;;  %4813 = vmatprep.mubr.bf16.mxu0 %v4638_v13  ;;  %v4578_v47 = vadd.f32 1.0, %v6467_v30  ;;  %v6469_v26 = vpop.eup %6468 }
 0xfed   : > { %v4609_v10 = vmul.f32 %v4577_v11, %v4353_v27  ;;  %v4486_v8 = vadd.f32 %v4454_v46, %v8716_v60  ;;  %v4456_v12 = vmul.f32 0.044715, %v4424_v3  ;;  %v8745_v17 = vadd.f32 %v4302_v55, %v8664_v14  ;;  %v4304_v24 = vpop.f32.mrb[102].mxu0  ;;  %4814 = vmatmul.mubr.bf16.vlgmr.msra.gmra.mrb[120].mxu0 %v4637_v36  ;;  %v6471_v25 = vpop.eup %6470 }
 0xfee   : > { %v4517_v41 = vmul.f32 0.7978846, %v4485_v57  ;;  %v4487_v44 = vadd.f32 %v4455_v28, %v8722_v21  ;;  %v4393_v5 = vmul.f32 %v8741_v7, %v8741_v7  ;;  %v8751_v35 = vadd.f32 %v4304_v24, %v8662_v34  ;;  %v4306_v38 = vpop.f32.mrb[103].mxu0 }
 0xfef   : > { %v4579_v23 = vadd.f32 1.0, %v6469_v26  ;;  %v4518_v4 = vmul.f32 0.7978846, %v4486_v8  ;;  %v4488_v2 = vadd.f32 %v4456_v12, %v8727_v45  ;;  %v4394_v52 = vmul.f32 %v8745_v17, %v8745_v17 }
 0xff0   : > { %6472 = vtanh.f32 %v4517_v41  ;;  %v4519_v22 = vmul.f32 0.7978846, %v4487_v44  ;;  %v4425_v19 = vmul.f32 %v4393_v5, %v8741_v7  ;;  %v4395_v39 = vmul.f32 %v8751_v35, %v8751_v35 }
 0xff1   : > { %v4611_v9 = vmul.f32 %v4579_v23, %v4355_v6  ;;  %6474 = vtanh.f32 %v4518_v4  ;;  %v4520_v58 = vmul.f32 0.7978846, %v4488_v2  ;;  %v4426_v27 = vmul.f32 %v4394_v52, %v8745_v17 }
 0xff2   : > { %6476 = vtanh.f32 %v4519_v22  ;;  %v4457_v42 = vmul.f32 0.044715, %v4425_v19  ;;  %v4427_v32 = vmul.f32 %v4395_v39, %v8751_v35  ;;  %v4307_v36 = vadd.f32 %v4306_v38, %v8664_v14 }
 0xff3   : > { %6478 = vtanh.f32 %v4520_v58  ;;  %v4458_v63 = vmul.f32 0.044715, %v4426_v27  ;;  %v4356_v61 = vmul.f32 0.5, %v8701_v59  ;;  %v4580_v53 = vadd.f32 1.0, %v6471_v25 }
 0xff4   : > { %v4489_v13 = vadd.f32 %v4457_v42, %v8741_v7  ;;  %v4459_v30 = vmul.f32 0.044715, %v4427_v32  ;;  %v4396_v11 = vmul.f32 %v4307_v36, %v4307_v36  ;;  %v4639_v6 = vpack.c.bf16 %v4611_v9, %v4609_v10 }
 0xff5   : > { %v4490_v46 = vadd.f32 %v4458_v63, %v8745_v17  ;;  %v4610_v3 = vmul.f32 %v4578_v47, %v4354_v1  ;;  %v4612_v37 = vmul.f32 %v4580_v53, %v4356_v61  ;;  %v4357_v23 = vmul.f32 0.5, %v8711_v33 }
 0xff6   : > { %v4521_v57 = vmul.f32 0.7978846, %v4489_v13  ;;  %v4491_v28 = vadd.f32 %v4459_v30, %v8751_v35  ;;  %v4428_v55 = vmul.f32 %v4396_v11, %v4307_v36  ;;  %v4359_v4 = vmul.f32 0.5, %v8722_v21 }
 0xff7   : > { %v4522_v8 = vmul.f32 0.7978846, %v4490_v46  ;;  %v4640_v12 = vpack.c.bf16 %v4612_v37, %v4610_v3  ;;  %v4358_v52 = vmul.f32 0.5, %v8716_v60  ;;  %v4360_v25 = vmul.f32 0.5, %v8727_v45 }
 0xff8   : > { %6480 = vtanh.f32 %v4521_v57  ;;  %v4523_v24 = vmul.f32 0.7978846, %v4491_v28  ;;  %v4460_v26 = vmul.f32 0.044715, %v4428_v55  ;;  %v4361_v33 = vmul.f32 0.5, %v8741_v7 }
 0xff9   : > { %6482 = vtanh.f32 %v4522_v8  ;;  %4821 = vmatprep.mubr.bf16.mxu1 %v4640_v12  ;;  %v4363_v21 = vmul.f32 0.5, %v8751_v35  ;;  %v4364_v46 = vmul.f32 0.5, %v4307_v36 }
 0xffa   : > { %v6473_v59 = vpop.eup %6472  ;;  %6484 = vtanh.f32 %v4523_v24  ;;  %v4492_v41 = vadd.f32 %v4460_v26, %v4307_v36  ;;  %4822 = vmatmul.mubr.bf16.vlgmr.msra.gmra.mrb[104].mxu1 %v4639_v6  ;;  %v4362_v6 = vmul.f32 0.5, %v8745_v17 }
 0xffb   : > { %v6475_v10 = vpop.eup %6474  ;;  %v4581_v44 = vadd.f32 1.0, %v6473_v59 }
 0xffc   : > { %v6477_v5 = vpop.eup %6476  ;;  %v4524_v1 = vmul.f32 0.7978846, %v4492_v41  ;;  %v4582_v47 = vadd.f32 1.0, %v6475_v10 }
 0xffd   : > { %v6479_v38 = vpop.eup %6478  ;;  %v4583_v2 = vadd.f32 1.0, %v6477_v5  ;;  %v4613_v19 = vmul.f32 %v4581_v44, %v4357_v23 }
 0xffe   : > { %6486 = vtanh.f32 %v4524_v1  ;;  %v4584_v22 = vadd.f32 1.0, %v6479_v38  ;;  %v4614_v9 = vmul.f32 %v4582_v47, %v4358_v52 }
 0xfff   : > { %v4615_v39 = vmul.f32 %v4583_v2, %v4359_v4 }
0x1000   : > { %v4616_v58 = vmul.f32 %v4584_v22, %v4360_v25 }
0x1001   : > { %v4641_v27 = vpack.c.bf16 %v4615_v39, %v4613_v19 }
0x1002   : > { %v6481_v42 = vpop.eup %6480  ;;  %v4642_v32 = vpack.c.bf16 %v4616_v58, %v4614_v9 }
0x1003   : > { %v6483_v63 = vpop.eup %6482  ;;  %v4585_v61 = vadd.f32 1.0, %v6481_v42 }
0x1004   : > { %v6485_v53 = vpop.eup %6484  ;;  %4829 = vmatprep.mubr.bf16.mxu1 %v4642_v32  ;;  %v4586_v13 = vadd.f32 1.0, %v6483_v63 }
0x1005   : > { %4830 = vmatmul.mubr.bf16.gmra.mrb[108].mxu1 %v4641_v27  ;;  %v4587_v60 = vadd.f32 1.0, %v6485_v53  ;;  %v4617_v45 = vmul.f32 %v4585_v61, %v4361_v33 }
0x1006   : > { %v4618_v57 = vmul.f32 %v4586_v13, %v4362_v6 }
0x1007   : > { %v4619_v30 = vmul.f32 %v4587_v60, %v4363_v21 }
0x1008   : > { %v6487_v11 = vpop.eup %6486 }
0x1009   : > { %v4588_v3 = vadd.f32 1.0, %v6487_v11  ;;  %v4643_v37 = vpack.c.bf16 %v4619_v30, %v4617_v45 }
0x100b   : > { %v4620_v28 = vmul.f32 %v4588_v3, %v4364_v46 }
0x100d   : > { %v4644_v55 = vpack.c.bf16 %v4620_v28, %v4618_v57 }
0x100f   : > { %4837 = vmatprep.mubr.bf16.mxu1 %v4644_v55 }
0x1010   : > { %4838 = vmatmul.mubr.bf16.gmra.mrb[112].mxu1 %v4643_v37 }
0x1036   : > { %v4310_v8 = vpop.f32.mrb[104].mxu0 }
0x1037   : > { %v4311_v7 = vadd.f32 %v4310_v8, %v8662_v34  ;;  %v4312_v12 = vpop.f32.mrb[105].mxu0 }
0x1038   : > { %v4313_v35 = vadd.f32 %v4312_v12, %v8664_v14  ;;  %v4314_v24 = vpop.f32.mrb[106].mxu0 }
0x1039   : > { %v4397_v26 = vmul.f32 %v4311_v7, %v4311_v7  ;;  %v4315_v59 = vadd.f32 %v4314_v24, %v8662_v34  ;;  %v4316_v41 = vpop.f32.mrb[107].mxu0  ;;  %v8780_v39 = vmul.f32 0.5, %v4311_v7 }
0x103a   : > { %v4398_v17 = vmul.f32 %v4313_v35, %v4313_v35  ;;  %v4317_v36 = vadd.f32 %v4316_v41, %v8664_v14  ;;  %v8783_v32 = vmul.f32 0.5, %v4313_v35 }
0x103b   : > { %v4429_v10 = vmul.f32 %v4397_v26, %v4311_v7  ;;  %v4399_v44 = vmul.f32 %v4315_v59, %v4315_v59  ;;  %v8795_v8 = vmul.f32 0.5, %v4315_v59 }
0x103c   : > { %v4430_v5 = vmul.f32 %v4398_v17, %v4313_v35  ;;  %v4400_v1 = vmul.f32 %v4317_v36, %v4317_v36  ;;  %v8797_v24 = vmul.f32 0.5, %v4317_v36 }
0x103d   : > { %v4461_v47 = vmul.f32 0.044715, %v4429_v10  ;;  %v4431_v38 = vmul.f32 %v4399_v44, %v4315_v59 }
0x103e   : > { %v4462_v23 = vmul.f32 0.044715, %v4430_v5  ;;  %v4432_v4 = vmul.f32 %v4400_v1, %v4317_v36  ;;  %v4320_v2 = vpop.f32.mrb[108].mxu0 }
0x103f   : > { %v4493_v52 = vadd.f32 %v4461_v47, %v4311_v7  ;;  %v4463_v25 = vmul.f32 0.044715, %v4431_v38  ;;  %v8778_v22 = vadd.f32 %v4320_v2, %v8662_v34  ;;  %v4322_v19 = vpop.f32.mrb[109].mxu0 }
0x1040   : > { %v4494_v9 = vadd.f32 %v4462_v23, %v4313_v35  ;;  %v4464_v58 = vmul.f32 0.044715, %v4432_v4  ;;  %v4323_v27 = vadd.f32 %v4322_v19, %v8664_v14  ;;  %v4324_v42 = vpop.f32.mrb[110].mxu0 }
0x1041   : > { %v4525_v63 = vmul.f32 0.7978846, %v4493_v52  ;;  %v4495_v61 = vadd.f32 %v4463_v25, %v4315_v59  ;;  %v4401_v53 = vmul.f32 %v8778_v22, %v8778_v22  ;;  %v8788_v33 = vadd.f32 %v4324_v42, %v8662_v34  ;;  %v4326_v21 = vpop.f32.mrb[111].mxu0 }
0x1042   : > { %v4526_v60 = vmul.f32 0.7978846, %v4494_v9  ;;  %v4496_v13 = vadd.f32 %v4464_v58, %v4317_v36  ;;  %v4402_v45 = vmul.f32 %v4323_v27, %v4323_v27  ;;  %v4327_v30 = vadd.f32 %v4326_v21, %v8664_v14 }
0x1043   : > { %6488 = vtanh.f32 %v4525_v63  ;;  %v4527_v11 = vmul.f32 0.7978846, %v4495_v61  ;;  %v4433_v6 = vmul.f32 %v4401_v53, %v8778_v22  ;;  %v4403_v46 = vmul.f32 %v8788_v33, %v8788_v33 }
0x1044   : > { %6490 = vtanh.f32 %v4526_v60  ;;  %v4528_v3 = vmul.f32 0.7978846, %v4496_v13  ;;  %v4434_v37 = vmul.f32 %v4402_v45, %v4323_v27  ;;  %v4404_v57 = vmul.f32 %v4327_v30, %v4327_v30 }
0x1045   : > { %6492 = vtanh.f32 %v4527_v11  ;;  %v4465_v28 = vmul.f32 0.044715, %v4433_v6  ;;  %v4435_v55 = vmul.f32 %v4403_v46, %v8788_v33  ;;  %v8799_v26 = vmul.f32 0.5, %v4323_v27 }
0x1046   : > { %v4466_v7 = vmul.f32 0.044715, %v4434_v37  ;;  %v4436_v12 = vmul.f32 %v4404_v57, %v4327_v30  ;;  %v4330_v35 = vpop.f32.mrb[112].mxu0  ;;  %6494 = vtanh.f32 %v4528_v3  ;;  %v8808_v38 = vmul.f32 0.5, %v4327_v30 }
0x1047   : > { %v4497_v41 = vadd.f32 %v4465_v28, %v8778_v22  ;;  %v4467_v17 = vmul.f32 0.044715, %v4435_v55  ;;  %v8803_v10 = vadd.f32 %v4330_v35, %v8662_v34  ;;  %v4332_v44 = vpop.f32.mrb[113].mxu0 }
0x1048   : > { %v4498_v5 = vadd.f32 %v4466_v7, %v4323_v27  ;;  %v4468_v1 = vmul.f32 0.044715, %v4436_v12  ;;  %v8806_v59 = vadd.f32 %v4332_v44, %v8664_v14  ;;  %v4334_v47 = vpop.f32.mrb[114].mxu0 }
0x1049   : > { %v4529_v36 = vmul.f32 0.7978846, %v4497_v41  ;;  %v4499_v23 = vadd.f32 %v4467_v17, %v8788_v33  ;;  %v4405_v4 = vmul.f32 %v8803_v10, %v8803_v10  ;;  %v8814_v2 = vadd.f32 %v4334_v47, %v8662_v34  ;;  %v4336_v52 = vpop.f32.mrb[115].mxu0 }
0x104a   : > { %v4530_v25 = vmul.f32 0.7978846, %v4498_v5  ;;  %v4500_v19 = vadd.f32 %v4468_v1, %v4327_v30  ;;  %v4406_v9 = vmul.f32 %v8806_v59, %v8806_v59  ;;  %v8819_v58 = vadd.f32 %v4336_v52, %v8664_v14 }
0x104b   : > { %6496 = vtanh.f32 %v4529_v36  ;;  %v4531_v27 = vmul.f32 0.7978846, %v4499_v23  ;;  %v4437_v42 = vmul.f32 %v4405_v4, %v8803_v10  ;;  %v4407_v63 = vmul.f32 %v8814_v2, %v8814_v2 }
0x104c   : > { %6498 = vtanh.f32 %v4530_v25  ;;  %v4532_v61 = vmul.f32 0.7978846, %v4500_v19  ;;  %v4438_v53 = vmul.f32 %v4406_v9, %v8806_v59  ;;  %v4408_v21 = vmul.f32 %v8819_v58, %v8819_v58 }
0x104d   : > { %v6489_v60 = vpop.eup %6488  ;;  %6500 = vtanh.f32 %v4531_v27  ;;  %v4469_v13 = vmul.f32 0.044715, %v4437_v42  ;;  %v4439_v45 = vmul.f32 %v4407_v63, %v8814_v2  ;;  %v8829_v30 = vmul.f32 0.5, %v8778_v22 }
0x104e   : > { %v6491_v11 = vpop.eup %6490  ;;  %6502 = vtanh.f32 %v4532_v61  ;;  %v4470_v6 = vmul.f32 0.044715, %v4438_v53  ;;  %v4440_v46 = vmul.f32 %v4408_v21, %v8819_v58  ;;  %v4340_v3 = vpop.f32.mrb[116].mxu0  ;;  %v4589_v37 = vadd.f32 1.0, %v6489_v60 }
0x104f   : > { %v6493_v57 = vpop.eup %6492  ;;  %v4501_v28 = vadd.f32 %v4469_v13, %v8803_v10  ;;  %v4471_v55 = vmul.f32 0.044715, %v4439_v45  ;;  %v8834_v7 = vadd.f32 %v4340_v3, %v8662_v34  ;;  %v4342_v12 = vpop.f32.mrb[117].mxu0  ;;  %v4590_v35 = vadd.f32 1.0, %v6491_v11 }
0x1050   : > { %v4502_v41 = vadd.f32 %v4470_v6, %v8806_v59  ;;  %v4472_v22 = vmul.f32 0.044715, %v4440_v46  ;;  %v8838_v17 = vadd.f32 %v4342_v12, %v8664_v14  ;;  %v4344_v44 = vpop.f32.mrb[118].mxu0  ;;  %v4591_v5 = vadd.f32 1.0, %v6493_v57  ;;  %v6495_v1 = vpop.eup %6494 }
0x1051   : > { %v4533_v47 = vmul.f32 0.7978846, %v4501_v28  ;;  %v4503_v36 = vadd.f32 %v4471_v55, %v8814_v2  ;;  %v4409_v23 = vmul.f32 %v8834_v7, %v8834_v7  ;;  %v8844_v4 = vadd.f32 %v4344_v44, %v8662_v34  ;;  %v4346_v52 = vpop.f32.mrb[119].mxu0 }
0x1052   : > { %v4534_v25 = vmul.f32 0.7978846, %v4502_v41  ;;  %v4504_v19 = vadd.f32 %v4472_v22, %v8819_v58  ;;  %v4410_v9 = vmul.f32 %v8838_v17, %v8838_v17  ;;  %v8850_v27 = vadd.f32 %v4346_v52, %v8664_v14 }
0x1053   : > { %6504 = vtanh.f32 %v4533_v47  ;;  %v4535_v42 = vmul.f32 0.7978846, %v4503_v36  ;;  %v4441_v63 = vmul.f32 %v4409_v23, %v8834_v7  ;;  %v4411_v61 = vmul.f32 %v8844_v4, %v8844_v4 }
0x1054   : > { %6506 = vtanh.f32 %v4534_v25  ;;  %v4536_v34 = vmul.f32 0.7978846, %v4504_v19  ;;  %v4442_v53 = vmul.f32 %v4410_v9, %v8838_v17  ;;  %v4412_v21 = vmul.f32 %v8850_v27, %v8850_v27 }
0x1055   : > { %v6497_v60 = vpop.eup %6496  ;;  %6508 = vtanh.f32 %v4535_v42  ;;  %v4473_v13 = vmul.f32 0.044715, %v4441_v63  ;;  %v4443_v14 = vmul.f32 %v4411_v61, %v8844_v4  ;;  %v4592_v45 = vadd.f32 1.0, %v6495_v1 }
0x1056   : > { %v6499_v11 = vpop.eup %6498  ;;  %6510 = vtanh.f32 %v4536_v34  ;;  %v4474_v6 = vmul.f32 0.044715, %v4442_v53  ;;  %v4444_v46 = vmul.f32 %v4412_v21, %v8850_v27  ;;  %v4622_v3 = vmul.f32 %v4590_v35, %v8783_v32 }
0x1057   : > { %v6501_v57 = vpop.eup %6500  ;;  %v4505_v28 = vadd.f32 %v4473_v13, %v8834_v7  ;;  %v4475_v55 = vmul.f32 0.044715, %v4443_v14  ;;  %v4624_v12 = vmul.f32 %v4592_v45, %v8797_v24  ;;  %v4621_v41 = vmul.f32 %v4589_v37, %v8780_v39 }
0x1058   : > { %v6503_v22 = vpop.eup %6502  ;;  %v4506_v44 = vadd.f32 %v4474_v6, %v8838_v17  ;;  %v4476_v47 = vmul.f32 0.044715, %v4444_v46  ;;  %v4623_v1 = vmul.f32 %v4591_v5, %v8795_v8  ;;  %v4594_v36 = vadd.f32 1.0, %v6499_v11 }
0x1059   : > { %v4537_v23 = vmul.f32 0.7978846, %v4505_v28  ;;  %v4507_v52 = vadd.f32 %v4475_v55, %v8844_v4  ;;  %v4646_v25 = vpack.c.bf16 %v4624_v12, %v4622_v3  ;;  %v4596_v32 = vadd.f32 1.0, %v6503_v22 }
0x105a   : > { %v4538_v35 = vmul.f32 0.7978846, %v4506_v44  ;;  %v4508_v19 = vadd.f32 %v4476_v47, %v8850_v27  ;;  %v4645_v9 = vpack.c.bf16 %v4623_v1, %v4621_v41  ;;  %v4626_v24 = vmul.f32 %v4594_v36, %v8799_v26 }
0x105b   : > { %6512 = vtanh.f32 %v4537_v23  ;;  %v4539_v39 = vmul.f32 0.7978846, %v4507_v52  ;;  %4845 = vmatprep.mubr.bf16.mxu1 %v4646_v25  ;;  %v4628_v37 = vmul.f32 %v4596_v32, %v8808_v38  ;;  %v4593_v42 = vadd.f32 1.0, %v6497_v60 }
0x105c   : > { %6514 = vtanh.f32 %v4538_v35  ;;  %v4540_v8 = vmul.f32 0.7978846, %v4508_v19  ;;  %4846 = vmatmul.mubr.bf16.gmra.mrb[116].mxu1 %v4645_v9  ;;  %v4371_v5 = vmul.f32 0.5, %v8788_v33  ;;  %v4595_v63 = vadd.f32 1.0, %v6501_v57 }
0x105d   : > { %v6505_v61 = vpop.eup %6504  ;;  %6516 = vtanh.f32 %v4539_v39  ;;  %v4648_v34 = vpack.c.bf16 %v4628_v37, %v4626_v24  ;;  %v4625_v21 = vmul.f32 %v4593_v42, %v8829_v30  ;;  %v4373_v11 = vmul.f32 0.5, %v8803_v10 }
0x105e   : > { %v6507_v53 = vpop.eup %6506  ;;  %6518 = vtanh.f32 %v4540_v8  ;;  %v4627_v26 = vmul.f32 %v4595_v63, %v4371_v5  ;;  %v4597_v13 = vadd.f32 1.0, %v6505_v61  ;;  %v4375_v6 = vmul.f32 0.5, %v8814_v2 }
0x105f   : > { %v6509_v14 = vpop.eup %6508  ;;  %4853 = vmatprep.mubr.bf16.mxu1 %v4648_v34  ;;  %v4598_v45 = vadd.f32 1.0, %v6507_v53  ;;  %v4374_v46 = vmul.f32 0.5, %v8806_v59  ;;  %v4376_v3 = vmul.f32 0.5, %v8819_v58  ;;  %v4377_v23 = vmul.f32 0.5, %v8834_v7 }
0x1060   : > { %v6511_v38 = vpop.eup %6510  ;;  %v4647_v60 = vpack.c.bf16 %v4627_v26, %v4625_v21  ;;  %v4599_v33 = vadd.f32 1.0, %v6509_v14  ;;  %v4629_v28 = vmul.f32 %v4597_v13, %v4373_v11  ;;  %v4379_v59 = vmul.f32 0.5, %v8844_v4 }
0x1061   : > { %v4600_v57 = vadd.f32 1.0, %v6511_v38  ;;  %v4630_v30 = vmul.f32 %v4598_v45, %v4374_v46  ;;  %v4378_v52 = vmul.f32 0.5, %v8838_v17  ;;  %v4380_v25 = vmul.f32 0.5, %v8850_v27  ;;  %v8884_v27 = vld [vmem:[%s8946_s12] ss:$0 sm:$0xff] }
0x1062   : > { %v4631_v55 = vmul.f32 %v4599_v33, %v4375_v6 }
0x1063   : > { %v4632_v12 = vmul.f32 %v4600_v57, %v4376_v3 }
0x1064   : > { %4854 = vmatmul.mubr.bf16.gmra.mrb[120].mxu1 %v4647_v60  ;;  %v4649_v41 = vpack.c.bf16 %v4631_v55, %v4629_v28 }
0x1065   : > { %v6513_v22 = vpop.eup %6512  ;;  %v4650_v44 = vpack.c.bf16 %v4632_v12, %v4630_v30 }
0x1066   : > { %v6515_v47 = vpop.eup %6514  ;;  %v4601_v1 = vadd.f32 1.0, %v6513_v22 }
0x1067   : > { %v6517_v36 = vpop.eup %6516  ;;  %4861 = vmatprep.mubr.bf16.mxu1 %v4650_v44  ;;  %v4602_v10 = vadd.f32 1.0, %v6515_v47 }
0x1068   : > { %v6519_v2 = vpop.eup %6518  ;;  %v4603_v58 = vadd.f32 1.0, %v6517_v36  ;;  %v4633_v35 = vmul.f32 %v4601_v1, %v4377_v23 }
0x1069   : > { %v4604_v32 = vadd.f32 1.0, %v6519_v2  ;;  %v4634_v9 = vmul.f32 %v4602_v10, %v4378_v52 }
0x106a   : > { %v4635_v19 = vmul.f32 %v4603_v58, %v4379_v59 }
0x106b   : > { %v4636_v24 = vmul.f32 %v4604_v32, %v4380_v25 }
0x106c   : > { %4862 = vmatmul.mubr.bf16.gmra.mrb[124].mxu1 %v4649_v41  ;;  %v4651_v39 = vpack.c.bf16 %v4635_v19, %v4633_v35 }
0x106d   : > { %v4652_v37 = vpack.c.bf16 %v4636_v24, %v4634_v9 }
0x106f   : > { %4869 = vmatprep.mubr.bf16.mxu1 %v4652_v37 }
0x1074   : > { %4870 = vmatmul.mubr.bf16.gmra.mrb[128].mxu1 %v4651_v39 }
0x10c0   : > { %v5485_v42 = vpop.f32.mrb[120].mxu0 }
0x10c1   : > { %v5486_v7 = vpop.f32.mrb[121].mxu0 }
0x10c2   : > { %v5487_v8 = vadd.f32 %v5486_v7, %v5485_v42  ;;  %v5488_v4 = vpop.f32.mrb[122].mxu0 }
0x10c3   : > { %v5489_v5 = vpop.f32.mrb[123].mxu0 }
0x10c4   : > { %v4878_v17 = vadd.f32 %v5487_v8, %v8389_v16  ;;  %v5490_v63 = vadd.f32 %v5489_v5, %v5488_v4 }
0x10c6   : > { %v4879_v61 = vadd.f32 %v5490_v63, %v8393_v54  ;;  %v4901_v34 = vadd.f32 %v8884_v27, %v4878_v17 }
0x10c8   : > { %v4902_v53 = vadd.f32 %v8884_v27, %v4879_v61 }
0x10ca   : > { %v5265_v16 = vpack.c.bf16 %v4902_v53, %v4901_v34 }
0x10cc   : > { %5266 = vst [vmem:[%s8893_s13] sm:$0xff] %v5265_v16  }
0x10cd   : > { %v5491_v21 = vpop.f32.mrb[104].mxu1 }
0x10ce   : > { %v5492_v26 = vpop.f32.mrb[105].mxu1 }
0x10cf   : > { %v5493_v13 = vadd.f32 %v5492_v26, %v5491_v21  ;;  %v5494_v14 = vpop.f32.mrb[106].mxu1 }
0x10d0   : > { %v5495_v45 = vpop.f32.mrb[107].mxu1 }
0x10d1   : > { %v4880_v54 = vadd.f32 %v5493_v13, %v8397_v50  ;;  %v5496_v38 = vadd.f32 %v5495_v45, %v5494_v14 }
0x10d3   : > { %v4881_v60 = vadd.f32 %v5496_v38, %v8403_v18  ;;  %v4903_v11 = vadd.f32 %v8884_v27, %v4880_v54 }
0x10d5   : > { %v4904_v6 = vadd.f32 %v8884_v27, %v4881_v60 }
0x10d7   : > { %v5270_v33 = vpack.c.bf16 %v4904_v6, %v4903_v11 }
0x10d8   : > { %v5497_v46 = vpop.f32.mrb[108].mxu1 }
0x10d9   : > { %5302 = vst [vmem:[%s8893_s13 + $0x8] sm:$0xff] %v5270_v33   ;;  %v5498_v3 = vpop.f32.mrb[109].mxu1 }
0x10da   : > { %v5499_v57 = vadd.f32 %v5498_v3, %v5497_v46  ;;  %v5500_v28 = vpop.f32.mrb[110].mxu1 }
0x10db   : > { %v5501_v55 = vpop.f32.mrb[111].mxu1 }
0x10dc   : > { %v4882_v30 = vadd.f32 %v5499_v57, %v8409_v56  ;;  %v5502_v12 = vadd.f32 %v5501_v55, %v5500_v28 }
0x10de   : > { %v4883_v50 = vadd.f32 %v5502_v12, %v8414_v15  ;;  %v4905_v18 = vadd.f32 %v8884_v27, %v4882_v30 }
0x10e0   : > { %v4906_v41 = vadd.f32 %v8884_v27, %v4883_v50 }
0x10e2   : > { %v5275_v22 = vpack.c.bf16 %v4906_v41, %v4905_v18 }
0x10e3   : > { %v5503_v44 = vpop.f32.mrb[112].mxu1 }
0x10e4   : > { %5303 = vst [vmem:[%s8893_s13 + $0x10] sm:$0xff] %v5275_v22   ;;  %v5504_v47 = vpop.f32.mrb[113].mxu1 }
0x10e5   : > { %v5505_v1 = vadd.f32 %v5504_v47, %v5503_v44  ;;  %v5506_v36 = vpop.f32.mrb[114].mxu1 }
0x10e6   : > { %v5507_v10 = vpop.f32.mrb[115].mxu1 }
0x10e7   : > { %v4884_v2 = vadd.f32 %v5505_v1, %v8418_v51  ;;  %v5508_v23 = vadd.f32 %v5507_v10, %v5506_v36 }
0x10e9   : > { %v4885_v56 = vadd.f32 %v5508_v23, %v8422_v62  ;;  %v4907_v59 = vadd.f32 %v8884_v27, %v4884_v2 }
0x10eb   : > { %v4908_v15 = vadd.f32 %v8884_v27, %v4885_v56 }
0x10ed   : > { %v5280_v58 = vpack.c.bf16 %v4908_v15, %v4907_v59 }
0x10ef   : > { %5304 = vst [vmem:[%s8893_s13 + $0x18] sm:$0xff] %v5280_v58  }
0x112f   : > { %v5509_v52 = vpop.f32.mrb[116].mxu1 }
0x1130   : > { %v5510_v25 = vpop.f32.mrb[117].mxu1 }
0x1131   : > { %v5511_v32 = vadd.f32 %v5510_v25, %v5509_v52  ;;  %v5512_v35 = vpop.f32.mrb[118].mxu1 }
0x1132   : > { %v5513_v19 = vpop.f32.mrb[119].mxu1 }
0x1133   : > { %v4886_v9 = vadd.f32 %v5511_v32, %v8429_v20  ;;  %v5514_v24 = vadd.f32 %v5513_v19, %v5512_v35 }
0x1135   : > { %v4887_v51 = vadd.f32 %v5514_v24, %v8434_v0  ;;  %v4909_v39 = vadd.f32 %v8884_v27, %v4886_v9 }
0x1137   : > { %v4910_v62 = vadd.f32 %v8884_v27, %v4887_v51  ;;  %v5515_v37 = vpop.f32.mrb[120].mxu1 }
0x1138   : > { %v5516_v42 = vpop.f32.mrb[121].mxu1 }
0x1139   : > { %v5285_v7 = vpack.c.bf16 %v4910_v62, %v4909_v39  ;;  %v5517_v8 = vadd.f32 %v5516_v42, %v5515_v37  ;;  %v5518_v4 = vpop.f32.mrb[122].mxu1 }
0x113a   : > { %v5519_v5 = vpop.f32.mrb[123].mxu1 }
0x113b   : > { %5305 = vst [vmem:[%s8893_s13 + $0x20] sm:$0xff] %v5285_v7   ;;  %v4888_v17 = vadd.f32 %v5517_v8, %v8438_v31  ;;  %v5520_v63 = vadd.f32 %v5519_v5, %v5518_v4 }
0x113d   : > { %v4889_v20 = vadd.f32 %v5520_v63, %v8442_v29  ;;  %v4911_v61 = vadd.f32 %v8884_v27, %v4888_v17 }
0x113f   : > { %v4912_v0 = vadd.f32 %v8884_v27, %v4889_v20  ;;  %v5521_v34 = vpop.f32.mrb[124].mxu1 }
0x1140   : > { %v5522_v53 = vpop.f32.mrb[125].mxu1 }
0x1141   : > { %v5290_v16 = vpack.c.bf16 %v4912_v0, %v4911_v61  ;;  %v5523_v21 = vadd.f32 %v5522_v53, %v5521_v34  ;;  %v5524_v26 = vpop.f32.mrb[126].mxu1 }
0x1142   : > { %v5525_v13 = vpop.f32.mrb[127].mxu1 }
0x1143   : > { %5306 = vst [vmem:[%s8893_s13 + $0x28] sm:$0xff] %v5290_v16   ;;  %v4890_v14 = vadd.f32 %v5523_v21, %v8449_v40  ;;  %v5526_v45 = vadd.f32 %v5525_v13, %v5524_v26 }
0x1145   : > { %v4891_v31 = vadd.f32 %v5526_v45, %v8454_v49  ;;  %v4913_v29 = vadd.f32 %v8884_v27, %v4890_v14 }
0x1147   : > { %v4914_v54 = vadd.f32 %v8884_v27, %v4891_v31  ;;  %v5527_v38 = vpop.f32.mrb[128].mxu1 }
0x1148   : > { %v5528_v60 = vpop.f32.mrb[129].mxu1 }
0x1149   : > { %v5295_v11 = vpack.c.bf16 %v4914_v54, %v4913_v29  ;;  %v5529_v6 = vadd.f32 %v5528_v60, %v5527_v38  ;;  %v5530_v33 = vpop.f32.mrb[130].mxu1 }
0x114a   : > { %v5531_v46 = vpop.f32.mrb[131].mxu1 }
0x114b   : > { %5307 = vst [vmem:[%s8893_s13 + $0x30] sm:$0xff] %v5295_v11   ;;  %v4892_v3 = vadd.f32 %v5529_v6, %v8458_v48  ;;  %v5532_v57 = vadd.f32 %v5531_v46, %v5530_v33 }
0x114d   : > { %v4893_v40 = vadd.f32 %v5532_v57, %v8462_v43  ;;  %v4915_v28 = vadd.f32 %v8884_v27, %v4892_v3 }
0x114f   : > { %v4916_v49 = vadd.f32 %v8884_v27, %v4893_v40 }
0x1151   : > { %v5300_v55 = vpack.c.bf16 %v4916_v49, %v4915_v28 }
0x1153   : > { %5308 = vst [vmem:[%s8893_s13 + $0x38] sm:$0xff] %v5300_v55  }
0x1154 PF: > { %s27_s18 = sadd.s32 1, %s6606_s18  }
0x1155   : > { %p24_p5 = scmp.ge.s32.totalorder %s27_s18, 6  }
0x1157   :  { %26 = sbr.rel (!%p24_p5) target bundleno = 2 (0x2), region = 119 }
0x115e   :  { %5021 = vsyncpa [#allocation3], 1 }
0x115f   :  { %5023 = vsyncpa [#allocation3 + $0x1], 1 }
0x1160   :  { %5024 = vsyncpa [#allocation5], 1 }

// kernel: transformer_fwd.3
= control target key start
LH: loop header
LB: loop body
LE: loop exit
PB: predicated region body
PF: predicated region fallthrough
CT: control target
= control target key end

     0   :  { %s9309_s0 = inlined_call_operand.vmem [shape: bf16[8,64,128], index: 0, kind: input, shape index: {}]   ;;  %s9310_s1 = inlined_call_operand.vmem [shape: f32[1,128], index: 1, kind: input, shape index: {}, may-alias: {1,7,13}]   ;;  %s9311_s2 = inlined_call_operand.vmem [shape: f32[1,128], index: 2, kind: input, shape index: {}, may-alias: {2,8,14}]   ;;  %s9312_s3 = inlined_call_operand.vmem [shape: bf16[128,128], index: 3, kind: input, shape index: {}]   ;;  %s9313_s4 = inlined_call_operand.vmem [shape: bf16[128,256], index: 4, kind: input, shape index: {}]   ;;  %s9314_s5 = inlined_call_operand.vmem [shape: bf16[128,128], index: 5, kind: input, shape index: {}]   ;;  %s9315_s6 = inlined_call_operand.vmem [shape: f32[1,128], index: 6, kind: input, shape index: {}]   ;;  %s9316_s7 = inlined_call_operand.vmem [shape: f32[1,128], index: 7, kind: input, shape index: {}, may-alias: {1,7,13}]   ;;  %s9317_s8 = inlined_call_operand.vmem [shape: f32[1,128], index: 8, kind: input, shape index: {}, may-alias: {2,8,14}]   ;;  %s9318_s9 = inlined_call_operand.vmem [shape: bf16[128,256], index: 9, kind: input, shape index: {}]   ;;  %s9319_s10 = inlined_call_operand.vmem [shape: f32[1,256], index: 10, kind: input, shape index: {}]   ;;  %s9320_s11 = inlined_call_operand.vmem [shape: bf16[256,128], index: 11, kind: input, shape index: {}]   ;;  %s9321_s12 = inlined_call_operand.vmem [shape: f32[1,128], index: 12, kind: input, shape index: {}]   ;;  %s9322_s13 = inlined_call_operand.vmem [shape: f32[1,128], index: 13, kind: input, shape index: {}, may-alias: {1,7,13}]   ;;  %s9323_s14 = inlined_call_operand.vmem [shape: f32[1,128], index: 14, kind: input, shape index: {}, may-alias: {2,8,14}]   ;;  %s9324_s15 = inlined_call_operand.hbm [shape: f32[8,64,128], index: 15, kind: output, shape index: {}]  }
   0x1   :  { %9350 = sst [smem:[#allocation42_spill]] %s9309_s0 }
   0x2   :  { %20 = vsyncpa [#allocation3], 0 }
   0x3   :  { %22 = vsyncpa [#allocation3 + $0x1], 0  ;;  %s6810_s18 = smov 0   ;;  %s6812_s19 = smov 0  }
   0x4   :  { %s6814_s20 = smov 0   ;;  %s6816_s21 = smov 0  }
   0x5 LB: > { %9351 = sst [smem:[#allocation5_spill]] %s6717_s20  ;;  %s6831_s22 = sadd.s32 4294967295, %s6721_s21   ;;  %s6721_s21 = sphi %s6816_s21, %s9443_s21   ;;  %s6717_s20 = sphi %s6814_s20, %s9445_s20   ;;  %s6713_s19 = sphi %s6812_s19, %s9447_s19   ;;  %s6709_s18 = sphi %s6810_s18, %s9446_s18  }
   0x6   : > { %s5214_s23 = sadd.s32 4294967294, %s6721_s21   ;;  %s6835_s24 = sadd.s32 1, %s6721_s21  }
   0x7   : > { %9352 = sst [smem:[#allocation6_spill]] %s6835_s24  ;;  %s355_s25 = sadd.s32 1, %s6717_s20 }
   0x8   : > { %s352_s26 = ssub.s32 %s6721_s21, %s6835_s24  ;;  %p365_p0 = scmp.ne.s32.totalorder %s6717_s20, %s6713_s19 }
   0x9   : > { %p353_p1 = scmp.eq.s32.totalorder %s352_s26, 0  ;;  %p366_p2 = scmp.eq.s32.totalorder %s6831_s22, 3 }
   0xa   : > { %p371_p3 = scmp.ne.s32.totalorder %s6713_s19, %s6709_s18  ;;  %p372_p4 = scmp.eq.s32.totalorder %s5214_s23, 3 }
   0xb   : > { %s6846_s27 = scalar_select %p353_p1, %s6717_s20, %s355_s25  }
   0xc   : > { %p6848_p5 = por %p366_p2, %p365_p0  ;;  %p6852_p6 = por %p372_p4, %p371_p3 }
   0xd   : > { %9353 = sst [smem:[#allocation7_spill]] %s6846_s27  ;;  %p5217_p7 = scmp.ge.s32.totalorder %s6721_s21, 1 }
   0xe   : > { %p442_p8 = scmp.lt.s32.totalorder %s6721_s21, 5 }
  0x10   : > { %p443_p9 = pnand %p5217_p7, %p442_p8 }
  0x12   : > { %446 = sbr.rel (%p443_p9) target bundleno = 4718 (0x126e), region = 80 }
  0x19   : > { %s5219_s30 = sshll.u32 %s6831_s22, 1  ;;  %s9356_s0 = sld [smem:[#allocation42_spill]]  ;;  %v6163_v24 = vld [vmem:[%s9313_s4 + $0x4] ss:$8 sps:$4 sm:$0xff]   ;;  %v6165_v25 = vld [vmem:[%s9313_s4] ss:$8 sps:$4 sm:$0xff]  }
  0x1a   : > { %p492_p10 = scmp.lt.s32.totalorder %s5219_s30, 7  ;;  %v6166_v26 = vld [vmem:[%s9312_s3] sm:$0xff]   ;;  %v6167_v27 = vld [vmem:[%s9313_s4 + $0x14] ss:$8 sps:$4 sm:$0xff]   ;;  %1036 = vmatprep.subr.bf16.mxu1 %v6163_v24  ;;  %v6170_v24 = vld [vmem:[%s9312_s3 + $0x8] sm:$0xff]   ;;  %vm1173_vm0 = vcmask 261120  }
  0x1b   : > { %5630 = vmatprep.subr.bf16.mxu0 %v6166_v26  ;;  %1037 = vmatpush1.bf16.msra.mxu1 %v6165_v25  ;;  %v6171_v25 = vld [vmem:[%s9313_s4 + $0x24] ss:$8 sps:$4 sm:$0xff]   ;;  %vm1352_vm1 = vcmask 523264   ;;  %s9348_s27 = smov 64   ;;  %s6726_s26 = smov 32   ;;  %vm3655_vm2 = vcmask 785408  }
  0x1c   : > { %s9449_s30 = smov (!%p492_p10, %s5219_s30), 7  ;;  %5631 = vmatpush3.bf16.msra.mxu0 %v6166_v26  ;;  %1038 = vmatprep.subr.bf16.mxu1 %v6167_v27  ;;  %s488_s24 = sand.u32 1, %s6713_s19  }
  0x1d   : > { %s5364_s16 = sshll.u32 %s9449_s30, 5  ;;  %5632 = vmatprep.subr.bf16.mxu0 %v6170_v24  ;;  %s9398_s30 = smov 64  }
  0x1f   : > { %s496_s25 = scalar_lea.vmem %s9356_s0, %s5364_s16  ;;  %s6724_s0 = smov 96  }
  0x20   : > { %v5368_v0 = vld [vmem:[%s496_s25] sm:$0xff]   ;;  %v5399_v1 = vld [vmem:[%s496_s25 + $0x8] sm:$0xff]   ;;  %v5400_v4 = vld [vmem:[%s496_s25 + $0x10] sm:$0xff]   ;;  %5633 = vmatpush3.bf16.msra.mxu0 %v6170_v24 }
  0x21   : > { %v6862_v2 = vunpack.c.l.bf16 %v5368_v0  ;;  %v6864_v3 = vunpack.c.l.bf16 %v5399_v1  ;;  %v6868_v5 = vunpack.c.h.bf16 %v5368_v0  ;;  %v6870_v6 = vunpack.c.h.bf16 %v5399_v1  ;;  %v5401_v7 = vld [vmem:[%s496_s25 + $0x18] sm:$0xff]   ;;  %v5402_v10 = vld [vmem:[%s496_s25 + $0x20] sm:$0xff]   ;;  %v5403_v13 = vld [vmem:[%s496_s25 + $0x28] sm:$0xff]  }
  0x22   : > { %v6874_v8 = vunpack.c.l.bf16 %v5400_v4  ;;  %v6876_v9 = vunpack.c.h.bf16 %v5400_v4  ;;  %v6880_v11 = vunpack.c.l.bf16 %v5401_v7  ;;  %v6882_v12 = vunpack.c.h.bf16 %v5401_v7  ;;  %v5404_v16 = vld [vmem:[%s496_s25 + $0x30] sm:$0xff]   ;;  %v5405_v19 = vld [vmem:[%s496_s25 + $0x38] sm:$0xff]   ;;  %s6727_s25 = smov [#allocation2]  }
  0x23   : > { %9357 = vst [vmem:[#allocation8_spill] sm:$0xff] %v6862_v2  ;;  %9358 = vst [vmem:[#allocation9_spill] sm:$0xff] %v6864_v3  ;;  %534 = vadd.xlane.f32.xlu0 %v6862_v2  ;;  %538 = vadd.xlane.f32.xlu1 %v6864_v3  ;;  %v6886_v14 = vunpack.c.l.bf16 %v5402_v10  ;;  %v6888_v15 = vunpack.c.h.bf16 %v5402_v10  ;;  %v6892_v17 = vunpack.c.l.bf16 %v5403_v13  ;;  %v6894_v18 = vunpack.c.h.bf16 %v5403_v13  ;;  %v6169_v4 = vld [vmem:[%s9313_s4 + $0x10] ss:$8 sps:$4 sm:$0xff]  }
  0x24   : > { %9359 = vst [vmem:[#allocation10_spill] sm:$0xff] %v6868_v5  ;;  %9360 = vst [vmem:[#allocation11_spill] sm:$0xff] %v6870_v6  ;;  %v6898_v20 = vunpack.c.l.bf16 %v5404_v16  ;;  %v6900_v21 = vunpack.c.h.bf16 %v5404_v16  ;;  %v6904_v22 = vunpack.c.l.bf16 %v5405_v19  ;;  %v6906_v23 = vunpack.c.h.bf16 %v5405_v19  ;;  %1039 = vmatpush1.bf16.msra.mxu1 %v6169_v4  ;;  %v6185_v4 = vld [vmem:[%s9313_s4 + $0x50] ss:$8 sps:$4 sm:$0xff]  }
  0x25   : > { %9361 = vst [vmem:[#allocation12_spill] sm:$0xff] %v6874_v8  ;;  %9362 = vst [vmem:[#allocation13_spill] sm:$0xff] %v6876_v9  ;;  %1040 = vmatprep.subr.bf16.mxu1 %v6171_v25  ;;  %v6193_v24 = vld [vmem:[%s9313_s4 + $0x70] ss:$8 sps:$4 sm:$0xff]  }
  0x26   : > { %9363 = vst [vmem:[#allocation14_spill] sm:$0xff] %v6880_v11  ;;  %9364 = vst [vmem:[#allocation15_spill] sm:$0xff] %v6882_v12  ;;  %v6194_v25 = vld [vmem:[%s9312_s3 + $0x38] sm:$0xff]  }
  0x27   : > { %536 = vadd.xlane.f32.xlu0 %v6868_v5  ;;  %540 = vadd.xlane.f32.xlu1 %v6870_v6  ;;  %9365 = vst [vmem:[#allocation16_spill] sm:$0xff] %v6886_v14  ;;  %9366 = vst [vmem:[#allocation17_spill] sm:$0xff] %v6888_v15 }
  0x28   : > { %9367 = vst [vmem:[#allocation18_spill] sm:$0xff] %v6892_v17  ;;  %9368 = vst [vmem:[#allocation19_spill] sm:$0xff] %v6894_v18 }
  0x29   : > { %9369 = vst [vmem:[#allocation20_spill] sm:$0xff] %v6898_v20  ;;  %9370 = vst [vmem:[#allocation21_spill] sm:$0xff] %v6900_v21 }
  0x2a   : > { %9371 = vst [vmem:[#allocation22_spill] sm:$0xff] %v6904_v22  ;;  %9372 = vst [vmem:[#allocation23_spill] sm:$0xff] %v6906_v23 }
  0x2b   : > { %542 = vadd.xlane.f32.xlu0 %v6874_v8  ;;  %544 = vadd.xlane.f32.xlu1 %v6876_v9 }
  0x2f   : > { %546 = vadd.xlane.f32.xlu0 %v6880_v11  ;;  %548 = vadd.xlane.f32.xlu1 %v6882_v12 }
  0x33   : > { %550 = vadd.xlane.f32.xlu0 %v6886_v14  ;;  %552 = vadd.xlane.f32.xlu1 %v6888_v15 }
  0x37   : > { %554 = vadd.xlane.f32.xlu0 %v6892_v17  ;;  %556 = vadd.xlane.f32.xlu1 %v6894_v18 }
  0x3b   : > { %558 = vadd.xlane.f32.xlu0 %v6898_v20  ;;  %560 = vadd.xlane.f32.xlu1 %v6900_v21 }
  0x3f   : > { %562 = vadd.xlane.f32.xlu0 %v6904_v22  ;;  %564 = vadd.xlane.f32.xlu1 %v6906_v23 }
  0xb0   : > { %v535_v28 = vpop.xlane.xlu0 %534  ;;  %v539_v29 = vpop.xlane.xlu1 %538 }
  0xb1   : > { %v567_v30 = vmul.f32 0.0078125, %v535_v28  ;;  %v569_v31 = vmul.f32 0.0078125, %v539_v29 }
  0xb3   : > { %v6923_v32 = vsub.f32 %v6862_v2, %v567_v30  ;;  %v6926_v33 = vsub.f32 %v6864_v3, %v569_v31  ;;  %v6173_v31 = vld [vmem:[%s9313_s4 + $0x20] ss:$8 sps:$4 sm:$0xff]  }
  0xb4   : > { %v537_v34 = vpop.xlane.xlu0 %536  ;;  %v541_v35 = vpop.xlane.xlu1 %540  ;;  %1041 = vmatpush1.bf16.msra.mxu1 %v6173_v31 }
  0xb5   : > { %v568_v36 = vmul.f32 0.0078125, %v537_v34  ;;  %v599_v37 = vmul.f32 %v6923_v32, %v6923_v32  ;;  %v570_v38 = vmul.f32 0.0078125, %v541_v35  ;;  %v601_v39 = vmul.f32 %v6926_v33, %v6926_v33 }
  0xb7   : > { %615 = vadd.xlane.f32.xlu0 %v599_v37  ;;  %v6933_v40 = vsub.f32 %v6868_v5, %v568_v36  ;;  %v6936_v41 = vsub.f32 %v6870_v6, %v570_v38 }
  0xb8   : > { %v543_v42 = vpop.xlane.xlu0 %542  ;;  %v545_v43 = vpop.xlane.xlu1 %544 }
  0xb9   : > { %v571_v44 = vmul.f32 0.0078125, %v543_v42  ;;  %v600_v45 = vmul.f32 %v6933_v40, %v6933_v40  ;;  %v572_v46 = vmul.f32 0.0078125, %v545_v43  ;;  %v602_v47 = vmul.f32 %v6936_v41, %v6936_v41  ;;  %v6174_v42 = vld [vmem:[%s9312_s3 + $0x10] sm:$0xff]  }
  0xba   : > { %v6175_v43 = vld [vmem:[%s9313_s4 + $0x34] ss:$8 sps:$4 sm:$0xff]   ;;  %5634 = vmatprep.subr.bf16.mxu0 %v6174_v42 }
  0xbb   : > { %619 = vadd.xlane.f32.xlu0 %v601_v39  ;;  %617 = vadd.xlane.f32.xlu1 %v600_v45  ;;  %v6943_v48 = vsub.f32 %v6874_v8, %v571_v44  ;;  %v6946_v49 = vsub.f32 %v6876_v9, %v572_v46  ;;  %v6177_v46 = vld [vmem:[%s9313_s4 + $0x30] ss:$8 sps:$4 sm:$0xff]  }
  0xbc   : > { %v547_v50 = vpop.xlane.xlu0 %546  ;;  %v549_v51 = vpop.xlane.xlu1 %548  ;;  %1042 = vmatprep.subr.bf16.mxu1 %v6175_v43  ;;  %5635 = vmatpush3.bf16.msra.mxu0 %v6174_v42 }
  0xbd   : > { %v573_v52 = vmul.f32 0.0078125, %v547_v50  ;;  %v603_v53 = vmul.f32 %v6943_v48, %v6943_v48  ;;  %v574_v54 = vmul.f32 0.0078125, %v549_v51  ;;  %v604_v55 = vmul.f32 %v6946_v49, %v6946_v49  ;;  %1043 = vmatpush1.bf16.msra.mxu1 %v6177_v46 }
  0xbf   : > { %621 = vadd.xlane.f32.xlu1 %v602_v47  ;;  %623 = vadd.xlane.f32.xlu0 %v603_v53  ;;  %v6953_v56 = vsub.f32 %v6880_v11, %v573_v52  ;;  %v6956_v57 = vsub.f32 %v6882_v12, %v574_v54 }
  0xc0   : > { %v551_v58 = vpop.xlane.xlu0 %550  ;;  %v553_v59 = vpop.xlane.xlu1 %552 }
  0xc1   : > { %v575_v60 = vmul.f32 0.0078125, %v551_v58  ;;  %v605_v61 = vmul.f32 %v6953_v56, %v6953_v56  ;;  %v576_v62 = vmul.f32 0.0078125, %v553_v59  ;;  %v606_v63 = vmul.f32 %v6956_v57, %v6956_v57  ;;  %v6179_v58 = vld [vmem:[%s9313_s4 + $0x44] ss:$8 sps:$4 sm:$0xff]   ;;  %v6181_v59 = vld [vmem:[%s9313_s4 + $0x40] ss:$8 sps:$4 sm:$0xff]  }
  0xc2   : > { %1044 = vmatprep.subr.bf16.mxu1 %v6179_v58 }
  0xc3   : > { %625 = vadd.xlane.f32.xlu1 %v604_v55  ;;  %627 = vadd.xlane.f32.xlu0 %v605_v61  ;;  %v6963_v0 = vsub.f32 %v6886_v14, %v575_v60  ;;  %v6966_v1 = vsub.f32 %v6888_v15, %v576_v62  ;;  %v6178_v55 = vld [vmem:[%s9312_s3 + $0x18] sm:$0xff]   ;;  %v6182_v62 = vld [vmem:[%s9312_s3 + $0x20] sm:$0xff]  }
  0xc4   : > { %v555_v7 = vpop.xlane.xlu0 %554  ;;  %v557_v10 = vpop.xlane.xlu1 %556  ;;  %5636 = vmatprep.subr.bf16.mxu0 %v6178_v55  ;;  %1045 = vmatpush1.bf16.msra.mxu1 %v6181_v59 }
  0xc5   : > { %v577_v13 = vmul.f32 0.0078125, %v555_v7  ;;  %v607_v16 = vmul.f32 %v6963_v0, %v6963_v0  ;;  %v578_v19 = vmul.f32 0.0078125, %v557_v10  ;;  %v608_v26 = vmul.f32 %v6966_v1, %v6966_v1  ;;  %5637 = vmatpush3.bf16.msra.mxu0 %v6178_v55  ;;  %v6186_v7 = vld [vmem:[%s9312_s3 + $0x28] sm:$0xff]  }
  0xc6   : > { %5638 = vmatprep.subr.bf16.mxu0 %v6182_v62  ;;  %v6187_v10 = vld [vmem:[%s9313_s4 + $0x64] ss:$8 sps:$4 sm:$0xff]  }
  0xc7   : > { %629 = vadd.xlane.f32.xlu1 %v606_v63  ;;  %631 = vadd.xlane.f32.xlu0 %v607_v16  ;;  %v6982_v27 = vsub.f32 %v6892_v17, %v577_v13  ;;  %v6985_v28 = vsub.f32 %v6894_v18, %v578_v19  ;;  %v6183_v63 = vld [vmem:[%s9313_s4 + $0x54] ss:$8 sps:$4 sm:$0xff]   ;;  %v6189_v13 = vld [vmem:[%s9313_s4 + $0x60] ss:$8 sps:$4 sm:$0xff]  }
  0xc8   : > { %v559_v29 = vpop.xlane.xlu0 %558  ;;  %v561_v30 = vpop.xlane.xlu1 %560  ;;  %1046 = vmatprep.subr.bf16.mxu1 %v6183_v63  ;;  %v6190_v16 = vld [vmem:[%s9312_s3 + $0x30] sm:$0xff]  }
  0xc9   : > { %v579_v34 = vmul.f32 0.0078125, %v559_v29  ;;  %v609_v35 = vmul.f32 %v6982_v27, %v6982_v27  ;;  %v580_v36 = vmul.f32 0.0078125, %v561_v30  ;;  %v610_v37 = vmul.f32 %v6985_v28, %v6985_v28  ;;  %5639 = vmatpush3.bf16.msra.mxu0 %v6182_v62  ;;  %1047 = vmatpush1.bf16.msra.mxu1 %v6185_v4  ;;  %v6191_v19 = vld [vmem:[%s9313_s4 + $0x74] ss:$8 sps:$4 sm:$0xff]  }
  0xca   : > { %5640 = vmatprep.subr.bf16.mxu0 %v6186_v7  ;;  %1048 = vmatprep.subr.bf16.mxu1 %v6187_v10 }
  0xcb   : > { %633 = vadd.xlane.f32.xlu1 %v608_v26  ;;  %635 = vadd.xlane.f32.xlu0 %v609_v35  ;;  %v6995_v38 = vsub.f32 %v6898_v20, %v579_v34  ;;  %v6998_v39 = vsub.f32 %v6900_v21, %v580_v36  ;;  %v9328_v26 = vmov 0  }
  0xcc   : > { %v563_v44 = vpop.xlane.xlu0 %562  ;;  %v565_v45 = vpop.xlane.xlu1 %564  ;;  %1068 = vmatprep.mubr.bf16.mxu1 %v9328_v26 }
  0xcd   : > { %v581_v47 = vmul.f32 0.0078125, %v563_v44  ;;  %v611_v50 = vmul.f32 %v6995_v38, %v6995_v38  ;;  %v582_v51 = vmul.f32 0.0078125, %v565_v45  ;;  %v612_v52 = vmul.f32 %v6998_v39, %v6998_v39  ;;  %5641 = vmatpush3.bf16.msra.mxu0 %v6186_v7  ;;  %1049 = vmatpush1.bf16.msra.mxu1 %v6189_v13 }
  0xce   : > { %5642 = vmatprep.subr.bf16.mxu0 %v6190_v16  ;;  %1050 = vmatprep.subr.bf16.mxu1 %v6191_v19 }
  0xcf   : > { %637 = vadd.xlane.f32.xlu1 %v610_v37  ;;  %639 = vadd.xlane.f32.xlu0 %v611_v50  ;;  %v7014_v53 = vsub.f32 %v6904_v22, %v581_v47  ;;  %v7017_v54 = vsub.f32 %v6906_v23, %v582_v51 }
  0xd1   : > { %v613_v60 = vmul.f32 %v7014_v53, %v7014_v53  ;;  %v614_v61 = vmul.f32 %v7017_v54, %v7017_v54  ;;  %5643 = vmatpush3.bf16.msra.mxu0 %v6190_v16  ;;  %1051 = vmatpush1.bf16.msra.mxu1 %v6193_v24  ;;  %v7067_v16 = vld [vmem:[%s9310_s1] ss:$0 sm:$0xff] }
  0xd2   : > { %5644 = vmatprep.subr.bf16.mxu0 %v6194_v25 }
  0xd3   : > { %641 = vadd.xlane.f32.xlu1 %v612_v52  ;;  %643 = vadd.xlane.f32.xlu0 %v613_v60 }
  0xd5   : > { %5645 = vmatpush3.bf16.msra.mxu0 %v6194_v25 }
  0xd7   : > { %645 = vadd.xlane.f32.xlu1 %v614_v61 }
 0x144   : > { %v616_v29 = vpop.xlane.xlu0 %615 }
 0x145   : > { %v647_v30 = vmul.f32 0.0078125, %v616_v29 }
 0x147   : > { %v663_v31 = vadd.f32 1e-05, %v647_v30 }
 0x148   : > { %v618_v34 = vpop.xlane.xlu1 %617  ;;  %v620_v35 = vpop.xlane.xlu0 %619 }
 0x149   : > { %6243 = vrsqrt.f32 %v663_v31  ;;  %v648_v36 = vmul.f32 0.0078125, %v618_v34  ;;  %v649_v37 = vmul.f32 0.0078125, %v620_v35 }
 0x14b   : > { %v664_v42 = vadd.f32 1e-05, %v648_v36  ;;  %v665_v43 = vadd.f32 1e-05, %v649_v37  ;;  %v7074_v37 = vld [vmem:[%s9311_s2] ss:$0 sm:$0xff] }
 0x14c   : > { %v622_v44 = vpop.xlane.xlu1 %621  ;;  %v624_v45 = vpop.xlane.xlu0 %623 }
 0x14d   : > { %6245 = vrsqrt.f32 %v664_v42  ;;  %v650_v46 = vmul.f32 0.0078125, %v622_v44  ;;  %v651_v47 = vmul.f32 0.0078125, %v624_v45 }
 0x14e   : > { %6247 = vrsqrt.f32 %v665_v43 }
 0x14f   : > { %v666_v50 = vadd.f32 1e-05, %v650_v46  ;;  %v667_v51 = vadd.f32 1e-05, %v651_v47 }
 0x150   : > { %v626_v52 = vpop.xlane.xlu1 %625  ;;  %v628_v55 = vpop.xlane.xlu0 %627 }
 0x151   : > { %6249 = vrsqrt.f32 %v666_v50  ;;  %v652_v58 = vmul.f32 0.0078125, %v626_v52  ;;  %v653_v59 = vmul.f32 0.0078125, %v628_v55 }
 0x152   : > { %6251 = vrsqrt.f32 %v667_v51 }
 0x153   : > { %v6244_v60 = vpop.eup %6243  ;;  %v668_v61 = vadd.f32 1e-05, %v652_v58  ;;  %v669_v62 = vadd.f32 1e-05, %v653_v59 }
 0x154   : > { %v630_v63 = vpop.xlane.xlu1 %629  ;;  %v632_v4 = vpop.xlane.xlu0 %631  ;;  %v695_v7 = vmul.f32 %v6244_v60, %v6923_v32 }
 0x155   : > { %6253 = vrsqrt.f32 %v668_v61  ;;  %v654_v10 = vmul.f32 0.0078125, %v630_v63  ;;  %v655_v13 = vmul.f32 0.0078125, %v632_v4 }
 0x156   : > { %6255 = vrsqrt.f32 %v669_v62  ;;  %v717_v35 = vmul.f32 %v7067_v16, %v695_v7 }
 0x157   : > { %v6246_v19 = vpop.eup %6245  ;;  %v670_v24 = vadd.f32 1e-05, %v654_v10  ;;  %v671_v25 = vadd.f32 1e-05, %v655_v13 }
 0x158   : > { %v6248_v29 = vpop.eup %6247  ;;  %v634_v30 = vpop.xlane.xlu1 %633  ;;  %v696_v34 = vmul.f32 %v6246_v19, %v6933_v40  ;;  %v739_v52 = vadd.f32 %v7074_v37, %v717_v35 }
 0x159   : > { %v636_v31 = vpop.xlane.xlu0 %635  ;;  %6257 = vrsqrt.f32 %v670_v24  ;;  %v656_v32 = vmul.f32 0.0078125, %v634_v30  ;;  %v697_v42 = vmul.f32 %v6248_v29, %v6926_v33 }
 0x15a   : > { %v657_v36 = vmul.f32 0.0078125, %v636_v31  ;;  %6259 = vrsqrt.f32 %v671_v25  ;;  %v718_v43 = vmul.f32 %v7067_v16, %v696_v34 }
 0x15b   : > { %v6250_v44 = vpop.eup %6249  ;;  %v672_v45 = vadd.f32 1e-05, %v656_v32  ;;  %v719_v40 = vmul.f32 %v7067_v16, %v697_v42 }
 0x15c   : > { %v673_v46 = vadd.f32 1e-05, %v657_v36  ;;  %v6252_v47 = vpop.eup %6251  ;;  %v638_v50 = vpop.xlane.xlu1 %637  ;;  %v740_v55 = vadd.f32 %v7074_v37, %v718_v43  ;;  %v698_v58 = vmul.f32 %v6250_v44, %v6936_v41 }
 0x15d   : > { %v640_v51 = vpop.xlane.xlu0 %639  ;;  %6261 = vrsqrt.f32 %v672_v45  ;;  %v658_v59 = vmul.f32 0.0078125, %v638_v50  ;;  %v699_v62 = vmul.f32 %v6252_v47, %v6943_v48  ;;  %v741_v10 = vadd.f32 %v7074_v37, %v719_v40 }
 0x15e   : > { %v659_v33 = vmul.f32 0.0078125, %v640_v51  ;;  %6263 = vrsqrt.f32 %v673_v46  ;;  %v755_v60 = vpack.c.bf16 %v740_v55, %v739_v52  ;;  %v720_v61 = vmul.f32 %v7067_v16, %v698_v58 }
 0x15f   : > { %v6254_v63 = vpop.eup %6253  ;;  %v674_v4 = vadd.f32 1e-05, %v658_v59  ;;  %v721_v29 = vmul.f32 %v7067_v16, %v699_v62 }
 0x160   : > { %v675_v7 = vadd.f32 1e-05, %v659_v33  ;;  %v6256_v13 = vpop.eup %6255  ;;  %v642_v19 = vpop.xlane.xlu1 %641  ;;  %5646 = vmatprep.mubr.bf16.mxu0 %v755_v60  ;;  %1069 = vmatmul.mubr.bf16.vlgmr.msra.gmra.mrb[0].mxu1 %v755_v60  ;;  %v742_v41 = vadd.f32 %v7074_v37, %v720_v61  ;;  %v700_v25 = vmul.f32 %v6254_v63, %v6946_v49 }
 0x161   : > { %v644_v24 = vpop.xlane.xlu0 %643  ;;  %6265 = vrsqrt.f32 %v674_v4  ;;  %v660_v30 = vmul.f32 0.0078125, %v642_v19  ;;  %1078 = vmatprep.mubr.bf16.mxu1 %v9328_v26  ;;  %v701_v48 = vmul.f32 %v6256_v13, %v6953_v56  ;;  %v743_v45 = vadd.f32 %v7074_v37, %v721_v29 }
 0x162   : > { %v661_v31 = vmul.f32 0.0078125, %v644_v24  ;;  %6267 = vrsqrt.f32 %v675_v7  ;;  %v756_v34 = vpack.c.bf16 %v742_v41, %v741_v10  ;;  %v722_v35 = vmul.f32 %v7067_v16, %v700_v25 }
 0x163   : > { %v6258_v32 = vpop.eup %6257  ;;  %v676_v36 = vadd.f32 1e-05, %v660_v30  ;;  %v723_v43 = vmul.f32 %v7067_v16, %v701_v48 }
 0x164   : > { %v677_v42 = vadd.f32 1e-05, %v661_v31  ;;  %v6260_v44 = vpop.eup %6259  ;;  %v646_v49 = vpop.xlane.xlu1 %645  ;;  %5647 = vmatmul.mubr.bf16.vlgmr.msra.gmra.mrb[0].mxu0 %v756_v34  ;;  %v744_v46 = vadd.f32 %v7074_v37, %v722_v35  ;;  %v702_v40 = vmul.f32 %v6258_v32, %v6956_v57 }
 0x165   : > { %6269 = vrsqrt.f32 %v676_v36  ;;  %v662_v56 = vmul.f32 0.0078125, %v646_v49  ;;  %v703_v47 = vmul.f32 %v6260_v44, %v6963_v0  ;;  %v745_v58 = vadd.f32 %v7074_v37, %v723_v43 }
 0x166   : > { %6271 = vrsqrt.f32 %v677_v42  ;;  %v757_v50 = vpack.c.bf16 %v744_v46, %v743_v45  ;;  %v724_v51 = vmul.f32 %v7067_v16, %v702_v40 }
 0x167   : > { %v6262_v52 = vpop.eup %6261  ;;  %v678_v55 = vadd.f32 1e-05, %v662_v56  ;;  %v725_v57 = vmul.f32 %v7067_v16, %v703_v47 }
 0x168   : > { %v6264_v59 = vpop.eup %6263  ;;  %5650 = vmatprep.mubr.bf16.mxu0 %v757_v50  ;;  %1079 = vmatmul.mubr.bf16.gmra.mrb[4].mxu1 %v756_v34  ;;  %v746_v33 = vadd.f32 %v7074_v37, %v724_v51  ;;  %v704_v60 = vmul.f32 %v6262_v52, %v6966_v1 }
 0x169   : > { %6273 = vrsqrt.f32 %v678_v55  ;;  %1088 = vmatprep.mubr.bf16.mxu1 %v9328_v26  ;;  %v705_v0 = vmul.f32 %v6264_v59, %v6982_v27  ;;  %v747_v10 = vadd.f32 %v7074_v37, %v725_v57 }
 0x16a   : > { %v758_v61 = vpack.c.bf16 %v746_v33, %v745_v58  ;;  %v726_v62 = vmul.f32 %v7067_v16, %v704_v60 }
 0x16b   : > { %v6266_v63 = vpop.eup %6265  ;;  %v727_v4 = vmul.f32 %v7067_v16, %v705_v0 }
 0x16c   : > { %v6268_v7 = vpop.eup %6267  ;;  %5651 = vmatmul.mubr.bf16.gmra.mrb[4].mxu0 %v758_v61  ;;  %v748_v13 = vadd.f32 %v7074_v37, %v726_v62  ;;  %v706_v1 = vmul.f32 %v6266_v63, %v6985_v28 }
 0x16d   : > { %v707_v19 = vmul.f32 %v6268_v7, %v6995_v38  ;;  %v749_v25 = vadd.f32 %v7074_v37, %v727_v4 }
 0x16e   : > { %v759_v24 = vpack.c.bf16 %v748_v13, %v747_v10  ;;  %v728_v41 = vmul.f32 %v7067_v16, %v706_v1 }
 0x16f   : > { %v6270_v27 = vpop.eup %6269  ;;  %v729_v48 = vmul.f32 %v7067_v16, %v707_v19 }
 0x170   : > { %v6272_v29 = vpop.eup %6271  ;;  %5654 = vmatprep.mubr.bf16.mxu0 %v759_v24  ;;  %1089 = vmatmul.mubr.bf16.gmra.mrb[8].mxu1 %v757_v50  ;;  %v750_v30 = vadd.f32 %v7074_v37, %v728_v41  ;;  %v708_v31 = vmul.f32 %v6270_v27, %v6998_v39 }
 0x171   : > { %1098 = vmatprep.mubr.bf16.mxu1 %v9328_v26  ;;  %v709_v28 = vmul.f32 %v6272_v29, %v7014_v53  ;;  %v751_v32 = vadd.f32 %v7074_v37, %v729_v48 }
 0x172   : > { %v760_v38 = vpack.c.bf16 %v750_v30, %v749_v25  ;;  %v730_v34 = vmul.f32 %v7067_v16, %v708_v31 }
 0x173   : > { %v6274_v35 = vpop.eup %6273  ;;  %v731_v43 = vmul.f32 %v7067_v16, %v709_v28 }
 0x174   : > { %5655 = vmatmul.mubr.bf16.gmra.mrb[8].mxu0 %v760_v38  ;;  %v752_v36 = vadd.f32 %v7074_v37, %v730_v34  ;;  %v710_v42 = vmul.f32 %v6274_v35, %v7017_v54 }
 0x175   : > { %v753_v53 = vadd.f32 %v7074_v37, %v731_v43 }
 0x176   : > { %v761_v39 = vpack.c.bf16 %v752_v36, %v751_v32  ;;  %v732_v44 = vmul.f32 %v7067_v16, %v710_v42 }
 0x178   : > { %5658 = vmatprep.mubr.bf16.mxu0 %v761_v39  ;;  %1099 = vmatmul.mubr.bf16.gmra.mrb[12].mxu1 %v758_v61  ;;  %v754_v49 = vadd.f32 %v7074_v37, %v732_v44 }
 0x179   : > { %1108 = vmatprep.mubr.bf16.mxu1 %v9328_v26 }
 0x17a   : > { %v762_v45 = vpack.c.bf16 %v754_v49, %v753_v53 }
 0x17c   : > { %5659 = vmatmul.mubr.bf16.gmra.mrb[12].mxu0 %v762_v45 }
 0x180   : > { %1109 = vmatmul.mubr.bf16.gmra.mrb[16].mxu1 %v759_v24 }
 0x181   : > { %1118 = vmatprep.mubr.bf16.mxu1 %v9328_v26 }
 0x188   : > { %1119 = vmatmul.mubr.bf16.gmra.mrb[20].mxu1 %v760_v38 }
 0x189   : > { %1128 = vmatprep.mubr.bf16.mxu1 %v9328_v26 }
 0x190   : > { %1129 = vmatmul.mubr.bf16.gmra.mrb[24].mxu1 %v761_v39 }
 0x191   : > { %1138 = vmatprep.mubr.bf16.mxu1 %v9328_v26 }
 0x198   : > { %1139 = vmatmul.mubr.bf16.gmra.mrb[28].mxu1 %v762_v45 }
 0x233   : > { %v1070_v54 = vpop.f32.mrb[0].mxu1 }
 0x234   : > { %v1072_v16 = vpop.f32.mrb[1].mxu1 }
 0x235   : > { %v1074_v46 = vpop.f32.mrb[2].mxu1 }
 0x236   : > { %v7128_v40 = vpack.c.bf16 %v1074_v46, %v1070_v54  ;;  %v1076_v37 = vpop.f32.mrb[3].mxu1 }
 0x237   : > { %v7130_v56 = vpack.c.bf16 %v1076_v37, %v1072_v16  ;;  %v5648_v47 = vpop.f32.mrb[0].mxu0 }
 0x238   : > { %1707 = vrot.lane.b32.xlu0 %v7128_v40, %s6724_s0  ;;  %v861_v50 = vpop.f32.mrb[1].mxu0  ;;  %5966 = vmatprep.subr.msk.bf16.mxu0 %vm1173_vm0, %v7128_v40  ;;  %v1187_v51 = vsel %vm1173_vm0, %v7128_v40, 0  ;;  %v926_v55 = vmul.f32 0.17677669, %v5648_v47 }
 0x239   : > { %v5649_v52 = vpop.f32.mrb[2].mxu0  ;;  %5663 = vmatpush3.bf16.xpose.msra.mxu0 %v1187_v51  ;;  %5694 = vmatprep.subr.bf16.mxu1 %v7130_v56  ;;  %v924_v33 = vmul.f32 0.17677669, %v861_v50 }
 0x23a   : > { %v927_v58 = vmul.f32 0.17677669, %v5649_v52  ;;  %v864_v59 = vpop.f32.mrb[3].mxu0  ;;  %5695 = vmatpush3.bf16.msra.mxu1 %v7130_v56 }
 0x23b   : > { %v925_v60 = vmul.f32 0.17677669, %v864_v59  ;;  %v1080_v57 = vpop.f32.mrb[4].mxu1 }
 0x23c   : > { %v7140_v0 = vpack.c.bf16 %v927_v58, %v926_v55  ;;  %v1082_v61 = vpop.f32.mrb[5].mxu1 }
 0x23d   : > { %v7142_v62 = vpack.c.bf16 %v925_v60, %v924_v33  ;;  %v1084_v63 = vpop.f32.mrb[6].mxu1 }
 0x23e   : > { %v7144_v4 = vpack.c.bf16 %v1084_v63, %v1080_v57  ;;  %v1086_v7 = vpop.f32.mrb[7].mxu1 }
 0x23f   : > { %v7146_v10 = vpack.c.bf16 %v1086_v7, %v1082_v61  ;;  %v5652_v13 = vpop.f32.mrb[4].mxu0  ;;  %5670 = vmatprep.mubr.msk.bf16.mxu0 %vm1173_vm0, %v7142_v62 }
 0x240   : > { %1709 = vrot.lane.b32.xlu1 %v7144_v4, %s6724_s0  ;;  %v877_v1 = vpop.f32.mrb[5].mxu0  ;;  %5967 = vmatprep.subr.msk.bf16.mxu0 %vm1173_vm0, %v7144_v4  ;;  %v1190_v19 = vsel %vm1173_vm0, %v7144_v4, 0  ;;  %v930_v41 = vmul.f32 0.17677669, %v5652_v13 }
 0x241   : > { %v5653_v24 = vpop.f32.mrb[6].mxu0  ;;  %5665 = vmatpush3.bf16.xpose.msra.mxu0 %v1190_v19  ;;  %5696 = vmatprep.subr.bf16.mxu1 %v7146_v10  ;;  %v928_v29 = vmul.f32 0.17677669, %v877_v1 }
 0x242   : > { %v931_v27 = vmul.f32 0.17677669, %v5653_v24  ;;  %v880_v25 = vpop.f32.mrb[7].mxu0  ;;  %5697 = vmatpush3.bf16.msra.mxu1 %v7146_v10 }
 0x243   : > { %v929_v30 = vmul.f32 0.17677669, %v880_v25  ;;  %v1090_v31 = vpop.f32.mrb[8].mxu1 }
 0x244   : > { %v7158_v48 = vpack.c.bf16 %v931_v27, %v930_v41  ;;  %v1092_v28 = vpop.f32.mrb[9].mxu1 }
 0x245   : > { %v7160_v38 = vpack.c.bf16 %v929_v30, %v928_v29  ;;  %v1094_v34 = vpop.f32.mrb[10].mxu1 }
 0x246   : > { %v7162_v35 = vpack.c.bf16 %v1094_v34, %v1090_v31  ;;  %v1096_v32 = vpop.f32.mrb[11].mxu1 }
 0x247   : > { %v7164_v36 = vpack.c.bf16 %v1096_v32, %v1092_v28  ;;  %v5656_v42 = vpop.f32.mrb[8].mxu0 }
 0x248   : > { %1711 = vrot.lane.b32.xlu0 %v7162_v35, %s6724_s0  ;;  %v893_v43 = vpop.f32.mrb[9].mxu0  ;;  %5968 = vmatprep.subr.msk.bf16.mxu0 %vm1173_vm0, %v7162_v35  ;;  %v1193_v39 = vsel %vm1173_vm0, %v7162_v35, 0  ;;  %v934_v53 = vmul.f32 0.17677669, %v5656_v42 }
 0x249   : > { %v5657_v44 = vpop.f32.mrb[10].mxu0  ;;  %5667 = vmatpush3.bf16.xpose.msra.mxu0 %v1193_v39  ;;  %5698 = vmatprep.subr.bf16.mxu1 %v7164_v36  ;;  %v932_v54 = vmul.f32 0.17677669, %v893_v43 }
 0x24a   : > { %v935_v49 = vmul.f32 0.17677669, %v5657_v44  ;;  %v896_v45 = vpop.f32.mrb[11].mxu0  ;;  %5699 = vmatpush3.bf16.msra.mxu1 %v7164_v36 }
 0x24b   : > { %v933_v16 = vmul.f32 0.17677669, %v896_v45  ;;  %v1100_v46 = vpop.f32.mrb[12].mxu1 }
 0x24c   : > { %v7174_v37 = vpack.c.bf16 %v935_v49, %v934_v53  ;;  %v1102_v47 = vpop.f32.mrb[13].mxu1 }
 0x24d   : > { %v7176_v50 = vpack.c.bf16 %v933_v16, %v932_v54  ;;  %v1104_v51 = vpop.f32.mrb[14].mxu1 }
 0x24e   : > { %v7178_v52 = vpack.c.bf16 %v1104_v51, %v1100_v46  ;;  %v1106_v55 = vpop.f32.mrb[15].mxu1 }
 0x24f   : > { %v7180_v58 = vpack.c.bf16 %v1106_v55, %v1102_v47  ;;  %v5660_v59 = vpop.f32.mrb[12].mxu0 }
 0x250   : > { %1713 = vrot.lane.b32.xlu0 %v7178_v52, %s6724_s0  ;;  %v909_v33 = vpop.f32.mrb[13].mxu0  ;;  %5969 = vmatprep.subr.msk.bf16.mxu0 %vm1173_vm0, %v7178_v52  ;;  %v1196_v60 = vsel %vm1173_vm0, %v7178_v52, 0  ;;  %v938_v61 = vmul.f32 0.17677669, %v5660_v59 }
 0x251   : > { %v5661_v57 = vpop.f32.mrb[14].mxu0  ;;  %5669 = vmatpush3.bf16.xpose.msra.mxu0 %v1196_v60  ;;  %5700 = vmatprep.subr.bf16.mxu1 %v7180_v58  ;;  %v936_v13 = vmul.f32 0.17677669, %v909_v33 }
 0x252   : > { %v939_v63 = vmul.f32 0.17677669, %v5661_v57  ;;  %v912_v7 = vpop.f32.mrb[15].mxu0  ;;  %5701 = vmatpush3.bf16.msra.mxu1 %v7180_v58 }
 0x253   : > { %v937_v1 = vmul.f32 0.17677669, %v912_v7  ;;  %v1110_v19 = vpop.f32.mrb[16].mxu1 }
 0x254   : > { %v7190_v24 = vpack.c.bf16 %v939_v63, %v938_v61  ;;  %v1112_v41 = vpop.f32.mrb[17].mxu1 }
 0x255   : > { %v7192_v27 = vpack.c.bf16 %v937_v1, %v936_v13  ;;  %v1114_v25 = vpop.f32.mrb[18].mxu1 }
 0x256   : > { %v7194_v29 = vpack.c.bf16 %v1114_v25, %v1110_v19  ;;  %v1116_v30 = vpop.f32.mrb[19].mxu1 }
 0x257   : > { %v7196_v31 = vpack.c.bf16 %v1116_v30, %v1112_v41 }
 0x258   : > { %5671 = vmatmul.mubr.msk.bf16.vlgmr.msra.gmra.mrb[16].mxu0 %vm1173_vm0, %v7140_v0  ;;  %5970 = vmatprep.subr.msk.bf16.mxu0 %vm1173_vm0, %v7194_v29  ;;  %v1276_v28 = vsel %vm1173_vm0, %v7194_v29, 0 }
 0x259   : > { %5674 = vmatprep.mubr.msk.bf16.mxu0 %vm1173_vm0, %v7160_v38  ;;  %5679 = vmatpush3.bf16.xpose.msra.mxu0 %v1276_v28 }
 0x25b   : > { %v1120_v34 = vpop.f32.mrb[20].mxu1 }
 0x25c   : > { %v1122_v32 = vpop.f32.mrb[21].mxu1 }
 0x25d   : > { %v1124_v42 = vpop.f32.mrb[22].mxu1 }
 0x25e   : > { %v7206_v43 = vpack.c.bf16 %v1124_v42, %v1120_v34  ;;  %v1126_v39 = vpop.f32.mrb[23].mxu1 }
 0x25f   : > { %v7208_v44 = vpack.c.bf16 %v1126_v39, %v1122_v32 }
 0x260   : > { %5675 = vmatmul.mubr.msk.bf16.gmra.mrb[20].mxu0 %vm1173_vm0, %v7158_v48  ;;  %5971 = vmatprep.subr.msk.bf16.mxu0 %vm1173_vm0, %v7206_v43  ;;  %v1279_v53 = vsel %vm1173_vm0, %v7206_v43, 0 }
 0x261   : > { %5681 = vmatpush3.bf16.xpose.msra.mxu0 %v1279_v53  ;;  %5686 = vmatprep.mubr.msk.bf16.mxu0 %vm1173_vm0, %v7176_v50 }
 0x263   : > { %v1130_v49 = vpop.f32.mrb[24].mxu1 }
 0x264   : > { %v1132_v45 = vpop.f32.mrb[25].mxu1 }
 0x265   : > { %v1134_v54 = vpop.f32.mrb[26].mxu1 }
 0x266   : > { %v7218_v16 = vpack.c.bf16 %v1134_v54, %v1130_v49  ;;  %v1136_v46 = vpop.f32.mrb[27].mxu1 }
 0x267   : > { %v7220_v47 = vpack.c.bf16 %v1136_v46, %v1132_v45 }
 0x268   : > { %5972 = vmatprep.subr.msk.bf16.mxu0 %vm1173_vm0, %v7218_v16  ;;  %v1282_v51 = vsel %vm1173_vm0, %v7218_v16, 0 }
 0x269   : > { %5683 = vmatpush3.bf16.xpose.msra.mxu0 %v1282_v51 }
 0x26b   : > { %v1140_v55 = vpop.f32.mrb[28].mxu1 }
 0x26c   : > { %v1142_v59 = vpop.f32.mrb[29].mxu1 }
 0x26d   : > { %v1144_v33 = vpop.f32.mrb[30].mxu1 }
 0x26e   : > { %v7226_v60 = vpack.c.bf16 %v1144_v33, %v1140_v55  ;;  %v1146_v57 = vpop.f32.mrb[31].mxu1 }
 0x26f   : > { %v7228_v61 = vpack.c.bf16 %v1146_v57, %v1142_v59 }
 0x270   : > { %5973 = vmatprep.subr.msk.bf16.mxu0 %vm1173_vm0, %v7226_v60  ;;  %v1285_v63 = vsel %vm1173_vm0, %v7226_v60, 0 }
 0x271   : > { %5685 = vmatpush3.bf16.xpose.msra.mxu0 %v1285_v63 }
 0x272   : > { %5710 = vmatprep.subr.bf16.mxu0 %v7196_v31 }
 0x278   : > { %5687 = vmatmul.mubr.msk.bf16.vlgmr.msra.gmra.mrb[24].mxu0 %vm1173_vm0, %v7174_v37 }
 0x279   : > { %5690 = vmatprep.mubr.msk.bf16.mxu0 %vm1173_vm0, %v7192_v27  ;;  %5711 = vmatpush3.bf16.msra.mxu0 %v7196_v31 }
 0x27a   : > { %5712 = vmatprep.subr.bf16.mxu0 %v7208_v44 }
 0x27d   : > { %5713 = vmatpush3.bf16.msra.mxu0 %v7208_v44 }
 0x27e   : > { %5714 = vmatprep.subr.bf16.mxu0 %v7220_v47 }
 0x280   : > { %5691 = vmatmul.mubr.msk.bf16.gmra.mrb[28].mxu0 %vm1173_vm0, %v7190_v24 }
 0x281   : > { %5715 = vmatpush3.bf16.msra.mxu0 %v7220_v47 }
 0x282   : > { %5716 = vmatprep.subr.bf16.mxu0 %v7228_v61 }
 0x285   : > { %5717 = vmatpush3.bf16.msra.mxu0 %v7228_v61 }
 0x2aa   : > { %v7248_v7 = vpop.permute.xlu0 %1707 }
 0x2ab   : > { %5974 = vmatprep.subr.msk.bf16.mxu1 %vm1173_vm0, %v7248_v7 }
 0x32b   : > { %v5672_v13 = vpop.f32.mrb[16].mxu0 }
 0x32c   : > { %v7252_v1 = vpop.f32.mrb[17].mxu0  ;;  %v1359_v19 = vsel %vm1352_vm1, %v5672_v13, -inf }
 0x32d   : > { %1360 = vmax.xlane.f32.xlu0 %v1359_v19  ;;  %v5673_v41 = vpop.f32.mrb[18].mxu0  ;;  %v1353_v28 = vsel %vm1352_vm1, %v7252_v1, -inf }
 0x32e   : > { %v7255_v25 = vpop.f32.mrb[19].mxu0  ;;  %v1362_v30 = vsel %vm1352_vm1, %v5673_v41, -inf }
 0x32f   : > { %1363 = vmax.xlane.f32.xlu1 %v1362_v30  ;;  %v1356_v34 = vsel %vm1352_vm1, %v7255_v25, -inf }
 0x331   : > { %1354 = vmax.xlane.f32.xlu0 %v1353_v28 }
 0x333   : > { %1357 = vmax.xlane.f32.xlu1 %v1356_v34  ;;  %v5676_v32 = vpop.f32.mrb[20].mxu0 }
 0x334   : > { %v7262_v42 = vpop.f32.mrb[21].mxu0  ;;  %v1371_v39 = vsel %vm1352_vm1, %v5676_v32, -inf }
 0x335   : > { %1372 = vmax.xlane.f32.xlu0 %v1371_v39  ;;  %v5677_v53 = vpop.f32.mrb[22].mxu0  ;;  %v1365_v54 = vsel %vm1352_vm1, %v7262_v42, -inf }
 0x336   : > { %v7265_v49 = vpop.f32.mrb[23].mxu0  ;;  %v1374_v45 = vsel %vm1352_vm1, %v5677_v53, -inf }
 0x337   : > { %1375 = vmax.xlane.f32.xlu1 %v1374_v45  ;;  %v1368_v46 = vsel %vm1352_vm1, %v7265_v49, -inf }
 0x339   : > { %1366 = vmax.xlane.f32.xlu0 %v1365_v54 }
 0x33b   : > { %1369 = vmax.xlane.f32.xlu1 %v1368_v46 }
 0x34b   : > { %v7272_v51 = vpop.f32.mrb[24].mxu0 }
 0x34c   : > { %v7274_v55 = vpop.f32.mrb[25].mxu0  ;;  %v1383_v59 = vsel %vm1352_vm1, %v7272_v51, -inf }
 0x34d   : > { %1384 = vmax.xlane.f32.xlu0 %v1383_v59  ;;  %v7278_v33 = vpop.f32.mrb[26].mxu0  ;;  %v1377_v19 = vsel %vm1352_vm1, %v7274_v55, -inf }
 0x34e   : > { %v7280_v57 = vpop.f32.mrb[27].mxu0  ;;  %v1386_v63 = vsel %vm1352_vm1, %v7278_v33, -inf }
 0x34f   : > { %1387 = vmax.xlane.f32.xlu1 %v1386_v63  ;;  %v1380_v30 = vsel %vm1352_vm1, %v7280_v57, -inf }
 0x351   : > { %1378 = vmax.xlane.f32.xlu0 %v1377_v19  ;;  %v7312_v19 = vpop.permute.xlu0 %1711 }
 0x353   : > { %1381 = vmax.xlane.f32.xlu1 %v1380_v30  ;;  %v7288_v28 = vpop.f32.mrb[28].mxu0 }
 0x354   : > { %v7290_v34 = vpop.f32.mrb[29].mxu0  ;;  %v1395_v39 = vsel %vm1352_vm1, %v7288_v28, -inf }
 0x355   : > { %1396 = vmax.xlane.f32.xlu0 %v1395_v39  ;;  %v7294_v45 = vpop.f32.mrb[30].mxu0  ;;  %v1389_v46 = vsel %vm1352_vm1, %v7290_v34, -inf  ;;  %v7314_v30 = vpop.permute.xlu0 %1713 }
 0x356   : > { %v7296_v54 = vpop.f32.mrb[31].mxu0  ;;  %v1398_v59 = vsel %vm1352_vm1, %v7294_v45, -inf  ;;  %v7316_v39 = vpop.permute.xlu1 %1709 }
 0x357   : > { %v1392_v63 = vsel %vm1352_vm1, %v7296_v54, -inf }
 0x359   : > { %1390 = vmax.xlane.f32.xlu0 %v1389_v46 }
 0x364   : > { %1697 = vrot.lane.b32.xlu1 %v7140_v0, %s6724_s0 }
 0x368   : > { %1820 = vrot.lane.b32.xlu1 %v7194_v29, %s6724_s0 }
 0x36c   : > { %1822 = vrot.lane.b32.xlu1 %v7206_v43, %s6724_s0 }
 0x36f   : > { %1695 = vrot.lane.b32.xlu0 %v7142_v62, %s6724_s0 }
 0x390   : > { %1399 = vmax.xlane.f32.xlu1 %v1398_v59 }
 0x394   : > { %1393 = vmax.xlane.f32.xlu1 %v1392_v63 }
 0x3ba   : > { %v1361_v46 = vpop.xlane.xlu0 %1360 }
 0x3bb   : > { %v1403_v26 = vsub.f32 %v5672_v13, %v1361_v46 }
 0x3bc   : > { %v1364_v23 = vpop.xlane.xlu1 %1363 }
 0x3bd   : > { %v1421_v21 = vmul.f32 1.442695, %v1403_v26  ;;  %v1404_v22 = vsub.f32 %v5673_v41, %v1364_v23 }
 0x3be   : > { %v1355_v20 = vpop.xlane.xlu0 %1354 }
 0x3bf   : > { %6275 = vpow2.f32 %v1421_v21  ;;  %v1423_v18 = vmul.f32 1.442695, %v1404_v22  ;;  %v1401_v59 = vsub.f32 %v7252_v1, %v1355_v20 }
 0x3c0   : > { %v1358_v15 = vpop.xlane.xlu1 %1357 }
 0x3c1   : > { %6277 = vpow2.f32 %v1423_v18  ;;  %v1417_v17 = vmul.f32 1.442695, %v1401_v59  ;;  %v1402_v63 = vsub.f32 %v7255_v25, %v1358_v15 }
 0x3c2   : > { %v1373_v14 = vpop.xlane.xlu0 %1372 }
 0x3c3   : > { %6279 = vpow2.f32 %v1417_v17  ;;  %v1419_v12 = vmul.f32 1.442695, %v1402_v63  ;;  %v1407_v9 = vsub.f32 %v5676_v32, %v1373_v14 }
 0x3c4   : > { %v1376_v11 = vpop.xlane.xlu1 %1375 }
 0x3c5   : > { %6281 = vpow2.f32 %v1419_v12  ;;  %v1429_v13 = vmul.f32 1.442695, %v1407_v9  ;;  %v1408_v46 = vsub.f32 %v5677_v53, %v1376_v11 }
 0x3c6   : > { %v1367_v26 = vpop.xlane.xlu0 %1366 }
 0x3c7   : > { %6283 = vpow2.f32 %v1429_v13  ;;  %v1431_v23 = vmul.f32 1.442695, %v1408_v46  ;;  %v1405_v21 = vsub.f32 %v7262_v42, %v1367_v26 }
 0x3c8   : > { %v1370_v22 = vpop.xlane.xlu1 %1369 }
 0x3c9   : > { %v7321_v20 = vpop.eup %6275  ;;  %6285 = vpow2.f32 %v1431_v23  ;;  %v1425_v18 = vmul.f32 1.442695, %v1405_v21  ;;  %v1406_v15 = vsub.f32 %v7265_v49, %v1370_v22 }
 0x3ca   : > { %v1455_v17 = vsel %vm1352_vm1, %v7321_v20, 0.0 }
 0x3cb   : > { %v7326_v14 = vpop.eup %6277  ;;  %6287 = vpow2.f32 %v1425_v18  ;;  %v1427_v9 = vmul.f32 1.442695, %v1406_v15  ;;  %1456 = vadd.xlane.f32.xlu0 %v1455_v17 }
 0x3cc   : > { %v1458_v11 = vsel %vm1352_vm1, %v7326_v14, 0.0 }
 0x3cd   : > { %v7330_v12 = vpop.eup %6279  ;;  %6289 = vpow2.f32 %v1427_v9  ;;  %1459 = vadd.xlane.f32.xlu1 %v1458_v11 }
 0x3ce   : > { %v1449_v1 = vsel %vm1352_vm1, %v7330_v12, 0.0 }
 0x3cf   : > { %v7334_v41 = vpop.eup %6281  ;;  %1450 = vadd.xlane.f32.xlu0 %v1449_v1 }
 0x3d0   : > { %v1452_v25 = vsel %vm1352_vm1, %v7334_v41, 0.0 }
 0x3d1   : > { %v7338_v32 = vpop.eup %6283  ;;  %1453 = vadd.xlane.f32.xlu1 %v1452_v25 }
 0x3d2   : > { %v1467_v42 = vsel %vm1352_vm1, %v7338_v32, 0.0 }
 0x3d3   : > { %v7342_v53 = vpop.eup %6285  ;;  %1468 = vadd.xlane.f32.xlu0 %v1467_v42 }
 0x3d4   : > { %v1470_v49 = vsel %vm1352_vm1, %v7342_v53, 0.0 }
 0x3d5   : > { %v7346_v59 = vpop.eup %6287  ;;  %1471 = vadd.xlane.f32.xlu1 %v1470_v49 }
 0x3d6   : > { %v1461_v63 = vsel %vm1352_vm1, %v7346_v59, 0.0 }
 0x3d7   : > { %v7350_v13 = vpop.eup %6289  ;;  %1462 = vadd.xlane.f32.xlu0 %v1461_v63 }
 0x3d8   : > { %v1464_v46 = vsel %vm1352_vm1, %v7350_v13, 0.0 }
 0x3d9   : > { %1465 = vadd.xlane.f32.xlu1 %v1464_v46 }
 0x3da   : > { %v1385_v26 = vpop.xlane.xlu0 %1384 }
 0x3db   : > { %v1411_v23 = vsub.f32 %v7272_v51, %v1385_v26 }
 0x3dc   : > { %v1388_v21 = vpop.xlane.xlu1 %1387 }
 0x3dd   : > { %v1437_v22 = vmul.f32 1.442695, %v1411_v23  ;;  %v1412_v18 = vsub.f32 %v7278_v33, %v1388_v21 }
 0x3de   : > { %v1379_v15 = vpop.xlane.xlu0 %1378 }
 0x3df   : > { %6291 = vpow2.f32 %v1437_v22  ;;  %v1409_v17 = vsub.f32 %v7274_v55, %v1379_v15  ;;  %v1439_v11 = vmul.f32 1.442695, %v1412_v18 }
 0x3e0   : > { %v1382_v9 = vpop.xlane.xlu1 %1381 }
 0x3e1   : > { %v1433_v1 = vmul.f32 1.442695, %v1409_v17  ;;  %v1410_v25 = vsub.f32 %v7280_v57, %v1382_v9 }
 0x3e2   : > { %v1397_v26 = vpop.xlane.xlu0 %1396 }
 0x3e3   : > { %6293 = vpow2.f32 %v1433_v1  ;;  %v1435_v49 = vmul.f32 1.442695, %v1410_v25  ;;  %v1415_v22 = vsub.f32 %v7288_v28, %v1397_v26 }
 0x3e4   : > { %v7358_v42 = vpop.permute.xlu1 %1697  ;;  %6295 = vpow2.f32 %v1439_v11 }
 0x3e5   : > { %6297 = vpow2.f32 %v1435_v49  ;;  %v1445_v17 = vmul.f32 1.442695, %v1415_v22 }
 0x3e6   : > { %v1391_v15 = vpop.xlane.xlu0 %1390 }
 0x3e7   : > { %v1413_v9 = vsub.f32 %v7290_v34, %v1391_v15  ;;  %6299 = vpow2.f32 %v1445_v17 }
 0x3e8   : > { %v7360_v63 = vpop.permute.xlu1 %1820 }
 0x3e9   : > { %v7362_v51 = vpop.eup %6291  ;;  %5978 = vmatprep.subr.msk.bf16.mxu0 %vm1173_vm0, %v7360_v63  ;;  %v1441_v11 = vmul.f32 1.442695, %v1413_v9 }
 0x3ea   : > { %v1479_v55 = vsel %vm1352_vm1, %v7362_v51, 0.0 }
 0x3eb   : > { %1480 = vadd.xlane.f32.xlu1 %v1479_v55  ;;  %6301 = vpow2.f32 %v1441_v11 }
 0x3ec   : > { %v7394_v55 = vpop.permute.xlu1 %1822 }
 0x3ed   : > { %v7368_v33 = vpop.eup %6293  ;;  %1824 = vrot.lane.b32.xlu0 %v7218_v16, %s6724_s0 }
 0x3ee   : > { %v1473_v57 = vsel %vm1352_vm1, %v7368_v33, 0.0  ;;  %v7374_v46 = vpop.eup %6295 }
 0x3ef   : > { %1474 = vadd.xlane.f32.xlu1 %v1473_v57  ;;  %v1482_v23 = vsel %vm1352_vm1, %v7374_v46, 0.0  ;;  %v7378_v21 = vpop.eup %6297 }
 0x3f0   : > { %v1476_v18 = vsel %vm1352_vm1, %v7378_v21, 0.0 }
 0x3f1   : > { %v7384_v1 = vpop.eup %6299 }
 0x3f2   : > { %v1491_v25 = vsel %vm1352_vm1, %v7384_v1, 0.0 }
 0x3f3   : > { %1483 = vadd.xlane.f32.xlu1 %v1482_v23 }
 0x3f5   : > { %v7390_v28 = vpop.eup %6301 }
 0x3f6   : > { %v1485_v49 = vsel %vm1352_vm1, %v7390_v28, 0.0 }
 0x3f7   : > { %1477 = vadd.xlane.f32.xlu1 %v1476_v18 }
 0x408   : > { %1699 = vrot.lane.b32.xlu1 %v7160_v38, %s6724_s0 }
 0x40c   : > { %1492 = vadd.xlane.f32.xlu0 %v1491_v25 }
 0x410   : > { %1486 = vadd.xlane.f32.xlu0 %v1485_v49 }
 0x41d   : > { %v1400_v34 = vpop.xlane.xlu1 %1399 }
 0x41e   : > { %v1416_v57 = vsub.f32 %v7294_v45, %v1400_v34  ;;  %v1696_v45 = vpop.permute.xlu0 %1695 }
 0x420   : > { %v1447_v26 = vmul.f32 1.442695, %v1416_v57 }
 0x421   : > { %v1394_v23 = vpop.xlane.xlu1 %1393 }
 0x422   : > { %6303 = vpow2.f32 %v1447_v26  ;;  %v1414_v22 = vsub.f32 %v7296_v54, %v1394_v23 }
 0x424   : > { %v1443_v18 = vmul.f32 1.442695, %v1414_v22 }
 0x426   : > { %6305 = vpow2.f32 %v1443_v18 }
 0x42c   : > { %v7398_v15 = vpop.eup %6303 }
 0x42d   : > { %v1494_v17 = vsel %vm1352_vm1, %v7398_v15, 0.0 }
 0x42e   : > { %1495 = vadd.xlane.f32.xlu0 %v1494_v17 }
 0x430   : > { %v7402_v9 = vpop.eup %6305 }
 0x431   : > { %v1488_v11 = vsel %vm1352_vm1, %v7402_v9, 0.0 }
 0x432   : > { %1489 = vadd.xlane.f32.xlu1 %v1488_v11 }
 0x443   : > { %1826 = vrot.lane.b32.xlu1 %v7226_v60, %s6724_s0 }
 0x444   : > { %1701 = vrot.lane.b32.xlu0 %v7158_v48, %s6724_s0 }
 0x447   : > { %1810 = vrot.lane.b32.xlu1 %v7174_v37, %s6724_s0 }
 0x448   : > { %1808 = vrot.lane.b32.xlu0 %v7176_v50, %s6724_s0 }
 0x44b   : > { %1814 = vrot.lane.b32.xlu1 %v7190_v24, %s6724_s0 }
 0x44c   : > { %1812 = vrot.lane.b32.xlu0 %v7192_v27, %s6724_s0 }
 0x44f   : > { %2107 = vrot.lane.b32.xlu1 %v7146_v10, %s6724_s0 }
 0x450   : > { %2105 = vrot.lane.b32.xlu0 %v7130_v56, %s6724_s0 }
 0x453   : > { %2109 = vrot.lane.b32.xlu1 %v7164_v36, %s6724_s0 }
 0x454   : > { %2295 = vrot.lane.b32.xlu0 %v7128_v40, %s9348_s27 }
 0x457   : > { %2111 = vrot.lane.b32.xlu1 %v7180_v58, %s6724_s0 }
 0x458   : > { %2198 = vrot.lane.b32.xlu0 %v7196_v31, %s6724_s0  ;;  %v1457_v54 = vpop.xlane.xlu0 %1456 }
 0x45a   : > { %v1460_v25 = vpop.xlane.xlu1 %1459 }
 0x45b   : > { %2297 = vrot.lane.b32.xlu1 %v7144_v4, %s9348_s27  ;;  %6307 = vrcp.f32 %v1460_v25 }
 0x45c   : > { %2200 = vrot.lane.b32.xlu0 %v7208_v44, %s6724_s0  ;;  %v1451_v49 = vpop.xlane.xlu0 %1450 }
 0x45d   : > { %6309 = vrcp.f32 %v1451_v49 }
 0x45e   : > { %6311 = vrcp.f32 %v1457_v54  ;;  %v1454_v34 = vpop.xlane.xlu1 %1453 }
 0x45f   : > { %6313 = vrcp.f32 %v1454_v34  ;;  %2202 = vrot.lane.b32.xlu1 %v7220_v47, %s6724_s0 }
 0x460   : > { %2299 = vrot.lane.b32.xlu0 %v7162_v35, %s9348_s27  ;;  %v1469_v57 = vpop.xlane.xlu0 %1468 }
 0x462   : > { %v1472_v26 = vpop.xlane.xlu1 %1471 }
 0x463   : > { %2301 = vrot.lane.b32.xlu1 %v7178_v52, %s9348_s27  ;;  %6315 = vrcp.f32 %v1472_v26 }
 0x464   : > { %2204 = vrot.lane.b32.xlu0 %v7228_v61, %s6724_s0  ;;  %v1463_v23 = vpop.xlane.xlu0 %1462 }
 0x465   : > { %6317 = vrcp.f32 %v1463_v23  ;;  %v6308_v22 = vpop.eup %6307 }
 0x466   : > { %6319 = vrcp.f32 %v1469_v57  ;;  %v1466_v18 = vpop.xlane.xlu1 %1465  ;;  %v1516_v25 = vmul.f32 %v6308_v22, %v7326_v14  ;;  %v1728_v57 = vsel %vm1173_vm0, %v7248_v7, 0 }
 0x467   : > { %v6310_v17 = vpop.eup %6309  ;;  %6321 = vrcp.f32 %v1466_v18 }
 0x468   : > { %v6312_v11 = vpop.eup %6311  ;;  %v1513_v49 = vmul.f32 %v6310_v17, %v7330_v12 }
 0x469   : > { %v6314_v54 = vpop.eup %6313  ;;  %v1515_v26 = vmul.f32 %v6312_v11, %v7321_v20 }
 0x46a   : > { %v1514_v34 = vmul.f32 %v6314_v54, %v7334_v41 }
 0x46b   : > { %v1530_v6 = vpack.c.bf16 %v1516_v25, %v1515_v26 }
 0x46c   : > { %v1529_v8 = vpack.c.bf16 %v1514_v34, %v1513_v49 }
 0x46d   : > { %v6316_v5 = vpop.eup %6315 }
 0x46e   : > { %5702 = vmatprep.mubr.msk.bf16.mxu1 %vm1352_vm1, %v1529_v8  ;;  %v1520_v12 = vmul.f32 %v6316_v5, %v7342_v53 }
 0x46f   : > { %v6318_v23 = vpop.eup %6317  ;;  %5703 = vmatmul.mubr.msk.bf16.vlgmr.msra.gmra.mrb[32].mxu1 %vm1352_vm1, %v1530_v6  ;;  %v1731_v6 = vsel %vm1173_vm0, %v7316_v39, 0 }
 0x470   : > { %v6320_v18 = vpop.eup %6319  ;;  %5727 = vmatpush3.bf16.xpose.msra.mxu1 %v1728_v57  ;;  %v1517_v20 = vmul.f32 %v6318_v23, %v7346_v59  ;;  %v1737_v59 = vsel %vm1173_vm0, %v7314_v30, 0 }
 0x471   : > { %v6322_v14 = vpop.eup %6321  ;;  %5975 = vmatprep.subr.msk.bf16.mxu1 %vm1173_vm0, %v7316_v39  ;;  %v1519_v8 = vmul.f32 %v6320_v18, %v7338_v32  ;;  %v1734_v32 = vsel %vm1173_vm0, %v7312_v19, 0 }
 0x472   : > { %v1518_v41 = vmul.f32 %v6322_v14, %v7350_v13 }
 0x473   : > { %v1532_v17 = vpack.c.bf16 %v1520_v12, %v1519_v8 }
 0x474   : > { %v1531_v22 = vpack.c.bf16 %v1518_v41, %v1517_v20 }
 0x476   : > { %5706 = vmatprep.mubr.msk.bf16.mxu1 %vm1352_vm1, %v1531_v22 }
 0x477   : > { %5707 = vmatmul.mubr.msk.bf16.gmra.mrb[36].mxu1 %vm1352_vm1, %v1532_v17 }
 0x478   : > { %5729 = vmatpush3.bf16.xpose.msra.mxu1 %v1731_v6  ;;  %v1481_v7 = vpop.xlane.xlu1 %1480  ;;  %5734 = vmatprep.mubr.msk.bf16.mxu1 %vm1173_vm0, %v1696_v45 }
 0x479   : > { %5976 = vmatprep.subr.msk.bf16.mxu1 %vm1173_vm0, %v7312_v19 }
 0x47c   : > { %v1475_v5 = vpop.xlane.xlu1 %1474 }
 0x480   : > { %5731 = vmatpush3.bf16.xpose.msra.mxu1 %v1734_v32  ;;  %v1484_v53 = vpop.xlane.xlu1 %1483 }
 0x481   : > { %5977 = vmatprep.subr.msk.bf16.mxu1 %vm1173_vm0, %v7314_v30  ;;  %6323 = vrcp.f32 %v1484_v53 }
 0x482   : > { %6325 = vrcp.f32 %v1475_v5 }
 0x483   : > { %6327 = vrcp.f32 %v1481_v7 }
 0x484   : > { %v1478_v39 = vpop.xlane.xlu1 %1477 }
 0x485   : > { %6329 = vrcp.f32 %v1478_v39 }
 0x488   : > { %5733 = vmatpush3.bf16.xpose.msra.mxu1 %v1737_v59  ;;  %v1700_v25 = vpop.permute.xlu1 %1699 }
 0x48b   : > { %v6324_v13 = vpop.eup %6323 }
 0x48c   : > { %v6326_v45 = vpop.eup %6325  ;;  %v1524_v19 = vmul.f32 %v6324_v13, %v7374_v46  ;;  %v1841_v46 = vsel %vm1173_vm0, %v7360_v63, 0 }
 0x48d   : > { %v6328_v11 = vpop.eup %6327  ;;  %v1521_v49 = vmul.f32 %v6326_v45, %v7368_v33  ;;  %v1825_v33 = vpop.permute.xlu0 %1824 }
 0x48e   : > { %v1523_v26 = vmul.f32 %v6328_v11, %v7362_v51  ;;  %v1847_v51 = vsel %vm1173_vm0, %v1825_v33, 0 }
 0x48f   : > { %v6330_v54 = vpop.eup %6329  ;;  %5735 = vmatmul.mubr.msk.bf16.vlgmr.msra.gmra.mrb[40].mxu1 %vm1173_vm0, %v7358_v42  ;;  %v1844_v42 = vsel %vm1173_vm0, %v7394_v55, 0 }
 0x490   : > { %5738 = vmatprep.mubr.msk.bf16.mxu1 %vm1173_vm0, %v1700_v25  ;;  %v1522_v34 = vmul.f32 %v6330_v54, %v7378_v21  ;;  %v1534_v23 = vpack.c.bf16 %v1524_v19, %v1523_v26 }
 0x492   : > { %v1533_v30 = vpack.c.bf16 %v1522_v34, %v1521_v49 }
 0x494   : > { %5718 = vmatprep.mubr.msk.bf16.mxu0 %vm1352_vm1, %v1533_v30 }
 0x495   : > { %5719 = vmatmul.mubr.msk.bf16.vlgmr.msra.gmra.mrb[32].mxu0 %vm1352_vm1, %v1534_v23 }
 0x496   : > { %5743 = vmatpush3.bf16.xpose.msra.mxu0 %v1841_v46 }
 0x497   : > { %5979 = vmatprep.subr.msk.bf16.mxu0 %vm1173_vm0, %v7394_v55 }
 0x499   : > { %v1493_v21 = vpop.xlane.xlu0 %1492 }
 0x49d   : > { %v1487_v57 = vpop.xlane.xlu0 %1486 }
 0x49e   : > { %5745 = vmatpush3.bf16.xpose.msra.mxu0 %v1844_v42 }
 0x49f   : > { %5980 = vmatprep.subr.msk.bf16.mxu0 %vm1173_vm0, %v1825_v33 }
 0x4a6   : > { %5747 = vmatpush3.bf16.xpose.msra.mxu0 %v1847_v51 }
 0x4bb   : > { %v1496_v18 = vpop.xlane.xlu0 %1495 }
 0x4bc   : > { %6331 = vrcp.f32 %v1496_v18 }
 0x4bd   : > { %6333 = vrcp.f32 %v1487_v57 }
 0x4be   : > { %6335 = vrcp.f32 %v1493_v21 }
 0x4bf   : > { %v1490_v63 = vpop.xlane.xlu1 %1489  ;;  %v1702_v14 = vpop.permute.xlu0 %1701 }
 0x4c0   : > { %6337 = vrcp.f32 %v1490_v63  ;;  %5739 = vmatmul.mubr.msk.bf16.gmra.mrb[44].mxu1 %vm1173_vm0, %v1702_v14 }
 0x4c3   : > { %v1827_v12 = vpop.permute.xlu1 %1826  ;;  %v1809_v55 = vpop.permute.xlu0 %1808 }
 0x4c4   : > { %5981 = vmatprep.subr.msk.bf16.mxu0 %vm1173_vm0, %v1827_v12  ;;  %v1850_v20 = vsel %vm1173_vm0, %v1827_v12, 0 }
 0x4c5   : > { %5749 = vmatpush3.bf16.xpose.msra.mxu0 %v1850_v20 }
 0x4c6   : > { %v6332_v41 = vpop.eup %6331 }
 0x4c7   : > { %v1811_v8 = vpop.permute.xlu1 %1810  ;;  %v1813_v22 = vpop.permute.xlu0 %1812  ;;  %v1528_v5 = vmul.f32 %v6332_v41, %v7398_v15 }
 0x4c8   : > { %v6334_v17 = vpop.eup %6333 }
 0x4c9   : > { %v6336_v6 = vpop.eup %6335  ;;  %v1525_v39 = vmul.f32 %v6334_v17, %v7390_v28 }
 0x4ca   : > { %v6338_v7 = vpop.eup %6337  ;;  %v1527_v13 = vmul.f32 %v6336_v6, %v7384_v1 }
 0x4cb   : > { %v1815_v32 = vpop.permute.xlu1 %1814  ;;  %v2106_v53 = vpop.permute.xlu0 %2105  ;;  %v1526_v59 = vmul.f32 %v6338_v7, %v7402_v9 }
 0x4cc   : > { %5758 = vmatprep.subr.bf16.mxu1 %v2106_v53  ;;  %v1536_v11 = vpack.c.bf16 %v1528_v5, %v1527_v13 }
 0x4cd   : > { %5759 = vmatpush3.bf16.msra.mxu1 %v2106_v53  ;;  %v1535_v45 = vpack.c.bf16 %v1526_v59, %v1525_v39 }
 0x4cf   : > { %v2108_v54 = vpop.permute.xlu1 %2107  ;;  %5722 = vmatprep.mubr.msk.bf16.mxu0 %vm1352_vm1, %v1535_v45  ;;  %v7494_v19 = vpop.permute.xlu0 %2295 }
 0x4d0   : > { %5723 = vmatmul.mubr.msk.bf16.gmra.mrb[36].mxu0 %vm1352_vm1, %v1536_v11  ;;  %5760 = vmatprep.subr.bf16.mxu1 %v2108_v54 }
 0x4d1   : > { %5750 = vmatprep.mubr.msk.bf16.mxu0 %vm1173_vm0, %v1809_v55  ;;  %5761 = vmatpush3.bf16.msra.mxu1 %v2108_v54 }
 0x4d3   : > { %v2110_v28 = vpop.permute.xlu1 %2109  ;;  %v2199_v15 = vpop.permute.xlu0 %2198 }
 0x4d4   : > { %5762 = vmatprep.subr.bf16.mxu1 %v2110_v28  ;;  %5774 = vmatprep.subr.bf16.mxu0 %v2199_v15 }
 0x4d5   : > { %5763 = vmatpush3.bf16.msra.mxu1 %v2110_v28 }
 0x4d7   : > { %v2112_v1 = vpop.permute.xlu1 %2111  ;;  %v2201_v9 = vpop.permute.xlu0 %2200 }
 0x4d8   : > { %5751 = vmatmul.mubr.msk.bf16.vlgmr.msra.gmra.mrb[40].mxu0 %vm1173_vm0, %v1811_v8  ;;  %5764 = vmatprep.subr.bf16.mxu1 %v2112_v1 }
 0x4d9   : > { %5775 = vmatpush3.bf16.msra.mxu0 %v2199_v15  ;;  %5754 = vmatprep.mubr.msk.bf16.mxu0 %vm1173_vm0, %v1813_v22 }
 0x4da   : > { %5765 = vmatpush3.bf16.msra.mxu1 %v2112_v1  ;;  %5776 = vmatprep.subr.bf16.mxu0 %v2201_v9 }
 0x4db   : > { %5982 = vmatprep.subr.msk.bf16.mxu1 %vm1173_vm0, %v7494_v19  ;;  %v7502_v25 = vpop.permute.xlu1 %2297  ;;  %v7504_v49 = vpop.permute.xlu0 %2299 }
 0x4dd   : > { %5777 = vmatpush3.bf16.msra.mxu0 %v2201_v9 }
 0x4df   : > { %v2203_v34 = vpop.permute.xlu1 %2202  ;;  %v2205_v26 = vpop.permute.xlu0 %2204 }
 0x4e0   : > { %5755 = vmatmul.mubr.msk.bf16.gmra.mrb[44].mxu0 %vm1173_vm0, %v1815_v32  ;;  %5778 = vmatprep.subr.bf16.mxu0 %v2203_v34 }
 0x4e1   : > { %5779 = vmatpush3.bf16.msra.mxu0 %v2203_v34 }
 0x4e2   : > { %5780 = vmatprep.subr.bf16.mxu0 %v2205_v26 }
 0x4e5   : > { %5781 = vmatpush3.bf16.msra.mxu0 %v2205_v26 }
 0x542   : > { %v7507_v30 = vpop.f32.mrb[32].mxu1 }
 0x543   : > { %9373 = vst [vmem:[#allocation24_spill] sm:$0xff] %v7507_v30  ;;  %v7509_v23 = vpop.f32.mrb[33].mxu1 }
 0x544   : > { %9374 = vst [vmem:[#allocation25_spill] sm:$0xff] %v7509_v23  ;;  %v7511_v46 = vpop.f32.mrb[34].mxu1 }
 0x545   : > { %9375 = vst [vmem:[#allocation26_spill] sm:$0xff] %v7511_v46  ;;  %v7513_v42 = vpop.f32.mrb[35].mxu1 }
 0x546   : > { %9376 = vst [vmem:[#allocation27_spill] sm:$0xff] %v7513_v42 }
 0x54a   : > { %v7515_v33 = vpop.f32.mrb[36].mxu1 }
 0x54b   : > { %9377 = vst [vmem:[#allocation28_spill] sm:$0xff] %v7515_v33  ;;  %v7517_v51 = vpop.f32.mrb[37].mxu1 }
 0x54c   : > { %9378 = vst [vmem:[#allocation29_spill] sm:$0xff] %v7517_v51  ;;  %v7519_v21 = vpop.f32.mrb[38].mxu1 }
 0x54d   : > { %9379 = vst [vmem:[#allocation30_spill] sm:$0xff] %v7519_v21  ;;  %v7521_v57 = vpop.f32.mrb[39].mxu1 }
 0x54e   : > { %9380 = vst [vmem:[#allocation31_spill] sm:$0xff] %v7521_v57 }
 0x562   : > { %v5736_v18 = vpop.f32.mrb[40].mxu1 }
 0x563   : > { %v7523_v63 = vpop.f32.mrb[41].mxu1  ;;  %v1923_v14 = vsel %vm1352_vm1, %v5736_v18, -inf }
 0x564   : > { %1924 = vmax.xlane.f32.xlu0 %v1923_v14  ;;  %v7526_v12 = vpop.f32.mrb[42].mxu1  ;;  %v1917_v41 = vsel %vm1352_vm1, %v7523_v63, -inf }
 0x565   : > { %v7528_v55 = vpop.f32.mrb[43].mxu1  ;;  %v1926_v7 = vsel %vm1352_vm1, %v7526_v12, -inf }
 0x566   : > { %v1920_v20 = vsel %vm1352_vm1, %v7528_v55, -inf }
 0x567   : > { %1921 = vmax.xlane.f32.xlu1 %v1920_v20 }
 0x568   : > { %1918 = vmax.xlane.f32.xlu0 %v1917_v41  ;;  %v7534_v8 = vpop.f32.mrb[32].mxu0 }
 0x569   : > { %9381 = vst [vmem:[#allocation32_spill] sm:$0xff] %v7534_v8  ;;  %v7536_v22 = vpop.f32.mrb[33].mxu0 }
 0x56a   : > { %9382 = vst [vmem:[#allocation33_spill] sm:$0xff] %v7536_v22  ;;  %v7538_v17 = vpop.f32.mrb[34].mxu0 }
 0x56b   : > { %9383 = vst [vmem:[#allocation34_spill] sm:$0xff] %v7538_v17  ;;  %v7540_v6 = vpop.f32.mrb[35].mxu0 }
 0x56c   : > { %9384 = vst [vmem:[#allocation35_spill] sm:$0xff] %v7540_v6  ;;  %1927 = vmax.xlane.f32.xlu0 %v1926_v7 }
 0x593   : > { %v7544_v5 = vpop.f32.mrb[44].mxu1 }
 0x594   : > { %v7546_v32 = vpop.f32.mrb[45].mxu1  ;;  %v1935_v53 = vsel %vm1352_vm1, %v7544_v5, -inf }
 0x595   : > { %1936 = vmax.xlane.f32.xlu0 %v1935_v53  ;;  %v7550_v39 = vpop.f32.mrb[46].mxu1  ;;  %v1929_v45 = vsel %vm1352_vm1, %v7546_v32, -inf }
 0x596   : > { %v7552_v59 = vpop.f32.mrb[47].mxu1  ;;  %v1938_v13 = vsel %vm1352_vm1, %v7550_v39, -inf }
 0x597   : > { %1939 = vmax.xlane.f32.xlu1 %v1938_v13  ;;  %v1932_v11 = vsel %vm1352_vm1, %v7552_v59, -inf }
 0x599   : > { %1930 = vmax.xlane.f32.xlu0 %v1929_v45 }
 0x59b   : > { %1933 = vmax.xlane.f32.xlu1 %v1932_v11 }
 0x5a3   : > { %v7560_v54 = vpop.f32.mrb[36].mxu0 }
 0x5a4   : > { %9385 = vst [vmem:[#allocation36_spill] sm:$0xff] %v7560_v54  ;;  %v7562_v28 = vpop.f32.mrb[37].mxu0 }
 0x5a5   : > { %9386 = vst [vmem:[#allocation37_spill] sm:$0xff] %v7562_v28  ;;  %v7564_v15 = vpop.f32.mrb[38].mxu0 }
 0x5a6   : > { %9387 = vst [vmem:[#allocation38_spill] sm:$0xff] %v7564_v15  ;;  %v7566_v1 = vpop.f32.mrb[39].mxu0 }
 0x5a7   : > { %9388 = vst [vmem:[#allocation39_spill] sm:$0xff] %v7566_v1 }
 0x5ab   : > { %v7568_v9 = vpop.f32.mrb[40].mxu0 }
 0x5ac   : > { %v7570_v34 = vpop.f32.mrb[41].mxu0  ;;  %v1947_v26 = vsel %vm1352_vm1, %v7568_v9, -inf }
 0x5ad   : > { %1948 = vmax.xlane.f32.xlu0 %v1947_v26  ;;  %v7574_v14 = vpop.f32.mrb[42].mxu0  ;;  %v1941_v7 = vsel %vm1352_vm1, %v7570_v34, -inf }
 0x5ae   : > { %v7576_v20 = vpop.f32.mrb[43].mxu0  ;;  %v1950_v41 = vsel %vm1352_vm1, %v7574_v14, -inf }
 0x5af   : > { %1951 = vmax.xlane.f32.xlu1 %v1950_v41  ;;  %v1944_v53 = vsel %vm1352_vm1, %v7576_v20, -inf }
 0x5b1   : > { %1942 = vmax.xlane.f32.xlu0 %v1941_v7 }
 0x5b3   : > { %1945 = vmax.xlane.f32.xlu1 %v1944_v53  ;;  %v7584_v13 = vpop.f32.mrb[44].mxu0 }
 0x5b4   : > { %v7586_v45 = vpop.f32.mrb[45].mxu0  ;;  %v1959_v11 = vsel %vm1352_vm1, %v7584_v13, -inf }
 0x5b5   : > { %1960 = vmax.xlane.f32.xlu0 %v1959_v11  ;;  %v7590_v26 = vpop.f32.mrb[46].mxu0  ;;  %v1953_v41 = vsel %vm1352_vm1, %v7586_v45, -inf }
 0x5b6   : > { %v7592_v3 = vpop.f32.mrb[47].mxu0  ;;  %v1962_v7 = vsel %vm1352_vm1, %v7590_v26, -inf }
 0x5b7   : > { %v1956_v53 = vsel %vm1352_vm1, %v7592_v3, -inf }
 0x5b9   : > { %1954 = vmax.xlane.f32.xlu0 %v1953_v41 }
 0x5c4   : > { %2289 = vrot.lane.b32.xlu1 %v7140_v0, %s9348_s27 }
 0x5c8   : > { %2400 = vrot.lane.b32.xlu1 %v7194_v29, %s9348_s27 }
 0x5cf   : > { %2287 = vrot.lane.b32.xlu0 %v7142_v62, %s9348_s27 }
 0x5ec   : > { %1963 = vmax.xlane.f32.xlu1 %v1962_v7 }
 0x5f0   : > { %1957 = vmax.xlane.f32.xlu1 %v1956_v53 }
 0x5f1   : > { %v1925_v11 = vpop.xlane.xlu0 %1924 }
 0x5f2   : > { %v1967_v2 = vsub.f32 %v5736_v18, %v1925_v11  ;;  %v7617_v18 = vpop.permute.xlu1 %2301 }
 0x5f4   : > { %v1985_v41 = vmul.f32 1.442695, %v1967_v2 }
 0x5f5   : > { %v1919_v28 = vpop.xlane.xlu0 %1918 }
 0x5f6   : > { %6339 = vpow2.f32 %v1985_v41  ;;  %v1965_v1 = vsub.f32 %v7523_v63, %v1919_v28  ;;  %v1922_v28 = vpop.xlane.xlu1 %1921 }
 0x5f8   : > { %v1981_v54 = vmul.f32 1.442695, %v1965_v1  ;;  %v1966_v1 = vsub.f32 %v7528_v55, %v1922_v28 }
 0x5f9   : > { %v1928_v63 = vpop.xlane.xlu0 %1927 }
 0x5fa   : > { %6341 = vpow2.f32 %v1981_v54  ;;  %v1968_v54 = vsub.f32 %v7526_v12, %v1928_v63  ;;  %v1983_v11 = vmul.f32 1.442695, %v1966_v1 }
 0x5fc   : > { %v1987_v53 = vmul.f32 1.442695, %v1968_v54 }
 0x5fe   : > { %6343 = vpow2.f32 %v1987_v53 }
 0x5ff   : > { %6345 = vpow2.f32 %v1983_v11 }
 0x600   : > { %v7607_v15 = vpop.eup %6339 }
 0x601   : > { %2402 = vrot.lane.b32.xlu1 %v7206_v43, %s9348_s27  ;;  %v2019_v7 = vsel %vm1352_vm1, %v7607_v15, 0.0 }
 0x602   : > { %2020 = vadd.xlane.f32.xlu0 %v2019_v7 }
 0x604   : > { %v7613_v22 = vpop.eup %6341 }
 0x605   : > { %v2013_v2 = vsel %vm1352_vm1, %v7613_v22, 0.0 }
 0x606   : > { %2014 = vadd.xlane.f32.xlu0 %v2013_v2 }
 0x608   : > { %v7621_v41 = vpop.eup %6343 }
 0x609   : > { %v2022_v2 = vsel %vm1352_vm1, %v7621_v41, 0.0  ;;  %v7626_v17 = vpop.eup %6345 }
 0x60a   : > { %v2016_v1 = vsel %vm1352_vm1, %v7626_v17, 0.0 }
 0x622   : > { %v1937_v7 = vpop.xlane.xlu0 %1936 }
 0x623   : > { %v1971_v6 = vsub.f32 %v7544_v5, %v1937_v7 }
 0x624   : > { %v1940_v8 = vpop.xlane.xlu1 %1939 }
 0x625   : > { %v1993_v51 = vmul.f32 1.442695, %v1971_v6  ;;  %v1972_v12 = vsub.f32 %v7550_v39, %v1940_v8  ;;  %2023 = vadd.xlane.f32.xlu1 %v2022_v2 }
 0x626   : > { %v1931_v55 = vpop.xlane.xlu0 %1930 }
 0x627   : > { %6347 = vpow2.f32 %v1993_v51  ;;  %v1969_v63 = vsub.f32 %v7546_v32, %v1931_v55  ;;  %v1995_v54 = vmul.f32 1.442695, %v1972_v12 }
 0x628   : > { %v1934_v28 = vpop.xlane.xlu1 %1933 }
 0x629   : > { %v1989_v5 = vmul.f32 1.442695, %v1969_v63  ;;  %v1970_v53 = vsub.f32 %v7552_v59, %v1934_v28  ;;  %2017 = vadd.xlane.f32.xlu1 %v2016_v1 }
 0x62b   : > { %6349 = vpow2.f32 %v1989_v5  ;;  %v1991_v11 = vmul.f32 1.442695, %v1970_v53 }
 0x62c   : > { %6351 = vpow2.f32 %v1995_v54 }
 0x62d   : > { %6353 = vpow2.f32 %v1991_v11 }
 0x631   : > { %v7633_v6 = vpop.eup %6347 }
 0x632   : > { %v2031_v51 = vsel %vm1352_vm1, %v7633_v6, 0.0 }
 0x633   : > { %2032 = vadd.xlane.f32.xlu0 %v2031_v51 }
 0x635   : > { %v7637_v8 = vpop.eup %6349 }
 0x636   : > { %v7639_v32 = vpop.eup %6351  ;;  %v2025_v39 = vsel %vm1352_vm1, %v7637_v8, 0.0 }
 0x637   : > { %v7643_v7 = vpop.eup %6353  ;;  %2026 = vadd.xlane.f32.xlu0 %v2025_v39  ;;  %v2034_v12 = vsel %vm1352_vm1, %v7639_v32, 0.0 }
 0x638   : > { %v2028_v59 = vsel %vm1352_vm1, %v7643_v7, 0.0 }
 0x639   : > { %2029 = vadd.xlane.f32.xlu1 %v2028_v59 }
 0x63a   : > { %v1949_v2 = vpop.xlane.xlu0 %1948 }
 0x63b   : > { %v1975_v55 = vsub.f32 %v7568_v9, %v1949_v2  ;;  %2035 = vadd.xlane.f32.xlu0 %v2034_v12 }
 0x63c   : > { %v1952_v63 = vpop.xlane.xlu1 %1951 }
 0x63d   : > { %v2001_v54 = vmul.f32 1.442695, %v1975_v55  ;;  %v1976_v28 = vsub.f32 %v7574_v14, %v1952_v63 }
 0x63e   : > { %v1943_v1 = vpop.xlane.xlu0 %1942 }
 0x63f   : > { %6355 = vpow2.f32 %v2001_v54  ;;  %v1973_v5 = vsub.f32 %v7570_v34, %v1943_v1  ;;  %v2003_v11 = vmul.f32 1.442695, %v1976_v28 }
 0x640   : > { %v1946_v53 = vpop.xlane.xlu1 %1945 }
 0x641   : > { %v1997_v51 = vmul.f32 1.442695, %v1973_v5  ;;  %v1974_v39 = vsub.f32 %v7576_v20, %v1946_v53 }
 0x642   : > { %v1961_v63 = vpop.xlane.xlu0 %1960 }
 0x643   : > { %6357 = vpow2.f32 %v1997_v51  ;;  %v1999_v57 = vmul.f32 1.442695, %v1974_v39  ;;  %v1979_v28 = vsub.f32 %v7584_v13, %v1961_v63 }
 0x644   : > { %v7653_v59 = vpop.permute.xlu1 %2289  ;;  %6359 = vpow2.f32 %v2003_v11 }
 0x645   : > { %6361 = vpow2.f32 %v1999_v57  ;;  %v2009_v5 = vmul.f32 1.442695, %v1979_v28 }
 0x646   : > { %v1955_v1 = vpop.xlane.xlu0 %1954 }
 0x647   : > { %v1977_v53 = vsub.f32 %v7586_v45, %v1955_v1  ;;  %6363 = vpow2.f32 %v2009_v5 }
 0x648   : > { %v7655_v9 = vpop.permute.xlu1 %2400 }
 0x649   : > { %v7657_v2 = vpop.eup %6355  ;;  %5986 = vmatprep.subr.msk.bf16.mxu0 %vm1173_vm0, %v7655_v9  ;;  %v2005_v11 = vmul.f32 1.442695, %v1977_v53 }
 0x64a   : > { %v2043_v34 = vsel %vm1352_vm1, %v7657_v2, 0.0 }
 0x64b   : > { %2044 = vadd.xlane.f32.xlu1 %v2043_v34  ;;  %6365 = vpow2.f32 %v2005_v11 }
 0x64d   : > { %v7663_v14 = vpop.eup %6357 }
 0x64e   : > { %v2037_v20 = vsel %vm1352_vm1, %v7663_v14, 0.0  ;;  %v7667_v12 = vpop.eup %6359 }
 0x64f   : > { %2038 = vadd.xlane.f32.xlu1 %v2037_v20  ;;  %v2046_v57 = vsel %vm1352_vm1, %v7667_v12, 0.0  ;;  %v7673_v55 = vpop.eup %6361 }
 0x650   : > { %v2040_v54 = vsel %vm1352_vm1, %v7673_v55, 0.0 }
 0x651   : > { %2404 = vrot.lane.b32.xlu0 %v7218_v16, %s9348_s27  ;;  %v7681_v51 = vpop.eup %6363 }
 0x652   : > { %v2055_v39 = vsel %vm1352_vm1, %v7681_v51, 0.0 }
 0x653   : > { %2047 = vadd.xlane.f32.xlu1 %v2046_v57 }
 0x655   : > { %v7685_v34 = vpop.eup %6365 }
 0x656   : > { %v2049_v13 = vsel %vm1352_vm1, %v7685_v34, 0.0 }
 0x657   : > { %2041 = vadd.xlane.f32.xlu1 %v2040_v54 }
 0x668   : > { %2291 = vrot.lane.b32.xlu1 %v7160_v38, %s9348_s27 }
 0x670   : > { %2056 = vadd.xlane.f32.xlu0 %v2055_v39 }
 0x674   : > { %2050 = vadd.xlane.f32.xlu0 %v2049_v13 }
 0x679   : > { %v1964_v20 = vpop.xlane.xlu1 %1963 }
 0x67a   : > { %v1980_v45 = vsub.f32 %v7590_v26, %v1964_v20 }
 0x67c   : > { %v2011_v57 = vmul.f32 1.442695, %v1980_v45 }
 0x67d   : > { %v1958_v63 = vpop.xlane.xlu1 %1957 }
 0x67e   : > { %6367 = vpow2.f32 %v2011_v57  ;;  %v1978_v54 = vsub.f32 %v7592_v3, %v1958_v63  ;;  %v7709_v3 = vpop.permute.xlu0 %2287 }
 0x680   : > { %v2007_v28 = vmul.f32 1.442695, %v1978_v54 }
 0x681   : > { %v7717_v39 = vpop.permute.xlu1 %2402 }
 0x682   : > { %6369 = vpow2.f32 %v2007_v28 }
 0x688   : > { %v7691_v1 = vpop.eup %6367 }
 0x689   : > { %v2058_v5 = vsel %vm1352_vm1, %v7691_v1, 0.0 }
 0x68a   : > { %2059 = vadd.xlane.f32.xlu0 %v2058_v5 }
 0x68c   : > { %v7695_v53 = vpop.eup %6369 }
 0x68d   : > { %v2052_v11 = vsel %vm1352_vm1, %v7695_v53, 0.0 }
 0x68e   : > { %2053 = vadd.xlane.f32.xlu1 %v2052_v11 }
 0x68f   : > { %v2021_v26 = vpop.xlane.xlu0 %2020 }
 0x693   : > { %v2015_v13 = vpop.xlane.xlu0 %2014 }
 0x69f   : > { %2406 = vrot.lane.b32.xlu1 %v7226_v60, %s9348_s27 }
 0x6a0   : > { %2293 = vrot.lane.b32.xlu0 %v7158_v48, %s9348_s27 }
 0x6a3   : > { %2394 = vrot.lane.b32.xlu1 %v7174_v37, %s9348_s27 }
 0x6a4   : > { %2392 = vrot.lane.b32.xlu0 %v7176_v50, %s9348_s27 }
 0x6a7   : > { %2398 = vrot.lane.b32.xlu1 %v7190_v24, %s9348_s27 }
 0x6a8   : > { %2396 = vrot.lane.b32.xlu0 %v7192_v27, %s9348_s27 }
 0x6ab   : > { %2683 = vrot.lane.b32.xlu1 %v7146_v10, %s9348_s27 }
 0x6ac   : > { %2681 = vrot.lane.b32.xlu0 %v7130_v56, %s9348_s27 }
 0x6af   : > { %2685 = vrot.lane.b32.xlu1 %v7164_v36, %s9348_s27 }
 0x6b0   : > { %2867 = vrot.lane.b32.xlu0 %v7128_v40, %s6726_s26 }
 0x6b2   : > { %v2024_v20 = vpop.xlane.xlu1 %2023 }
 0x6b3   : > { %2687 = vrot.lane.b32.xlu1 %v7180_v58, %s9348_s27  ;;  %6371 = vrcp.f32 %v2024_v20 }
 0x6b4   : > { %2770 = vrot.lane.b32.xlu0 %v7196_v31, %s9348_s27  ;;  %6373 = vrcp.f32 %v2015_v13 }
 0x6b5   : > { %6375 = vrcp.f32 %v2021_v26 }
 0x6b6   : > { %v2018_v45 = vpop.xlane.xlu1 %2017 }
 0x6b7   : > { %6377 = vrcp.f32 %v2018_v45  ;;  %2869 = vrot.lane.b32.xlu1 %v7144_v4, %s6726_s26 }
 0x6b8   : > { %2772 = vrot.lane.b32.xlu0 %v7208_v44, %s9348_s27 }
 0x6bb   : > { %2774 = vrot.lane.b32.xlu1 %v7220_v47, %s9348_s27 }
 0x6bc   : > { %2871 = vrot.lane.b32.xlu0 %v7162_v35, %s6726_s26 }
 0x6bd   : > { %v6372_v40 = vpop.eup %6371 }
 0x6be   : > { %v6374_v57 = vpop.eup %6373  ;;  %v2080_v28 = vmul.f32 %v6372_v40, %v7621_v41  ;;  %v2316_v41 = vsel %vm1173_vm0, %v7494_v19, 0 }
 0x6bf   : > { %2873 = vrot.lane.b32.xlu1 %v7178_v52, %s6726_s26  ;;  %v6376_v63 = vpop.eup %6375  ;;  %v2077_v5 = vmul.f32 %v6374_v57, %v7613_v22 }
 0x6c0   : > { %2776 = vrot.lane.b32.xlu0 %v7228_v61, %s9348_s27  ;;  %v2033_v54 = vpop.xlane.xlu0 %2032  ;;  %v2079_v26 = vmul.f32 %v6376_v63, %v7607_v15  ;;  %v2319_v15 = vsel %vm1173_vm0, %v7502_v25, 0 }
 0x6c1   : > { %v6378_v4 = vpop.eup %6377 }
 0x6c2   : > { %v2078_v11 = vmul.f32 %v6378_v4, %v7626_v17  ;;  %v2094_v20 = vpack.c.bf16 %v2080_v28, %v2079_v26 }
 0x6c4   : > { %v2027_v35 = vpop.xlane.xlu0 %2026  ;;  %v2093_v13 = vpack.c.bf16 %v2078_v11, %v2077_v5 }
 0x6c5   : > { %6379 = vrcp.f32 %v2027_v35 }
 0x6c6   : > { %6381 = vrcp.f32 %v2033_v54  ;;  %v2030_v52 = vpop.xlane.xlu1 %2029  ;;  %5766 = vmatprep.mubr.msk.bf16.mxu1 %vm1352_vm1, %v2093_v13 }
 0x6c7   : > { %6383 = vrcp.f32 %v2030_v52  ;;  %5767 = vmatmul.mubr.msk.bf16.vlgmr.msra.gmra.mrb[48].mxu1 %vm1352_vm1, %v2094_v20 }
 0x6c8   : > { %5791 = vmatpush3.bf16.xpose.msra.mxu1 %v2316_v41  ;;  %v2036_v22 = vpop.xlane.xlu0 %2035 }
 0x6c9   : > { %5983 = vmatprep.subr.msk.bf16.mxu1 %vm1173_vm0, %v7502_v25  ;;  %6385 = vrcp.f32 %v2036_v22  ;;  %v2322_v25 = vsel %vm1173_vm0, %v7504_v49, 0 }
 0x6cf   : > { %v6380_v17 = vpop.eup %6379 }
 0x6d0   : > { %v6382_v45 = vpop.eup %6381  ;;  %5793 = vmatpush3.bf16.xpose.msra.mxu1 %v2319_v15  ;;  %v2081_v57 = vmul.f32 %v6380_v17, %v7637_v8 }
 0x6d1   : > { %v6384_v40 = vpop.eup %6383  ;;  %5984 = vmatprep.subr.msk.bf16.mxu1 %vm1173_vm0, %v7504_v49  ;;  %v2083_v4 = vmul.f32 %v6382_v45, %v7633_v6  ;;  %v2325_v6 = vsel %vm1173_vm0, %v7617_v18, 0 }
 0x6d2   : > { %v2082_v19 = vmul.f32 %v6384_v40, %v7643_v7 }
 0x6d3   : > { %v6386_v63 = vpop.eup %6385 }
 0x6d4   : > { %v2095_v54 = vpack.c.bf16 %v2082_v19, %v2081_v57  ;;  %v2084_v28 = vmul.f32 %v6386_v63, %v7639_v32 }
 0x6d6   : > { %5770 = vmatprep.mubr.msk.bf16.mxu1 %vm1352_vm1, %v2095_v54  ;;  %v2096_v5 = vpack.c.bf16 %v2084_v28, %v2083_v4 }
 0x6d8   : > { %5795 = vmatpush3.bf16.xpose.msra.mxu1 %v2322_v25  ;;  %v2045_v11 = vpop.xlane.xlu1 %2044 }
 0x6d9   : > { %5771 = vmatmul.mubr.msk.bf16.gmra.mrb[52].mxu1 %vm1352_vm1, %v2096_v5  ;;  %5985 = vmatprep.subr.msk.bf16.mxu1 %vm1173_vm0, %v7617_v18 }
 0x6da   : > { %5798 = vmatprep.mubr.msk.bf16.mxu1 %vm1173_vm0, %v7709_v3 }
 0x6dc   : > { %v2039_v8 = vpop.xlane.xlu1 %2038 }
 0x6e0   : > { %5797 = vmatpush3.bf16.xpose.msra.mxu1 %v2325_v6  ;;  %v2048_v32 = vpop.xlane.xlu1 %2047 }
 0x6e1   : > { %6387 = vrcp.f32 %v2048_v32 }
 0x6e2   : > { %6389 = vrcp.f32 %v2039_v8 }
 0x6e3   : > { %6391 = vrcp.f32 %v2045_v11 }
 0x6e4   : > { %v2042_v49 = vpop.xlane.xlu1 %2041 }
 0x6e5   : > { %6393 = vrcp.f32 %v2042_v49 }
 0x6e7   : > { %5799 = vmatmul.mubr.msk.bf16.vlgmr.msra.gmra.mrb[56].mxu1 %vm1173_vm0, %v7653_v59  ;;  %v2421_v59 = vsel %vm1173_vm0, %v7655_v9, 0 }
 0x6e8   : > { %v2292_v7 = vpop.permute.xlu1 %2291 }
 0x6e9   : > { %5802 = vmatprep.mubr.msk.bf16.mxu1 %vm1173_vm0, %v2292_v7 }
 0x6eb   : > { %v6388_v26 = vpop.eup %6387 }
 0x6ec   : > { %v6390_v35 = vpop.eup %6389  ;;  %v2088_v20 = vmul.f32 %v6388_v26, %v7667_v12  ;;  %v2405_v12 = vpop.permute.xlu0 %2404 }
 0x6ed   : > { %v6392_v3 = vpop.eup %6391  ;;  %v2085_v18 = vmul.f32 %v6390_v35, %v7663_v14  ;;  %v2424_v14 = vsel %vm1173_vm0, %v7717_v39, 0 }
 0x6ee   : > { %v2087_v41 = vmul.f32 %v6392_v3, %v7657_v2  ;;  %v2427_v2 = vsel %vm1173_vm0, %v2405_v12, 0 }
 0x6ef   : > { %v6394_v13 = vpop.eup %6393 }
 0x6f0   : > { %v2086_v52 = vmul.f32 %v6394_v13, %v7673_v55  ;;  %v2098_v17 = vpack.c.bf16 %v2088_v20, %v2087_v41 }
 0x6f2   : > { %v2097_v22 = vpack.c.bf16 %v2086_v52, %v2085_v18 }
 0x6f4   : > { %5782 = vmatprep.mubr.msk.bf16.mxu0 %vm1352_vm1, %v2097_v22 }
 0x6f5   : > { %5783 = vmatmul.mubr.msk.bf16.vlgmr.msra.gmra.mrb[48].mxu0 %vm1352_vm1, %v2098_v17 }
 0x6f6   : > { %5807 = vmatpush3.bf16.xpose.msra.mxu0 %v2421_v59 }
 0x6f7   : > { %5987 = vmatprep.subr.msk.bf16.mxu0 %vm1173_vm0, %v7717_v39 }
 0x6fd   : > { %v2057_v55 = vpop.xlane.xlu0 %2056 }
 0x6fe   : > { %5809 = vmatpush3.bf16.xpose.msra.mxu0 %v2424_v14 }
 0x6ff   : > { %5988 = vmatprep.subr.msk.bf16.mxu0 %vm1173_vm0, %v2405_v12 }
 0x701   : > { %v2051_v15 = vpop.xlane.xlu0 %2050 }
 0x706   : > { %5811 = vmatpush3.bf16.xpose.msra.mxu0 %v2427_v2 }
 0x717   : > { %v2060_v45 = vpop.xlane.xlu0 %2059 }
 0x718   : > { %6395 = vrcp.f32 %v2060_v45 }
 0x719   : > { %6397 = vrcp.f32 %v2051_v15 }
 0x71a   : > { %6399 = vrcp.f32 %v2057_v55 }
 0x71b   : > { %v2054_v9 = vpop.xlane.xlu1 %2053  ;;  %v2294_v40 = vpop.permute.xlu0 %2293 }
 0x71c   : > { %6401 = vrcp.f32 %v2054_v9  ;;  %5803 = vmatmul.mubr.msk.bf16.gmra.mrb[60].mxu1 %vm1173_vm0, %v2294_v40 }
 0x71f   : > { %v2407_v57 = vpop.permute.xlu1 %2406  ;;  %v2393_v39 = vpop.permute.xlu0 %2392 }
 0x720   : > { %5989 = vmatprep.subr.msk.bf16.mxu0 %vm1173_vm0, %v2407_v57  ;;  %v2430_v19 = vsel %vm1173_vm0, %v2407_v57, 0 }
 0x721   : > { %5813 = vmatpush3.bf16.xpose.msra.mxu0 %v2430_v19 }
 0x722   : > { %v6396_v63 = vpop.eup %6395 }
 0x723   : > { %v2395_v54 = vpop.permute.xlu1 %2394  ;;  %v2397_v4 = vpop.permute.xlu0 %2396  ;;  %v2092_v11 = vmul.f32 %v6396_v63, %v7691_v1 }
 0x724   : > { %v6398_v28 = vpop.eup %6397 }
 0x725   : > { %v6400_v5 = vpop.eup %6399  ;;  %v2089_v32 = vmul.f32 %v6398_v28, %v7685_v34 }
 0x726   : > { %v6402_v25 = vpop.eup %6401  ;;  %v2091_v7 = vmul.f32 %v6400_v5, %v7681_v51 }
 0x727   : > { %v2399_v8 = vpop.permute.xlu1 %2398  ;;  %v2682_v6 = vpop.permute.xlu0 %2681  ;;  %v2090_v49 = vmul.f32 %v6402_v25, %v7695_v53 }
 0x728   : > { %5822 = vmatprep.subr.bf16.mxu1 %v2682_v6  ;;  %v2100_v35 = vpack.c.bf16 %v2092_v11, %v2091_v7 }
 0x729   : > { %5823 = vmatpush3.bf16.msra.mxu1 %v2682_v6  ;;  %v2099_v26 = vpack.c.bf16 %v2090_v49, %v2089_v32 }
 0x72b   : > { %v2684_v3 = vpop.permute.xlu1 %2683  ;;  %5786 = vmatprep.mubr.msk.bf16.mxu0 %vm1352_vm1, %v2099_v26  ;;  %v7792_v13 = vpop.permute.xlu0 %2867 }
 0x72c   : > { %5787 = vmatmul.mubr.msk.bf16.gmra.mrb[52].mxu0 %vm1352_vm1, %v2100_v35  ;;  %5824 = vmatprep.subr.bf16.mxu1 %v2684_v3 }
 0x72d   : > { %5814 = vmatprep.mubr.msk.bf16.mxu0 %vm1173_vm0, %v2393_v39  ;;  %5825 = vmatpush3.bf16.msra.mxu1 %v2684_v3 }
 0x72f   : > { %v2686_v34 = vpop.permute.xlu1 %2685  ;;  %v2771_v1 = vpop.permute.xlu0 %2770 }
 0x730   : > { %5826 = vmatprep.subr.bf16.mxu1 %v2686_v34  ;;  %5838 = vmatprep.subr.bf16.mxu0 %v2771_v1 }
 0x731   : > { %5827 = vmatpush3.bf16.msra.mxu1 %v2686_v34 }
 0x733   : > { %v2688_v51 = vpop.permute.xlu1 %2687  ;;  %v2773_v53 = vpop.permute.xlu0 %2772 }
 0x734   : > { %5815 = vmatmul.mubr.msk.bf16.vlgmr.msra.gmra.mrb[56].mxu0 %vm1173_vm0, %v2395_v54  ;;  %5828 = vmatprep.subr.bf16.mxu1 %v2688_v51 }
 0x735   : > { %5839 = vmatpush3.bf16.msra.mxu0 %v2771_v1  ;;  %5818 = vmatprep.mubr.msk.bf16.mxu0 %vm1173_vm0, %v2397_v4 }
 0x736   : > { %5829 = vmatpush3.bf16.msra.mxu1 %v2688_v51  ;;  %5840 = vmatprep.subr.bf16.mxu0 %v2773_v53 }
 0x737   : > { %5990 = vmatprep.subr.msk.bf16.mxu1 %vm1173_vm0, %v7792_v13  ;;  %v7800_v20 = vpop.permute.xlu1 %2869  ;;  %v7802_v18 = vpop.permute.xlu0 %2871 }
 0x739   : > { %5841 = vmatpush3.bf16.msra.mxu0 %v2773_v53 }
 0x73b   : > { %v2775_v52 = vpop.permute.xlu1 %2774  ;;  %v2777_v41 = vpop.permute.xlu0 %2776 }
 0x73c   : > { %5819 = vmatmul.mubr.msk.bf16.gmra.mrb[60].mxu0 %vm1173_vm0, %v2399_v8  ;;  %5842 = vmatprep.subr.bf16.mxu0 %v2775_v52 }
 0x73d   : > { %5843 = vmatpush3.bf16.msra.mxu0 %v2775_v52 }
 0x73e   : > { %5844 = vmatprep.subr.bf16.mxu0 %v2777_v41 }
 0x741   : > { %5845 = vmatpush3.bf16.msra.mxu0 %v2777_v41 }
 0x79a   : > { %v7805_v22 = vpop.f32.mrb[48].mxu1 }
 0x79b   : > { %v7807_v17 = vpop.f32.mrb[49].mxu1 }
 0x79c   : > { %v7809_v59 = vpop.f32.mrb[50].mxu1 }
 0x79d   : > { %v7813_v12 = vpop.f32.mrb[51].mxu1 }
 0x7ac   : > { %v7817_v55 = vpop.f32.mrb[52].mxu1 }
 0x7ad   : > { %v7819_v15 = vpop.f32.mrb[53].mxu1 }
 0x7ae   : > { %v7821_v45 = vpop.f32.mrb[54].mxu1 }
 0x7af   : > { %v7825_v40 = vpop.f32.mrb[55].mxu1 }
 0x7ba   : > { %v7829_v39 = vpop.f32.mrb[56].mxu1 }
 0x7bb   : > { %v7831_v19 = vpop.f32.mrb[57].mxu1  ;;  %v2503_v63 = vsel %vm1352_vm1, %v7829_v39, -inf }
 0x7bc   : > { %2504 = vmax.xlane.f32.xlu0 %v2503_v63  ;;  %v7835_v54 = vpop.f32.mrb[58].mxu1  ;;  %v2497_v5 = vsel %vm1352_vm1, %v7831_v19, -inf }
 0x7bd   : > { %v7837_v4 = vpop.f32.mrb[59].mxu1  ;;  %v2506_v25 = vsel %vm1352_vm1, %v7835_v54, -inf }
 0x7be   : > { %v2500_v28 = vsel %vm1352_vm1, %v7837_v4, -inf }
 0x7bf   : > { %2501 = vmax.xlane.f32.xlu1 %v2500_v28 }
 0x7c0   : > { %2498 = vmax.xlane.f32.xlu0 %v2497_v5 }
 0x7c4   : > { %2507 = vmax.xlane.f32.xlu0 %v2506_v25 }
 0x7c8   : > { %v7845_v11 = vpop.f32.mrb[48].mxu0 }
 0x7c9   : > { %v7847_v8 = vpop.f32.mrb[49].mxu0 }
 0x7ca   : > { %v7849_v6 = vpop.f32.mrb[50].mxu0 }
 0x7cb   : > { %v7853_v49 = vpop.f32.mrb[51].mxu0 }
 0x7ef   : > { %v7857_v26 = vpop.f32.mrb[60].mxu1 }
 0x7f0   : > { %v7859_v35 = vpop.f32.mrb[61].mxu1  ;;  %v2515_v3 = vsel %vm1352_vm1, %v7857_v26, -inf }
 0x7f1   : > { %2516 = vmax.xlane.f32.xlu0 %v2515_v3  ;;  %v7863_v34 = vpop.f32.mrb[62].mxu1  ;;  %v2509_v53 = vsel %vm1352_vm1, %v7859_v35, -inf }
 0x7f2   : > { %v7865_v1 = vpop.f32.mrb[63].mxu1  ;;  %v2518_v51 = vsel %vm1352_vm1, %v7863_v34, -inf }
 0x7f3   : > { %2519 = vmax.xlane.f32.xlu1 %v2518_v51  ;;  %v2512_v52 = vsel %vm1352_vm1, %v7865_v1, -inf }
 0x7f5   : > { %2510 = vmax.xlane.f32.xlu0 %v2509_v53 }
 0x7f7   : > { %2513 = vmax.xlane.f32.xlu1 %v2512_v52 }
 0x7ff   : > { %v7873_v41 = vpop.f32.mrb[52].mxu0 }
 0x800   : > { %v7875_v63 = vpop.f32.mrb[53].mxu0 }
 0x801   : > { %9389 = vst [vmem:[#allocation40_spill] sm:$0xff] %v7875_v63  ;;  %v7877_v28 = vpop.f32.mrb[54].mxu0 }
 0x802   : > { %v7881_v25 = vpop.f32.mrb[55].mxu0 }
 0x807   : > { %v7885_v51 = vpop.f32.mrb[56].mxu0 }
 0x808   : > { %2861 = vrot.lane.b32.xlu1 %v7140_v0, %s6726_s26  ;;  %v7889_v53 = vpop.f32.mrb[57].mxu0  ;;  %v2527_v52 = vsel %vm1352_vm1, %v7885_v51, -inf }
 0x809   : > { %2528 = vmax.xlane.f32.xlu0 %v2527_v52  ;;  %v7893_v7 = vpop.f32.mrb[58].mxu0  ;;  %v2521_v3 = vsel %vm1352_vm1, %v7889_v53, -inf }
 0x80a   : > { %v7895_v32 = vpop.f32.mrb[59].mxu0  ;;  %v2530_v52 = vsel %vm1352_vm1, %v7893_v7, -inf }
 0x80c   : > { %2972 = vrot.lane.b32.xlu1 %v7194_v29, %s6726_s26  ;;  %v2524_v29 = vsel %vm1352_vm1, %v7895_v32, -inf }
 0x80d   : > { %2522 = vmax.xlane.f32.xlu0 %v2521_v3 }
 0x80f   : > { %v7901_v5 = vpop.f32.mrb[60].mxu0 }
 0x810   : > { %v7903_v0 = vpop.f32.mrb[61].mxu0  ;;  %v2539_v2 = vsel %vm1352_vm1, %v7901_v5, -inf }
 0x811   : > { %v7905_v57 = vpop.f32.mrb[62].mxu0 }
 0x812   : > { %v7907_v9 = vpop.f32.mrb[63].mxu0  ;;  %v2542_v3 = vsel %vm1352_vm1, %v7905_v57, -inf }
 0x813   : > { %v2536_v14 = vsel %vm1352_vm1, %v7907_v9, -inf }
 0x823   : > { %2859 = vrot.lane.b32.xlu0 %v7142_v62, %s6726_s26  ;;  %v2533_v62 = vsel %vm1352_vm1, %v7903_v0, -inf }
 0x830   : > { %2531 = vmax.xlane.f32.xlu1 %v2530_v52 }
 0x834   : > { %2525 = vmax.xlane.f32.xlu1 %v2524_v29 }
 0x838   : > { %2543 = vmax.xlane.f32.xlu1 %v2542_v3 }
 0x83c   : > { %2537 = vmax.xlane.f32.xlu1 %v2536_v14 }
 0x842   : > { %2540 = vmax.xlane.f32.xlu0 %v2539_v2  ;;  %v7929_v2 = vpop.permute.xlu1 %2873 }
 0x846   : > { %2534 = vmax.xlane.f32.xlu0 %v2533_v62 }
 0x849   : > { %v2505_v52 = vpop.xlane.xlu0 %2504 }
 0x84a   : > { %v2547_v33 = vsub.f32 %v7829_v39, %v2505_v52 }
 0x84c   : > { %v2565_v29 = vmul.f32 1.442695, %v2547_v33  ;;  %v2502_v52 = vpop.xlane.xlu1 %2501 }
 0x84d   : > { %v2499_v21 = vpop.xlane.xlu0 %2498  ;;  %2974 = vrot.lane.b32.xlu1 %v7206_v43, %s6726_s26 }
 0x84e   : > { %6403 = vpow2.f32 %v2565_v29  ;;  %v2545_v3 = vsub.f32 %v7831_v19, %v2499_v21  ;;  %v2546_v21 = vsub.f32 %v7837_v4, %v2502_v52 }
 0x850   : > { %v2561_v14 = vmul.f32 1.442695, %v2545_v3  ;;  %v2563_v29 = vmul.f32 1.442695, %v2546_v21 }
 0x851   : > { %v2508_v46 = vpop.xlane.xlu0 %2507 }
 0x852   : > { %6405 = vpow2.f32 %v2561_v14  ;;  %v2548_v33 = vsub.f32 %v7835_v54, %v2508_v46 }
 0x854   : > { %v2567_v19 = vmul.f32 1.442695, %v2548_v33 }
 0x856   : > { %6407 = vpow2.f32 %v2567_v19 }
 0x857   : > { %6409 = vpow2.f32 %v2563_v29 }
 0x858   : > { %v7927_v30 = vpop.eup %6403 }
 0x859   : > { %v2599_v62 = vsel %vm1352_vm1, %v7927_v30, 0.0 }
 0x85a   : > { %2600 = vadd.xlane.f32.xlu0 %v2599_v62 }
 0x85c   : > { %v7934_v39 = vpop.eup %6405 }
 0x85d   : > { %v2593_v43 = vsel %vm1352_vm1, %v7934_v39, 0.0 }
 0x85e   : > { %2594 = vadd.xlane.f32.xlu0 %v2593_v43 }
 0x860   : > { %v7939_v3 = vpop.eup %6407 }
 0x861   : > { %v2602_v14 = vsel %vm1352_vm1, %v7939_v3, 0.0  ;;  %v7943_v62 = vpop.eup %6409 }
 0x862   : > { %v2596_v46 = vsel %vm1352_vm1, %v7943_v62, 0.0 }
 0x871   : > { %2603 = vadd.xlane.f32.xlu1 %v2602_v14 }
 0x875   : > { %2597 = vadd.xlane.f32.xlu1 %v2596_v46 }
 0x87e   : > { %v2517_v54 = vpop.xlane.xlu0 %2516 }
 0x87f   : > { %v2551_v43 = vsub.f32 %v7857_v26, %v2517_v54 }
 0x880   : > { %v2520_v4 = vpop.xlane.xlu1 %2519 }
 0x881   : > { %v2573_v33 = vmul.f32 1.442695, %v2551_v43  ;;  %v2552_v52 = vsub.f32 %v7863_v34, %v2520_v4 }
 0x882   : > { %v2511_v21 = vpop.xlane.xlu0 %2510 }
 0x883   : > { %6411 = vpow2.f32 %v2573_v33  ;;  %v2549_v19 = vsub.f32 %v7859_v35, %v2511_v21  ;;  %v2575_v29 = vmul.f32 1.442695, %v2552_v52 }
 0x884   : > { %v2514_v23 = vpop.xlane.xlu1 %2513 }
 0x885   : > { %v2569_v42 = vmul.f32 1.442695, %v2549_v19  ;;  %v2550_v14 = vsub.f32 %v7865_v1, %v2514_v23 }
 0x887   : > { %6413 = vpow2.f32 %v2569_v42  ;;  %v2571_v63 = vmul.f32 1.442695, %v2550_v14 }
 0x888   : > { %6415 = vpow2.f32 %v2575_v29  ;;  %v7951_v46 = vpop.permute.xlu1 %2861 }
 0x889   : > { %6417 = vpow2.f32 %v2571_v63 }
 0x88c   : > { %v7953_v26 = vpop.permute.xlu1 %2972 }
 0x88d   : > { %v7955_v54 = vpop.eup %6411  ;;  %5994 = vmatprep.subr.msk.bf16.mxu0 %vm1173_vm0, %v7953_v26 }
 0x88e   : > { %v2611_v35 = vsel %vm1352_vm1, %v7955_v54, 0.0 }
 0x88f   : > { %2612 = vadd.xlane.f32.xlu0 %v2611_v35 }
 0x891   : > { %v7961_v34 = vpop.eup %6413 }
 0x892   : > { %v7963_v23 = vpop.eup %6415  ;;  %v2605_v42 = vsel %vm1352_vm1, %v7961_v34, 0.0 }
 0x893   : > { %v7967_v1 = vpop.eup %6417  ;;  %2606 = vadd.xlane.f32.xlu0 %v2605_v42  ;;  %v2614_v4 = vsel %vm1352_vm1, %v7963_v23, 0.0 }
 0x894   : > { %v2608_v63 = vsel %vm1352_vm1, %v7967_v1, 0.0 }
 0x895   : > { %2609 = vadd.xlane.f32.xlu1 %v2608_v63 }
 0x896   : > { %v2529_v43 = vpop.xlane.xlu0 %2528 }
 0x897   : > { %v2555_v33 = vsub.f32 %v7885_v51, %v2529_v43  ;;  %2615 = vadd.xlane.f32.xlu0 %v2614_v4 }
 0x899   : > { %v2581_v52 = vmul.f32 1.442695, %v2555_v33 }
 0x89a   : > { %v2523_v21 = vpop.xlane.xlu0 %2522 }
 0x89b   : > { %6419 = vpow2.f32 %v2581_v52  ;;  %v2553_v19 = vsub.f32 %v7889_v53, %v2523_v21 }
 0x89d   : > { %v2577_v29 = vmul.f32 1.442695, %v2553_v19 }
 0x89e   : > { %v7987_v21 = vpop.permute.xlu0 %2859 }
 0x89f   : > { %6421 = vpow2.f32 %v2577_v29 }
 0x8a5   : > { %v7975_v14 = vpop.eup %6419 }
 0x8a6   : > { %v2623_v35 = vsel %vm1352_vm1, %v7975_v14, 0.0 }
 0x8a7   : > { %2624 = vadd.xlane.f32.xlu1 %v2623_v35 }
 0x8a9   : > { %v7979_v42 = vpop.eup %6421 }
 0x8aa   : > { %v2617_v63 = vsel %vm1352_vm1, %v7979_v42, 0.0 }
 0x8ab   : > { %2618 = vadd.xlane.f32.xlu1 %v2617_v63 }
 0x8ad   : > { %2863 = vrot.lane.b32.xlu0 %v7160_v38, %s6726_s26 }
 0x8bd   : > { %v2532_v51 = vpop.xlane.xlu1 %2531 }
 0x8be   : > { %v2556_v53 = vsub.f32 %v7893_v7, %v2532_v51 }
 0x8c0   : > { %v2583_v43 = vmul.f32 1.442695, %v2556_v53 }
 0x8c1   : > { %v2526_v4 = vpop.xlane.xlu1 %2525 }
 0x8c2   : > { %6423 = vpow2.f32 %v2583_v43  ;;  %v2554_v33 = vsub.f32 %v7895_v32, %v2526_v4 }
 0x8c4   : > { %v2579_v52 = vmul.f32 1.442695, %v2554_v33 }
 0x8c5   : > { %v2544_v35 = vpop.xlane.xlu1 %2543 }
 0x8c6   : > { %6425 = vpow2.f32 %v2579_v52  ;;  %v2560_v32 = vsub.f32 %v7905_v57, %v2544_v35 }
 0x8c8   : > { %v2591_v33 = vmul.f32 1.442695, %v2560_v32 }
 0x8cc   : > { %v7989_v19 = vpop.eup %6423 }
 0x8cd   : > { %v2626_v29 = vsel %vm1352_vm1, %v7989_v19, 0.0 }
 0x8ce   : > { %2627 = vadd.xlane.f32.xlu1 %v2626_v29 }
 0x8cf   : > { %v2541_v38 = vpop.xlane.xlu0 %2540 }
 0x8d0   : > { %v7993_v63 = vpop.eup %6425  ;;  %v2559_v7 = vsub.f32 %v7901_v5, %v2541_v38 }
 0x8d1   : > { %v2620_v51 = vsel %vm1352_vm1, %v7993_v63, 0.0 }
 0x8d2   : > { %v2589_v53 = vmul.f32 1.442695, %v2559_v7  ;;  %2621 = vadd.xlane.f32.xlu1 %v2620_v51  ;;  %v2538_v7 = vpop.xlane.xlu1 %2537 }
 0x8d3   : > { %v2535_v43 = vpop.xlane.xlu0 %2534  ;;  %v2558_v51 = vsub.f32 %v7907_v9, %v2538_v7 }
 0x8d4   : > { %6427 = vpow2.f32 %v2589_v53  ;;  %v2557_v4 = vsub.f32 %v7903_v0, %v2535_v43 }
 0x8d5   : > { %v2587_v32 = vmul.f32 1.442695, %v2558_v51 }
 0x8d6   : > { %v2585_v52 = vmul.f32 1.442695, %v2557_v4  ;;  %v8015_v43 = vpop.permute.xlu1 %2974 }
 0x8d8   : > { %6429 = vpow2.f32 %v2585_v52 }
 0x8d9   : > { %6431 = vpow2.f32 %v2591_v33 }
 0x8da   : > { %6433 = vpow2.f32 %v2587_v32 }
 0x8de   : > { %v8000_v29 = vpop.eup %6427 }
 0x8df   : > { %v2635_v5 = vsel %vm1352_vm1, %v8000_v29, 0.0 }
 0x8e0   : > { %2636 = vadd.xlane.f32.xlu0 %v2635_v5 }
 0x8e2   : > { %v8004_v38 = vpop.eup %6429 }
 0x8e3   : > { %2865 = vrot.lane.b32.xlu1 %v7158_v48, %s6726_s26  ;;  %v2629_v57 = vsel %vm1352_vm1, %v8004_v38, 0.0  ;;  %v8010_v35 = vpop.eup %6431 }
 0x8e4   : > { %2630 = vadd.xlane.f32.xlu0 %v2629_v57  ;;  %v2638_v0 = vsel %vm1352_vm1, %v8010_v35, 0.0  ;;  %v8021_v52 = vpop.eup %6433 }
 0x8e5   : > { %v2632_v9 = vsel %vm1352_vm1, %v8021_v52, 0.0 }
 0x8e7   : > { %v2601_v53 = vpop.xlane.xlu0 %2600 }
 0x8e8   : > { %2639 = vadd.xlane.f32.xlu0 %v2638_v0 }
 0x8eb   : > { %v2595_v4 = vpop.xlane.xlu0 %2594 }
 0x8fe   : > { %v2604_v48 = vpop.xlane.xlu1 %2603  ;;  %2976 = vrot.lane.b32.xlu0 %v7218_v16, %s6726_s26 }
 0x8ff   : > { %6435 = vrcp.f32 %v2604_v48 }
 0x900   : > { %6437 = vrcp.f32 %v2595_v4 }
 0x901   : > { %6439 = vrcp.f32 %v2601_v53 }
 0x902   : > { %v2598_v33 = vpop.xlane.xlu1 %2597  ;;  %2964 = vrot.lane.b32.xlu0 %v7176_v50, %s6726_s26 }
 0x903   : > { %6441 = vrcp.f32 %v2598_v33 }
 0x906   : > { %2968 = vrot.lane.b32.xlu0 %v7192_v27, %s6726_s26 }
 0x907   : > { %2633 = vadd.xlane.f32.xlu1 %v2632_v9 }
 0x909   : > { %v6436_v5 = vpop.eup %6435 }
 0x90a   : > { %3253 = vrot.lane.b32.xlu0 %v7130_v56, %s6726_s26  ;;  %v6438_v16 = vpop.eup %6437  ;;  %v2660_v7 = vmul.f32 %v6436_v5, %v7939_v3  ;;  %v2888_v56 = vsel %vm1173_vm0, %v7792_v13, 0 }
 0x90b   : > { %v6440_v57 = vpop.eup %6439  ;;  %v2657_v50 = vmul.f32 %v6438_v16, %v7934_v39  ;;  %v2891_v39 = vsel %vm1173_vm0, %v7800_v20, 0 }
 0x90c   : > { %v2659_v32 = vmul.f32 %v6440_v57, %v7927_v30 }
 0x90d   : > { %v6442_v0 = vpop.eup %6441 }
 0x90e   : > { %v2658_v51 = vmul.f32 %v6442_v0, %v7943_v62  ;;  %v2674_v53 = vpack.c.bf16 %v2660_v7, %v2659_v32  ;;  %v2897_v62 = vsel %vm1173_vm0, %v7929_v2, 0 }
 0x910   : > { %v2673_v27 = vpack.c.bf16 %v2658_v51, %v2657_v50 }
 0x912   : > { %5830 = vmatprep.mubr.msk.bf16.mxu1 %vm1352_vm1, %v2673_v27 }
 0x913   : > { %5831 = vmatmul.mubr.msk.bf16.vlgmr.msra.gmra.mrb[64].mxu1 %vm1352_vm1, %v2674_v53 }
 0x914   : > { %5855 = vmatpush3.bf16.xpose.msra.mxu1 %v2888_v56 }
 0x915   : > { %5991 = vmatprep.subr.msk.bf16.mxu1 %vm1173_vm0, %v7800_v20 }
 0x918   : > { %2978 = vrot.lane.b32.xlu1 %v7226_v60, %s6726_s26  ;;  %v2894_v60 = vsel %vm1173_vm0, %v7802_v18, 0 }
 0x91c   : > { %5857 = vmatpush3.bf16.xpose.msra.mxu1 %v2891_v39  ;;  %2966 = vrot.lane.b32.xlu1 %v7174_v37, %s6726_s26  ;;  %v2613_v30 = vpop.xlane.xlu0 %2612 }
 0x91d   : > { %5992 = vmatprep.subr.msk.bf16.mxu1 %vm1173_vm0, %v7802_v18 }
 0x920   : > { %2970 = vrot.lane.b32.xlu1 %v7190_v24, %s6726_s26  ;;  %v2607_v13 = vpop.xlane.xlu0 %2606 }
 0x921   : > { %6443 = vrcp.f32 %v2607_v13  ;;  %v2993_v13 = vsel %vm1173_vm0, %v7953_v26, 0 }
 0x922   : > { %6445 = vrcp.f32 %v2613_v30  ;;  %v2610_v3 = vpop.xlane.xlu1 %2609 }
 0x923   : > { %6447 = vrcp.f32 %v2610_v3 }
 0x924   : > { %5859 = vmatpush3.bf16.xpose.msra.mxu1 %v2894_v60  ;;  %v2616_v20 = vpop.xlane.xlu0 %2615 }
 0x925   : > { %5993 = vmatprep.subr.msk.bf16.mxu1 %vm1173_vm0, %v7929_v2  ;;  %6449 = vrcp.f32 %v2616_v20 }
 0x928   : > { %v2864_v2 = vpop.permute.xlu0 %2863 }
 0x92b   : > { %v6444_v37 = vpop.eup %6443 }
 0x92c   : > { %v6446_v4 = vpop.eup %6445  ;;  %5861 = vmatpush3.bf16.xpose.msra.mxu1 %v2897_v62  ;;  %v2661_v48 = vmul.f32 %v6444_v37, %v7961_v34 }
 0x92d   : > { %v6448_v24 = vpop.eup %6447  ;;  %v2663_v18 = vmul.f32 %v6446_v4, %v7955_v54 }
 0x92e   : > { %v2662_v33 = vmul.f32 %v6448_v24, %v7967_v1 }
 0x92f   : > { %v6450_v9 = vpop.eup %6449 }
 0x930   : > { %v2675_v5 = vpack.c.bf16 %v2662_v33, %v2661_v48  ;;  %v2664_v16 = vmul.f32 %v6450_v9, %v7963_v23 }
 0x932   : > { %5834 = vmatprep.mubr.msk.bf16.mxu1 %vm1352_vm1, %v2675_v5  ;;  %v2676_v57 = vpack.c.bf16 %v2664_v16, %v2663_v18 }
 0x934   : > { %5835 = vmatmul.mubr.msk.bf16.gmra.mrb[68].mxu1 %vm1352_vm1, %v2676_v57  ;;  %v2625_v34 = vpop.xlane.xlu1 %2624 }
 0x935   : > { %5862 = vmatprep.mubr.msk.bf16.mxu1 %vm1173_vm0, %v7987_v21 }
 0x938   : > { %v2619_v1 = vpop.xlane.xlu1 %2618 }
 0x93c   : > { %5863 = vmatmul.mubr.msk.bf16.vlgmr.msra.gmra.mrb[72].mxu1 %vm1173_vm0, %v7951_v46 }
 0x93d   : > { %5866 = vmatprep.mubr.msk.bf16.mxu1 %vm1173_vm0, %v2864_v2 }
 0x95b   : > { %v2628_v0 = vpop.xlane.xlu1 %2627 }
 0x95c   : > { %6451 = vrcp.f32 %v2628_v0 }
 0x95d   : > { %6453 = vrcp.f32 %v2619_v1 }
 0x95e   : > { %6455 = vrcp.f32 %v2625_v34 }
 0x95f   : > { %v2622_v54 = vpop.xlane.xlu1 %2621 }
 0x960   : > { %6457 = vrcp.f32 %v2622_v54 }
 0x963   : > { %v2866_v23 = vpop.permute.xlu1 %2865 }
 0x964   : > { %5867 = vmatmul.mubr.msk.bf16.gmra.mrb[76].mxu1 %vm1173_vm0, %v2866_v23 }
 0x966   : > { %v6452_v7 = vpop.eup %6451 }
 0x967   : > { %v6454_v50 = vpop.eup %6453  ;;  %v2668_v32 = vmul.f32 %v6452_v7, %v7989_v19  ;;  %v2996_v19 = vsel %vm1173_vm0, %v8015_v43, 0 }
 0x968   : > { %v6456_v21 = vpop.eup %6455  ;;  %v2665_v46 = vmul.f32 %v6454_v50, %v7979_v42 }
 0x969   : > { %v2667_v53 = vmul.f32 %v6456_v21, %v7975_v14 }
 0x96a   : > { %v6458_v51 = vpop.eup %6457 }
 0x96b   : > { %v2666_v27 = vmul.f32 %v6458_v51, %v7993_v63  ;;  %v2678_v30 = vpack.c.bf16 %v2668_v32, %v2667_v53 }
 0x96d   : > { %v2637_v56 = vpop.xlane.xlu0 %2636  ;;  %v2677_v39 = vpack.c.bf16 %v2666_v27, %v2665_v46 }
 0x96f   : > { %5846 = vmatprep.mubr.msk.bf16.mxu0 %vm1352_vm1, %v2677_v39 }
 0x970   : > { %5847 = vmatmul.mubr.msk.bf16.vlgmr.msra.gmra.mrb[64].mxu0 %vm1352_vm1, %v2678_v30 }
 0x971   : > { %5871 = vmatpush3.bf16.xpose.msra.mxu0 %v2993_v13  ;;  %v2631_v3 = vpop.xlane.xlu0 %2630 }
 0x972   : > { %5995 = vmatprep.subr.msk.bf16.mxu0 %vm1173_vm0, %v8015_v43 }
 0x975   : > { %v2640_v42 = vpop.xlane.xlu0 %2639 }
 0x976   : > { %6459 = vrcp.f32 %v2640_v42 }
 0x977   : > { %6461 = vrcp.f32 %v2631_v3 }
 0x978   : > { %6463 = vrcp.f32 %v2637_v56 }
 0x979   : > { %5873 = vmatpush3.bf16.xpose.msra.mxu0 %v2996_v19  ;;  %v2977_v14 = vpop.permute.xlu0 %2976 }
 0x97a   : > { %5996 = vmatprep.subr.msk.bf16.mxu0 %vm1173_vm0, %v2977_v14  ;;  %v2999_v60 = vsel %vm1173_vm0, %v2977_v14, 0 }
 0x97d   : > { %v2965_v63 = vpop.permute.xlu0 %2964 }
 0x980   : > { %v6460_v4 = vpop.eup %6459 }
 0x981   : > { %5875 = vmatpush3.bf16.xpose.msra.mxu0 %v2999_v60  ;;  %v2969_v20 = vpop.permute.xlu0 %2968  ;;  %v6462_v24 = vpop.eup %6461  ;;  %v2672_v9 = vmul.f32 %v6460_v4, %v8010_v35 }
 0x982   : > { %v6464_v48 = vpop.eup %6463  ;;  %v2669_v5 = vmul.f32 %v6462_v24, %v8004_v38 }
 0x983   : > { %v2671_v16 = vmul.f32 %v6464_v48, %v8000_v29 }
 0x985   : > { %v3254_v37 = vpop.permute.xlu0 %3253  ;;  %v2680_v2 = vpack.c.bf16 %v2672_v9, %v2671_v16 }
 0x986   : > { %5886 = vmatprep.subr.bf16.mxu1 %v3254_v37 }
 0x987   : > { %5887 = vmatpush3.bf16.msra.mxu1 %v3254_v37 }
 0x994   : > { %v2634_v26 = vpop.xlane.xlu1 %2633 }
 0x995   : > { %6465 = vrcp.f32 %v2634_v26 }
 0x998   : > { %v2979_v62 = vpop.permute.xlu1 %2978 }
 0x999   : > { %5997 = vmatprep.subr.msk.bf16.mxu0 %vm1173_vm0, %v2979_v62  ;;  %v3002_v43 = vsel %vm1173_vm0, %v2979_v62, 0 }
 0x99a   : > { %5877 = vmatpush3.bf16.xpose.msra.mxu0 %v3002_v43 }
 0x99c   : > { %v2967_v34 = vpop.permute.xlu1 %2966 }
 0x99f   : > { %v6466_v33 = vpop.eup %6465 }
 0x9a0   : > { %v2670_v18 = vmul.f32 %v6466_v33, %v8021_v52  ;;  %v2971_v35 = vpop.permute.xlu1 %2970 }
 0x9a2   : > { %v2679_v57 = vpack.c.bf16 %v2670_v18, %v2669_v5 }
 0x9a4   : > { %5850 = vmatprep.mubr.msk.bf16.mxu0 %vm1352_vm1, %v2679_v57 }
 0x9a5   : > { %5851 = vmatmul.mubr.msk.bf16.gmra.mrb[68].mxu0 %vm1352_vm1, %v2680_v2 }
 0x9a6   : > { %5878 = vmatprep.mubr.msk.bf16.mxu0 %vm1173_vm0, %v2965_v63 }
 0x9ad   : > { %5879 = vmatmul.mubr.msk.bf16.vlgmr.msra.gmra.mrb[72].mxu0 %vm1173_vm0, %v2967_v34 }
 0x9ae   : > { %5882 = vmatprep.mubr.msk.bf16.mxu0 %vm1173_vm0, %v2969_v20 }
 0x9b5   : > { %5883 = vmatmul.mubr.msk.bf16.gmra.mrb[76].mxu0 %vm1173_vm0, %v2971_v35 }
 0x9e6   : > { %v8093_v38 = vpop.f32.mrb[64].mxu1 }
 0x9e7   : > { %v8095_v52 = vpop.f32.mrb[65].mxu1 }
 0x9e8   : > { %v8097_v29 = vpop.f32.mrb[66].mxu1 }
 0x9e9   : > { %v8101_v0 = vpop.f32.mrb[67].mxu1 }
 0xa07   : > { %v8105_v23 = vpop.f32.mrb[68].mxu1 }
 0xa08   : > { %v8107_v7 = vpop.f32.mrb[69].mxu1 }
 0xa09   : > { %v8109_v50 = vpop.f32.mrb[70].mxu1 }
 0xa0a   : > { %v8113_v51 = vpop.f32.mrb[71].mxu1 }
 0xa0f   : > { %v8117_v46 = vpop.f32.mrb[72].mxu1 }
 0xa10   : > { %v8119_v27 = vpop.f32.mrb[73].mxu1  ;;  %v3075_v53 = vsel %vm1352_vm1, %v8117_v46, -inf }
 0xa11   : > { %3076 = vmax.xlane.f32.xlu0 %v3075_v53  ;;  %v8123_v56 = vpop.f32.mrb[74].mxu1  ;;  %v3069_v13 = vsel %vm1352_vm1, %v8119_v27, -inf }
 0xa12   : > { %v8125_v39 = vpop.f32.mrb[75].mxu1  ;;  %v3078_v3 = vsel %vm1352_vm1, %v8123_v56, -inf }
 0xa13   : > { %v3072_v30 = vsel %vm1352_vm1, %v8125_v39, -inf }
 0xa14   : > { %3073 = vmax.xlane.f32.xlu1 %v3072_v30 }
 0xa15   : > { %3070 = vmax.xlane.f32.xlu0 %v3069_v13 }
 0xa19   : > { %3079 = vmax.xlane.f32.xlu0 %v3078_v3 }
 0xa37   : > { %v8133_v42 = vpop.f32.mrb[76].mxu1 }
 0xa38   : > { %v8135_v19 = vpop.f32.mrb[77].mxu1  ;;  %v3087_v14 = vsel %vm1352_vm1, %v8133_v42, -inf }
 0xa39   : > { %3088 = vmax.xlane.f32.xlu0 %v3087_v14  ;;  %v8139_v63 = vpop.f32.mrb[78].mxu1  ;;  %v3081_v37 = vsel %vm1352_vm1, %v8135_v19, -inf }
 0xa3a   : > { %v8141_v60 = vpop.f32.mrb[79].mxu1  ;;  %v3090_v20 = vsel %vm1352_vm1, %v8139_v63, -inf }
 0xa3b   : > { %3091 = vmax.xlane.f32.xlu1 %v3090_v20  ;;  %v3084_v26 = vsel %vm1352_vm1, %v8141_v60, -inf }
 0xa3d   : > { %3082 = vmax.xlane.f32.xlu0 %v3081_v37 }
 0xa3f   : > { %3085 = vmax.xlane.f32.xlu1 %v3084_v26 }
 0xa43   : > { %v8149_v62 = vpop.f32.mrb[64].mxu0 }
 0xa44   : > { %v8151_v43 = vpop.f32.mrb[65].mxu0 }
 0xa45   : > { %v8153_v4 = vpop.f32.mrb[66].mxu0 }
 0xa46   : > { %v8157_v48 = vpop.f32.mrb[67].mxu0 }
 0xa78   : > { %v8161_v9 = vpop.f32.mrb[68].mxu0 }
 0xa79   : > { %v8163_v5 = vpop.f32.mrb[69].mxu0 }
 0xa7a   : > { %9390 = vst [vmem:[#allocation41_spill] sm:$0xff] %v8163_v5  ;;  %v8165_v18 = vpop.f32.mrb[70].mxu0 }
 0xa7b   : > { %v8169_v57 = vpop.f32.mrb[71].mxu0 }
 0xa80   : > { %v8173_v34 = vpop.f32.mrb[72].mxu0 }
 0xa81   : > { %v8175_v35 = vpop.f32.mrb[73].mxu0  ;;  %v3099_v53 = vsel %vm1352_vm1, %v8173_v34, -inf }
 0xa82   : > { %3100 = vmax.xlane.f32.xlu0 %v3099_v53  ;;  %v8179_v30 = vpop.f32.mrb[74].mxu0  ;;  %v3093_v14 = vsel %vm1352_vm1, %v8175_v35, -inf }
 0xa83   : > { %v8181_v13 = vpop.f32.mrb[75].mxu0  ;;  %v3102_v3 = vsel %vm1352_vm1, %v8179_v30, -inf }
 0xa84   : > { %3103 = vmax.xlane.f32.xlu1 %v3102_v3  ;;  %v3096_v20 = vsel %vm1352_vm1, %v8181_v13, -inf }
 0xa86   : > { %3094 = vmax.xlane.f32.xlu0 %v3093_v14 }
 0xa88   : > { %3097 = vmax.xlane.f32.xlu1 %v3096_v20  ;;  %v8189_v37 = vpop.f32.mrb[76].mxu0 }
 0xa89   : > { %v8191_v26 = vpop.f32.mrb[77].mxu0  ;;  %v3111_v53 = vsel %vm1352_vm1, %v8189_v37, -inf }
 0xa8a   : > { %3112 = vmax.xlane.f32.xlu0 %v3111_v53  ;;  %v8195_v2 = vpop.f32.mrb[78].mxu0  ;;  %v3105_v14 = vsel %vm1352_vm1, %v8191_v26, -inf }
 0xa8b   : > { %v8197_v16 = vpop.f32.mrb[79].mxu0  ;;  %v3114_v3 = vsel %vm1352_vm1, %v8195_v2, -inf }
 0xa8c   : > { %3115 = vmax.xlane.f32.xlu1 %v3114_v3  ;;  %v3108_v20 = vsel %vm1352_vm1, %v8197_v16, -inf }
 0xa8e   : > { %3106 = vmax.xlane.f32.xlu0 %v3105_v14 }
 0xa90   : > { %3109 = vmax.xlane.f32.xlu1 %v3108_v20 }
 0xa9e   : > { %v3077_v33 = vpop.xlane.xlu0 %3076 }
 0xa9f   : > { %v3119_v14 = vsub.f32 %v8117_v46, %v3077_v33 }
 0xaa1   : > { %3255 = vrot.lane.b32.xlu1 %v7146_v10, %s6726_s26  ;;  %v3074_v32 = vpop.xlane.xlu1 %3073  ;;  %v3137_v1 = vmul.f32 1.442695, %v3119_v14 }
 0xaa2   : > { %v3071_v53 = vpop.xlane.xlu0 %3070  ;;  %v3118_v21 = vsub.f32 %v8125_v39, %v3074_v32 }
 0xaa3   : > { %v3117_v54 = vsub.f32 %v8119_v27, %v3071_v53 }
 0xaa4   : > { %3257 = vrot.lane.b32.xlu0 %v7164_v36, %s6726_s26  ;;  %v3135_v10 = vmul.f32 1.442695, %v3118_v21 }
 0xaa5   : > { %v3133_v36 = vmul.f32 1.442695, %v3117_v54 }
 0xaa6   : > { %v3080_v3 = vpop.xlane.xlu0 %3079 }
 0xaa7   : > { %v3120_v24 = vsub.f32 %v8123_v56, %v3080_v3 }
 0xaa8   : > { %3259 = vrot.lane.b32.xlu0 %v7180_v58, %s6726_s26 }
 0xaa9   : > { %v3139_v20 = vmul.f32 1.442695, %v3120_v24 }
 0xaab   : > { %6467 = vpow2.f32 %v3139_v20 }
 0xaac   : > { %6469 = vpow2.f32 %v3137_v1 }
 0xaad   : > { %6471 = vpow2.f32 %v3135_v10 }
 0xaae   : > { %6473 = vpow2.f32 %v3133_v36 }
 0xab5   : > { %v8215_v5 = vpop.eup %6467 }
 0xab6   : > { %v8217_v58 = vpop.eup %6469  ;;  %v3174_v56 = vsel %vm1352_vm1, %v8215_v5, 0.0 }
 0xab7   : > { %v8221_v46 = vpop.eup %6471  ;;  %v3171_v27 = vsel %vm1352_vm1, %v8217_v58, 0.0 }
 0xab8   : > { %v8225_v21 = vpop.eup %6473  ;;  %v3168_v39 = vsel %vm1352_vm1, %v8221_v46, 0.0 }
 0xab9   : > { %v3165_v3 = vsel %vm1352_vm1, %v8225_v21, 0.0 }
 0xac5   : > { %3175 = vadd.xlane.f32.xlu1 %v3174_v56 }
 0xac6   : > { %v3089_v32 = vpop.xlane.xlu0 %3088 }
 0xac7   : > { %v3123_v1 = vsub.f32 %v8133_v42, %v3089_v32  ;;  %3172 = vadd.xlane.f32.xlu0 %v3171_v27 }
 0xac8   : > { %v3092_v54 = vpop.xlane.xlu1 %3091 }
 0xac9   : > { %v3145_v24 = vmul.f32 1.442695, %v3123_v1  ;;  %v3124_v33 = vsub.f32 %v8139_v63, %v3092_v54  ;;  %3169 = vadd.xlane.f32.xlu1 %v3168_v39 }
 0xaca   : > { %v3083_v53 = vpop.xlane.xlu0 %3082 }
 0xacb   : > { %6475 = vpow2.f32 %v3145_v24  ;;  %v3121_v14 = vsub.f32 %v8135_v19, %v3083_v53  ;;  %3166 = vadd.xlane.f32.xlu0 %v3165_v3  ;;  %v3147_v10 = vmul.f32 1.442695, %v3124_v33 }
 0xacc   : > { %v3086_v20 = vpop.xlane.xlu1 %3085 }
 0xacd   : > { %v3141_v42 = vmul.f32 1.442695, %v3121_v14  ;;  %v3122_v36 = vsub.f32 %v8141_v60, %v3086_v20 }
 0xacf   : > { %6477 = vpow2.f32 %v3141_v42  ;;  %v3143_v56 = vmul.f32 1.442695, %v3122_v36 }
 0xad0   : > { %6479 = vpow2.f32 %v3147_v10 }
 0xad1   : > { %6481 = vpow2.f32 %v3143_v56 }
 0xad5   : > { %v8235_v32 = vpop.eup %6475 }
 0xad6   : > { %v3183_v63 = vsel %vm1352_vm1, %v8235_v32, 0.0 }
 0xad7   : > { %3184 = vadd.xlane.f32.xlu1 %v3183_v63 }
 0xad9   : > { %v8239_v27 = vpop.eup %6477 }
 0xada   : > { %v3177_v19 = vsel %vm1352_vm1, %v8239_v27, 0.0  ;;  %v8243_v1 = vpop.eup %6479 }
 0xadb   : > { %3178 = vadd.xlane.f32.xlu1 %v3177_v19  ;;  %v3186_v60 = vsel %vm1352_vm1, %v8243_v1, 0.0  ;;  %v8247_v54 = vpop.eup %6481 }
 0xadc   : > { %v3180_v39 = vsel %vm1352_vm1, %v8247_v54, 0.0 }
 0xadf   : > { %3187 = vadd.xlane.f32.xlu1 %v3186_v60 }
 0xae1   : > { %3342 = vrot.lane.b32.xlu0 %v7196_v31, %s6726_s26 }
 0xae3   : > { %3181 = vadd.xlane.f32.xlu1 %v3180_v39 }
 0xb0f   : > { %v3101_v24 = vpop.xlane.xlu0 %3100 }
 0xb10   : > { %v3127_v33 = vsub.f32 %v8173_v34, %v3101_v24 }
 0xb11   : > { %v3104_v53 = vpop.xlane.xlu1 %3103 }
 0xb12   : > { %v3153_v3 = vmul.f32 1.442695, %v3127_v33  ;;  %v3128_v14 = vsub.f32 %v8179_v30, %v3104_v53 }
 0xb13   : > { %v3095_v20 = vpop.xlane.xlu0 %3094 }
 0xb14   : > { %6483 = vpow2.f32 %v3153_v3  ;;  %v3125_v10 = vsub.f32 %v8175_v35, %v3095_v20  ;;  %v3155_v42 = vmul.f32 1.442695, %v3128_v14 }
 0xb15   : > { %v3098_v36 = vpop.xlane.xlu1 %3097 }
 0xb16   : > { %v3149_v56 = vmul.f32 1.442695, %v3125_v10  ;;  %v3126_v31 = vsub.f32 %v8181_v13, %v3098_v36 }
 0xb17   : > { %v3113_v63 = vpop.xlane.xlu0 %3112 }
 0xb18   : > { %6485 = vpow2.f32 %v3149_v56  ;;  %v3151_v19 = vmul.f32 1.442695, %v3126_v31  ;;  %v3131_v60 = vsub.f32 %v8189_v37, %v3113_v63 }
 0xb19   : > { %6487 = vpow2.f32 %v3155_v42  ;;  %v3116_v34 = vpop.xlane.xlu1 %3115 }
 0xb1a   : > { %6489 = vpow2.f32 %v3151_v19  ;;  %v3161_v39 = vmul.f32 1.442695, %v3131_v60  ;;  %v3132_v30 = vsub.f32 %v8195_v2, %v3116_v34 }
 0xb1b   : > { %v3107_v24 = vpop.xlane.xlu0 %3106 }
 0xb1c   : > { %6491 = vpow2.f32 %v3161_v39  ;;  %v3129_v35 = vsub.f32 %v8191_v26, %v3107_v24  ;;  %v3163_v14 = vmul.f32 1.442695, %v3132_v30 }
 0xb1d   : > { %v3110_v33 = vpop.xlane.xlu1 %3109 }
 0xb1e   : > { %v8260_v53 = vpop.eup %6483  ;;  %v3157_v3 = vmul.f32 1.442695, %v3129_v35  ;;  %v3130_v37 = vsub.f32 %v8197_v16, %v3110_v33 }
 0xb1f   : > { %v3195_v13 = vsel %vm1352_vm1, %v8260_v53, 0.0  ;;  %v3258_v20 = vpop.permute.xlu0 %3257 }
 0xb20   : > { %6493 = vpow2.f32 %v3157_v3  ;;  %3196 = vadd.xlane.f32.xlu0 %v3195_v13  ;;  %v3159_v56 = vmul.f32 1.442695, %v3130_v37  ;;  %v9391_v3 = vpack.i.bf16 %v7813_v12, %v7807_v17  ;;  %v9392_v13 = vpack.i.bf16 %v8101_v0, %v8095_v52 }
 0xb21   : > { %v3256_v10 = vpop.permute.xlu1 %3255  ;;  %6495 = vpow2.f32 %v3163_v14 }
 0xb22   : > { %v8265_v42 = vpop.eup %6485  ;;  %5888 = vmatprep.subr.bf16.mxu1 %v3256_v10  ;;  %6497 = vpow2.f32 %v3159_v56 }
 0xb23   : > { %v8267_v2 = vpop.eup %6487  ;;  %5889 = vmatpush3.bf16.msra.mxu1 %v3256_v10  ;;  %v3189_v26 = vsel %vm1352_vm1, %v8265_v42, 0.0  ;;  %v3260_v63 = vpop.permute.xlu0 %3259 }
 0xb24   : > { %v8271_v36 = vpop.eup %6489  ;;  %3190 = vadd.xlane.f32.xlu0 %v3189_v26  ;;  %5890 = vmatprep.subr.bf16.mxu1 %v3258_v20  ;;  %v3198_v19 = vsel %vm1352_vm1, %v8267_v2, 0.0 }
 0xb25   : > { %v3192_v16 = vsel %vm1352_vm1, %v8271_v36, 0.0 }
 0xb26   : > { %v8275_v31 = vpop.eup %6491  ;;  %3193 = vadd.xlane.f32.xlu1 %v3192_v16 }
 0xb27   : > { %5891 = vmatpush3.bf16.msra.mxu1 %v3258_v20  ;;  %v3207_v60 = vsel %vm1352_vm1, %v8275_v31, 0.0 }
 0xb28   : > { %3199 = vadd.xlane.f32.xlu0 %v3198_v19  ;;  %5892 = vmatprep.subr.bf16.mxu1 %v3260_v63 }
 0xb2a   : > { %v8281_v34 = vpop.eup %6493  ;;  %3208 = vadd.xlane.f32.xlu1 %v3207_v60 }
 0xb2b   : > { %5893 = vmatpush3.bf16.msra.mxu1 %v3260_v63  ;;  %v3201_v39 = vsel %vm1352_vm1, %v8281_v34, 0.0  ;;  %v8285_v24 = vpop.eup %6495 }
 0xb2c   : > { %v3210_v30 = vsel %vm1352_vm1, %v8285_v24, 0.0  ;;  %v8289_v35 = vpop.eup %6497 }
 0xb2d   : > { %v3204_v33 = vsel %vm1352_vm1, %v8289_v35, 0.0 }
 0xb2e   : > { %3202 = vadd.xlane.f32.xlu1 %v3201_v39 }
 0xb32   : > { %3211 = vadd.xlane.f32.xlu1 %v3210_v30 }
 0xb36   : > { %3205 = vadd.xlane.f32.xlu1 %v3204_v33 }
 0xb3e   : > { %3346 = vrot.lane.b32.xlu0 %v7220_v47, %s6726_s26  ;;  %v9393_v47 = vpack.i.bf16 %v7809_v59, %v7805_v22 }
 0xb42   : > { %3348 = vrot.lane.b32.xlu0 %v7228_v61, %s6726_s26  ;;  %v9394_v61 = vpack.i.bf16 %v8097_v29, %v8093_v38 }
 0xb46   : > { %6044 = vrot.lane.b32.xlu0 %v9391_v3, %s6726_s26 }
 0xb47   : > { %3344 = vrot.lane.b32.xlu1 %v7208_v44, %s6726_s26 }
 0xb4a   : > { %6054 = vrot.lane.b32.xlu0 %v9392_v13, %s9348_s27 }
 0xb4b   : > { %6049 = vrot.lane.b32.xlu1 %v9393_v47, %s6726_s26 }
 0xb4f   : > { %6059 = vrot.lane.b32.xlu1 %v9394_v61, %s9348_s27  ;;  %s5218_s27 = sshll.u32 %s488_s24, 7 }
 0xb52   : > { %v3176_v17 = vpop.xlane.xlu1 %3175 }
 0xb54   : > { %v3173_v12 = vpop.xlane.xlu0 %3172 }
 0xb55   : > { %6499 = vrcp.f32 %v3173_v12 }
 0xb56   : > { %v3170_v14 = vpop.xlane.xlu1 %3169 }
 0xb57   : > { %6501 = vrcp.f32 %v3170_v14 }
 0xb58   : > { %6503 = vrcp.f32 %v3176_v17  ;;  %v3167_v44 = vpop.xlane.xlu0 %3166 }
 0xb59   : > { %6505 = vrcp.f32 %v3167_v44 }
 0xb5c   : > { %v3343_v52 = vpop.permute.xlu0 %3342 }
 0xb5d   : > { %5902 = vmatprep.subr.bf16.mxu0 %v3343_v52 }
 0xb5e   : > { %5903 = vmatpush3.bf16.msra.mxu0 %v3343_v52 }
 0xb5f   : > { %v6500_v0 = vpop.eup %6499 }
 0xb60   : > { %v3231_v20 = vmul.f32 %v6500_v0, %v8217_v58 }
 0xb61   : > { %v6502_v37 = vpop.eup %6501 }
 0xb62   : > { %v6504_v22 = vpop.eup %6503  ;;  %v3230_v29 = vmul.f32 %v6502_v37, %v8221_v46 }
 0xb63   : > { %v6506_v59 = vpop.eup %6505  ;;  %v3232_v26 = vmul.f32 %v6504_v22, %v8215_v5 }
 0xb64   : > { %v3185_v10 = vpop.xlane.xlu1 %3184  ;;  %v3229_v38 = vmul.f32 %v6506_v59, %v8225_v21 }
 0xb65   : > { %v3246_v16 = vpack.c.bf16 %v3232_v26, %v3231_v20 }
 0xb66   : > { %v3245_v56 = vpack.c.bf16 %v3230_v29, %v3229_v38 }
 0xb68   : > { %v3179_v63 = vpop.xlane.xlu1 %3178  ;;  %5894 = vmatprep.mubr.msk.bf16.mxu1 %vm1352_vm1, %v3245_v56 }
 0xb69   : > { %5895 = vmatmul.mubr.msk.bf16.vlgmr.msra.gmra.mrb[80].mxu1 %vm1352_vm1, %v3246_v16 }
 0xb6c   : > { %v3188_v19 = vpop.xlane.xlu1 %3187 }
 0xb6d   : > { %6507 = vrcp.f32 %v3188_v19 }
 0xb6e   : > { %6509 = vrcp.f32 %v3179_v63 }
 0xb6f   : > { %6511 = vrcp.f32 %v3185_v10 }
 0xb70   : > { %v3182_v60 = vpop.xlane.xlu1 %3181 }
 0xb71   : > { %6513 = vrcp.f32 %v3182_v60 }
 0xb77   : > { %v6508_v58 = vpop.eup %6507 }
 0xb78   : > { %v6510_v39 = vpop.eup %6509  ;;  %v3236_v46 = vmul.f32 %v6508_v58, %v8243_v1 }
 0xb79   : > { %v6512_v21 = vpop.eup %6511  ;;  %v3233_v5 = vmul.f32 %v6510_v39, %v8239_v27 }
 0xb7a   : > { %v3235_v3 = vmul.f32 %v6512_v21, %v8235_v32 }
 0xb7b   : > { %v6514_v30 = vpop.eup %6513 }
 0xb7c   : > { %v3234_v33 = vmul.f32 %v6514_v30, %v8247_v54  ;;  %v3248_v47 = vpack.c.bf16 %v3236_v46, %v3235_v3  ;;  %v6199_v46 = vld [vmem:[%s9314_s5 + $0x20] sm:$0xff]   ;;  %v6202_v3 = vld [vmem:[%s9314_s5 + $0x38] sm:$0xff]  }
 0xb7e   : > { %v3247_v13 = vpack.c.bf16 %v3234_v33, %v3233_v5  ;;  %v6200_v5 = vld [vmem:[%s9314_s5 + $0x28] sm:$0xff]   ;;  %v6201_v33 = vld [vmem:[%s9314_s5 + $0x30] sm:$0xff]  }
 0xb80   : > { %5898 = vmatprep.mubr.msk.bf16.mxu1 %vm1352_vm1, %v3247_v13 }
 0xb81   : > { %5899 = vmatmul.mubr.msk.bf16.gmra.mrb[84].mxu1 %vm1352_vm1, %v3248_v47 }
 0xbad   : > { %v3197_v61 = vpop.xlane.xlu0 %3196 }
 0xbb1   : > { %v3191_v17 = vpop.xlane.xlu0 %3190 }
 0xbb2   : > { %6515 = vrcp.f32 %v3191_v17 }
 0xbb3   : > { %v3194_v12 = vpop.xlane.xlu1 %3193 }
 0xbb4   : > { %6517 = vrcp.f32 %v3194_v12 }
 0xbb5   : > { %v3200_v27 = vpop.xlane.xlu0 %3199 }
 0xbb6   : > { %6519 = vrcp.f32 %v3200_v27  ;;  %v9400_v27 = vpack.i.bf16 %v8113_v51, %v8107_v7  ;;  %v9404_v7 = vpack.i.bf16 %v8157_v48, %v8151_v43  ;;  %v9405_v48 = vpack.i.bf16 %v7877_v28, %v7873_v41 }
 0xbb7   : > { %v3209_v14 = vpop.xlane.xlu1 %3208  ;;  %6521 = vrcp.f32 %v3197_v61 }
 0xbb9   : > { %v3347_v59 = vpop.permute.xlu0 %3346 }
 0xbbb   : > { %v3203_v44 = vpop.xlane.xlu1 %3202 }
 0xbbc   : > { %v6516_v1 = vpop.eup %6515  ;;  %6523 = vrcp.f32 %v3203_v44  ;;  %v9396_v44 = vpack.i.bf16 %v7821_v45, %v7817_v55 }
 0xbbd   : > { %v3237_v54 = vmul.f32 %v6516_v1, %v8265_v42  ;;  %v3349_v29 = vpop.permute.xlu0 %3348  ;;  %v9397_v1 = vpack.i.bf16 %v7825_v40, %v7819_v15  ;;  %v9401_v15 = vpack.i.bf16 %v7849_v6, %v7845_v11  ;;  %v9402_v40 = vpack.i.bf16 %v7853_v49, %v7847_v8 }
 0xbbe   : > { %v6518_v52 = vpop.eup %6517 }
 0xbbf   : > { %v3212_v0 = vpop.xlane.xlu1 %3211  ;;  %v3238_v32 = vmul.f32 %v6518_v52, %v8271_v36  ;;  %v9399_v52 = vpack.i.bf16 %v8109_v50, %v8105_v23  ;;  %v9403_v23 = vpack.i.bf16 %v8153_v4, %v8149_v62 }
 0xbc0   : > { %v6520_v10 = vpop.eup %6519 }
 0xbc1   : > { %v3249_v37 = vpack.c.bf16 %v3238_v32, %v3237_v54  ;;  %v6522_v38 = vpop.eup %6521  ;;  %v3240_v26 = vmul.f32 %v6520_v10, %v8267_v2  ;;  %v6045_v11 = vpop.permute.xlu0 %6044 }
 0xbc2   : > { %v3239_v16 = vmul.f32 %v6522_v38, %v8260_v53  ;;  %v6195_v53 = vld [vmem:[%s9314_s5] sm:$0xff]   ;;  %v6047_v49 = vunpack.i.h.bf16 %v6045_v11  ;;  %v6046_v62 = vunpack.i.l.bf16 %v6045_v11  ;;  %v9415_v11 = vld [vmem:[#allocation30_spill] sm:$0xff] }
 0xbc3   : > { %v3206_v22 = vpop.xlane.xlu1 %3205  ;;  %5910 = vmatprep.mubr.msk.bf16.mxu0 %vm1352_vm1, %v3249_v37  ;;  %5918 = vmatprep.subr.bf16.mxu1 %v6195_v53 }
 0xbc4   : > { %6525 = vrcp.f32 %v3206_v22  ;;  %v3250_v19 = vpack.c.bf16 %v3240_v26, %v3239_v16  ;;  %5919 = vmatpush3.bf16.msra.mxu1 %v6195_v53 }
 0xbc5   : > { %6527 = vrcp.f32 %v3212_v0  ;;  %v6055_v4 = vpop.permute.xlu0 %6054 }
 0xbc6   : > { %6529 = vrcp.f32 %v3209_v14  ;;  %v6524_v42 = vpop.eup %6523 }
 0xbc7   : > { %v3345_v20 = vpop.permute.xlu1 %3344  ;;  %v3241_v63 = vmul.f32 %v6524_v42, %v8281_v34  ;;  %v6196_v34 = vld [vmem:[%s9314_s5 + $0x8] sm:$0xff]  }
 0xbc8   : > { %5904 = vmatprep.subr.bf16.mxu0 %v3345_v20  ;;  %5920 = vmatprep.subr.bf16.mxu1 %v6196_v34 }
 0xbc9   : > { %5905 = vmatpush3.bf16.msra.mxu0 %v3345_v20  ;;  %5921 = vmatpush3.bf16.msra.mxu1 %v6196_v34  ;;  %v9410_v34 = vld [vmem:[#allocation26_spill] sm:$0xff] }
 0xbca   : > { %5906 = vmatprep.subr.bf16.mxu0 %v3347_v59 }
 0xbcb   : > { %v6050_v51 = vpop.permute.xlu1 %6049 }
 0xbcc   : > { %v6052_v42 = vunpack.i.h.bf16 %v6050_v51  ;;  %v6051_v43 = vunpack.i.l.bf16 %v6050_v51 }
 0xbcd   : > { %5907 = vmatpush3.bf16.msra.mxu0 %v3347_v59 }
 0xbce   : > { %v6526_v36 = vpop.eup %6525  ;;  %5908 = vmatprep.subr.bf16.mxu0 %v3349_v29 }
 0xbcf   : > { %v3242_v56 = vmul.f32 %v6526_v36, %v8289_v35  ;;  %v6528_v60 = vpop.eup %6527  ;;  %v9395_v35 = vmov 0   ;;  %v6060_v8 = vpop.permute.xlu1 %6059 }
 0xbd0   : > { %v6530_v39 = vpop.eup %6529  ;;  %v3244_v21 = vmul.f32 %v6528_v60, %v8285_v24  ;;  %v6198_v24 = vld [vmem:[%s9314_s5 + $0x18] sm:$0xff]   ;;  %v6062_v36 = vunpack.i.h.bf16 %v6060_v8  ;;  %v6061_v26 = vunpack.i.l.bf16 %v6060_v8  ;;  %v6056_v60 = vunpack.i.l.bf16 %v6055_v4 }
 0xbd1   : > { %5909 = vmatpush3.bf16.msra.mxu0 %v3349_v29  ;;  %v3251_v58 = vpack.c.bf16 %v3242_v56, %v3241_v63  ;;  %v3243_v2 = vmul.f32 %v6530_v39, %v8275_v31  ;;  %v6197_v31 = vld [vmem:[%s9314_s5 + $0x10] sm:$0xff]   ;;  %v9406_v56 = vld [vmem:[#allocation40_spill] sm:$0xff]  ;;  %v9417_v8 = vld [vmem:[#allocation31_spill] sm:$0xff] }
 0xbd2   : > { %5922 = vmatprep.subr.bf16.mxu1 %v6197_v31  ;;  %v9407_v16 = vpack.i.bf16 %v7881_v25, %v9406_v56 }
 0xbd3   : > { %v3252_v30 = vpack.c.bf16 %v3244_v21, %v3243_v2  ;;  %5923 = vmatpush3.bf16.msra.mxu1 %v6197_v31  ;;  %v9408_v21 = vld [vmem:[#allocation27_spill] sm:$0xff]  ;;  %v3626_v31 = vsel %vm1173_vm0, %v9410_v34, %v6052_v42 }
 0xbd4   : > { %5911 = vmatmul.mubr.msk.bf16.vlgmr.msra.gmra.mrb[80].mxu0 %vm1352_vm1, %v3250_v19  ;;  %5924 = vmatprep.subr.bf16.mxu1 %v6198_v24  ;;  %v6057_v19 = vunpack.i.h.bf16 %v6055_v4  ;;  %v3624_v2 = vsel %vm1173_vm0, %v9408_v21, %v6047_v49 }
 0xbd5   : > { %5914 = vmatprep.mubr.msk.bf16.mxu0 %vm1352_vm1, %v3251_v58 }
 0xbd7   : > { %5925 = vmatpush3.bf16.msra.mxu1 %v6198_v24  ;;  %v9411_v24 = vld [vmem:[#allocation24_spill] sm:$0xff] }
 0xbd8   : > { %5926 = vmatprep.subr.bf16.mxu1 %v6199_v46  ;;  %v3625_v25 = vsel %vm1173_vm0, %v9411_v24, %v6051_v43 }
 0xbdb   : > { %5927 = vmatpush3.bf16.msra.mxu1 %v6199_v46 }
 0xbdc   : > { %5915 = vmatmul.mubr.msk.bf16.gmra.mrb[84].mxu0 %vm1352_vm1, %v3252_v30  ;;  %5928 = vmatprep.subr.bf16.mxu1 %v6200_v5  ;;  %v9409_v30 = vld [vmem:[#allocation25_spill] sm:$0xff] }
 0xbdd   : > { %4250 = vmatprep.mubr.bf16.mxu0 %v9395_v35  ;;  %v3623_v41 = vsel %vm1173_vm0, %v9409_v30, %v6046_v62  ;;  %v9418_v62 = vld [vmem:[#allocation29_spill] sm:$0xff] }
 0xbdf   : > { %5929 = vmatpush3.bf16.msra.mxu1 %v6200_v5 }
 0xbe0   : > { %5930 = vmatprep.subr.bf16.mxu1 %v6201_v33 }
 0xbe3   : > { %5931 = vmatpush3.bf16.msra.mxu1 %v6201_v33  ;;  %v9412_v33 = vpack.i.bf16 %v8165_v18, %v8161_v9 }
 0xbe4   : > { %5932 = vmatprep.subr.bf16.mxu1 %v6202_v3 }
 0xbe7   : > { %5933 = vmatpush3.bf16.msra.mxu1 %v6202_v3 }
 0xc3c   : > { %v5896_v13 = vpop.f32.mrb[80].mxu1 }
 0xc3d   : > { %v3311_v47 = vpop.f32.mrb[81].mxu1 }
 0xc3e   : > { %v5897_v61 = vpop.f32.mrb[82].mxu1 }
 0xc3f   : > { %v6068_v17 = vpack.i.bf16 %v5897_v61, %v5896_v13  ;;  %v3314_v12 = vpop.f32.mrb[83].mxu1  ;;  %v3641_v13 = vsel %vm1352_vm1, %v3625_v25, %v6061_v26 }
 0xc40   : > { %v6063_v14 = vpack.i.bf16 %v3314_v12, %v3311_v47  ;;  %v3642_v47 = vsel %vm1352_vm1, %v3626_v31, %v6062_v36  ;;  %v9413_v12 = vld [vmem:[#allocation41_spill] sm:$0xff] }
 0xc41   : > { %6069 = vrot.lane.b32.xlu1 %v6068_v17, %s6724_s0 }
 0xc42   : > { %6064 = vrot.lane.b32.xlu0 %v6063_v14, %s6724_s0  ;;  %v9414_v14 = vpack.i.bf16 %v8169_v57, %v9413_v12  ;;  %v9421_v12 = vld [vmem:[#allocation35_spill] sm:$0xff] }
 0xc45   : > { %6079 = vrot.lane.b32.xlu1 %v9396_v44, %s6726_s26  ;;  %v3639_v44 = vsel %vm1352_vm1, %v3623_v41, %v6056_v60 }
 0xc46   : > { %6074 = vrot.lane.b32.xlu0 %v9397_v1, %s6726_s26  ;;  %v3640_v1 = vsel %vm1352_vm1, %v3624_v2, %v6057_v19 }
 0xc49   : > { %6089 = vrot.lane.b32.xlu1 %v9399_v52, %s9398_s30 }
 0xc4a   : > { %6084 = vrot.lane.b32.xlu0 %v9400_v27, %s9398_s30 }
 0xc54   : > { %v5900_v0 = vpop.f32.mrb[84].mxu1 }
 0xc55   : > { %v3327_v54 = vpop.f32.mrb[85].mxu1 }
 0xc56   : > { %v5901_v32 = vpop.f32.mrb[86].mxu1 }
 0xc57   : > { %v6098_v55 = vpack.i.bf16 %v5901_v32, %v5900_v0  ;;  %v3330_v45 = vpop.f32.mrb[87].mxu1 }
 0xc58   : > { %v6093_v37 = vpack.i.bf16 %v3330_v45, %v3327_v54 }
 0xc59   : > { %6099 = vrot.lane.b32.xlu1 %v6098_v55, %s6724_s0 }
 0xc5a   : > { %6094 = vrot.lane.b32.xlu0 %v6093_v37, %s6724_s0 }
 0xc5d   : > { %6109 = vrot.lane.b32.xlu1 %v9401_v15, %s6726_s26 }
 0xc5e   : > { %6104 = vrot.lane.b32.xlu0 %v9402_v40, %s6726_s26 }
 0xc61   : > { %6119 = vrot.lane.b32.xlu1 %v9403_v23, %s9398_s30 }
 0xc62   : > { %6114 = vrot.lane.b32.xlu0 %v9404_v7, %s9398_s30 }
 0xca7   : > { %v5912_v50 = vpop.f32.mrb[80].mxu0 }
 0xca8   : > { %v3400_v22 = vpop.f32.mrb[81].mxu0 }
 0xca9   : > { %v5913_v6 = vpop.f32.mrb[82].mxu0 }
 0xcaa   : > { %v6128_v59 = vpack.i.bf16 %v5913_v6, %v5912_v50  ;;  %v3403_v20 = vpop.f32.mrb[83].mxu0 }
 0xcab   : > { %v6123_v10 = vpack.i.bf16 %v3403_v20, %v3400_v22 }
 0xcac   : > { %6129 = vrot.lane.b32.xlu1 %v6128_v59, %s6724_s0  ;;  %v9416_v59 = vld [vmem:[#allocation28_spill] sm:$0xff] }
 0xcad   : > { %6124 = vrot.lane.b32.xlu0 %v6123_v10, %s6724_s0 }
 0xcaf   : > { %v5916_v38 = vpop.f32.mrb[84].mxu0 }
 0xcb0   : > { %6139 = vrot.lane.b32.xlu1 %v9405_v48, %s6726_s26  ;;  %v3416_v29 = vpop.f32.mrb[85].mxu0 }
 0xcb1   : > { %6134 = vrot.lane.b32.xlu0 %v9407_v16, %s6726_s26  ;;  %v5917_v63 = vpop.f32.mrb[86].mxu0  ;;  %s5366_s26 = sshll.u32 %s6831_s22, 11  ;;  %s9268_s22 = scalar_lea.sflag [#allocation3], %s488_s24 }
 0xcb2   : > { %v6158_v58 = vpack.i.bf16 %v5917_v63, %v5916_v38  ;;  %v3419_v39 = vpop.f32.mrb[87].mxu0  ;;  %s9259_s23 = scalar_lea.hbm %s9324_s15, %s5366_s26 }
 0xcb3   : > { %v6153_v28 = vpack.i.bf16 %v3419_v39, %v3416_v29  ;;  %v6070_v53 = vpop.permute.xlu1 %6069 }
 0xcb4   : > { %v6072_v46 = vunpack.i.h.bf16 %v6070_v53  ;;  %v6071_v5 = vunpack.i.l.bf16 %v6070_v53  ;;  %6149 = vrot.lane.b32.xlu1 %v9412_v33, %s9398_s30  ;;  %v6065_v3 = vpop.permute.xlu0 %6064 }
 0xcb5   : > { %v6067_v61 = vunpack.i.h.bf16 %v6065_v3  ;;  %v6066_v17 = vunpack.i.l.bf16 %v6065_v3  ;;  %6144 = vrot.lane.b32.xlu0 %v9414_v14, %s9398_s30  ;;  %v9419_v3 = vld [vmem:[#allocation34_spill] sm:$0xff]  ;;  %s6663_s30 = sshll.u32 %s6727_s25, 4  ;;  %s6664_s30 = int_to_ptr.vmem [resolvable:$false] %s6663_s30 }
 0xcb6   : > { %v3659_v52 = vsel %vm3655_vm2, %v3642_v47, %v6072_v46  ;;  %v3658_v9 = vsel %vm3655_vm2, %v3641_v13, %v6071_v5  ;;  %v9420_v47 = vld [vmem:[#allocation32_spill] sm:$0xff]  ;;  %s6665_s26 = scalar_lea.vmem %s6664_s30, 4096 }
 0xcb7   : > { %v3673_v18 = vpack.c.bf16 %v3659_v52, %v3658_v9  ;;  %v3656_v27 = vsel %vm3655_vm2, %v3639_v44, %v6066_v17  ;;  %v3657_v0 = vsel %vm3655_vm2, %v3640_v1, %v6067_v61  ;;  %v6080_v57 = vpop.permute.xlu1 %6079  ;;  %v9422_v44 = vld [vmem:[#allocation33_spill] sm:$0xff] }
 0xcb8   : > { %6159 = vrot.lane.b32.xlu1 %v6158_v58, %s6724_s0  ;;  %v3672_v54 = vpack.c.bf16 %v3657_v0, %v3656_v27  ;;  %v6075_v32 = vpop.permute.xlu0 %6074  ;;  %v6082_v45 = vunpack.i.h.bf16 %v6080_v57  ;;  %v6081_v37 = vunpack.i.l.bf16 %v6080_v57 }
 0xcb9   : > { %6154 = vrot.lane.b32.xlu0 %v6153_v28, %s6724_s0  ;;  %v6077_v40 = vunpack.i.h.bf16 %v6075_v32  ;;  %v6076_v23 = vunpack.i.l.bf16 %v6075_v32  ;;  %s9196_s0 = scalar_lea.vmem [#allocation2], %s5218_s27 }
 0xcba   : > { %5934 = vmatprep.mubr.bf16.mxu1 %v3672_v54  ;;  %v3630_v6 = vsel %vm1173_vm0, %v9415_v11, %v6082_v45  ;;  %v3629_v20 = vsel %vm1173_vm0, %v9416_v59, %v6081_v37  ;;  %s5152_s20 = sshll.u32 %s9196_s0, 4  ;;  %s9261_s20 = int_to_ptr.vmem [resolvable:$true] %s5152_s20 }
 0xcbb   : > { %5935 = vmatmul.mubr.bf16.vlgmr.msra.gmra.mrb[88].mxu1 %v3673_v18  ;;  %v6090_v55 = vpop.permute.xlu1 %6089  ;;  %v3628_v49 = vsel %vm1173_vm0, %v9417_v8, %v6077_v40  ;;  %v3627_v4 = vsel %vm1173_vm0, %v9418_v62, %v6076_v23  ;;  %s6659_s27 = scalar_lea.vmem %s9261_s20, 2048  ;;  %p6666_p0 = scmp.lt.s32.totalorder %s9261_s20, %s6664_s30 }
 0xcbc   : > { %v6085_v15 = vpop.permute.xlu0 %6084  ;;  %v6092_v7 = vunpack.i.h.bf16 %v6090_v55  ;;  %v6091_v50 = vunpack.i.l.bf16 %v6090_v55  ;;  %p6660_p11 = scmp.ne.s32.totalorder %s9261_s20, %s6659_s27  ;;  %p6667_p1 = scmp.lt.s32.totalorder %s6665_s26, %s6659_s27 }
 0xcbd   : > { %v6087_v51 = vunpack.i.h.bf16 %v6085_v15  ;;  %v6086_v22 = vunpack.i.l.bf16 %v6085_v15 }
 0xcbe   : > { %v3645_v48 = vsel %vm1352_vm1, %v3629_v20, %v6091_v50  ;;  %v3646_v29 = vsel %vm1352_vm1, %v3630_v6, %v6092_v7  ;;  %p6661_p12 = pnand %p6660_p11, %p6848_p5  ;;  %p6668_p2 = por %p6667_p1, %p6666_p0 }
 0xcbf   : > { %v3643_v56 = vsel %vm1352_vm1, %v3627_v4, %v6086_v22  ;;  %v3644_v16 = vsel %vm1352_vm1, %v3628_v49, %v6087_v51 }
 0xcc0   : > { %p6662_p13 = pneg %p6661_p12 }
 0xcc2   : > { %p6669_p3 = pnand %p6668_p2, %p6662_p13 }
 0xccb   : > { %v6100_v10 = vpop.permute.xlu1 %6099 }
 0xccc   : > { %v6102_v38 = vunpack.i.h.bf16 %v6100_v10  ;;  %v6101_v42 = vunpack.i.l.bf16 %v6100_v10  ;;  %v6095_v43 = vpop.permute.xlu0 %6094 }
 0xccd   : > { %v6097_v36 = vunpack.i.h.bf16 %v6095_v43  ;;  %v6096_v26 = vunpack.i.l.bf16 %v6095_v43  ;;  %v9424_v43 = vld [vmem:[#allocation36_spill] sm:$0xff] }
 0xcce   : > { %v3662_v63 = vsel %vm3655_vm2, %v3645_v48, %v6101_v42  ;;  %v3663_v19 = vsel %vm3655_vm2, %v3646_v29, %v6102_v38  ;;  %v9423_v38 = vld [vmem:[#allocation38_spill] sm:$0xff] }
 0xccf   : > { %v3660_v60 = vsel %vm3655_vm2, %v3643_v56, %v6096_v26  ;;  %v3661_v58 = vsel %vm3655_vm2, %v3644_v16, %v6097_v36  ;;  %v3675_v39 = vpack.c.bf16 %v3663_v19, %v3662_v63  ;;  %v6110_v2 = vpop.permute.xlu1 %6109  ;;  %v9425_v36 = vld [vmem:[#allocation39_spill] sm:$0xff]  ;;  %v9426_v56 = vld [vmem:[#allocation37_spill] sm:$0xff] }
 0xcd0   : > { %v3674_v21 = vpack.c.bf16 %v3661_v58, %v3660_v60  ;;  %v6105_v30 = vpop.permute.xlu0 %6104  ;;  %v6112_v28 = vunpack.i.h.bf16 %v6110_v2  ;;  %v6111_v53 = vunpack.i.l.bf16 %v6110_v2 }
 0xcd1   : > { %v6107_v31 = vunpack.i.h.bf16 %v6105_v30  ;;  %v6106_v24 = vunpack.i.l.bf16 %v6105_v30 }
 0xcd2   : > { %5938 = vmatprep.mubr.bf16.mxu1 %v3674_v21  ;;  %v3634_v13 = vsel %vm1173_vm0, %v9419_v3, %v6112_v28  ;;  %v3633_v61 = vsel %vm1173_vm0, %v9420_v47, %v6111_v53  ;;  %v9427_v3 = vld [vmem:[#allocation8_spill] sm:$0xff] }
 0xcd3   : > { %5939 = vmatmul.mubr.bf16.gmra.mrb[92].mxu1 %v3675_v39  ;;  %v6120_v41 = vpop.permute.xlu1 %6119  ;;  %v3632_v14 = vsel %vm1173_vm0, %v9421_v12, %v6107_v31  ;;  %v3631_v1 = vsel %vm1173_vm0, %v9422_v44, %v6106_v24  ;;  %v9429_v44 = vld [vmem:[#allocation10_spill] sm:$0xff] }
 0xcd4   : > { %v6115_v34 = vpop.permute.xlu0 %6114  ;;  %v6122_v25 = vunpack.i.h.bf16 %v6120_v41  ;;  %v6121_v46 = vunpack.i.l.bf16 %v6120_v41 }
 0xcd5   : > { %v6117_v5 = vunpack.i.h.bf16 %v6115_v34  ;;  %v6116_v33 = vunpack.i.l.bf16 %v6115_v34 }
 0xcd6   : > { %v3649_v27 = vsel %vm1352_vm1, %v3633_v61, %v6121_v46  ;;  %v3650_v0 = vsel %vm1352_vm1, %v3634_v13, %v6122_v25 }
 0xcd7   : > { %v3647_v32 = vsel %vm1352_vm1, %v3631_v1, %v6116_v33  ;;  %v3648_v55 = vsel %vm1352_vm1, %v3632_v14, %v6117_v5  ;;  %v5320_v5 = vld [vmem:[%s9315_s6] ss:$0 sm:$0xff] }
 0xd1e   : > { %v6130_v17 = vpop.permute.xlu1 %6129 }
 0xd1f   : > { %v6132_v52 = vunpack.i.h.bf16 %v6130_v17  ;;  %v6131_v9 = vunpack.i.l.bf16 %v6130_v17  ;;  %v6125_v18 = vpop.permute.xlu0 %6124  ;;  %v9428_v17 = vld [vmem:[#allocation9_spill] sm:$0xff] }
 0xd20   : > { %v6127_v54 = vunpack.i.h.bf16 %v6125_v18  ;;  %v6126_v57 = vunpack.i.l.bf16 %v6125_v18  ;;  %v9430_v18 = vld [vmem:[#allocation11_spill] sm:$0xff] }
 0xd21   : > { %v3666_v45 = vsel %vm3655_vm2, %v3649_v27, %v6131_v9  ;;  %v3667_v37 = vsel %vm3655_vm2, %v3650_v0, %v6132_v52 }
 0xd22   : > { %v6140_v15 = vpop.permute.xlu1 %6139  ;;  %v3664_v40 = vsel %vm3655_vm2, %v3647_v32, %v6126_v57  ;;  %v3665_v23 = vsel %vm3655_vm2, %v3648_v55, %v6127_v54  ;;  %v3677_v7 = vpack.c.bf16 %v3667_v37, %v3666_v45  ;;  %v9431_v32 = vld [vmem:[#allocation12_spill] sm:$0xff] }
 0xd23   : > { %v6135_v50 = vpop.permute.xlu0 %6134  ;;  %v3676_v51 = vpack.c.bf16 %v3665_v23, %v3664_v40  ;;  %v6142_v22 = vunpack.i.h.bf16 %v6140_v15  ;;  %v6141_v11 = vunpack.i.l.bf16 %v6140_v15  ;;  %v9432_v15 = vld [vmem:[#allocation14_spill] sm:$0xff] }
 0xd24   : > { %v6137_v59 = vunpack.i.h.bf16 %v6135_v50  ;;  %v6136_v20 = vunpack.i.l.bf16 %v6135_v50 }
 0xd25   : > { %5942 = vmatprep.mubr.bf16.mxu1 %v3676_v51  ;;  %v3638_v42 = vsel %vm1173_vm0, %v9423_v38, %v6142_v22  ;;  %v3637_v48 = vsel %vm1173_vm0, %v9424_v43, %v6141_v11  ;;  %v9434_v51 = vld [vmem:[#allocation15_spill] sm:$0xff]  ;;  %v9436_v38 = vld [vmem:[#allocation18_spill] sm:$0xff] }
 0xd26   : > { %v6150_v6 = vpop.permute.xlu1 %6149  ;;  %5943 = vmatmul.mubr.bf16.gmra.mrb[96].mxu1 %v3677_v7  ;;  %v3636_v26 = vsel %vm1173_vm0, %v9425_v36, %v6137_v59  ;;  %v3635_v16 = vsel %vm1173_vm0, %v9426_v56, %v6136_v20  ;;  %v9433_v7 = vld [vmem:[#allocation13_spill] sm:$0xff]  ;;  %v9438_v36 = vld [vmem:[#allocation19_spill] sm:$0xff] }
 0xd27   : > { %v6145_v10 = vpop.permute.xlu0 %6144  ;;  %v6152_v8 = vunpack.i.h.bf16 %v6150_v6  ;;  %v6151_v49 = vunpack.i.l.bf16 %v6150_v6 }
 0xd28   : > { %v6147_v62 = vunpack.i.h.bf16 %v6145_v10  ;;  %v6146_v4 = vunpack.i.l.bf16 %v6145_v10 }
 0xd29   : > { %v3653_v58 = vsel %vm1352_vm1, %v3637_v48, %v6151_v49  ;;  %v3654_v39 = vsel %vm1352_vm1, %v3638_v42, %v6152_v8  ;;  %v9435_v8 = vld [vmem:[#allocation16_spill] sm:$0xff]  ;;  %v9437_v48 = vld [vmem:[#allocation17_spill] sm:$0xff] }
 0xd2a   : > { %v6160_v29 = vpop.permute.xlu1 %6159  ;;  %v3651_v30 = vsel %vm1352_vm1, %v3635_v16, %v6146_v4  ;;  %v3652_v41 = vsel %vm1352_vm1, %v3636_v26, %v6147_v62 }
 0xd2b   : > { %v6162_v63 = vunpack.i.h.bf16 %v6160_v29  ;;  %v6161_v19 = vunpack.i.l.bf16 %v6160_v29  ;;  %v6155_v60 = vpop.permute.xlu0 %6154 }
 0xd2c   : > { %v6157_v21 = vunpack.i.h.bf16 %v6155_v60  ;;  %v6156_v2 = vunpack.i.l.bf16 %v6155_v60 }
 0xd2d   : > { %v3670_v28 = vsel %vm3655_vm2, %v3653_v58, %v6161_v19  ;;  %v3671_v53 = vsel %vm3655_vm2, %v3654_v39, %v6162_v63  ;;  %v9439_v58 = vld [vmem:[#allocation20_spill] sm:$0xff] }
 0xd2e   : > { %v3668_v34 = vsel %vm3655_vm2, %v3651_v30, %v6156_v2  ;;  %v3669_v31 = vsel %vm3655_vm2, %v3652_v41, %v6157_v21  ;;  %v3679_v24 = vpack.c.bf16 %v3671_v53, %v3670_v28  ;;  %v9440_v30 = vld [vmem:[#allocation22_spill] sm:$0xff]  ;;  %v9441_v53 = vld [vmem:[#allocation21_spill] sm:$0xff] }
 0xd2f   : > { %v3678_v25 = vpack.c.bf16 %v3669_v31, %v3668_v34  ;;  %v9442_v31 = vld [vmem:[#allocation23_spill] sm:$0xff] }
 0xd31   : > { %5946 = vmatprep.mubr.bf16.mxu1 %v3678_v25 }
 0xd32   : > { %5947 = vmatmul.mubr.bf16.gmra.mrb[100].mxu1 %v3679_v24 }
 0xd8e   : > { %v5936_v46 = vpop.f32.mrb[88].mxu1 }
 0xd8f   : > { %v3778_v33 = vpop.f32.mrb[89].mxu1  ;;  %v3843_v12 = vadd.f32 %v5936_v46, %v9428_v17 }
 0xd90   : > { %v3841_v13 = vadd.f32 %v9427_v3, %v3778_v33  ;;  %v5937_v47 = vpop.f32.mrb[90].mxu1 }
 0xd91   : > { %v3781_v61 = vpop.f32.mrb[91].mxu1  ;;  %v8495_v9 = vadd.f32 %v5320_v5, %v3843_v12  ;;  %v3844_v27 = vadd.f32 %v5937_v47, %v9430_v18 }
 0xd92   : > { %v8489_v14 = vadd.f32 %v5320_v5, %v3841_v13  ;;  %v3842_v1 = vadd.f32 %v9429_v44, %v3781_v61  ;;  %v6203_v44 = vld [vmem:[%s9318_s9] ss:$8 sps:$4 sm:$0xff]  }
 0xd93   : > { %v8500_v0 = vadd.f32 %v5320_v5, %v3844_v27 }
 0xd94   : > { %v8492_v52 = vadd.f32 %v5320_v5, %v3842_v1  ;;  %3882 = vadd.xlane.f32.xlu0 %v8489_v14 }
 0xd96   : > { %3884 = vadd.xlane.f32.xlu1 %v8492_v52 }
 0xd98   : > { %3886 = vadd.xlane.f32.xlu0 %v8495_v9 }
 0xd9c   : > { %3888 = vadd.xlane.f32.xlu0 %v8500_v0 }
 0xda6   : > { %v5940_v54 = vpop.f32.mrb[92].mxu1 }
 0xda7   : > { %v3794_v57 = vpop.f32.mrb[93].mxu1  ;;  %v3847_v40 = vadd.f32 %v5940_v54, %v9432_v15  ;;  %v6208_v54 = vld [vmem:[%s9318_s9 + $0x14] ss:$8 sps:$4 sm:$0xff]  }
 0xda8   : > { %v3845_v55 = vadd.f32 %v9431_v32, %v3794_v57  ;;  %v5941_v45 = vpop.f32.mrb[94].mxu1 }
 0xda9   : > { %v3797_v37 = vpop.f32.mrb[95].mxu1  ;;  %v3848_v22 = vadd.f32 %v5941_v45, %v9434_v51  ;;  %v8512_v6 = vadd.f32 %v5320_v5, %v3847_v40  ;;  %v6209_v51 = vld [vmem:[%s9318_s9 + $0x20] ss:$8 sps:$4 sm:$0xff]  }
 0xdaa   : > { %v8505_v23 = vadd.f32 %v5320_v5, %v3845_v55  ;;  %v3846_v50 = vadd.f32 %v9433_v7, %v3797_v37  ;;  %v6206_v55 = vld [vmem:[%s9318_s9 + $0x10] ss:$8 sps:$4 sm:$0xff]  }
 0xdab   : > { %v8515_v59 = vadd.f32 %v5320_v5, %v3848_v22 }
 0xdac   : > { %v8509_v11 = vadd.f32 %v5320_v5, %v3846_v50  ;;  %3890 = vadd.xlane.f32.xlu0 %v8505_v23  ;;  %v6211_v50 = vld [vmem:[%s9318_s9 + $0x24] ss:$8 sps:$4 sm:$0xff]  }
 0xdae   : > { %3892 = vadd.xlane.f32.xlu1 %v8509_v11 }
 0xdb0   : > { %3894 = vadd.xlane.f32.xlu0 %v8512_v6 }
 0xdb2   : > { %3896 = vadd.xlane.f32.xlu1 %v8515_v59 }
 0xdf9   : > { %v5944_v20 = vpop.f32.mrb[96].mxu1 }
 0xdfa   : > { %v3810_v10 = vpop.f32.mrb[97].mxu1  ;;  %v3851_v42 = vadd.f32 %v5944_v20, %v9436_v38 }
 0xdfb   : > { %v3849_v49 = vadd.f32 %v9435_v8, %v3810_v10  ;;  %v5945_v62 = vpop.f32.mrb[98].mxu1  ;;  %v6214_v8 = vld [vmem:[%s9318_s9 + $0x34] ss:$8 sps:$4 sm:$0xff]  }
 0xdfc   : > { %v3813_v4 = vpop.f32.mrb[99].mxu1  ;;  %v3852_v26 = vadd.f32 %v5945_v62, %v9438_v36  ;;  %v8528_v16 = vadd.f32 %v5320_v5, %v3851_v42 }
 0xdfd   : > { %v8521_v43 = vadd.f32 %v5320_v5, %v3849_v49  ;;  %v3850_v29 = vadd.f32 %v9437_v48, %v3813_v4  ;;  %v6212_v4 = vld [vmem:[%s9318_s9 + $0x30] ss:$8 sps:$4 sm:$0xff]  }
 0xdfe   : > { %v8531_v63 = vadd.f32 %v5320_v5, %v3852_v26  ;;  %v6217_v26 = vld [vmem:[%s9318_s9 + $0x44] ss:$8 sps:$4 sm:$0xff]  }
 0xdff   : > { %v8525_v56 = vadd.f32 %v5320_v5, %v3850_v29  ;;  %3898 = vadd.xlane.f32.xlu0 %v8521_v43 }
 0xe01   : > { %3900 = vadd.xlane.f32.xlu1 %v8525_v56 }
 0xe03   : > { %3902 = vadd.xlane.f32.xlu0 %v8528_v16 }
 0xe05   : > { %3904 = vadd.xlane.f32.xlu1 %v8531_v63  ;;  %v5948_v19 = vpop.f32.mrb[100].mxu1 }
 0xe06   : > { %v3826_v60 = vpop.f32.mrb[101].mxu1  ;;  %v3855_v41 = vadd.f32 %v5948_v19, %v9440_v30  ;;  %v6220_v30 = vld [vmem:[%s9318_s9 + $0x54] ss:$8 sps:$4 sm:$0xff]  }
 0xe07   : > { %v3853_v39 = vadd.f32 %v9439_v58, %v3826_v60  ;;  %v5949_v21 = vpop.f32.mrb[102].mxu1 }
 0xe08   : > { %v3829_v2 = vpop.f32.mrb[103].mxu1  ;;  %v3856_v24 = vadd.f32 %v5949_v21, %v9442_v31  ;;  %v8544_v46 = vadd.f32 %v5320_v5, %v3855_v41  ;;  %v6221_v31 = vld [vmem:[%s9318_s9 + $0x60] ss:$8 sps:$4 sm:$0xff]  }
 0xe09   : > { %v8537_v28 = vadd.f32 %v5320_v5, %v3853_v39  ;;  %v3854_v34 = vadd.f32 %v9441_v53, %v3829_v2  ;;  %v6215_v39 = vld [vmem:[%s9318_s9 + $0x40] ss:$8 sps:$4 sm:$0xff]   ;;  %v6218_v53 = vld [vmem:[%s9318_s9 + $0x50] ss:$8 sps:$4 sm:$0xff]  }
 0xe0a   : > { %v8547_v33 = vadd.f32 %v5320_v5, %v3856_v24  ;;  %v6226_v24 = vld [vmem:[%s9318_s9 + $0x74] ss:$8 sps:$4 sm:$0xff]  }
 0xe0b   : > { %v8541_v25 = vadd.f32 %v5320_v5, %v3854_v34  ;;  %3906 = vadd.xlane.f32.xlu0 %v8537_v28  ;;  %v6205_v5 = vld [vmem:[%s9318_s9 + $0x4] ss:$8 sps:$4 sm:$0xff]  }
 0xe0c   : > { %4218 = vmatprep.subr.bf16.mxu0 %v6205_v5  ;;  %v6223_v34 = vld [vmem:[%s9318_s9 + $0x64] ss:$8 sps:$4 sm:$0xff]  }
 0xe0d   : > { %3908 = vadd.xlane.f32.xlu1 %v8541_v25  ;;  %4219 = vmatpush1.bf16.msra.mxu0 %v6203_v44 }
 0xe0e   : > { %4220 = vmatprep.subr.bf16.mxu0 %v6208_v54 }
 0xe0f   : > { %3910 = vadd.xlane.f32.xlu0 %v8544_v46 }
 0xe11   : > { %3912 = vadd.xlane.f32.xlu1 %v8547_v33  ;;  %4221 = vmatpush1.bf16.msra.mxu0 %v6206_v55 }
 0xe12   : > { %4222 = vmatprep.subr.bf16.mxu0 %v6211_v50 }
 0xe15   : > { %4223 = vmatpush1.bf16.msra.mxu0 %v6209_v51 }
 0xe16   : > { %4224 = vmatprep.subr.bf16.mxu0 %v6214_v8 }
 0xe19   : > { %4225 = vmatpush1.bf16.msra.mxu0 %v6212_v4 }
 0xe1a   : > { %4226 = vmatprep.subr.bf16.mxu0 %v6217_v26 }
 0xe1d   : > { %4227 = vmatpush1.bf16.msra.mxu0 %v6215_v39 }
 0xe1e   : > { %4228 = vmatprep.subr.bf16.mxu0 %v6220_v30 }
 0xe21   : > { %v3883_v3 = vpop.xlane.xlu0 %3882  ;;  %4229 = vmatpush1.bf16.msra.mxu0 %v6218_v53 }
 0xe22   : > { %v3914_v13 = vmul.f32 0.0078125, %v3883_v3  ;;  %4230 = vmatprep.subr.bf16.mxu0 %v6223_v34  ;;  %v6224_v3 = vld [vmem:[%s9318_s9 + $0x70] ss:$8 sps:$4 sm:$0xff]  }
 0xe23   : > { %v3885_v47 = vpop.xlane.xlu1 %3884 }
 0xe24   : > { %v8552_v61 = vsub.f32 %v8489_v14, %v3914_v13  ;;  %v3915_v17 = vmul.f32 0.0078125, %v3885_v47 }
 0xe25   : > { %v3887_v12 = vpop.xlane.xlu0 %3886  ;;  %4231 = vmatpush1.bf16.msra.mxu0 %v6221_v31 }
 0xe26   : > { %v8561_v1 = vsub.f32 %v8492_v52, %v3915_v17  ;;  %v3916_v18 = vmul.f32 0.0078125, %v3887_v12  ;;  %v3946_v27 = vmul.f32 %v8552_v61, %v8552_v61  ;;  %4232 = vmatprep.subr.bf16.mxu0 %v6226_v24 }
 0xe28   : > { %v8569_v57 = vsub.f32 %v8495_v9, %v3916_v18  ;;  %3962 = vadd.xlane.f32.xlu0 %v3946_v27  ;;  %v3947_v32 = vmul.f32 %v8561_v1, %v8561_v1 }
 0xe29   : > { %v3889_v45 = vpop.xlane.xlu0 %3888  ;;  %4233 = vmatpush1.bf16.msra.mxu0 %v6224_v3 }
 0xe2a   : > { %v3917_v37 = vmul.f32 0.0078125, %v3889_v45  ;;  %3964 = vadd.xlane.f32.xlu1 %v3947_v32  ;;  %v3948_v15 = vmul.f32 %v8569_v57, %v8569_v57 }
 0xe2c   : > { %v8579_v40 = vsub.f32 %v8500_v0, %v3917_v37  ;;  %3966 = vadd.xlane.f32.xlu0 %v3948_v15 }
 0xe2e   : > { %v3949_v7 = vmul.f32 %v8579_v40, %v8579_v40 }
 0xe30   : > { %3968 = vadd.xlane.f32.xlu1 %v3949_v7 }
 0xe39   : > { %v3891_v22 = vpop.xlane.xlu0 %3890 }
 0xe3a   : > { %v3918_v20 = vmul.f32 0.0078125, %v3891_v22 }
 0xe3b   : > { %v3893_v10 = vpop.xlane.xlu1 %3892 }
 0xe3c   : > { %v8593_v49 = vsub.f32 %v8505_v23, %v3918_v20  ;;  %v3919_v62 = vmul.f32 0.0078125, %v3893_v10 }
 0xe3d   : > { %v3895_v38 = vpop.xlane.xlu0 %3894 }
 0xe3e   : > { %v8599_v42 = vsub.f32 %v8509_v11, %v3919_v62  ;;  %v3920_v48 = vmul.f32 0.0078125, %v3895_v38  ;;  %v3950_v29 = vmul.f32 %v8593_v49, %v8593_v49 }
 0xe3f   : > { %v3897_v36 = vpop.xlane.xlu1 %3896 }
 0xe40   : > { %v8607_v19 = vsub.f32 %v8512_v6, %v3920_v48  ;;  %v3921_v60 = vmul.f32 0.0078125, %v3897_v36  ;;  %3970 = vadd.xlane.f32.xlu0 %v3950_v29  ;;  %v3951_v58 = vmul.f32 %v8599_v42, %v8599_v42 }
 0xe42   : > { %v8615_v21 = vsub.f32 %v8515_v59, %v3921_v60  ;;  %3972 = vadd.xlane.f32.xlu1 %v3951_v58  ;;  %v3952_v2 = vmul.f32 %v8607_v19, %v8607_v19 }
 0xe44   : > { %3974 = vadd.xlane.f32.xlu0 %v3952_v2  ;;  %v3953_v41 = vmul.f32 %v8615_v21, %v8615_v21 }
 0xe46   : > { %3976 = vadd.xlane.f32.xlu1 %v3953_v41 }
 0xe8c   : > { %v3899_v13 = vpop.xlane.xlu0 %3898 }
 0xe8d   : > { %v3922_v47 = vmul.f32 0.0078125, %v3899_v13 }
 0xe8e   : > { %v3901_v17 = vpop.xlane.xlu1 %3900 }
 0xe8f   : > { %v8640_v12 = vsub.f32 %v8521_v43, %v3922_v47  ;;  %v3923_v44 = vmul.f32 0.0078125, %v3901_v17 }
 0xe90   : > { %v3903_v5 = vpop.xlane.xlu0 %3902 }
 0xe91   : > { %v8643_v18 = vsub.f32 %v8525_v56, %v3923_v44  ;;  %v3924_v27 = vmul.f32 0.0078125, %v3903_v5  ;;  %v3954_v54 = vmul.f32 %v8640_v12, %v8640_v12 }
 0xe92   : > { %v3905_v32 = vpop.xlane.xlu1 %3904 }
 0xe93   : > { %v8648_v55 = vsub.f32 %v8528_v16, %v3924_v27  ;;  %v3925_v45 = vmul.f32 0.0078125, %v3905_v32  ;;  %3978 = vadd.xlane.f32.xlu0 %v3954_v54  ;;  %v3955_v37 = vmul.f32 %v8643_v18, %v8643_v18  ;;  %v8682_v54 = vld [vmem:[%s9316_s7] ss:$0 sm:$0xff] }
 0xe95   : > { %v8653_v15 = vsub.f32 %v8531_v63, %v3925_v45  ;;  %3980 = vadd.xlane.f32.xlu1 %v3955_v37  ;;  %v3956_v7 = vmul.f32 %v8648_v55, %v8648_v55 }
 0xe97   : > { %3982 = vadd.xlane.f32.xlu0 %v3956_v7  ;;  %v3957_v50 = vmul.f32 %v8653_v15, %v8653_v15 }
 0xe98   : > { %v3907_v51 = vpop.xlane.xlu0 %3906 }
 0xe99   : > { %v3926_v22 = vmul.f32 0.0078125, %v3907_v51  ;;  %3984 = vadd.xlane.f32.xlu1 %v3957_v50  ;;  %v8690_v51 = vld [vmem:[%s9317_s8] ss:$0 sm:$0xff] }
 0xe9a   : > { %v3909_v20 = vpop.xlane.xlu1 %3908 }
 0xe9b   : > { %v8660_v10 = vsub.f32 %v8537_v28, %v3926_v22  ;;  %v3927_v8 = vmul.f32 0.0078125, %v3909_v20 }
 0xe9c   : > { %v3911_v62 = vpop.xlane.xlu0 %3910 }
 0xe9d   : > { %v8663_v4 = vsub.f32 %v8541_v25, %v3927_v8  ;;  %v3928_v38 = vmul.f32 0.0078125, %v3911_v62  ;;  %v3958_v48 = vmul.f32 %v8660_v10, %v8660_v10 }
 0xe9e   : > { %v3913_v29 = vpop.xlane.xlu1 %3912 }
 0xe9f   : > { %v8668_v36 = vsub.f32 %v8544_v46, %v3928_v38  ;;  %v3929_v26 = vmul.f32 0.0078125, %v3913_v29  ;;  %3986 = vadd.xlane.f32.xlu0 %v3958_v48  ;;  %v3959_v60 = vmul.f32 %v8663_v4, %v8663_v4 }
 0xea1   : > { %v8673_v58 = vsub.f32 %v8547_v33, %v3929_v26  ;;  %3988 = vadd.xlane.f32.xlu1 %v3959_v60  ;;  %v3960_v39 = vmul.f32 %v8668_v36, %v8668_v36 }
 0xea3   : > { %3990 = vadd.xlane.f32.xlu0 %v3960_v39  ;;  %v3961_v2 = vmul.f32 %v8673_v58, %v8673_v58 }
 0xea5   : > { %3992 = vadd.xlane.f32.xlu1 %v3961_v2 }
 0xeb5   : > { %v3963_v30 = vpop.xlane.xlu0 %3962 }
 0xeb6   : > { %v3994_v41 = vmul.f32 0.0078125, %v3963_v30 }
 0xeb7   : > { %v3965_v53 = vpop.xlane.xlu1 %3964 }
 0xeb8   : > { %v4010_v34 = vadd.f32 1e-05, %v3994_v41  ;;  %v3995_v31 = vmul.f32 0.0078125, %v3965_v53 }
 0xeb9   : > { %v3967_v24 = vpop.xlane.xlu0 %3966 }
 0xeba   : > { %6531 = vrsqrt.f32 %v4010_v34  ;;  %v4011_v3 = vadd.f32 1e-05, %v3995_v31  ;;  %v3996_v13 = vmul.f32 0.0078125, %v3967_v24 }
 0xebc   : > { %6533 = vrsqrt.f32 %v4011_v3  ;;  %v4012_v47 = vadd.f32 1e-05, %v3996_v13 }
 0xebd   : > { %v3969_v17 = vpop.xlane.xlu1 %3968 }
 0xebe   : > { %6535 = vrsqrt.f32 %v4012_v47  ;;  %v3997_v44 = vmul.f32 0.0078125, %v3969_v17 }
 0xec0   : > { %v4013_v5 = vadd.f32 1e-05, %v3997_v44 }
 0xec2   : > { %6537 = vrsqrt.f32 %v4013_v5 }
 0xec4   : > { %v6532_v27 = vpop.eup %6531 }
 0xec5   : > { %v4042_v32 = vmul.f32 %v6532_v27, %v8552_v61 }
 0xec6   : > { %v6534_v45 = vpop.eup %6533 }
 0xec7   : > { %v4064_v37 = vmul.f32 %v8682_v54, %v4042_v32  ;;  %v4043_v7 = vmul.f32 %v6534_v45, %v8561_v1 }
 0xec8   : > { %v6536_v50 = vpop.eup %6535 }
 0xec9   : > { %v4065_v22 = vmul.f32 %v8682_v54, %v4043_v7  ;;  %v4086_v20 = vadd.f32 %v8690_v51, %v4064_v37  ;;  %v4044_v62 = vmul.f32 %v6536_v50, %v8569_v57 }
 0xecb   : > { %v4087_v8 = vadd.f32 %v8690_v51, %v4065_v22  ;;  %v4066_v60 = vmul.f32 %v8682_v54, %v4044_v62 }
 0xecc   : > { %v6538_v61 = vpop.eup %6537 }
 0xecd   : > { %v3971_v38 = vpop.xlane.xlu0 %3970  ;;  %v4102_v48 = vpack.c.bf16 %v4087_v8, %v4086_v20  ;;  %v4045_v29 = vmul.f32 %v6538_v61, %v8579_v40  ;;  %v4088_v40 = vadd.f32 %v8690_v51, %v4066_v60 }
 0xece   : > { %v3998_v1 = vmul.f32 0.0078125, %v3971_v38 }
 0xecf   : > { %4251 = vmatmul.mubr.bf16.vlgmr.msra.gmra.mrb[88].mxu0 %v4102_v48  ;;  %v3973_v26 = vpop.xlane.xlu1 %3972  ;;  %v4067_v39 = vmul.f32 %v8682_v54, %v4045_v29 }
 0xed0   : > { %v4014_v2 = vadd.f32 1e-05, %v3998_v1  ;;  %v3999_v30 = vmul.f32 0.0078125, %v3973_v26  ;;  %4260 = vmatprep.mubr.bf16.mxu0 %v9395_v35 }
 0xed1   : > { %v3975_v41 = vpop.xlane.xlu0 %3974  ;;  %v4089_v53 = vadd.f32 %v8690_v51, %v4067_v39  ;;  %v6227_v39 = vld [vmem:[%s9320_s11 + $0x40] sm:$0xff]  }
 0xed2   : > { %6539 = vrsqrt.f32 %v4014_v2  ;;  %v4015_v57 = vadd.f32 1e-05, %v3999_v30  ;;  %v4000_v34 = vmul.f32 0.0078125, %v3975_v41  ;;  %v6228_v41 = vld [vmem:[%s9320_s11] sm:$0xff]   ;;  %5566 = vmatprep.subr.bf16.mxu0 %v6227_v39  ;;  %5950 = vmatprep.subr.bf16.mxu1 %v6227_v39 }
 0xed3   : > { %v3977_v31 = vpop.xlane.xlu1 %3976  ;;  %v4103_v13 = vpack.c.bf16 %v4089_v53, %v4088_v40  ;;  %5567 = vmatpush3.bf16.msra.mxu0 %v6228_v41  ;;  %5958 = vmatpush3.bf16.msra.mxu1 %v6228_v41  ;;  %v6237_v41 = vld [vmem:[%s9320_s11 + $0x68] sm:$0xff]  }
 0xed4   : > { %6541 = vrsqrt.f32 %v4015_v57  ;;  %v4016_v24 = vadd.f32 1e-05, %v4000_v34  ;;  %v4001_v3 = vmul.f32 0.0078125, %v3977_v31  ;;  %v6229_v31 = vld [vmem:[%s9320_s11 + $0x48] sm:$0xff]  }
 0xed5   : > { %5568 = vmatprep.subr.bf16.mxu0 %v6229_v31  ;;  %5951 = vmatprep.subr.bf16.mxu1 %v6229_v31 }
 0xed6   : > { %6543 = vrsqrt.f32 %v4016_v24  ;;  %v4017_v47 = vadd.f32 1e-05, %v4001_v3  ;;  %v6230_v24 = vld [vmem:[%s9320_s11 + $0x8] sm:$0xff]  }
 0xed7   : > { %4261 = vmatmul.mubr.bf16.gmra.mrb[92].mxu0 %v4103_v13  ;;  %5959 = vmatpush3.bf16.msra.mxu1 %v6230_v24  ;;  %v6231_v13 = vld [vmem:[%s9320_s11 + $0x50] sm:$0xff]  }
 0xed8   : > { %6545 = vrsqrt.f32 %v4017_v47  ;;  %4270 = vmatprep.mubr.bf16.mxu0 %v9395_v35  ;;  %5569 = vmatpush3.bf16.msra.mxu0 %v6230_v24 }
 0xed9   : > { %5570 = vmatprep.subr.bf16.mxu0 %v6231_v13  ;;  %5952 = vmatprep.subr.bf16.mxu1 %v6231_v13 }
 0xedc   : > { %v6540_v17 = vpop.eup %6539 }
 0xedd   : > { %v4046_v44 = vmul.f32 %v6540_v17, %v8593_v49  ;;  %v6232_v17 = vld [vmem:[%s9320_s11 + $0x10] sm:$0xff]  }
 0xede   : > { %v6542_v5 = vpop.eup %6541  ;;  %5571 = vmatpush3.bf16.msra.mxu0 %v6232_v17  ;;  %5960 = vmatpush3.bf16.msra.mxu1 %v6232_v17 }
 0xedf   : > { %v4047_v27 = vmul.f32 %v6542_v5, %v8599_v42  ;;  %v4068_v32 = vmul.f32 %v8682_v54, %v4046_v44 }
 0xee0   : > { %v6544_v45 = vpop.eup %6543 }
 0xee1   : > { %v4069_v37 = vmul.f32 %v8682_v54, %v4047_v27  ;;  %v4090_v50 = vadd.f32 %v8690_v51, %v4068_v32  ;;  %v4048_v20 = vmul.f32 %v6544_v45, %v8607_v19 }
 0xee2   : > { %v6546_v7 = vpop.eup %6545 }
 0xee3   : > { %v4091_v22 = vadd.f32 %v8690_v51, %v4069_v37  ;;  %v4049_v8 = vmul.f32 %v6546_v7, %v8615_v21  ;;  %v4070_v42 = vmul.f32 %v8682_v54, %v4048_v20  ;;  %v6233_v7 = vld [vmem:[%s9320_s11 + $0x58] sm:$0xff]  }
 0xee4   : > { %5572 = vmatprep.subr.bf16.mxu0 %v6233_v7  ;;  %5953 = vmatprep.subr.bf16.mxu1 %v6233_v7 }
 0xee5   : > { %v4104_v62 = vpack.c.bf16 %v4091_v22, %v4090_v50  ;;  %v4071_v49 = vmul.f32 %v8682_v54, %v4049_v8  ;;  %v4092_v38 = vadd.f32 %v8690_v51, %v4070_v42  ;;  %v6234_v8 = vld [vmem:[%s9320_s11 + $0x18] sm:$0xff]  }
 0xee6   : > { %5573 = vmatpush3.bf16.msra.mxu0 %v6234_v8  ;;  %5961 = vmatpush3.bf16.msra.mxu1 %v6234_v8 }
 0xee7   : > { %4271 = vmatmul.mubr.bf16.gmra.mrb[96].mxu0 %v4104_v62  ;;  %v4093_v61 = vadd.f32 %v8690_v51, %v4071_v49 }
 0xee8   : > { %4280 = vmatprep.mubr.bf16.mxu0 %v9395_v35 }
 0xee9   : > { %v4105_v48 = vpack.c.bf16 %v4093_v61, %v4092_v38 }
 0xeef   : > { %4281 = vmatmul.mubr.bf16.gmra.mrb[100].mxu0 %v4105_v48  ;;  %v6235_v48 = vld [vmem:[%s9320_s11 + $0x60] sm:$0xff]  }
 0xef0   : > { %4290 = vmatprep.mubr.bf16.mxu0 %v9395_v35  ;;  %5574 = vmatprep.subr.bf16.mxu0 %v6235_v48 }
 0xef1   : > { %5954 = vmatprep.subr.bf16.mxu1 %v6235_v48 }
 0xf20   : > { %v3979_v29 = vpop.xlane.xlu0 %3978 }
 0xf21   : > { %v4002_v19 = vmul.f32 0.0078125, %v3979_v29 }
 0xf22   : > { %v3981_v1 = vpop.xlane.xlu1 %3980 }
 0xf23   : > { %v4018_v21 = vadd.f32 1e-05, %v4002_v19  ;;  %v4003_v26 = vmul.f32 0.0078125, %v3981_v1 }
 0xf24   : > { %v3983_v60 = vpop.xlane.xlu0 %3982 }
 0xf25   : > { %6547 = vrsqrt.f32 %v4018_v21  ;;  %v4019_v2 = vadd.f32 1e-05, %v4003_v26  ;;  %v4004_v30 = vmul.f32 0.0078125, %v3983_v60  ;;  %v6236_v21 = vld [vmem:[%s9320_s11 + $0x20] sm:$0xff]  }
 0xf26   : > { %v3985_v53 = vpop.xlane.xlu1 %3984  ;;  %5575 = vmatpush3.bf16.msra.mxu0 %v6236_v21  ;;  %5962 = vmatpush3.bf16.msra.mxu1 %v6236_v21 }
 0xf27   : > { %6549 = vrsqrt.f32 %v4019_v2  ;;  %v4020_v57 = vadd.f32 1e-05, %v4004_v30  ;;  %v4005_v34 = vmul.f32 0.0078125, %v3985_v53  ;;  %v6238_v53 = vld [vmem:[%s9320_s11 + $0x28] sm:$0xff]   ;;  %5576 = vmatprep.subr.bf16.mxu0 %v6237_v41  ;;  %5955 = vmatprep.subr.bf16.mxu1 %v6237_v41 }
 0xf29   : > { %6551 = vrsqrt.f32 %v4020_v57  ;;  %v4021_v40 = vadd.f32 1e-05, %v4005_v34  ;;  %v6239_v34 = vld [vmem:[%s9320_s11 + $0x70] sm:$0xff]  }
 0xf2a   : > { %5577 = vmatpush3.bf16.msra.mxu0 %v6238_v53  ;;  %5963 = vmatpush3.bf16.msra.mxu1 %v6238_v53 }
 0xf2b   : > { %6553 = vrsqrt.f32 %v4021_v40  ;;  %v6240_v40 = vld [vmem:[%s9320_s11 + $0x30] sm:$0xff]   ;;  %5578 = vmatprep.subr.bf16.mxu0 %v6239_v34  ;;  %5956 = vmatprep.subr.bf16.mxu1 %v6239_v34 }
 0xf2c   : > { %v3987_v3 = vpop.xlane.xlu0 %3986 }
 0xf2d   : > { %v4006_v47 = vmul.f32 0.0078125, %v3987_v3 }
 0xf2e   : > { %v3989_v44 = vpop.xlane.xlu1 %3988  ;;  %5579 = vmatpush3.bf16.msra.mxu0 %v6240_v40  ;;  %5964 = vmatpush3.bf16.msra.mxu1 %v6240_v40 }
 0xf2f   : > { %v6548_v5 = vpop.eup %6547  ;;  %v4022_v27 = vadd.f32 1e-05, %v4006_v47  ;;  %v4007_v32 = vmul.f32 0.0078125, %v3989_v44  ;;  %v6241_v44 = vld [vmem:[%s9320_s11 + $0x78] sm:$0xff]  }
 0xf30   : > { %v3991_v45 = vpop.xlane.xlu0 %3990  ;;  %v4050_v37 = vmul.f32 %v6548_v5, %v8640_v12  ;;  %5580 = vmatprep.subr.bf16.mxu0 %v6241_v44  ;;  %5957 = vmatprep.subr.bf16.mxu1 %v6241_v44 }
 0xf31   : > { %v6550_v50 = vpop.eup %6549  ;;  %6555 = vrsqrt.f32 %v4022_v27  ;;  %v4023_v22 = vadd.f32 1e-05, %v4007_v32  ;;  %v4008_v20 = vmul.f32 0.0078125, %v3991_v45  ;;  %v6242_v27 = vld [vmem:[%s9320_s11 + $0x38] sm:$0xff]  }
 0xf32   : > { %v3993_v62 = vpop.xlane.xlu1 %3992  ;;  %v4051_v49 = vmul.f32 %v6550_v50, %v8643_v18  ;;  %v4072_v42 = vmul.f32 %v8682_v54, %v4050_v37  ;;  %5581 = vmatpush3.bf16.msra.mxu0 %v6242_v27  ;;  %5965 = vmatpush3.bf16.msra.mxu1 %v6242_v27 }
 0xf33   : > { %v6552_v12 = vpop.eup %6551  ;;  %6557 = vrsqrt.f32 %v4023_v22  ;;  %v4009_v61 = vmul.f32 0.0078125, %v3993_v62  ;;  %v4024_v19 = vadd.f32 1e-05, %v4008_v20 }
 0xf34   : > { %v4073_v38 = vmul.f32 %v8682_v54, %v4051_v49  ;;  %v4094_v18 = vadd.f32 %v8690_v51, %v4072_v42  ;;  %v4052_v60 = vmul.f32 %v6552_v12, %v8648_v55 }
 0xf35   : > { %v6554_v29 = vpop.eup %6553  ;;  %v4025_v1 = vadd.f32 1e-05, %v4009_v61 }
 0xf36   : > { %v4095_v26 = vadd.f32 %v8690_v51, %v4073_v38  ;;  %v4053_v39 = vmul.f32 %v6554_v29, %v8653_v15  ;;  %v4074_v55 = vmul.f32 %v8682_v54, %v4052_v60 }
 0xf37   : > { %6559 = vrsqrt.f32 %v4025_v1 }
 0xf38   : > { %v4106_v2 = vpack.c.bf16 %v4095_v26, %v4094_v18  ;;  %v4075_v30 = vmul.f32 %v8682_v54, %v4053_v39  ;;  %6561 = vrsqrt.f32 %v4024_v19  ;;  %v4096_v24 = vadd.f32 %v8690_v51, %v4074_v55 }
 0xf3a   : > { %4291 = vmatmul.mubr.bf16.gmra.mrb[104].mxu0 %v4106_v2  ;;  %v4097_v57 = vadd.f32 %v8690_v51, %v4075_v30 }
 0xf3b   : > { %v6556_v15 = vpop.eup %6555  ;;  %4300 = vmatprep.mubr.bf16.mxu0 %v9395_v35 }
 0xf3c   : > { %v4054_v3 = vmul.f32 %v6556_v15, %v8660_v10  ;;  %v4107_v47 = vpack.c.bf16 %v4097_v57, %v4096_v24 }
 0xf3d   : > { %v6558_v31 = vpop.eup %6557 }
 0xf3e   : > { %v4055_v13 = vmul.f32 %v6558_v31, %v8663_v4  ;;  %v4076_v10 = vmul.f32 %v8682_v54, %v4054_v3 }
 0xf40   : > { %v4077_v17 = vmul.f32 %v8682_v54, %v4055_v13  ;;  %v4098_v37 = vadd.f32 %v8690_v51, %v4076_v10 }
 0xf41   : > { %v6560_v5 = vpop.eup %6559 }
 0xf42   : > { %4301 = vmatmul.mubr.bf16.gmra.mrb[108].mxu0 %v4107_v47  ;;  %v6562_v4 = vpop.eup %6561  ;;  %v4099_v32 = vadd.f32 %v8690_v51, %v4077_v17  ;;  %v4057_v45 = vmul.f32 %v6560_v5, %v8673_v58  ;;  %v4128_v58 = vlaneseq }
 0xf43   : > { %4310 = vmatprep.mubr.bf16.mxu0 %v9395_v35  ;;  %v4056_v7 = vmul.f32 %v6562_v4, %v8668_v36  ;;  %v4126_v36 = vld [vmem:[%s9319_s10] sm:$0x3] }
 0xf44   : > { %v4108_v50 = vpack.c.bf16 %v4099_v32, %v4098_v37  ;;  %v4079_v22 = vmul.f32 %v8682_v54, %v4057_v45  ;;  %v4129_v42 = vshrl.u32 %v4128_v58, 7 }
 0xf45   : > { %v4078_v20 = vmul.f32 %v8682_v54, %v4056_v7 }
 0xf46   : > { %v4101_v8 = vadd.f32 %v8690_v51, %v4079_v22  ;;  %v4130_v12 = vsub.s32 0, %v4129_v42  ;;  %v4134_v61 = vsub.s32 1, %v4129_v42 }
 0xf47   : > { %v4100_v62 = vadd.f32 %v8690_v51, %v4078_v20 }
 0xf48   : > { %v8795_v38 = vrot.slane %v4126_v36, %v4130_v12  ;;  %v8797_v48 = vrot.slane %v4126_v36, %v4134_v61 }
 0xf49   : > { %v4109_v49 = vpack.c.bf16 %v4101_v8, %v4100_v62 }
 0xf4a   : > { %4311 = vmatmul.mubr.bf16.gmra.mrb[112].mxu0 %v4108_v50 }
 0xf4b   : > { %4320 = vmatprep.mubr.bf16.mxu0 %v9395_v35 }
 0xf52   : > { %4321 = vmatmul.mubr.bf16.gmra.mrb[116].mxu0 %v4109_v49 }
 0xfa2   : > { %v4252_v54 = vpop.f32.mrb[88].mxu0 }
 0xfa3   : > { %v4253_v35 = vadd.f32 %v4252_v54, %v8795_v38  ;;  %v4254_v29 = vpop.f32.mrb[89].mxu0 }
 0xfa4   : > { %v8801_v51 = vadd.f32 %v4254_v29, %v8797_v48  ;;  %v4256_v19 = vpop.f32.mrb[90].mxu0 }
 0xfa5   : > { %v4363_v1 = vmul.f32 %v4253_v35, %v4253_v35  ;;  %v8804_v18 = vadd.f32 %v4256_v19, %v8795_v38  ;;  %v4258_v21 = vpop.f32.mrb[91].mxu0 }
 0xfa6   : > { %v4364_v26 = vmul.f32 %v8801_v51, %v8801_v51  ;;  %v8809_v60 = vadd.f32 %v4258_v21, %v8797_v48 }
 0xfa7   : > { %v4395_v39 = vmul.f32 %v4363_v1, %v4253_v35  ;;  %v4365_v2 = vmul.f32 %v8804_v18, %v8804_v18 }
 0xfa8   : > { %v4396_v30 = vmul.f32 %v4364_v26, %v8801_v51  ;;  %v4366_v41 = vmul.f32 %v8809_v60, %v8809_v60 }
 0xfa9   : > { %v4427_v53 = vmul.f32 0.044715, %v4395_v39  ;;  %v4397_v55 = vmul.f32 %v4365_v2, %v8804_v18 }
 0xfaa   : > { %v4428_v15 = vmul.f32 0.044715, %v4396_v30  ;;  %v4398_v57 = vmul.f32 %v4366_v41, %v8809_v60  ;;  %v4262_v34 = vpop.f32.mrb[92].mxu0 }
 0xfab   : > { %v4459_v31 = vadd.f32 %v4427_v53, %v4253_v35  ;;  %v4429_v40 = vmul.f32 0.044715, %v4397_v55  ;;  %v8819_v24 = vadd.f32 %v4262_v34, %v8795_v38  ;;  %v4264_v3 = vpop.f32.mrb[93].mxu0 }
 0xfac   : > { %v4460_v13 = vadd.f32 %v4428_v15, %v8801_v51  ;;  %v4430_v47 = vmul.f32 0.044715, %v4398_v57  ;;  %v8823_v17 = vadd.f32 %v4264_v3, %v8797_v48  ;;  %v4266_v44 = vpop.f32.mrb[94].mxu0  ;;  %v4331_v15 = vmul.f32 0.5, %v4253_v35 }
 0xfad   : > { %v4491_v5 = vmul.f32 0.7978846, %v4459_v31  ;;  %v4461_v27 = vadd.f32 %v4429_v40, %v8804_v18  ;;  %v4367_v10 = vmul.f32 %v8819_v24, %v8819_v24  ;;  %v4268_v4 = vpop.f32.mrb[95].mxu0  ;;  %v4267_v7 = vadd.f32 %v4266_v44, %v8795_v38 }
 0xfae   : > { %v4492_v32 = vmul.f32 0.7978846, %v4460_v13  ;;  %v4462_v45 = vadd.f32 %v4430_v47, %v8809_v60  ;;  %v4368_v37 = vmul.f32 %v8823_v17, %v8823_v17  ;;  %v8834_v20 = vadd.f32 %v4268_v4, %v8797_v48 }
 0xfaf   : > { %6563 = vtanh.f32 %v4491_v5  ;;  %v4493_v50 = vmul.f32 0.7978846, %v4461_v27  ;;  %v4399_v22 = vmul.f32 %v4367_v10, %v8819_v24  ;;  %v4369_v58 = vmul.f32 %v4267_v7, %v4267_v7 }
 0xfb0   : > { %6565 = vtanh.f32 %v4492_v32  ;;  %v4494_v8 = vmul.f32 0.7978846, %v4462_v45  ;;  %v4400_v62 = vmul.f32 %v4368_v37, %v8823_v17  ;;  %v4370_v42 = vmul.f32 %v8834_v20, %v8834_v20 }
 0xfb1   : > { %6567 = vtanh.f32 %v4493_v50  ;;  %v4431_v49 = vmul.f32 0.044715, %v4399_v22  ;;  %v4401_v61 = vmul.f32 %v4369_v58, %v4267_v7  ;;  %v4332_v13 = vmul.f32 0.5, %v8801_v51 }
 0xfb2   : > { %6569 = vtanh.f32 %v4494_v8  ;;  %v4432_v12 = vmul.f32 0.044715, %v4400_v62  ;;  %v4402_v54 = vmul.f32 %v4370_v42, %v8834_v20  ;;  %v4333_v5 = vmul.f32 0.5, %v8804_v18 }
 0xfb3   : > { %v4463_v36 = vadd.f32 %v4431_v49, %v8819_v24  ;;  %v4433_v1 = vmul.f32 0.044715, %v4401_v61  ;;  %v4334_v35 = vmul.f32 0.5, %v8809_v60  ;;  %v4335_v42 = vmul.f32 0.5, %v8819_v24 }
 0xfb4   : > { %v4464_v29 = vadd.f32 %v4432_v12, %v8823_v17  ;;  %v4434_v21 = vmul.f32 0.044715, %v4402_v54  ;;  %v4336_v24 = vmul.f32 0.5, %v8823_v17 }
 0xfb5   : > { %v4495_v19 = vmul.f32 0.7978846, %v4463_v36  ;;  %v4465_v39 = vadd.f32 %v4433_v1, %v4267_v7 }
 0xfb6   : > { %v4496_v26 = vmul.f32 0.7978846, %v4464_v29  ;;  %v4466_v2 = vadd.f32 %v4434_v21, %v8834_v20  ;;  %v4337_v29 = vmul.f32 0.5, %v4267_v7 }
 0xfb7   : > { %6571 = vtanh.f32 %v4495_v19  ;;  %v4497_v41 = vmul.f32 0.7978846, %v4465_v39 }
 0xfb8   : > { %6573 = vtanh.f32 %v4496_v26  ;;  %v4498_v53 = vmul.f32 0.7978846, %v4466_v2 }
 0xfb9   : > { %v6564_v30 = vpop.eup %6563  ;;  %6575 = vtanh.f32 %v4497_v41 }
 0xfba   : > { %v6566_v55 = vpop.eup %6565  ;;  %v4555_v57 = vadd.f32 1.0, %v6564_v30  ;;  %v4272_v34 = vpop.f32.mrb[96].mxu0  ;;  %6577 = vtanh.f32 %v4498_v53 }
 0xfbb   : > { %v6568_v31 = vpop.eup %6567  ;;  %v8844_v40 = vadd.f32 %v4272_v34, %v8795_v38  ;;  %v4274_v3 = vpop.f32.mrb[97].mxu0  ;;  %v4556_v47 = vadd.f32 1.0, %v6566_v55 }
 0xfbc   : > { %v6570_v44 = vpop.eup %6569  ;;  %v4557_v27 = vadd.f32 1.0, %v6568_v31  ;;  %v8849_v10 = vadd.f32 %v4274_v3, %v8797_v48  ;;  %v4276_v4 = vpop.f32.mrb[98].mxu0  ;;  %v4587_v50 = vmul.f32 %v4555_v57, %v4331_v15 }
 0xfbd   : > { %v4371_v32 = vmul.f32 %v8844_v40, %v8844_v40  ;;  %v8855_v45 = vadd.f32 %v4276_v4, %v8795_v38  ;;  %v4278_v37 = vpop.f32.mrb[99].mxu0  ;;  %v4558_v51 = vadd.f32 1.0, %v6570_v44  ;;  %v4588_v49 = vmul.f32 %v4556_v47, %v4332_v13 }
 0xfbe   : > { %v4589_v22 = vmul.f32 %v4557_v27, %v4333_v5  ;;  %v4372_v18 = vmul.f32 %v8849_v10, %v8849_v10  ;;  %v8860_v8 = vadd.f32 %v4278_v37, %v8797_v48 }
 0xfbf   : > { %v4403_v62 = vmul.f32 %v4371_v32, %v8844_v40  ;;  %v4373_v60 = vmul.f32 %v8855_v45, %v8855_v45  ;;  %v4590_v58 = vmul.f32 %v4558_v51, %v4334_v35 }
 0xfc0   : > { %v4404_v12 = vmul.f32 %v4372_v18, %v8849_v10  ;;  %v4374_v36 = vmul.f32 %v8860_v8, %v8860_v8  ;;  %v4619_v61 = vpack.c.bf16 %v4589_v22, %v4587_v50 }
 0xfc1   : > { %v6572_v54 = vpop.eup %6571  ;;  %v4435_v19 = vmul.f32 0.044715, %v4403_v62  ;;  %v4405_v1 = vmul.f32 %v4373_v60, %v8855_v45  ;;  %v4620_v21 = vpack.c.bf16 %v4590_v58, %v4588_v49 }
 0xfc2   : > { %v6574_v26 = vpop.eup %6573  ;;  %v4559_v39 = vadd.f32 1.0, %v6572_v54  ;;  %v4436_v2 = vmul.f32 0.044715, %v4404_v12  ;;  %v4406_v30 = vmul.f32 %v4374_v36, %v8860_v8  ;;  %v4282_v41 = vpop.f32.mrb[100].mxu0 }
 0xfc3   : > { %v4467_v53 = vadd.f32 %v4435_v19, %v8844_v40  ;;  %v4437_v55 = vmul.f32 0.044715, %v4405_v1  ;;  %v8874_v15 = vadd.f32 %v4282_v41, %v8795_v38  ;;  %v4284_v57 = vpop.f32.mrb[101].mxu0  ;;  %4795 = vmatprep.mubr.bf16.mxu0 %v4620_v21  ;;  %v4560_v7 = vadd.f32 1.0, %v6574_v26  ;;  %v6576_v44 = vpop.eup %6575 }
 0xfc4   : > { %v4591_v34 = vmul.f32 %v4559_v39, %v4335_v42  ;;  %v4468_v31 = vadd.f32 %v4436_v2, %v8849_v10  ;;  %v4438_v3 = vmul.f32 0.044715, %v4406_v30  ;;  %v8878_v13 = vadd.f32 %v4284_v57, %v8797_v48  ;;  %v4286_v47 = vpop.f32.mrb[102].mxu0  ;;  %4796 = vmatmul.mubr.bf16.vlgmr.msra.gmra.mrb[120].mxu0 %v4619_v61  ;;  %v6578_v22 = vpop.eup %6577 }
 0xfc5   : > { %v4499_v17 = vmul.f32 0.7978846, %v4467_v53  ;;  %v4469_v5 = vadd.f32 %v4437_v55, %v8855_v45  ;;  %v4375_v27 = vmul.f32 %v8874_v15, %v8874_v15  ;;  %v8884_v4 = vadd.f32 %v4286_v47, %v8795_v38  ;;  %v4288_v35 = vpop.f32.mrb[103].mxu0 }
 0xfc6   : > { %v4561_v32 = vadd.f32 1.0, %v6576_v44  ;;  %v4500_v37 = vmul.f32 0.7978846, %v4468_v31  ;;  %v4470_v51 = vadd.f32 %v4438_v3, %v8860_v8  ;;  %v4376_v50 = vmul.f32 %v8878_v13, %v8878_v13 }
 0xfc7   : > { %6579 = vtanh.f32 %v4499_v17  ;;  %v4501_v18 = vmul.f32 0.7978846, %v4469_v5  ;;  %v4407_v62 = vmul.f32 %v4375_v27, %v8874_v15  ;;  %v4377_v60 = vmul.f32 %v8884_v4, %v8884_v4 }
 0xfc8   : > { %v4593_v49 = vmul.f32 %v4561_v32, %v4337_v29  ;;  %6581 = vtanh.f32 %v4500_v37  ;;  %v4502_v58 = vmul.f32 0.7978846, %v4470_v51  ;;  %v4408_v42 = vmul.f32 %v4376_v50, %v8878_v13 }
 0xfc9   : > { %6583 = vtanh.f32 %v4501_v18  ;;  %v4439_v12 = vmul.f32 0.044715, %v4407_v62  ;;  %v4409_v36 = vmul.f32 %v4377_v60, %v8884_v4  ;;  %v4289_v61 = vadd.f32 %v4288_v35, %v8797_v48 }
 0xfca   : > { %6585 = vtanh.f32 %v4502_v58  ;;  %v4440_v54 = vmul.f32 0.044715, %v4408_v42  ;;  %v4338_v19 = vmul.f32 0.5, %v8834_v20  ;;  %v4562_v1 = vadd.f32 1.0, %v6578_v22 }
 0xfcb   : > { %v4471_v21 = vadd.f32 %v4439_v12, %v8874_v15  ;;  %v4441_v26 = vmul.f32 0.044715, %v4409_v36  ;;  %v4378_v39 = vmul.f32 %v4289_v61, %v4289_v61  ;;  %v4621_v29 = vpack.c.bf16 %v4593_v49, %v4591_v34 }
 0xfcc   : > { %v4472_v2 = vadd.f32 %v4440_v54, %v8878_v13  ;;  %v4592_v30 = vmul.f32 %v4560_v7, %v4336_v24  ;;  %v4594_v41 = vmul.f32 %v4562_v1, %v4338_v19  ;;  %v4339_v32 = vmul.f32 0.5, %v8844_v40 }
 0xfcd   : > { %v4503_v53 = vmul.f32 0.7978846, %v4471_v21  ;;  %v4473_v55 = vadd.f32 %v4441_v26, %v8884_v4  ;;  %v4410_v57 = vmul.f32 %v4378_v39, %v4289_v61  ;;  %v4341_v37 = vmul.f32 0.5, %v8855_v45 }
 0xfce   : > { %v4504_v31 = vmul.f32 0.7978846, %v4472_v2  ;;  %v4622_v3 = vpack.c.bf16 %v4594_v41, %v4592_v30  ;;  %v4340_v50 = vmul.f32 0.5, %v8849_v10  ;;  %v4342_v22 = vmul.f32 0.5, %v8860_v8 }
 0xfcf   : > { %6587 = vtanh.f32 %v4503_v53  ;;  %v4505_v47 = vmul.f32 0.7978846, %v4473_v55  ;;  %v4442_v44 = vmul.f32 0.044715, %v4410_v57  ;;  %v4343_v40 = vmul.f32 0.5, %v8874_v15 }
 0xfd0   : > { %6589 = vtanh.f32 %v4504_v31  ;;  %4803 = vmatprep.mubr.bf16.mxu1 %v4622_v3  ;;  %v4345_v45 = vmul.f32 0.5, %v8884_v4  ;;  %v4346_v2 = vmul.f32 0.5, %v4289_v61 }
 0xfd1   : > { %v6580_v20 = vpop.eup %6579  ;;  %6591 = vtanh.f32 %v4505_v47  ;;  %v4474_v17 = vadd.f32 %v4442_v44, %v4289_v61  ;;  %4804 = vmatmul.mubr.bf16.vlgmr.msra.gmra.mrb[104].mxu1 %v4621_v29  ;;  %v4344_v29 = vmul.f32 0.5, %v8878_v13 }
 0xfd2   : > { %v6582_v34 = vpop.eup %6581  ;;  %v4563_v5 = vadd.f32 1.0, %v6580_v20 }
 0xfd3   : > { %v6584_v27 = vpop.eup %6583  ;;  %v4506_v24 = vmul.f32 0.7978846, %v4474_v17  ;;  %v4564_v7 = vadd.f32 1.0, %v6582_v34 }
 0xfd4   : > { %v6586_v35 = vpop.eup %6585  ;;  %v4565_v51 = vadd.f32 1.0, %v6584_v27  ;;  %v4595_v62 = vmul.f32 %v4563_v5, %v4339_v32 }
 0xfd5   : > { %6593 = vtanh.f32 %v4506_v24  ;;  %v4566_v18 = vadd.f32 1.0, %v6586_v35  ;;  %v4596_v49 = vmul.f32 %v4564_v7, %v4340_v50 }
 0xfd6   : > { %v4597_v60 = vmul.f32 %v4565_v51, %v4341_v37 }
 0xfd7   : > { %v4598_v58 = vmul.f32 %v4566_v18, %v4342_v22 }
 0xfd8   : > { %v4623_v42 = vpack.c.bf16 %v4597_v60, %v4595_v62 }
 0xfd9   : > { %v6588_v12 = vpop.eup %6587  ;;  %v4624_v36 = vpack.c.bf16 %v4598_v58, %v4596_v49 }
 0xfda   : > { %v6590_v54 = vpop.eup %6589  ;;  %v4567_v19 = vadd.f32 1.0, %v6588_v12 }
 0xfdb   : > { %v6592_v1 = vpop.eup %6591  ;;  %4811 = vmatprep.mubr.bf16.mxu1 %v4624_v36  ;;  %v4568_v21 = vadd.f32 1.0, %v6590_v54 }
 0xfdc   : > { %4812 = vmatmul.mubr.bf16.gmra.mrb[108].mxu1 %v4623_v42  ;;  %v4569_v10 = vadd.f32 1.0, %v6592_v1  ;;  %v4599_v8 = vmul.f32 %v4567_v19, %v4343_v40 }
 0xfdd   : > { %v4600_v53 = vmul.f32 %v4568_v21, %v4344_v29 }
 0xfde   : > { %v4601_v26 = vmul.f32 %v4569_v10, %v4345_v45 }
 0xfdf   : > { %v6594_v39 = vpop.eup %6593 }
 0xfe0   : > { %v4570_v30 = vadd.f32 1.0, %v6594_v39  ;;  %v4625_v41 = vpack.c.bf16 %v4601_v26, %v4599_v8 }
 0xfe2   : > { %v4602_v55 = vmul.f32 %v4570_v30, %v4346_v2 }
 0xfe4   : > { %v4626_v57 = vpack.c.bf16 %v4602_v55, %v4600_v53 }
 0xfe6   : > { %4819 = vmatprep.mubr.bf16.mxu1 %v4626_v57 }
 0xfe7   : > { %4820 = vmatmul.mubr.bf16.gmra.mrb[112].mxu1 %v4625_v41 }
0x100d   : > { %v4292_v31 = vpop.f32.mrb[104].mxu0 }
0x100e   : > { %v4293_v15 = vadd.f32 %v4292_v31, %v8795_v38  ;;  %v4294_v3 = vpop.f32.mrb[105].mxu0 }
0x100f   : > { %v4295_v4 = vadd.f32 %v4294_v3, %v8797_v48  ;;  %v4296_v47 = vpop.f32.mrb[106].mxu0 }
0x1010   : > { %v4379_v44 = vmul.f32 %v4293_v15, %v4293_v15  ;;  %v4297_v20 = vadd.f32 %v4296_v47, %v8795_v38  ;;  %v4298_v17 = vpop.f32.mrb[107].mxu0  ;;  %v8913_v60 = vmul.f32 0.5, %v4293_v15 }
0x1011   : > { %v4380_v13 = vmul.f32 %v4295_v4, %v4295_v4  ;;  %v4299_v61 = vadd.f32 %v4298_v17, %v8797_v48  ;;  %v8916_v36 = vmul.f32 0.5, %v4295_v4 }
0x1012   : > { %v4411_v34 = vmul.f32 %v4379_v44, %v4293_v15  ;;  %v4381_v5 = vmul.f32 %v4297_v20, %v4297_v20  ;;  %v8928_v31 = vmul.f32 0.5, %v4297_v20 }
0x1013   : > { %v4412_v27 = vmul.f32 %v4380_v13, %v4295_v4  ;;  %v4382_v24 = vmul.f32 %v4299_v61, %v4299_v61  ;;  %v8930_v47 = vmul.f32 0.5, %v4299_v61 }
0x1014   : > { %v4443_v7 = vmul.f32 0.044715, %v4411_v34  ;;  %v4413_v35 = vmul.f32 %v4381_v5, %v4297_v20 }
0x1015   : > { %v4444_v32 = vmul.f32 0.044715, %v4412_v27  ;;  %v4414_v37 = vmul.f32 %v4382_v24, %v4299_v61  ;;  %v4302_v51 = vpop.f32.mrb[108].mxu0 }
0x1016   : > { %v4475_v50 = vadd.f32 %v4443_v7, %v4293_v15  ;;  %v4445_v22 = vmul.f32 0.044715, %v4413_v35  ;;  %v8911_v18 = vadd.f32 %v4302_v51, %v8795_v38  ;;  %v4304_v62 = vpop.f32.mrb[109].mxu0 }
0x1017   : > { %v4476_v49 = vadd.f32 %v4444_v32, %v4295_v4  ;;  %v4446_v58 = vmul.f32 0.044715, %v4414_v37  ;;  %v4305_v42 = vadd.f32 %v4304_v62, %v8797_v48  ;;  %v4306_v12 = vpop.f32.mrb[110].mxu0 }
0x1018   : > { %v4507_v54 = vmul.f32 0.7978846, %v4475_v50  ;;  %v4477_v19 = vadd.f32 %v4445_v22, %v4297_v20  ;;  %v4383_v1 = vmul.f32 %v8911_v18, %v8911_v18  ;;  %v8921_v40 = vadd.f32 %v4306_v12, %v8795_v38  ;;  %v4308_v45 = vpop.f32.mrb[111].mxu0 }
0x1019   : > { %v4508_v10 = vmul.f32 0.7978846, %v4476_v49  ;;  %v4478_v21 = vadd.f32 %v4446_v58, %v4299_v61  ;;  %v4384_v8 = vmul.f32 %v4305_v42, %v4305_v42  ;;  %v4309_v26 = vadd.f32 %v4308_v45, %v8797_v48 }
0x101a   : > { %6595 = vtanh.f32 %v4507_v54  ;;  %v4509_v39 = vmul.f32 0.7978846, %v4477_v19  ;;  %v4415_v29 = vmul.f32 %v4383_v1, %v8911_v18  ;;  %v4385_v2 = vmul.f32 %v8921_v40, %v8921_v40 }
0x101b   : > { %6597 = vtanh.f32 %v4508_v10  ;;  %v4510_v30 = vmul.f32 0.7978846, %v4478_v21  ;;  %v4416_v41 = vmul.f32 %v4384_v8, %v4305_v42  ;;  %v4386_v53 = vmul.f32 %v4309_v26, %v4309_v26 }
0x101c   : > { %6599 = vtanh.f32 %v4509_v39  ;;  %v4447_v55 = vmul.f32 0.044715, %v4415_v29  ;;  %v4417_v57 = vmul.f32 %v4385_v2, %v8921_v40  ;;  %v8932_v44 = vmul.f32 0.5, %v4305_v42 }
0x101d   : > { %v4448_v15 = vmul.f32 0.044715, %v4416_v41  ;;  %v4418_v3 = vmul.f32 %v4386_v53, %v4309_v26  ;;  %v4312_v4 = vpop.f32.mrb[112].mxu0  ;;  %6601 = vtanh.f32 %v4510_v30  ;;  %v8941_v35 = vmul.f32 0.5, %v4309_v26 }
0x101e   : > { %v4479_v17 = vadd.f32 %v4447_v55, %v8911_v18  ;;  %v4449_v13 = vmul.f32 0.044715, %v4417_v57  ;;  %v8936_v34 = vadd.f32 %v4312_v4, %v8795_v38  ;;  %v4314_v5 = vpop.f32.mrb[113].mxu0 }
0x101f   : > { %v4480_v27 = vadd.f32 %v4448_v15, %v4305_v42  ;;  %v4450_v24 = vmul.f32 0.044715, %v4418_v3  ;;  %v8939_v20 = vadd.f32 %v4314_v5, %v8797_v48  ;;  %v4316_v7 = vpop.f32.mrb[114].mxu0 }
0x1020   : > { %v4511_v61 = vmul.f32 0.7978846, %v4479_v17  ;;  %v4481_v32 = vadd.f32 %v4449_v13, %v8921_v40  ;;  %v4387_v37 = vmul.f32 %v8936_v34, %v8936_v34  ;;  %v8947_v51 = vadd.f32 %v4316_v7, %v8795_v38  ;;  %v4318_v50 = vpop.f32.mrb[115].mxu0 }
0x1021   : > { %v4512_v22 = vmul.f32 0.7978846, %v4480_v27  ;;  %v4482_v62 = vadd.f32 %v4450_v24, %v4309_v26  ;;  %v4388_v49 = vmul.f32 %v8939_v20, %v8939_v20  ;;  %v8952_v58 = vadd.f32 %v4318_v50, %v8797_v48 }
0x1022   : > { %6603 = vtanh.f32 %v4511_v61  ;;  %v4513_v42 = vmul.f32 0.7978846, %v4481_v32  ;;  %v4419_v12 = vmul.f32 %v4387_v37, %v8936_v34  ;;  %v4389_v54 = vmul.f32 %v8947_v51, %v8947_v51 }
0x1023   : > { %6605 = vtanh.f32 %v4512_v22  ;;  %v4514_v19 = vmul.f32 0.7978846, %v4482_v62  ;;  %v4420_v1 = vmul.f32 %v4388_v49, %v8939_v20  ;;  %v4390_v45 = vmul.f32 %v8952_v58, %v8952_v58 }
0x1024   : > { %v6596_v10 = vpop.eup %6595  ;;  %6607 = vtanh.f32 %v4513_v42  ;;  %v4451_v21 = vmul.f32 0.044715, %v4419_v12  ;;  %v4421_v8 = vmul.f32 %v4389_v54, %v8947_v51  ;;  %v8962_v26 = vmul.f32 0.5, %v8911_v18 }
0x1025   : > { %v6598_v39 = vpop.eup %6597  ;;  %6609 = vtanh.f32 %v4514_v19  ;;  %v4452_v29 = vmul.f32 0.044715, %v4420_v1  ;;  %v4422_v2 = vmul.f32 %v4390_v45, %v8952_v58  ;;  %v4322_v30 = vpop.f32.mrb[116].mxu0  ;;  %v4571_v41 = vadd.f32 1.0, %v6596_v10 }
0x1026   : > { %v6600_v53 = vpop.eup %6599  ;;  %v4483_v55 = vadd.f32 %v4451_v21, %v8936_v34  ;;  %v4453_v57 = vmul.f32 0.044715, %v4421_v8  ;;  %v8967_v15 = vadd.f32 %v4322_v30, %v8795_v38  ;;  %v4324_v3 = vpop.f32.mrb[117].mxu0  ;;  %v4572_v4 = vadd.f32 1.0, %v6598_v39 }
0x1027   : > { %v4484_v17 = vadd.f32 %v4452_v29, %v8939_v20  ;;  %v4454_v18 = vmul.f32 0.044715, %v4422_v2  ;;  %v8971_v13 = vadd.f32 %v4324_v3, %v8797_v48  ;;  %v4326_v5 = vpop.f32.mrb[118].mxu0  ;;  %v4573_v27 = vadd.f32 1.0, %v6600_v53  ;;  %v6602_v24 = vpop.eup %6601 }
0x1028   : > { %v4515_v7 = vmul.f32 0.7978846, %v4483_v55  ;;  %v4485_v61 = vadd.f32 %v4453_v57, %v8947_v51  ;;  %v4391_v32 = vmul.f32 %v8967_v15, %v8967_v15  ;;  %v8977_v37 = vadd.f32 %v4326_v5, %v8795_v38  ;;  %v4328_v50 = vpop.f32.mrb[119].mxu0 }
0x1029   : > { %v4516_v22 = vmul.f32 0.7978846, %v4484_v17  ;;  %v4486_v62 = vadd.f32 %v4454_v18, %v8952_v58  ;;  %v4392_v49 = vmul.f32 %v8971_v13, %v8971_v13  ;;  %v8983_v42 = vadd.f32 %v4328_v50, %v8797_v48 }
0x102a   : > { %6611 = vtanh.f32 %v4515_v7  ;;  %v4517_v12 = vmul.f32 0.7978846, %v4485_v61  ;;  %v4423_v54 = vmul.f32 %v4391_v32, %v8967_v15  ;;  %v4393_v19 = vmul.f32 %v8977_v37, %v8977_v37 }
0x102b   : > { %6613 = vtanh.f32 %v4516_v22  ;;  %v4518_v38 = vmul.f32 0.7978846, %v4486_v62  ;;  %v4424_v1 = vmul.f32 %v4392_v49, %v8971_v13  ;;  %v4394_v45 = vmul.f32 %v8983_v42, %v8983_v42 }
0x102c   : > { %v6604_v10 = vpop.eup %6603  ;;  %6615 = vtanh.f32 %v4517_v12  ;;  %v4455_v21 = vmul.f32 0.044715, %v4423_v54  ;;  %v4425_v48 = vmul.f32 %v4393_v19, %v8977_v37  ;;  %v4574_v8 = vadd.f32 1.0, %v6602_v24 }
0x102d   : > { %v6606_v39 = vpop.eup %6605  ;;  %6617 = vtanh.f32 %v4518_v38  ;;  %v4456_v29 = vmul.f32 0.044715, %v4424_v1  ;;  %v4426_v2 = vmul.f32 %v4394_v45, %v8983_v42  ;;  %v4604_v30 = vmul.f32 %v4572_v4, %v8916_v36 }
0x102e   : > { %v6608_v53 = vpop.eup %6607  ;;  %v4487_v55 = vadd.f32 %v4455_v21, %v8967_v15  ;;  %v4457_v57 = vmul.f32 0.044715, %v4425_v48  ;;  %v4606_v3 = vmul.f32 %v4574_v8, %v8930_v47  ;;  %v4603_v17 = vmul.f32 %v4571_v41, %v8913_v60 }
0x102f   : > { %v6610_v18 = vpop.eup %6609  ;;  %v4488_v5 = vadd.f32 %v4456_v29, %v8971_v13  ;;  %v4458_v7 = vmul.f32 0.044715, %v4426_v2  ;;  %v4605_v24 = vmul.f32 %v4573_v27, %v8928_v31  ;;  %v4576_v61 = vadd.f32 1.0, %v6606_v39 }
0x1030   : > { %v4519_v32 = vmul.f32 0.7978846, %v4487_v55  ;;  %v4489_v50 = vadd.f32 %v4457_v57, %v8977_v37  ;;  %v4628_v22 = vpack.c.bf16 %v4606_v3, %v4604_v30  ;;  %v4578_v36 = vadd.f32 1.0, %v6610_v18 }
0x1031   : > { %v4520_v4 = vmul.f32 0.7978846, %v4488_v5  ;;  %v4490_v62 = vadd.f32 %v4458_v7, %v8983_v42  ;;  %v4627_v49 = vpack.c.bf16 %v4605_v24, %v4603_v17  ;;  %v4608_v47 = vmul.f32 %v4576_v61, %v8932_v44 }
0x1032   : > { %6619 = vtanh.f32 %v4519_v32  ;;  %v4521_v60 = vmul.f32 0.7978846, %v4489_v50  ;;  %4827 = vmatprep.mubr.bf16.mxu1 %v4628_v22  ;;  %v4610_v41 = vmul.f32 %v4578_v36, %v8941_v35  ;;  %v4575_v12 = vadd.f32 1.0, %v6604_v10 }
0x1033   : > { %6621 = vtanh.f32 %v4520_v4  ;;  %v4522_v31 = vmul.f32 0.7978846, %v4490_v62  ;;  %4828 = vmatmul.mubr.bf16.gmra.mrb[116].mxu1 %v4627_v49  ;;  %v4353_v27 = vmul.f32 0.5, %v8921_v40  ;;  %v4577_v54 = vadd.f32 1.0, %v6608_v53 }
0x1034   : > { %v6612_v19 = vpop.eup %6611  ;;  %6623 = vtanh.f32 %v4521_v60  ;;  %v4630_v38 = vpack.c.bf16 %v4610_v41, %v4608_v47  ;;  %v4607_v45 = vmul.f32 %v4575_v12, %v8962_v26  ;;  %v4355_v39 = vmul.f32 0.5, %v8936_v34 }
0x1035   : > { %v6614_v1 = vpop.eup %6613  ;;  %6625 = vtanh.f32 %v4522_v31  ;;  %v4609_v44 = vmul.f32 %v4577_v54, %v4353_v27  ;;  %v4579_v21 = vadd.f32 1.0, %v6612_v19  ;;  %v4357_v29 = vmul.f32 0.5, %v8947_v51 }
0x1036   : > { %v6616_v48 = vpop.eup %6615  ;;  %4835 = vmatprep.mubr.bf16.mxu1 %v4630_v38  ;;  %v4580_v8 = vadd.f32 1.0, %v6614_v1  ;;  %v4356_v2 = vmul.f32 0.5, %v8939_v20  ;;  %v4358_v30 = vmul.f32 0.5, %v8952_v58  ;;  %v4359_v32 = vmul.f32 0.5, %v8967_v15 }
0x1037   : > { %v6618_v35 = vpop.eup %6617  ;;  %v4629_v10 = vpack.c.bf16 %v4609_v44, %v4607_v45  ;;  %v4581_v40 = vadd.f32 1.0, %v6616_v48  ;;  %v4611_v55 = vmul.f32 %v4579_v21, %v4355_v39  ;;  %v4361_v20 = vmul.f32 0.5, %v8977_v37 }
0x1038   : > { %v4582_v53 = vadd.f32 1.0, %v6618_v35  ;;  %v4612_v26 = vmul.f32 %v4580_v8, %v4356_v2  ;;  %v4360_v50 = vmul.f32 0.5, %v8971_v13  ;;  %v4362_v22 = vmul.f32 0.5, %v8983_v42  ;;  %v9016_v13 = vld [vmem:[%s9321_s12] ss:$0 sm:$0xff] }
0x1039   : > { %v4613_v57 = vmul.f32 %v4581_v40, %v4357_v29 }
0x103a   : > { %v4614_v3 = vmul.f32 %v4582_v53, %v4358_v30 }
0x103b   : > { %4836 = vmatmul.mubr.bf16.gmra.mrb[120].mxu1 %v4629_v10  ;;  %v4631_v17 = vpack.c.bf16 %v4613_v57, %v4611_v55 }
0x103c   : > { %v6620_v18 = vpop.eup %6619  ;;  %v4632_v5 = vpack.c.bf16 %v4614_v3, %v4612_v26 }
0x103d   : > { %v6622_v7 = vpop.eup %6621  ;;  %v4583_v24 = vadd.f32 1.0, %v6620_v18 }
0x103e   : > { %v6624_v61 = vpop.eup %6623  ;;  %4843 = vmatprep.mubr.bf16.mxu1 %v4632_v5  ;;  %v4584_v34 = vadd.f32 1.0, %v6622_v7 }
0x103f   : > { %v6626_v51 = vpop.eup %6625  ;;  %v4585_v58 = vadd.f32 1.0, %v6624_v61  ;;  %v4615_v4 = vmul.f32 %v4583_v24, %v4359_v32 }
0x1040   : > { %v4586_v36 = vadd.f32 1.0, %v6626_v51  ;;  %v4616_v49 = vmul.f32 %v4584_v34, %v4360_v50 }
0x1041   : > { %v4617_v62 = vmul.f32 %v4585_v58, %v4361_v20 }
0x1042   : > { %v4618_v47 = vmul.f32 %v4586_v36, %v4362_v22 }
0x1043   : > { %4844 = vmatmul.mubr.bf16.gmra.mrb[124].mxu1 %v4631_v17  ;;  %v4633_v60 = vpack.c.bf16 %v4617_v62, %v4615_v4 }
0x1044   : > { %v4634_v41 = vpack.c.bf16 %v4618_v47, %v4616_v49 }
0x1046   : > { %4851 = vmatprep.mubr.bf16.mxu1 %v4634_v41 }
0x104b   : > { %4852 = vmatmul.mubr.bf16.gmra.mrb[128].mxu1 %v4633_v60 }
0x1097   : > { %v5582_v12 = vpop.f32.mrb[120].mxu0 }
0x1098   : > { %v5583_v31 = vpop.f32.mrb[121].mxu0 }
0x1099   : > { %v5584_v15 = vadd.f32 %v5583_v31, %v5582_v12  ;;  %v5585_v27 = vpop.f32.mrb[122].mxu0 }
0x109a   : > { %v5586_v37 = vpop.f32.mrb[123].mxu0 }
0x109b   : > { %v4860_v42 = vadd.f32 %v5584_v15, %v8489_v14  ;;  %v5587_v54 = vadd.f32 %v5586_v37, %v5585_v27 }
0x109d   : > { %v4861_v19 = vadd.f32 %v5587_v54, %v8492_v52  ;;  %v9021_v38 = vadd.f32 %v9016_v13, %v4860_v42 }
0x109f   : > { %4901 = vadd.xlane.f32.xlu0 %v9021_v38  ;;  %v9025_v1 = vadd.f32 %v9016_v13, %v4861_v19 }
0x10a1   : > { %4903 = vadd.xlane.f32.xlu1 %v9025_v1 }
0x10a4   : > { %v5588_v45 = vpop.f32.mrb[104].mxu1 }
0x10a5   : > { %v5589_v44 = vpop.f32.mrb[105].mxu1 }
0x10a6   : > { %v5590_v21 = vadd.f32 %v5589_v44, %v5588_v45  ;;  %v5591_v48 = vpop.f32.mrb[106].mxu1 }
0x10a7   : > { %v5592_v8 = vpop.f32.mrb[107].mxu1 }
0x10a8   : > { %v4862_v14 = vadd.f32 %v5590_v21, %v8495_v9  ;;  %v5593_v35 = vadd.f32 %v5592_v8, %v5591_v48 }
0x10aa   : > { %v4863_v52 = vadd.f32 %v5593_v35, %v8500_v0  ;;  %v9031_v10 = vadd.f32 %v9016_v13, %v4862_v14 }
0x10ac   : > { %4905 = vadd.xlane.f32.xlu0 %v9031_v10  ;;  %v9035_v39 = vadd.f32 %v9016_v13, %v4863_v52 }
0x10ae   : > { %4907 = vadd.xlane.f32.xlu1 %v9035_v39 }
0x10af   : > { %v5594_v29 = vpop.f32.mrb[108].mxu1 }
0x10b0   : > { %v5595_v40 = vpop.f32.mrb[109].mxu1 }
0x10b1   : > { %v5596_v2 = vadd.f32 %v5595_v40, %v5594_v29  ;;  %v5597_v30 = vpop.f32.mrb[110].mxu1 }
0x10b2   : > { %v5598_v53 = vpop.f32.mrb[111].mxu1 }
0x10b3   : > { %v4864_v9 = vadd.f32 %v5596_v2, %v8505_v23  ;;  %v5599_v55 = vadd.f32 %v5598_v53, %v5597_v30 }
0x10b5   : > { %v4865_v0 = vadd.f32 %v5599_v55, %v8509_v11  ;;  %v9041_v57 = vadd.f32 %v9016_v13, %v4864_v9 }
0x10b7   : > { %4909 = vadd.xlane.f32.xlu0 %v9041_v57  ;;  %v9045_v26 = vadd.f32 %v9016_v13, %v4865_v0 }
0x10b9   : > { %4911 = vadd.xlane.f32.xlu1 %v9045_v26 }
0x10ba   : > { %v5600_v3 = vpop.f32.mrb[112].mxu1 }
0x10bb   : > { %v5601_v17 = vpop.f32.mrb[113].mxu1 }
0x10bc   : > { %v5602_v18 = vadd.f32 %v5601_v17, %v5600_v3  ;;  %v5603_v5 = vpop.f32.mrb[114].mxu1 }
0x10bd   : > { %v5604_v7 = vpop.f32.mrb[115].mxu1 }
0x10be   : > { %v4866_v23 = vadd.f32 %v5602_v18, %v8512_v6  ;;  %v5605_v24 = vadd.f32 %v5604_v7, %v5603_v5 }
0x10c0   : > { %v4867_v11 = vadd.f32 %v5605_v24, %v8515_v59  ;;  %v9051_v61 = vadd.f32 %v9016_v13, %v4866_v23 }
0x10c2   : > { %4913 = vadd.xlane.f32.xlu0 %v9051_v61  ;;  %v9055_v34 = vadd.f32 %v9016_v13, %v4867_v11 }
0x10c4   : > { %4915 = vadd.xlane.f32.xlu1 %v9055_v34 }
0x1106   : > { %v5606_v51 = vpop.f32.mrb[116].mxu1 }
0x1107   : > { %v5607_v32 = vpop.f32.mrb[117].mxu1 }
0x1108   : > { %v5608_v20 = vadd.f32 %v5607_v32, %v5606_v51  ;;  %v5609_v58 = vpop.f32.mrb[118].mxu1 }
0x1109   : > { %v5610_v50 = vpop.f32.mrb[119].mxu1 }
0x110a   : > { %v4868_v6 = vadd.f32 %v5608_v20, %v8521_v43  ;;  %v5611_v22 = vadd.f32 %v5610_v50, %v5609_v58 }
0x110c   : > { %v4869_v59 = vadd.f32 %v5611_v22, %v8525_v56  ;;  %v9061_v36 = vadd.f32 %v9016_v13, %v4868_v6 }
0x110e   : > { %v5612_v4 = vpop.f32.mrb[120].mxu1  ;;  %4917 = vadd.xlane.f32.xlu0 %v9061_v36  ;;  %v9065_v62 = vadd.f32 %v9016_v13, %v4869_v59 }
0x110f   : > { %v5613_v49 = vpop.f32.mrb[121].mxu1 }
0x1110   : > { %v5614_v47 = vadd.f32 %v5613_v49, %v5612_v4  ;;  %v5615_v60 = vpop.f32.mrb[122].mxu1  ;;  %4919 = vadd.xlane.f32.xlu1 %v9065_v62 }
0x1111   : > { %v5616_v41 = vpop.f32.mrb[123].mxu1 }
0x1112   : > { %v4870_v43 = vadd.f32 %v5614_v47, %v8528_v16  ;;  %v5617_v12 = vadd.f32 %v5616_v41, %v5615_v60 }
0x1114   : > { %v4871_v56 = vadd.f32 %v5617_v12, %v8531_v63  ;;  %v9071_v31 = vadd.f32 %v9016_v13, %v4870_v43 }
0x1116   : > { %v5618_v15 = vpop.f32.mrb[124].mxu1  ;;  %4921 = vadd.xlane.f32.xlu0 %v9071_v31  ;;  %v9075_v27 = vadd.f32 %v9016_v13, %v4871_v56 }
0x1117   : > { %v5619_v37 = vpop.f32.mrb[125].mxu1 }
0x1118   : > { %v5620_v42 = vadd.f32 %v5619_v37, %v5618_v15  ;;  %v5621_v54 = vpop.f32.mrb[126].mxu1  ;;  %4923 = vadd.xlane.f32.xlu1 %v9075_v27 }
0x1119   : > { %v5622_v19 = vpop.f32.mrb[127].mxu1 }
0x111a   : > { %v4872_v16 = vadd.f32 %v5620_v42, %v8537_v28  ;;  %v5623_v45 = vadd.f32 %v5622_v19, %v5621_v54 }
0x111c   : > { %v4873_v63 = vadd.f32 %v5623_v45, %v8541_v25  ;;  %v9081_v44 = vadd.f32 %v9016_v13, %v4872_v16 }
0x111e   : > { %4925 = vadd.xlane.f32.xlu0 %v9081_v44  ;;  %v5624_v21 = vpop.f32.mrb[128].mxu1  ;;  %v9085_v48 = vadd.f32 %v9016_v13, %v4873_v63 }
0x111f   : > { %v5625_v8 = vpop.f32.mrb[129].mxu1 }
0x1120   : > { %v5626_v14 = vadd.f32 %v5625_v8, %v5624_v21  ;;  %4927 = vadd.xlane.f32.xlu1 %v9085_v48  ;;  %v5627_v35 = vpop.f32.mrb[130].mxu1 }
0x1121   : > { %v5628_v52 = vpop.f32.mrb[131].mxu1 }
0x1122   : > { %v4874_v28 = vadd.f32 %v5626_v14, %v8544_v46  ;;  %v5629_v29 = vadd.f32 %v5628_v52, %v5627_v35 }
0x1124   : > { %v4875_v25 = vadd.f32 %v5629_v29, %v8547_v33  ;;  %v9091_v40 = vadd.f32 %v9016_v13, %v4874_v28 }
0x1126   : > { %4929 = vadd.xlane.f32.xlu0 %v9091_v40  ;;  %v9095_v2 = vadd.f32 %v9016_v13, %v4875_v25 }
0x1128   : > { %4931 = vadd.xlane.f32.xlu1 %v9095_v2 }
0x112c   : > { %v4902_v30 = vpop.xlane.xlu0 %4901 }
0x112d   : > { %v4933_v53 = vmul.f32 0.0078125, %v4902_v30 }
0x112e   : > { %v4904_v9 = vpop.xlane.xlu1 %4903 }
0x112f   : > { %v9099_v55 = vsub.f32 %v9021_v38, %v4933_v53  ;;  %v4934_v46 = vmul.f32 0.0078125, %v4904_v9 }
0x1131   : > { %v9102_v0 = vsub.f32 %v9025_v1, %v4934_v46  ;;  %v4965_v33 = vmul.f32 %v9099_v55, %v9099_v55 }
0x1133   : > { %4981 = vadd.xlane.f32.xlu0 %v4965_v33  ;;  %v4966_v13 = vmul.f32 %v9102_v0, %v9102_v0 }
0x1135   : > { %4983 = vadd.xlane.f32.xlu1 %v4966_v13 }
0x1139   : > { %v4906_v3 = vpop.xlane.xlu0 %4905 }
0x113a   : > { %v4935_v17 = vmul.f32 0.0078125, %v4906_v3 }
0x113b   : > { %v4908_v18 = vpop.xlane.xlu1 %4907 }
0x113c   : > { %v9109_v5 = vsub.f32 %v9031_v10, %v4935_v17  ;;  %v4936_v38 = vmul.f32 0.0078125, %v4908_v18 }
0x113e   : > { %v9112_v7 = vsub.f32 %v9035_v39, %v4936_v38  ;;  %v4967_v1 = vmul.f32 %v9109_v5, %v9109_v5  ;;  %v9182_v38 = vld [vmem:[%s9322_s13] ss:$0 sm:$0xff] }
0x1140   : > { %4985 = vadd.xlane.f32.xlu0 %v4967_v1  ;;  %v4968_v23 = vmul.f32 %v9112_v7, %v9112_v7 }
0x1142   : > { %4987 = vadd.xlane.f32.xlu1 %v4968_v23 }
0x1144   : > { %v4910_v24 = vpop.xlane.xlu0 %4909 }
0x1145   : > { %v4937_v11 = vmul.f32 0.0078125, %v4910_v24 }
0x1146   : > { %v4912_v51 = vpop.xlane.xlu1 %4911 }
0x1147   : > { %v9119_v32 = vsub.f32 %v9041_v57, %v4937_v11  ;;  %v4938_v10 = vmul.f32 0.0078125, %v4912_v51 }
0x1149   : > { %v9122_v20 = vsub.f32 %v9045_v26, %v4938_v10  ;;  %v4969_v39 = vmul.f32 %v9119_v32, %v9119_v32  ;;  %v9190_v10 = vld [vmem:[%s9323_s14] ss:$0 sm:$0xff] }
0x114b   : > { %4989 = vadd.xlane.f32.xlu0 %v4969_v39  ;;  %v4970_v58 = vmul.f32 %v9122_v20, %v9122_v20 }
0x114d   : > { %4991 = vadd.xlane.f32.xlu1 %v4970_v58 }
0x114f   : > { %v4914_v50 = vpop.xlane.xlu0 %4913 }
0x1150   : > { %v4939_v6 = vmul.f32 0.0078125, %v4914_v50 }
0x1151   : > { %v4916_v22 = vpop.xlane.xlu1 %4915 }
0x1152   : > { %v9129_v59 = vsub.f32 %v9051_v61, %v4939_v6  ;;  %v4940_v57 = vmul.f32 0.0078125, %v4916_v22 }
0x1154   : > { %v9132_v4 = vsub.f32 %v9055_v34, %v4940_v57  ;;  %v4971_v26 = vmul.f32 %v9129_v59, %v9129_v59 }
0x1156   : > { %4993 = vadd.xlane.f32.xlu0 %v4971_v26  ;;  %v4972_v49 = vmul.f32 %v9132_v4, %v9132_v4 }
0x1158   : > { %4995 = vadd.xlane.f32.xlu1 %v4972_v49 }
0x119b   : > { %v4918_v47 = vpop.xlane.xlu0 %4917 }
0x119c   : > { %v4941_v60 = vmul.f32 0.0078125, %v4918_v47 }
0x119d   : > { %v4920_v41 = vpop.xlane.xlu1 %4919 }
0x119e   : > { %v9139_v43 = vsub.f32 %v9061_v36, %v4941_v60  ;;  %v4942_v61 = vmul.f32 0.0078125, %v4920_v41 }
0x11a0   : > { %v9142_v12 = vsub.f32 %v9065_v62, %v4942_v61  ;;  %v4973_v34 = vmul.f32 %v9139_v43, %v9139_v43 }
0x11a2   : > { %4997 = vadd.xlane.f32.xlu0 %v4973_v34  ;;  %v4974_v56 = vmul.f32 %v9142_v12, %v9142_v12 }
0x11a3   : > { %v4922_v15 = vpop.xlane.xlu0 %4921 }
0x11a4   : > { %v4943_v37 = vmul.f32 0.0078125, %v4922_v15  ;;  %4999 = vadd.xlane.f32.xlu1 %v4974_v56 }
0x11a5   : > { %v4924_v42 = vpop.xlane.xlu1 %4923 }
0x11a6   : > { %v9149_v54 = vsub.f32 %v9071_v31, %v4943_v37  ;;  %v4944_v36 = vmul.f32 0.0078125, %v4924_v42 }
0x11a8   : > { %v9152_v19 = vsub.f32 %v9075_v27, %v4944_v36  ;;  %v4975_v62 = vmul.f32 %v9149_v54, %v9149_v54 }
0x11aa   : > { %5001 = vadd.xlane.f32.xlu0 %v4975_v62  ;;  %v4976_v16 = vmul.f32 %v9152_v19, %v9152_v19 }
0x11ab   : > { %v4926_v45 = vpop.xlane.xlu0 %4925 }
0x11ac   : > { %v4945_v63 = vmul.f32 0.0078125, %v4926_v45  ;;  %5003 = vadd.xlane.f32.xlu1 %v4976_v16 }
0x11ad   : > { %v4928_v21 = vpop.xlane.xlu1 %4927 }
0x11ae   : > { %v9159_v8 = vsub.f32 %v9081_v44, %v4945_v63  ;;  %v4946_v31 = vmul.f32 0.0078125, %v4928_v21 }
0x11b0   : > { %v9162_v14 = vsub.f32 %v9085_v48, %v4946_v31  ;;  %v4977_v27 = vmul.f32 %v9159_v8, %v9159_v8 }
0x11b2   : > { %5005 = vadd.xlane.f32.xlu0 %v4977_v27  ;;  %v4978_v35 = vmul.f32 %v9162_v14, %v9162_v14 }
0x11b3   : > { %v4930_v52 = vpop.xlane.xlu0 %4929 }
0x11b4   : > { %v4947_v28 = vmul.f32 0.0078125, %v4930_v52  ;;  %5007 = vadd.xlane.f32.xlu1 %v4978_v35 }
0x11b5   : > { %v4932_v29 = vpop.xlane.xlu1 %4931 }
0x11b6   : > { %v9169_v25 = vsub.f32 %v9091_v40, %v4947_v28  ;;  %v4948_v44 = vmul.f32 0.0078125, %v4932_v29 }
0x11b8   : > { %v9172_v30 = vsub.f32 %v9095_v2, %v4948_v44  ;;  %v4979_v48 = vmul.f32 %v9169_v25, %v9169_v25 }
0x11ba   : > { %5009 = vadd.xlane.f32.xlu0 %v4979_v48  ;;  %v4980_v53 = vmul.f32 %v9172_v30, %v9172_v30 }
0x11bc   : > { %5011 = vadd.xlane.f32.xlu1 %v4980_v53 }
0x11c0   : > { %v4982_v9 = vpop.xlane.xlu0 %4981 }
0x11c1   : > { %v5013_v46 = vmul.f32 0.0078125, %v4982_v9 }
0x11c2   : > { %v4984_v33 = vpop.xlane.xlu1 %4983 }
0x11c3   : > { %v5029_v13 = vadd.f32 1e-05, %v5013_v46  ;;  %v5014_v3 = vmul.f32 0.0078125, %v4984_v33 }
0x11c5   : > { %6627 = vrsqrt.f32 %v5029_v13  ;;  %v5030_v40 = vadd.f32 1e-05, %v5014_v3 }
0x11c7   : > { %6629 = vrsqrt.f32 %v5030_v40 }
0x11cd   : > { %v4986_v2 = vpop.xlane.xlu0 %4985 }
0x11ce   : > { %v5015_v17 = vmul.f32 0.0078125, %v4986_v2 }
0x11cf   : > { %v6628_v18 = vpop.eup %6627  ;;  %v4988_v1 = vpop.xlane.xlu1 %4987 }
0x11d0   : > { %v5061_v23 = vmul.f32 %v6628_v18, %v9099_v55  ;;  %v5031_v24 = vadd.f32 1e-05, %v5015_v17  ;;  %v5016_v11 = vmul.f32 0.0078125, %v4988_v1 }
0x11d1   : > { %v6630_v51 = vpop.eup %6629 }
0x11d2   : > { %v5083_v39 = vmul.f32 %v9182_v38, %v5061_v23  ;;  %v5062_v58 = vmul.f32 %v6630_v51, %v9102_v0  ;;  %6631 = vrsqrt.f32 %v5031_v24  ;;  %v5032_v50 = vadd.f32 1e-05, %v5016_v11 }
0x11d4   : > { %v5105_v6 = vadd.f32 %v9190_v10, %v5083_v39  ;;  %v5084_v22 = vmul.f32 %v9182_v38, %v5062_v58  ;;  %6633 = vrsqrt.f32 %v5032_v50 }
0x11d6   : > { %5121 = vst [vmem:[%s9196_s0] sm:$0xff] %v5105_v6  ;;  %v5106_v55 = vadd.f32 %v9190_v10, %v5084_v22 }
0x11d8   : > { %5122 = vst [vmem:[%s9196_s0 + $0x8] sm:$0xff] %v5106_v55  ;;  %v4990_v57 = vpop.xlane.xlu0 %4989 }
0x11d9   : > { %v5017_v26 = vmul.f32 0.0078125, %v4990_v57 }
0x11da   : > { %v4992_v49 = vpop.xlane.xlu1 %4991 }
0x11db   : > { %v5033_v0 = vadd.f32 1e-05, %v5017_v26  ;;  %v5018_v47 = vmul.f32 0.0078125, %v4992_v49 }
0x11dc   : > { %v6632_v60 = vpop.eup %6631 }
0x11dd   : > { %v5063_v41 = vmul.f32 %v6632_v60, %v9109_v5  ;;  %6635 = vrsqrt.f32 %v5033_v0  ;;  %v5034_v61 = vadd.f32 1e-05, %v5018_v47 }
0x11de   : > { %v6634_v34 = vpop.eup %6633 }
0x11df   : > { %v5085_v56 = vmul.f32 %v9182_v38, %v5063_v41  ;;  %v5064_v15 = vmul.f32 %v6634_v34, %v9112_v7  ;;  %6637 = vrsqrt.f32 %v5034_v61 }
0x11e1   : > { %v5107_v37 = vadd.f32 %v9190_v10, %v5085_v56  ;;  %v5086_v42 = vmul.f32 %v9182_v38, %v5064_v15 }
0x11e3   : > { %5123 = vst [vmem:[%s9196_s0 + $0x10] sm:$0xff] %v5107_v37  ;;  %v5108_v36 = vadd.f32 %v9190_v10, %v5086_v42  ;;  %v4994_v62 = vpop.xlane.xlu0 %4993 }
0x11e4   : > { %v5019_v16 = vmul.f32 0.0078125, %v4994_v62 }
0x11e5   : > { %5124 = vst [vmem:[%s9196_s0 + $0x18] sm:$0xff] %v5108_v36  ;;  %v4996_v5 = vpop.xlane.xlu1 %4995 }
0x11e6   : > { %v5035_v45 = vadd.f32 1e-05, %v5019_v16  ;;  %v5020_v63 = vmul.f32 0.0078125, %v4996_v5 }
0x11e7   : > { %v6636_v21 = vpop.eup %6635 }
0x11e8   : > { %v5065_v31 = vmul.f32 %v6636_v21, %v9119_v32  ;;  %6639 = vrsqrt.f32 %v5035_v45  ;;  %v5036_v7 = vadd.f32 1e-05, %v5020_v63 }
0x11e9   : > { %v6638_v27 = vpop.eup %6637 }
0x11ea   : > { %v5087_v35 = vmul.f32 %v9182_v38, %v5065_v31  ;;  %v5066_v52 = vmul.f32 %v6638_v27, %v9122_v20  ;;  %6641 = vrsqrt.f32 %v5036_v7 }
0x11ec   : > { %v5109_v28 = vadd.f32 %v9190_v10, %v5087_v35  ;;  %v5088_v29 = vmul.f32 %v9182_v38, %v5066_v52 }
0x11ee   : > { %5125 = vst [vmem:[%s9196_s0 + $0x20] sm:$0xff] %v5109_v28  ;;  %v5110_v44 = vadd.f32 %v9190_v10, %v5088_v29 }
0x11f0   : > { %5126 = vst [vmem:[%s9196_s0 + $0x28] sm:$0xff] %v5110_v44 }
0x11f2   : > { %v6640_v48 = vpop.eup %6639 }
0x11f3   : > { %v5067_v32 = vmul.f32 %v6640_v48, %v9129_v59 }
0x11f4   : > { %v6642_v53 = vpop.eup %6641 }
0x11f5   : > { %v5089_v9 = vmul.f32 %v9182_v38, %v5067_v32  ;;  %v5068_v46 = vmul.f32 %v6642_v53, %v9132_v4 }
0x11f7   : > { %v5111_v20 = vadd.f32 %v9190_v10, %v5089_v9  ;;  %v5090_v33 = vmul.f32 %v9182_v38, %v5068_v46 }
0x11f9   : > { %5127 = vst [vmem:[%s9196_s0 + $0x30] sm:$0xff] %v5111_v20  ;;  %v5112_v13 = vadd.f32 %v9190_v10, %v5090_v33 }
0x11fb   : > { %5128 = vst [vmem:[%s9196_s0 + $0x38] sm:$0xff] %v5112_v13 }
0x122f   : > { %v4998_v3 = vpop.xlane.xlu0 %4997 }
0x1230   : > { %v5021_v40 = vmul.f32 0.0078125, %v4998_v3 }
0x1231   : > { %v5000_v2 = vpop.xlane.xlu1 %4999 }
0x1232   : > { %v5037_v17 = vadd.f32 1e-05, %v5021_v40  ;;  %v5022_v18 = vmul.f32 0.0078125, %v5000_v2 }
0x1234   : > { %6643 = vrsqrt.f32 %v5037_v17  ;;  %v5038_v59 = vadd.f32 1e-05, %v5022_v18 }
0x1236   : > { %6645 = vrsqrt.f32 %v5038_v59 }
0x1237   : > { %v5002_v1 = vpop.xlane.xlu0 %5001 }
0x1238   : > { %v5023_v23 = vmul.f32 0.0078125, %v5002_v1 }
0x1239   : > { %v5004_v24 = vpop.xlane.xlu1 %5003 }
0x123a   : > { %v5039_v4 = vadd.f32 1e-05, %v5023_v23  ;;  %v5024_v11 = vmul.f32 0.0078125, %v5004_v24 }
0x123c   : > { %6647 = vrsqrt.f32 %v5039_v4  ;;  %v5040_v51 = vadd.f32 1e-05, %v5024_v11 }
0x123e   : > { %v6644_v39 = vpop.eup %6643  ;;  %6649 = vrsqrt.f32 %v5040_v51 }
0x123f   : > { %v5069_v58 = vmul.f32 %v6644_v39, %v9139_v43  ;;  %v5006_v50 = vpop.xlane.xlu0 %5005 }
0x1240   : > { %v6646_v6 = vpop.eup %6645  ;;  %v5025_v22 = vmul.f32 0.0078125, %v5006_v50 }
0x1241   : > { %v5091_v55 = vmul.f32 %v9182_v38, %v5069_v58  ;;  %v5070_v57 = vmul.f32 %v6646_v6, %v9142_v12  ;;  %v5008_v26 = vpop.xlane.xlu1 %5007 }
0x1242   : > { %v5041_v49 = vadd.f32 1e-05, %v5025_v22  ;;  %v5026_v0 = vmul.f32 0.0078125, %v5008_v26 }
0x1243   : > { %v5113_v47 = vadd.f32 %v9190_v10, %v5091_v55  ;;  %v5092_v60 = vmul.f32 %v9182_v38, %v5070_v57 }
0x1244   : > { %6651 = vrsqrt.f32 %v5041_v49  ;;  %v5042_v41 = vadd.f32 1e-05, %v5026_v0 }
0x1245   : > { %5129 = vst [vmem:[%s9196_s0 + $0x40] sm:$0xff] %v5113_v47  ;;  %v5114_v43 = vadd.f32 %v9190_v10, %v5092_v60 }
0x1246   : > { %v6648_v61 = vpop.eup %6647  ;;  %6653 = vrsqrt.f32 %v5042_v41 }
0x1247   : > { %5130 = vst [vmem:[%s9196_s0 + $0x48] sm:$0xff] %v5114_v43  ;;  %v5071_v34 = vmul.f32 %v6648_v61, %v9149_v54  ;;  %v5010_v56 = vpop.xlane.xlu0 %5009 }
0x1248   : > { %v6650_v12 = vpop.eup %6649  ;;  %v5027_v15 = vmul.f32 0.0078125, %v5010_v56 }
0x1249   : > { %v5093_v37 = vmul.f32 %v9182_v38, %v5071_v34  ;;  %v5072_v42 = vmul.f32 %v6650_v12, %v9152_v19  ;;  %v5012_v36 = vpop.xlane.xlu1 %5011 }
0x124a   : > { %v5043_v62 = vadd.f32 1e-05, %v5027_v15  ;;  %v5028_v16 = vmul.f32 0.0078125, %v5012_v36 }
0x124b   : > { %v5115_v5 = vadd.f32 %v9190_v10, %v5093_v37  ;;  %v5094_v45 = vmul.f32 %v9182_v38, %v5072_v42 }
0x124c   : > { %6655 = vrsqrt.f32 %v5043_v62  ;;  %v5044_v63 = vadd.f32 1e-05, %v5028_v16 }
0x124d   : > { %5131 = vst [vmem:[%s9196_s0 + $0x50] sm:$0xff] %v5115_v5  ;;  %v5116_v54 = vadd.f32 %v9190_v10, %v5094_v45 }
0x124e   : > { %v6652_v21 = vpop.eup %6651  ;;  %6657 = vrsqrt.f32 %v5044_v63 }
0x124f   : > { %5132 = vst [vmem:[%s9196_s0 + $0x58] sm:$0xff] %v5116_v54  ;;  %v5073_v19 = vmul.f32 %v6652_v21, %v9159_v8 }
0x1250   : > { %v6654_v31 = vpop.eup %6653 }
0x1251   : > { %v5095_v7 = vmul.f32 %v9182_v38, %v5073_v19  ;;  %v5074_v27 = vmul.f32 %v6654_v31, %v9162_v14 }
0x1253   : > { %v5117_v35 = vadd.f32 %v9190_v10, %v5095_v7  ;;  %v5096_v52 = vmul.f32 %v9182_v38, %v5074_v27 }
0x1255   : > { %5133 = vst [vmem:[%s9196_s0 + $0x60] sm:$0xff] %v5117_v35  ;;  %v5118_v28 = vadd.f32 %v9190_v10, %v5096_v52 }
0x1256   : > { %v6656_v29 = vpop.eup %6655 }
0x1257   : > { %5134 = vst [vmem:[%s9196_s0 + $0x68] sm:$0xff] %v5118_v28  ;;  %v5075_v44 = vmul.f32 %v6656_v29, %v9169_v25 }
0x1258   : > { %v6658_v8 = vpop.eup %6657 }
0x1259   : > { %v5097_v48 = vmul.f32 %v9182_v38, %v5075_v44  ;;  %v5076_v14 = vmul.f32 %v6658_v8, %v9172_v30 }
0x125b   : > { %v5119_v32 = vadd.f32 %v9190_v10, %v5097_v48  ;;  %v5098_v53 = vmul.f32 %v9182_v38, %v5076_v14 }
0x125d   : > { %5135 = vst [vmem:[%s9196_s0 + $0x70] sm:$0xff] %v5119_v32  ;;  %v5120_v25 = vadd.f32 %v9190_v10, %v5098_v53 }
0x125f   : > { %5136 = vst [vmem:[%s9196_s0 + $0x78] sm:$0xff] %v5120_v25 }
0x1260   : > { %6672 = shalt.err (!%p6669_p3)
}
0x1261   : > { %s6673_s24 = scalar_lea.hbm %s9259_s23, 2048  ;;  %s6677_s17 = scalar_lea.hbm %s9324_s15, 8192 }
0x1262   : > { %p6674_p4 = scmp.ne.s32.totalorder %s9259_s23, %s6673_s24  ;;  %p6678_p9 = scmp.lt.u32.totalorder %s9259_s23, %s9324_s15 }
0x1263   : > { %p6679_p10 = scmp.lt.u32.totalorder %s6677_s17, %s6673_s24  ;;  %p6681_p12 = scmp.lt.u32.totalorder %s6673_s24, %s9259_s23 }
0x1264   : > { %p6675_p7 = pnand %p6674_p4, %p6848_p5 }
0x1265   : > { %p6680_p11 = por %p6679_p10, %p6678_p9 }
0x1266   : > { %p6676_p8 = pneg %p6675_p7 }
0x1267   : > { %p6682_p13 = por %p6681_p12, %p6680_p11 }
0x1269   : > { %p6683_p0 = pnand %p6682_p13, %p6676_p8 }
0x126b   : > { %6686 = shalt.err (!%p6683_p0)
}
0x126c   : > { %s6728_s27 = smov 128   ;;  %s6729_s26 = smov 8  }
0x126d   : > { %5998 = dma.vmem_to_hbm [thread:$0]  (%p6848_p5), %s9261_s20, 2048, %s9259_s23, %s9268_s22, %s6728_s27, %s6728_s27, %s6729_s26  }
0x126e PF: > { %p6004_p1 = scmp.ge.s32.totalorder %s6721_s21, 2  ;;  %s5167_s0 = sand.u32 1, %s6709_s18  }
0x126f   : > { %s5168_s24 = scalar_lea.sflag [#allocation3], %s5167_s0 }
0x1270   : > { %p6001_p2 = pnand %p6004_p1, %p6852_p6 }
0x1272   : > { %6704 = dma.done.wait (!%p6001_p2), %s5168_s24, 2048  }
0x1273   : > { %6706 = vsyncadd (!%p6001_p2), %s5168_s24, 4294965248  ;;  %s9443_s21 = sld [smem:[#allocation6_spill]]  ;;  %s9444_s16 = sld [smem:[#allocation5_spill]] }
0x1274   : > { %s9445_s20 = sld [smem:[#allocation7_spill]]  ;;  %s9446_s18 = smov %s6713_s19 }
0x1279   : > { %p25_p3 = scmp.ge.s32.totalorder %s9443_s21, 6   ;;  %s9447_s19 = smov %s9444_s16 }
0x127b   :  { %27 = sbr.rel (!%p25_p3) target bundleno = 5 (0x5), region = 115 }
0x1282   :  { %5173 = vsyncpa [#allocation3], 1 }
0x1283   :  { %5175 = vsyncpa [#allocation3 + $0x1], 1 }

</bundles_post_ra>
